<compile_context>
chip_gen: v7x
topology: tpu7x:2x2x1
jax: 0.10.0
libtpu: 0.0.40
codegen_flags: <defaults>
</compile_context>

<pallas_src>
import functools

import numpy as np
import jax
import jax.numpy as jnp
from jax.experimental import pallas as pl
from jax.experimental.pallas import tpu as pltpu

NEG_SLOPE = 0.01      # F.leaky_relu default negative_slope
BN_EPS = 1e-5         # nn.BatchNorm2d default eps
LANE = 128


def _leaky_relu(x):
    return jnp.where(x >= 0, x, NEG_SLOPE * x)


def _round_up(x, m):
    return (x + m - 1) // m * m


# ---------------------------------------------------------------------------
# Fused kernel: 3x (banded conv matmul -> lrelu -> 2x2 pool) + MLP head
# ---------------------------------------------------------------------------
def _make_fused_kernel(TB):
    def hpool(y, ho):
        # y: (TB, H, L) f32 -> (TB, ho, L); floor semantics (odd last row dropped)
        rows = [jnp.maximum(y[:, 2 * i:2 * i + 1, :], y[:, 2 * i + 1:2 * i + 2, :])
                for i in range(ho)]
        return jnp.concatenate(rows, axis=1)

    def wpool(y, wo, c):
        # y: (TB, ho, W*c) with lanes packed as w*c + ch -> (TB, ho, wo*c)
        parts = [jnp.maximum(y[..., (2 * w) * c:(2 * w + 1) * c],
                             y[..., (2 * w + 1) * c:(2 * w + 2) * c])
                 for w in range(wo)]
        return jnp.concatenate(parts, axis=-1)

    def pad_packed(a, c):
        # 1-pixel zero halo for a lane-packed (TB, H, W*c) activation
        tb, h, wc = a.shape
        zw = jnp.zeros((tb, h, c), a.dtype)
        a = jnp.concatenate([zw, a, zw], axis=-1)            # (TB, H, (W+2)*c)
        zh = jnp.zeros((tb, 1, wc + 2 * c), a.dtype)
        return jnp.concatenate([zh, a, zh], axis=1)          # (TB, H+2, (W+2)*c)

    def conv_pool(ap, band_ref, brow_ref, H, W, cout):
        # ap: (TB, H+2, (W+2)*cin) bf16, halo-padded, lane-packed.
        # One MXU matmul: M = TB*H rows, K = 3*(W+2)*cin, N = W*cout.
        lhs = jnp.concatenate([ap[:, dy:dy + H, :] for dy in range(3)], axis=-1)
        lhs = lhs.reshape(TB * H, lhs.shape[-1])
        y = jnp.dot(lhs, band_ref[...], preferred_element_type=jnp.float32)
        y = _leaky_relu(y + brow_ref[...])                   # (TB*H, W*cout) f32
        y = y.reshape(TB, H, W * cout)
        return wpool(hpool(y, H // 2), W // 2, cout)         # (TB, H//2, (W//2)*cout)

    def kernel(x_ref, band1_ref, r1_ref, band2_ref, r2_ref, band3_ref, r3_ref,
               wf1_ref, rf1_ref, wf2_ref, rf2_ref, wf3_ref, rf3_ref, o_ref):
        xv = x_ref[0]                                        # (TB, 30, 30) bf16
        a1 = conv_pool(xv, band1_ref, r1_ref, 28, 28, 32)    # (TB, 14, 14*32)
        a2 = conv_pool(pad_packed(a1.astype(jnp.bfloat16), 32),
                       band2_ref, r2_ref, 14, 14, 64)        # (TB, 7, 7*64)
        a3 = conv_pool(pad_packed(a2.astype(jnp.bfloat16), 64),
                       band3_ref, r3_ref, 7, 7, 128)         # (TB, 3, 3*128)

        # Flatten in (h, w, c) order via lane-concat (fc1 rows are pre-permuted).
        xf = jnp.concatenate([a3[:, h, :] for h in range(3)], axis=-1)
        xf = xf.astype(jnp.bfloat16)                         # (TB, 1152)
        h1 = _leaky_relu(jnp.dot(xf, wf1_ref[...],
                                 preferred_element_type=jnp.float32) + rf1_ref[...])
        # Dropout(p=0.5) is the identity at inference time.
        h2 = _leaky_relu(jnp.dot(h1.astype(jnp.bfloat16), wf2_ref[...],
                                 preferred_element_type=jnp.float32) + rf2_ref[...])
        o_ref[0] = (jnp.dot(h2.astype(jnp.bfloat16), wf3_ref[...],
                            preferred_element_type=jnp.float32) + rf3_ref[...])

    return kernel


def _pick_tb(n):
    # >= 2 grid steps so both v7x TensorCores get work; TB=8 keeps the fused
    # per-step working set a few MB (well under the 64 MiB v7x VMEM).
    if n >= 16:
        return 8
    return max(1, n // 2)


@functools.partial(jax.jit, static_argnames=("num_classes",))
def forward(x_nchw, q, *, num_classes):
    N = x_nchw.shape[0]
    ncp = q["wf3"].shape[1]
    x = x_nchw.reshape(N, 28, 28)                            # drop the Cin=1 dim
    x = jnp.pad(x, ((0, 0), (1, 1), (1, 1))).astype(jnp.bfloat16)   # halo pad
    TB = _pick_tb(N)
    npad = _round_up(N, TB)
    if npad != N:
        x = jnp.pad(x, ((0, npad - N), (0, 0), (0, 0)))
    G = npad // TB
    x = x.reshape(G, TB, 30, 30)

    flops = 2 * npad * (28 * 90 * 896 + 14 * 1536 * 896 + 7 * 1728 * 896
                        + 1152 * 256 + 256 * 128 + 128 * ncp)
    w_bytes = sum(int(np.prod(q[k].shape)) * q[k].dtype.itemsize for k in q)
    bytes_accessed = int(x.size) * 2 + w_bytes + npad * ncp * 4

    full2d = lambda arr: pl.BlockSpec(arr.shape, lambda i: (0, 0))
    out = pl.pallas_call(
        _make_fused_kernel(TB),
        out_shape=jax.ShapeDtypeStruct((G, TB, ncp), jnp.float32),
        grid_spec=pltpu.PrefetchScalarGridSpec(
            num_scalar_prefetch=0,
            grid=(G,),
            in_specs=[
                pl.BlockSpec((1, TB, 30, 30), lambda i: (i, 0, 0, 0)),
                full2d(q["B1"]), full2d(q["b1"]),
                full2d(q["B2"]), full2d(q["b2"]),
                full2d(q["B3"]), full2d(q["b3"]),
                full2d(q["wf1"]), full2d(q["bf1"]),
                full2d(q["wf2"]), full2d(q["bf2"]),
                full2d(q["wf3"]), full2d(q["bf3"]),
            ],
            out_specs=pl.BlockSpec((1, TB, ncp), lambda i: (i, 0, 0)),
        ),
        compiler_params=pltpu.CompilerParams(
            dimension_semantics=("parallel",),
            vmem_limit_bytes=48 * 1024 * 1024),
        cost_estimate=pl.CostEstimate(flops=int(flops), transcendentals=0,
                                      bytes_accessed=int(bytes_accessed)),
    )(x, q["B1"], q["b1"], q["B2"], q["b2"], q["B3"], q["b3"],
      q["wf1"], q["bf1"], q["wf2"], q["bf2"], q["wf3"], q["bf3"])
    return out.reshape(npad, ncp)[:N, :num_classes]


# ---------------------------------------------------------------------------
# Parameters (PyTorch-style init), BN folding, banded matrices, bf16 casts
# ---------------------------------------------------------------------------
def init_params(key, num_classes):
    ks = jax.random.split(key, 6)

    def conv_p(k, cout, cin):
        kw, kb = jax.random.split(k)
        bound = float(1.0 / np.sqrt(cin * 9.0))
        w = jax.random.uniform(kw, (cout, cin, 3, 3), jnp.float32, -bound, bound)
        b = jax.random.uniform(kb, (cout,), jnp.float32, -bound, bound)
        return w, b

    def lin_p(k, cout, cin):
        kw, kb = jax.random.split(k)
        bound = float(1.0 / np.sqrt(float(cin)))
        w = jax.random.uniform(kw, (cin, cout), jnp.float32, -bound, bound)  # (in, out)
        b = jax.random.uniform(kb, (cout,), jnp.float32, -bound, bound)
        return w, b

    def bn_p(c):   # (gamma, beta, running_mean, running_var) at init
        return (jnp.ones((c,), jnp.float32), jnp.zeros((c,), jnp.float32),
                jnp.zeros((c,), jnp.float32), jnp.ones((c,), jnp.float32))

    p = {}
    p["conv1_w"], p["conv1_b"] = conv_p(ks[0], 32, 1)
    p["bn1"] = bn_p(32)
    p["conv2_w"], p["conv2_b"] = conv_p(ks[1], 64, 32)
    p["bn2"] = bn_p(64)
    p["conv3_w"], p["conv3_b"] = conv_p(ks[2], 128, 64)
    p["bn3"] = bn_p(128)
    p["fc1_w"], p["fc1_b"] = lin_p(ks[3], 256, 128 * 3 * 3)
    p["fc2_w"], p["fc2_b"] = lin_p(ks[4], 128, 256)
    p["fc3_w"], p["fc3_b"] = lin_p(ks[5], num_classes, 128)
    return p


def _banded_conv_matrix(w_hwio, w_out_dim):
    """B[dy*Wp*Cin + w_in*Cin + ci, w_o*Cout + co] = w[dy, w_in-w_o, ci, co] (else 0)."""
    _, _, cin, cout = w_hwio.shape
    wp = w_out_dim + 2
    B = np.zeros((3 * wp * cin, w_out_dim * cout), np.float32)
    for dy in range(3):
        for dx in range(3):
            for wo in range(w_out_dim):
                wi = wo + dx
                r0 = dy * wp * cin + wi * cin
                B[r0:r0 + cin, wo * cout:(wo + 1) * cout] = w_hwio[dy, dx]
    return B


def prepare_params(p, num_classes):
    """Fold BN(eval) + conv bias, build banded conv matrices (w,c lane-packed),
    permute fc1 rows for the (h,w,c) flatten, pad fc3 to 128 lanes, cast to bf16."""
    def fold(w_oihw, b, bn):
        gamma, beta, mean, var = (np.asarray(t, np.float32) for t in bn)
        scale = gamma / np.sqrt(var + BN_EPS)                        # (Cout,)
        w = np.transpose(np.asarray(w_oihw, np.float32), (2, 3, 1, 0)) * scale
        bf = scale * np.asarray(b, np.float32) + (beta - mean * scale)
        return w, bf                                                 # (3,3,Cin,Cout), (Cout,)

    w1, c1 = fold(p["conv1_w"], p["conv1_b"], p["bn1"])
    w2, c2 = fold(p["conv2_w"], p["conv2_b"], p["bn2"])
    w3, c3 = fold(p["conv3_w"], p["conv3_b"], p["bn3"])

    q = {}
    q["B1"] = jnp.asarray(_banded_conv_matrix(w1, 28), jnp.bfloat16)   # (90, 896)
    q["B2"] = jnp.asarray(_banded_conv_matrix(w2, 14), jnp.bfloat16)   # (1536, 896)
    q["B3"] = jnp.asarray(_banded_conv_matrix(w3, 7), jnp.bfloat16)    # (1728, 896)
    q["b1"] = jnp.asarray(np.tile(c1, 28)[None, :], jnp.float32)       # (1, 896)
    q["b2"] = jnp.asarray(np.tile(c2, 14)[None, :], jnp.float32)       # (1, 896)
    q["b3"] = jnp.asarray(np.tile(c3, 7)[None, :], jnp.float32)        # (1, 896)

    # PyTorch flattens NCHW (c, h, w); the kernel flattens (h, w, c).
    wf1 = np.asarray(p["fc1_w"], np.float32)                           # (1152, 256)
    wf1 = wf1.reshape(128, 3, 3, 256).transpose(1, 2, 0, 3).reshape(1152, 256)
    q["wf1"] = jnp.asarray(wf1, jnp.bfloat16)
    q["bf1"] = jnp.asarray(np.asarray(p["fc1_b"], np.float32)[None, :], jnp.float32)
    q["wf2"] = jnp.asarray(np.asarray(p["fc2_w"], np.float32), jnp.bfloat16)
    q["bf2"] = jnp.asarray(np.asarray(p["fc2_b"], np.float32)[None, :], jnp.float32)
    ncp = _round_up(num_classes, LANE)       # lane-dense final store, sliced after
    wf3 = np.zeros((128, ncp), np.float32)
    wf3[:, :num_classes] = np.asarray(p["fc3_w"], np.float32)
    bf3 = np.zeros((ncp,), np.float32)
    bf3[:num_classes] = np.asarray(p["fc3_b"], np.float32)
    q["wf3"] = jnp.asarray(wf3, jnp.bfloat16)
    q["bf3"] = jnp.asarray(bf3[None, :], jnp.float32)
    return q


# ---------------------------------------------------------------------------
# Plain-JAX f32 reference replicating the PyTorch module in eval mode
# ---------------------------------------------------------------------------
def reference_forward(x_nchw, p):
    hi = jax.lax.Precision.HIGHEST

    def block(x, w, b, bn):
        gamma, beta, mean, var = bn
        y = jax.lax.conv_general_dilated(
            x, w, window_strides=(1, 1), padding=((1, 1), (1, 1)),
            dimension_numbers=("NCHW", "OIHW", "NCHW"), precision=hi)
        y = y + b[None, :, None, None]
        scale = gamma / jnp.sqrt(var + BN_EPS)
        y = y * scale[None, :, None, None] + (beta - mean * scale)[None, :, None, None]
        y = _leaky_relu(y)
        return jax.lax.reduce_window(y, -jnp.inf, jax.lax.max,
                                     (1, 1, 2, 2), (1, 1, 2, 2), "VALID")

    x = block(x_nchw, p["conv1_w"], p["conv1_b"], p["bn1"])
    x = block(x, p["conv2_w"], p["conv2_b"], p["bn2"])
    x = block(x, p["conv3_w"], p["conv3_b"], p["bn3"])
    x = x.reshape(x.shape[0], 128 * 3 * 3)                             # NCHW flatten
    h1 = _leaky_relu(jnp.dot(x, p["fc1_w"], precision=hi) + p["fc1_b"])
    h2 = _leaky_relu(jnp.dot(h1, p["fc2_w"], precision=hi) + p["fc2_b"])
    return jnp.dot(h2, p["fc3_w"], precision=hi) + p["fc3_b"]


if __name__ == "__main__":
    # TODO(synk): training-mode BatchNorm (batch statistics) and active Dropout
    # are not implemented; this is the eval-mode forward pass.
    num_classes = 10
    batch = 2
    key = jax.random.PRNGKey(0)
    k_x, k_p = jax.random.split(key)
    # MNIST-shaped input: the 128*3*3 flatten requires 28x28 spatial input.
    x = jax.random.normal(k_x, (batch, 1, 28, 28), jnp.float32)
    params = init_params(k_p, num_classes)
    qparams = prepare_params(params, num_classes)

    logits = forward(x, qparams, num_classes=num_classes)
    jax.block_until_ready(logits)
    assert logits.shape == (batch, num_classes), logits.shape
    assert logits.dtype == jnp.float32
    assert bool(jnp.all(jnp.isfinite(logits)))

    # Sanity check vs. a plain-JAX f32 reference (kernel matmuls run in bf16).
    ref = reference_forward(x, params)
    err = float(jnp.max(jnp.abs(logits - ref)))
    assert err < 3e-2, f"kernel vs reference max |diff| = {err}"

    print("KERNEL_OK")
</pallas_src>

<mosaic_0001>
module attributes {stable_mosaic.version = 11 : i64} {
  func.func @kernel(%arg0: i32, %arg1: memref<1x1x30x30xbf16, #tpu.memory_space<vmem>>, %arg2: memref<90x896xbf16, #tpu.memory_space<vmem>>, %arg3: memref<1x896xf32, #tpu.memory_space<vmem>>, %arg4: memref<1536x896xbf16, #tpu.memory_space<vmem>>, %arg5: memref<1x896xf32, #tpu.memory_space<vmem>>, %arg6: memref<1728x896xbf16, #tpu.memory_space<vmem>>, %arg7: memref<1x896xf32, #tpu.memory_space<vmem>>, %arg8: memref<1152x256xbf16, #tpu.memory_space<vmem>>, %arg9: memref<1x256xf32, #tpu.memory_space<vmem>>, %arg10: memref<256x128xbf16, #tpu.memory_space<vmem>>, %arg11: memref<1x128xf32, #tpu.memory_space<vmem>>, %arg12: memref<128x128xbf16, #tpu.memory_space<vmem>>, %arg13: memref<1x128xf32, #tpu.memory_space<vmem>>, %arg14: memref<1x1x128xf32, #tpu.memory_space<vmem>>) attributes {dimension_semantics = [#tpu.dimension_semantics<parallel>], iteration_bounds = array<i64: 2>, scalar_prefetch = 0 : i64, scratch_operands = 0 : i64, tpu.core_type = #tpu.core_type<tc>, window_params = [{transform_indices = @transform_0, window_bounds = array<i64: 1, 1, 30, 30>}, {pipeline_mode = #tpu.pipeline_mode<synchronous>, transform_indices = @transform_1, window_bounds = array<i64: 90, 896>}, {pipeline_mode = #tpu.pipeline_mode<synchronous>, transform_indices = @transform_2, window_bounds = array<i64: 1, 896>}, {pipeline_mode = #tpu.pipeline_mode<synchronous>, transform_indices = @transform_3, window_bounds = array<i64: 1536, 896>}, {pipeline_mode = #tpu.pipeline_mode<synchronous>, transform_indices = @transform_4, window_bounds = array<i64: 1, 896>}, {pipeline_mode = #tpu.pipeline_mode<synchronous>, transform_indices = @transform_5, window_bounds = array<i64: 1728, 896>}, {pipeline_mode = #tpu.pipeline_mode<synchronous>, transform_indices = @transform_6, window_bounds = array<i64: 1, 896>}, {pipeline_mode = #tpu.pipeline_mode<synchronous>, transform_indices = @transform_7, window_bounds = array<i64: 1152, 256>}, {pipeline_mode = #tpu.pipeline_mode<synchronous>, transform_indices = @transform_8, window_bounds = array<i64: 1, 256>}, {pipeline_mode = #tpu.pipeline_mode<synchronous>, transform_indices = @transform_9, window_bounds = array<i64: 256, 128>}, {pipeline_mode = #tpu.pipeline_mode<synchronous>, transform_indices = @transform_10, window_bounds = array<i64: 1, 128>}, {pipeline_mode = #tpu.pipeline_mode<synchronous>, transform_indices = @transform_11, window_bounds = array<i64: 128, 128>}, {pipeline_mode = #tpu.pipeline_mode<synchronous>, transform_indices = @transform_12, window_bounds = array<i64: 1, 128>}, {transform_indices = @transform_13, window_bounds = array<i64: 1, 1, 128>}]} {
    %c0 = arith.constant 0 : index
    %c0_0 = arith.constant 0 : index
    %c0_1 = arith.constant 0 : index
    %c0_2 = arith.constant 0 : index
    %0 = vector.load %arg1[%c0, %c0_0, %c0_1, %c0_2] : memref<1x1x30x30xbf16, #tpu.memory_space<vmem>>, vector<1x1x30x30xbf16>
    %1 = vector.shape_cast %0 : vector<1x1x30x30xbf16> to vector<1x30x30xbf16>
    %2 = vector.extract_strided_slice %1 {offsets = [0, 0, 0], sizes = [1, 28, 30], strides = [1, 1, 1]} : vector<1x30x30xbf16> to vector<1x28x30xbf16>
    %3 = vector.extract_strided_slice %1 {offsets = [0, 1, 0], sizes = [1, 28, 30], strides = [1, 1, 1]} : vector<1x30x30xbf16> to vector<1x28x30xbf16>
    %4 = vector.extract_strided_slice %1 {offsets = [0, 2, 0], sizes = [1, 28, 30], strides = [1, 1, 1]} : vector<1x30x30xbf16> to vector<1x28x30xbf16>
    %5 = tpu.concatenate %2, %3, %4 in 2 : vector<1x28x30xbf16>, vector<1x28x30xbf16>, vector<1x28x30xbf16> -> vector<1x28x90xbf16>
    %6 = vector.shape_cast %5 : vector<1x28x90xbf16> to vector<28x90xbf16>
    %c0_3 = arith.constant 0 : index
    %c0_4 = arith.constant 0 : index
    %7 = vector.load %arg2[%c0_3, %c0_4] : memref<90x896xbf16, #tpu.memory_space<vmem>>, vector<90x896xbf16>
    %cst = arith.constant dense<0.000000e+00> : vector<28x896xf32>
    %8 = tpu.matmul %6, %7, %cst {dimension_numbers = #tpu.dot_dimension_numbers<[1], [0], [0], [1], [0, 0, 1, 1], [], []>} : vector<28x90xbf16>, vector<90x896xbf16>, vector<28x896xf32> -> vector<28x896xf32>
    %c0_5 = arith.constant 0 : index
    %c0_6 = arith.constant 0 : index
    %9 = vector.load %arg3[%c0_5, %c0_6] : memref<1x896xf32, #tpu.memory_space<vmem>>, vector<1x896xf32>
    %10 = vector.broadcast %9 : vector<1x896xf32> to vector<28x896xf32>
    %11 = arith.addf %8, %10 : vector<28x896xf32>
    %cst_7 = arith.constant 0.000000e+00 : f32
    %12 = vector.broadcast %cst_7 : f32 to vector<28x896xf32>
    %13 = arith.cmpf oge, %11, %12 : vector<28x896xf32>
    %cst_8 = arith.constant 0.00999999977 : f32
    %14 = vector.broadcast %cst_8 : f32 to vector<28x896xf32>
    %15 = arith.mulf %14, %11 : vector<28x896xf32>
    %16 = arith.select %13, %11, %15 : vector<28x896xi1>, vector<28x896xf32>
    %17 = vector.shape_cast %16 : vector<28x896xf32> to vector<1x28x896xf32>
    %18 = vector.extract_strided_slice %17 {offsets = [0, 0, 0], sizes = [1, 1, 896], strides = [1, 1, 1]} : vector<1x28x896xf32> to vector<1x1x896xf32>
    %19 = vector.extract_strided_slice %17 {offsets = [0, 1, 0], sizes = [1, 1, 896], strides = [1, 1, 1]} : vector<1x28x896xf32> to vector<1x1x896xf32>
    %20 = arith.maximumf %18, %19 : vector<1x1x896xf32>
    %21 = vector.extract_strided_slice %17 {offsets = [0, 2, 0], sizes = [1, 1, 896], strides = [1, 1, 1]} : vector<1x28x896xf32> to vector<1x1x896xf32>
    %22 = vector.extract_strided_slice %17 {offsets = [0, 3, 0], sizes = [1, 1, 896], strides = [1, 1, 1]} : vector<1x28x896xf32> to vector<1x1x896xf32>
    %23 = arith.maximumf %21, %22 : vector<1x1x896xf32>
    %24 = vector.extract_strided_slice %17 {offsets = [0, 4, 0], sizes = [1, 1, 896], strides = [1, 1, 1]} : vector<1x28x896xf32> to vector<1x1x896xf32>
    %25 = vector.extract_strided_slice %17 {offsets = [0, 5, 0], sizes = [1, 1, 896], strides = [1, 1, 1]} : vector<1x28x896xf32> to vector<1x1x896xf32>
    %26 = arith.maximumf %24, %25 : vector<1x1x896xf32>
    %27 = vector.extract_strided_slice %17 {offsets = [0, 6, 0], sizes = [1, 1, 896], strides = [1, 1, 1]} : vector<1x28x896xf32> to vector<1x1x896xf32>
    %28 = vector.extract_strided_slice %17 {offsets = [0, 7, 0], sizes = [1, 1, 896], strides = [1, 1, 1]} : vector<1x28x896xf32> to vector<1x1x896xf32>
    %29 = arith.maximumf %27, %28 : vector<1x1x896xf32>
    %30 = vector.extract_strided_slice %17 {offsets = [0, 8, 0], sizes = [1, 1, 896], strides = [1, 1, 1]} : vector<1x28x896xf32> to vector<1x1x896xf32>
    %31 = vector.extract_strided_slice %17 {offsets = [0, 9, 0], sizes = [1, 1, 896], strides = [1, 1, 1]} : vector<1x28x896xf32> to vector<1x1x896xf32>
    %32 = arith.maximumf %30, %31 : vector<1x1x896xf32>
    %33 = vector.extract_strided_slice %17 {offsets = [0, 10, 0], sizes = [1, 1, 896], strides = [1, 1, 1]} : vector<1x28x896xf32> to vector<1x1x896xf32>
    %34 = vector.extract_strided_slice %17 {offsets = [0, 11, 0], sizes = [1, 1, 896], strides = [1, 1, 1]} : vector<1x28x896xf32> to vector<1x1x896xf32>
    %35 = arith.maximumf %33, %34 : vector<1x1x896xf32>
    %36 = vector.extract_strided_slice %17 {offsets = [0, 12, 0], sizes = [1, 1, 896], strides = [1, 1, 1]} : vector<1x28x896xf32> to vector<1x1x896xf32>
    %37 = vector.extract_strided_slice %17 {offsets = [0, 13, 0], sizes = [1, 1, 896], strides = [1, 1, 1]} : vector<1x28x896xf32> to vector<1x1x896xf32>
    %38 = arith.maximumf %36, %37 : vector<1x1x896xf32>
    %39 = vector.extract_strided_slice %17 {offsets = [0, 14, 0], sizes = [1, 1, 896], strides = [1, 1, 1]} : vector<1x28x896xf32> to vector<1x1x896xf32>
    %40 = vector.extract_strided_slice %17 {offsets = [0, 15, 0], sizes = [1, 1, 896], strides = [1, 1, 1]} : vector<1x28x896xf32> to vector<1x1x896xf32>
    %41 = arith.maximumf %39, %40 : vector<1x1x896xf32>
    %42 = vector.extract_strided_slice %17 {offsets = [0, 16, 0], sizes = [1, 1, 896], strides = [1, 1, 1]} : vector<1x28x896xf32> to vector<1x1x896xf32>
    %43 = vector.extract_strided_slice %17 {offsets = [0, 17, 0], sizes = [1, 1, 896], strides = [1, 1, 1]} : vector<1x28x896xf32> to vector<1x1x896xf32>
    %44 = arith.maximumf %42, %43 : vector<1x1x896xf32>
    %45 = vector.extract_strided_slice %17 {offsets = [0, 18, 0], sizes = [1, 1, 896], strides = [1, 1, 1]} : vector<1x28x896xf32> to vector<1x1x896xf32>
    %46 = vector.extract_strided_slice %17 {offsets = [0, 19, 0], sizes = [1, 1, 896], strides = [1, 1, 1]} : vector<1x28x896xf32> to vector<1x1x896xf32>
    %47 = arith.maximumf %45, %46 : vector<1x1x896xf32>
    %48 = vector.extract_strided_slice %17 {offsets = [0, 20, 0], sizes = [1, 1, 896], strides = [1, 1, 1]} : vector<1x28x896xf32> to vector<1x1x896xf32>
    %49 = vector.extract_strided_slice %17 {offsets = [0, 21, 0], sizes = [1, 1, 896], strides = [1, 1, 1]} : vector<1x28x896xf32> to vector<1x1x896xf32>
    %50 = arith.maximumf %48, %49 : vector<1x1x896xf32>
    %51 = vector.extract_strided_slice %17 {offsets = [0, 22, 0], sizes = [1, 1, 896], strides = [1, 1, 1]} : vector<1x28x896xf32> to vector<1x1x896xf32>
    %52 = vector.extract_strided_slice %17 {offsets = [0, 23, 0], sizes = [1, 1, 896], strides = [1, 1, 1]} : vector<1x28x896xf32> to vector<1x1x896xf32>
    %53 = arith.maximumf %51, %52 : vector<1x1x896xf32>
    %54 = vector.extract_strided_slice %17 {offsets = [0, 24, 0], sizes = [1, 1, 896], strides = [1, 1, 1]} : vector<1x28x896xf32> to vector<1x1x896xf32>
    %55 = vector.extract_strided_slice %17 {offsets = [0, 25, 0], sizes = [1, 1, 896], strides = [1, 1, 1]} : vector<1x28x896xf32> to vector<1x1x896xf32>
    %56 = arith.maximumf %54, %55 : vector<1x1x896xf32>
    %57 = vector.extract_strided_slice %17 {offsets = [0, 26, 0], sizes = [1, 1, 896], strides = [1, 1, 1]} : vector<1x28x896xf32> to vector<1x1x896xf32>
    %58 = vector.extract_strided_slice %17 {offsets = [0, 27, 0], sizes = [1, 1, 896], strides = [1, 1, 1]} : vector<1x28x896xf32> to vector<1x1x896xf32>
    %59 = arith.maximumf %57, %58 : vector<1x1x896xf32>
    %60 = tpu.concatenate %20, %23, %26, %29, %32, %35, %38, %41, %44, %47, %50, %53, %56, %59 in 1 : vector<1x1x896xf32>, vector<1x1x896xf32>, vector<1x1x896xf32>, vector<1x1x896xf32>, vector<1x1x896xf32>, vector<1x1x896xf32>, vector<1x1x896xf32>, vector<1x1x896xf32>, vector<1x1x896xf32>, vector<1x1x896xf32>, vector<1x1x896xf32>, vector<1x1x896xf32>, vector<1x1x896xf32>, vector<1x1x896xf32> -> vector<1x14x896xf32>
    %61 = vector.extract_strided_slice %60 {offsets = [0, 0, 0], sizes = [1, 14, 32], strides = [1, 1, 1]} : vector<1x14x896xf32> to vector<1x14x32xf32>
    %62 = vector.extract_strided_slice %60 {offsets = [0, 0, 32], sizes = [1, 14, 32], strides = [1, 1, 1]} : vector<1x14x896xf32> to vector<1x14x32xf32>
    %63 = arith.maximumf %61, %62 : vector<1x14x32xf32>
    %64 = vector.extract_strided_slice %60 {offsets = [0, 0, 64], sizes = [1, 14, 32], strides = [1, 1, 1]} : vector<1x14x896xf32> to vector<1x14x32xf32>
    %65 = vector.extract_strided_slice %60 {offsets = [0, 0, 96], sizes = [1, 14, 32], strides = [1, 1, 1]} : vector<1x14x896xf32> to vector<1x14x32xf32>
    %66 = arith.maximumf %64, %65 : vector<1x14x32xf32>
    %67 = vector.extract_strided_slice %60 {offsets = [0, 0, 128], sizes = [1, 14, 32], strides = [1, 1, 1]} : vector<1x14x896xf32> to vector<1x14x32xf32>
    %68 = vector.extract_strided_slice %60 {offsets = [0, 0, 160], sizes = [1, 14, 32], strides = [1, 1, 1]} : vector<1x14x896xf32> to vector<1x14x32xf32>
    %69 = arith.maximumf %67, %68 : vector<1x14x32xf32>
    %70 = vector.extract_strided_slice %60 {offsets = [0, 0, 192], sizes = [1, 14, 32], strides = [1, 1, 1]} : vector<1x14x896xf32> to vector<1x14x32xf32>
    %71 = vector.extract_strided_slice %60 {offsets = [0, 0, 224], sizes = [1, 14, 32], strides = [1, 1, 1]} : vector<1x14x896xf32> to vector<1x14x32xf32>
    %72 = arith.maximumf %70, %71 : vector<1x14x32xf32>
    %73 = vector.extract_strided_slice %60 {offsets = [0, 0, 256], sizes = [1, 14, 32], strides = [1, 1, 1]} : vector<1x14x896xf32> to vector<1x14x32xf32>
    %74 = vector.extract_strided_slice %60 {offsets = [0, 0, 288], sizes = [1, 14, 32], strides = [1, 1, 1]} : vector<1x14x896xf32> to vector<1x14x32xf32>
    %75 = arith.maximumf %73, %74 : vector<1x14x32xf32>
    %76 = vector.extract_strided_slice %60 {offsets = [0, 0, 320], sizes = [1, 14, 32], strides = [1, 1, 1]} : vector<1x14x896xf32> to vector<1x14x32xf32>
    %77 = vector.extract_strided_slice %60 {offsets = [0, 0, 352], sizes = [1, 14, 32], strides = [1, 1, 1]} : vector<1x14x896xf32> to vector<1x14x32xf32>
    %78 = arith.maximumf %76, %77 : vector<1x14x32xf32>
    %79 = vector.extract_strided_slice %60 {offsets = [0, 0, 384], sizes = [1, 14, 32], strides = [1, 1, 1]} : vector<1x14x896xf32> to vector<1x14x32xf32>
    %80 = vector.extract_strided_slice %60 {offsets = [0, 0, 416], sizes = [1, 14, 32], strides = [1, 1, 1]} : vector<1x14x896xf32> to vector<1x14x32xf32>
    %81 = arith.maximumf %79, %80 : vector<1x14x32xf32>
    %82 = vector.extract_strided_slice %60 {offsets = [0, 0, 448], sizes = [1, 14, 32], strides = [1, 1, 1]} : vector<1x14x896xf32> to vector<1x14x32xf32>
    %83 = vector.extract_strided_slice %60 {offsets = [0, 0, 480], sizes = [1, 14, 32], strides = [1, 1, 1]} : vector<1x14x896xf32> to vector<1x14x32xf32>
    %84 = arith.maximumf %82, %83 : vector<1x14x32xf32>
    %85 = vector.extract_strided_slice %60 {offsets = [0, 0, 512], sizes = [1, 14, 32], strides = [1, 1, 1]} : vector<1x14x896xf32> to vector<1x14x32xf32>
    %86 = vector.extract_strided_slice %60 {offsets = [0, 0, 544], sizes = [1, 14, 32], strides = [1, 1, 1]} : vector<1x14x896xf32> to vector<1x14x32xf32>
    %87 = arith.maximumf %85, %86 : vector<1x14x32xf32>
    %88 = vector.extract_strided_slice %60 {offsets = [0, 0, 576], sizes = [1, 14, 32], strides = [1, 1, 1]} : vector<1x14x896xf32> to vector<1x14x32xf32>
    %89 = vector.extract_strided_slice %60 {offsets = [0, 0, 608], sizes = [1, 14, 32], strides = [1, 1, 1]} : vector<1x14x896xf32> to vector<1x14x32xf32>
    %90 = arith.maximumf %88, %89 : vector<1x14x32xf32>
    %91 = vector.extract_strided_slice %60 {offsets = [0, 0, 640], sizes = [1, 14, 32], strides = [1, 1, 1]} : vector<1x14x896xf32> to vector<1x14x32xf32>
    %92 = vector.extract_strided_slice %60 {offsets = [0, 0, 672], sizes = [1, 14, 32], strides = [1, 1, 1]} : vector<1x14x896xf32> to vector<1x14x32xf32>
    %93 = arith.maximumf %91, %92 : vector<1x14x32xf32>
    %94 = vector.extract_strided_slice %60 {offsets = [0, 0, 704], sizes = [1, 14, 32], strides = [1, 1, 1]} : vector<1x14x896xf32> to vector<1x14x32xf32>
    %95 = vector.extract_strided_slice %60 {offsets = [0, 0, 736], sizes = [1, 14, 32], strides = [1, 1, 1]} : vector<1x14x896xf32> to vector<1x14x32xf32>
    %96 = arith.maximumf %94, %95 : vector<1x14x32xf32>
    %97 = vector.extract_strided_slice %60 {offsets = [0, 0, 768], sizes = [1, 14, 32], strides = [1, 1, 1]} : vector<1x14x896xf32> to vector<1x14x32xf32>
    %98 = vector.extract_strided_slice %60 {offsets = [0, 0, 800], sizes = [1, 14, 32], strides = [1, 1, 1]} : vector<1x14x896xf32> to vector<1x14x32xf32>
    %99 = arith.maximumf %97, %98 : vector<1x14x32xf32>
    %100 = vector.extract_strided_slice %60 {offsets = [0, 0, 832], sizes = [1, 14, 32], strides = [1, 1, 1]} : vector<1x14x896xf32> to vector<1x14x32xf32>
    %101 = vector.extract_strided_slice %60 {offsets = [0, 0, 864], sizes = [1, 14, 32], strides = [1, 1, 1]} : vector<1x14x896xf32> to vector<1x14x32xf32>
    %102 = arith.maximumf %100, %101 : vector<1x14x32xf32>
    %103 = tpu.concatenate %63, %66, %69, %72, %75, %78, %81, %84, %87, %90, %93, %96, %99, %102 in 2 : vector<1x14x32xf32>, vector<1x14x32xf32>, vector<1x14x32xf32>, vector<1x14x32xf32>, vector<1x14x32xf32>, vector<1x14x32xf32>, vector<1x14x32xf32>, vector<1x14x32xf32>, vector<1x14x32xf32>, vector<1x14x32xf32>, vector<1x14x32xf32>, vector<1x14x32xf32>, vector<1x14x32xf32>, vector<1x14x32xf32> -> vector<1x14x448xf32>
    %104 = arith.truncf %103 : vector<1x14x448xf32> to vector<1x14x448xbf16>
    %cst_9 = arith.constant 0.000000e+00 : bf16
    %105 = vector.broadcast %cst_9 : bf16 to vector<1x14x32xbf16>
    %106 = tpu.concatenate %105, %104, %105 in 2 : vector<1x14x32xbf16>, vector<1x14x448xbf16>, vector<1x14x32xbf16> -> vector<1x14x512xbf16>
    %cst_10 = arith.constant 0.000000e+00 : bf16
    %107 = vector.broadcast %cst_10 : bf16 to vector<1x1x512xbf16>
    %108 = tpu.concatenate %107, %106, %107 in 1 : vector<1x1x512xbf16>, vector<1x14x512xbf16>, vector<1x1x512xbf16> -> vector<1x16x512xbf16>
    %109 = vector.extract_strided_slice %108 {offsets = [0, 0, 0], sizes = [1, 14, 512], strides = [1, 1, 1]} : vector<1x16x512xbf16> to vector<1x14x512xbf16>
    %110 = vector.extract_strided_slice %108 {offsets = [0, 1, 0], sizes = [1, 14, 512], strides = [1, 1, 1]} : vector<1x16x512xbf16> to vector<1x14x512xbf16>
    %111 = vector.extract_strided_slice %108 {offsets = [0, 2, 0], sizes = [1, 14, 512], strides = [1, 1, 1]} : vector<1x16x512xbf16> to vector<1x14x512xbf16>
    %112 = tpu.concatenate %109, %110, %111 in 2 : vector<1x14x512xbf16>, vector<1x14x512xbf16>, vector<1x14x512xbf16> -> vector<1x14x1536xbf16>
    %113 = vector.shape_cast %112 : vector<1x14x1536xbf16> to vector<14x1536xbf16>
    %c0_11 = arith.constant 0 : index
    %c0_12 = arith.constant 0 : index
    %114 = vector.load %arg4[%c0_11, %c0_12] : memref<1536x896xbf16, #tpu.memory_space<vmem>>, vector<1536x896xbf16>
    %cst_13 = arith.constant dense<0.000000e+00> : vector<14x896xf32>
    %115 = tpu.matmul %113, %114, %cst_13 {dimension_numbers = #tpu.dot_dimension_numbers<[1], [0], [0], [1], [0, 0, 1, 1], [], []>} : vector<14x1536xbf16>, vector<1536x896xbf16>, vector<14x896xf32> -> vector<14x896xf32>
    %c0_14 = arith.constant 0 : index
    %c0_15 = arith.constant 0 : index
    %116 = vector.load %arg5[%c0_14, %c0_15] : memref<1x896xf32, #tpu.memory_space<vmem>>, vector<1x896xf32>
    %117 = vector.broadcast %116 : vector<1x896xf32> to vector<14x896xf32>
    %118 = arith.addf %115, %117 : vector<14x896xf32>
    %cst_16 = arith.constant 0.000000e+00 : f32
    %119 = vector.broadcast %cst_16 : f32 to vector<14x896xf32>
    %120 = arith.cmpf oge, %118, %119 : vector<14x896xf32>
    %cst_17 = arith.constant 0.00999999977 : f32
    %121 = vector.broadcast %cst_17 : f32 to vector<14x896xf32>
    %122 = arith.mulf %121, %118 : vector<14x896xf32>
    %123 = arith.select %120, %118, %122 : vector<14x896xi1>, vector<14x896xf32>
    %124 = vector.shape_cast %123 : vector<14x896xf32> to vector<1x14x896xf32>
    %125 = vector.extract_strided_slice %124 {offsets = [0, 0, 0], sizes = [1, 1, 896], strides = [1, 1, 1]} : vector<1x14x896xf32> to vector<1x1x896xf32>
    %126 = vector.extract_strided_slice %124 {offsets = [0, 1, 0], sizes = [1, 1, 896], strides = [1, 1, 1]} : vector<1x14x896xf32> to vector<1x1x896xf32>
    %127 = arith.maximumf %125, %126 : vector<1x1x896xf32>
    %128 = vector.extract_strided_slice %124 {offsets = [0, 2, 0], sizes = [1, 1, 896], strides = [1, 1, 1]} : vector<1x14x896xf32> to vector<1x1x896xf32>
    %129 = vector.extract_strided_slice %124 {offsets = [0, 3, 0], sizes = [1, 1, 896], strides = [1, 1, 1]} : vector<1x14x896xf32> to vector<1x1x896xf32>
    %130 = arith.maximumf %128, %129 : vector<1x1x896xf32>
    %131 = vector.extract_strided_slice %124 {offsets = [0, 4, 0], sizes = [1, 1, 896], strides = [1, 1, 1]} : vector<1x14x896xf32> to vector<1x1x896xf32>
    %132 = vector.extract_strided_slice %124 {offsets = [0, 5, 0], sizes = [1, 1, 896], strides = [1, 1, 1]} : vector<1x14x896xf32> to vector<1x1x896xf32>
    %133 = arith.maximumf %131, %132 : vector<1x1x896xf32>
    %134 = vector.extract_strided_slice %124 {offsets = [0, 6, 0], sizes = [1, 1, 896], strides = [1, 1, 1]} : vector<1x14x896xf32> to vector<1x1x896xf32>
    %135 = vector.extract_strided_slice %124 {offsets = [0, 7, 0], sizes = [1, 1, 896], strides = [1, 1, 1]} : vector<1x14x896xf32> to vector<1x1x896xf32>
    %136 = arith.maximumf %134, %135 : vector<1x1x896xf32>
    %137 = vector.extract_strided_slice %124 {offsets = [0, 8, 0], sizes = [1, 1, 896], strides = [1, 1, 1]} : vector<1x14x896xf32> to vector<1x1x896xf32>
    %138 = vector.extract_strided_slice %124 {offsets = [0, 9, 0], sizes = [1, 1, 896], strides = [1, 1, 1]} : vector<1x14x896xf32> to vector<1x1x896xf32>
    %139 = arith.maximumf %137, %138 : vector<1x1x896xf32>
    %140 = vector.extract_strided_slice %124 {offsets = [0, 10, 0], sizes = [1, 1, 896], strides = [1, 1, 1]} : vector<1x14x896xf32> to vector<1x1x896xf32>
    %141 = vector.extract_strided_slice %124 {offsets = [0, 11, 0], sizes = [1, 1, 896], strides = [1, 1, 1]} : vector<1x14x896xf32> to vector<1x1x896xf32>
    %142 = arith.maximumf %140, %141 : vector<1x1x896xf32>
    %143 = vector.extract_strided_slice %124 {offsets = [0, 12, 0], sizes = [1, 1, 896], strides = [1, 1, 1]} : vector<1x14x896xf32> to vector<1x1x896xf32>
    %144 = vector.extract_strided_slice %124 {offsets = [0, 13, 0], sizes = [1, 1, 896], strides = [1, 1, 1]} : vector<1x14x896xf32> to vector<1x1x896xf32>
    %145 = arith.maximumf %143, %144 : vector<1x1x896xf32>
    %146 = tpu.concatenate %127, %130, %133, %136, %139, %142, %145 in 1 : vector<1x1x896xf32>, vector<1x1x896xf32>, vector<1x1x896xf32>, vector<1x1x896xf32>, vector<1x1x896xf32>, vector<1x1x896xf32>, vector<1x1x896xf32> -> vector<1x7x896xf32>
    %147 = vector.extract_strided_slice %146 {offsets = [0, 0, 0], sizes = [1, 7, 64], strides = [1, 1, 1]} : vector<1x7x896xf32> to vector<1x7x64xf32>
    %148 = vector.extract_strided_slice %146 {offsets = [0, 0, 64], sizes = [1, 7, 64], strides = [1, 1, 1]} : vector<1x7x896xf32> to vector<1x7x64xf32>
    %149 = arith.maximumf %147, %148 : vector<1x7x64xf32>
    %150 = vector.extract_strided_slice %146 {offsets = [0, 0, 128], sizes = [1, 7, 64], strides = [1, 1, 1]} : vector<1x7x896xf32> to vector<1x7x64xf32>
    %151 = vector.extract_strided_slice %146 {offsets = [0, 0, 192], sizes = [1, 7, 64], strides = [1, 1, 1]} : vector<1x7x896xf32> to vector<1x7x64xf32>
    %152 = arith.maximumf %150, %151 : vector<1x7x64xf32>
    %153 = vector.extract_strided_slice %146 {offsets = [0, 0, 256], sizes = [1, 7, 64], strides = [1, 1, 1]} : vector<1x7x896xf32> to vector<1x7x64xf32>
    %154 = vector.extract_strided_slice %146 {offsets = [0, 0, 320], sizes = [1, 7, 64], strides = [1, 1, 1]} : vector<1x7x896xf32> to vector<1x7x64xf32>
    %155 = arith.maximumf %153, %154 : vector<1x7x64xf32>
    %156 = vector.extract_strided_slice %146 {offsets = [0, 0, 384], sizes = [1, 7, 64], strides = [1, 1, 1]} : vector<1x7x896xf32> to vector<1x7x64xf32>
    %157 = vector.extract_strided_slice %146 {offsets = [0, 0, 448], sizes = [1, 7, 64], strides = [1, 1, 1]} : vector<1x7x896xf32> to vector<1x7x64xf32>
    %158 = arith.maximumf %156, %157 : vector<1x7x64xf32>
    %159 = vector.extract_strided_slice %146 {offsets = [0, 0, 512], sizes = [1, 7, 64], strides = [1, 1, 1]} : vector<1x7x896xf32> to vector<1x7x64xf32>
    %160 = vector.extract_strided_slice %146 {offsets = [0, 0, 576], sizes = [1, 7, 64], strides = [1, 1, 1]} : vector<1x7x896xf32> to vector<1x7x64xf32>
    %161 = arith.maximumf %159, %160 : vector<1x7x64xf32>
    %162 = vector.extract_strided_slice %146 {offsets = [0, 0, 640], sizes = [1, 7, 64], strides = [1, 1, 1]} : vector<1x7x896xf32> to vector<1x7x64xf32>
    %163 = vector.extract_strided_slice %146 {offsets = [0, 0, 704], sizes = [1, 7, 64], strides = [1, 1, 1]} : vector<1x7x896xf32> to vector<1x7x64xf32>
    %164 = arith.maximumf %162, %163 : vector<1x7x64xf32>
    %165 = vector.extract_strided_slice %146 {offsets = [0, 0, 768], sizes = [1, 7, 64], strides = [1, 1, 1]} : vector<1x7x896xf32> to vector<1x7x64xf32>
    %166 = vector.extract_strided_slice %146 {offsets = [0, 0, 832], sizes = [1, 7, 64], strides = [1, 1, 1]} : vector<1x7x896xf32> to vector<1x7x64xf32>
    %167 = arith.maximumf %165, %166 : vector<1x7x64xf32>
    %168 = tpu.concatenate %149, %152, %155, %158, %161, %164, %167 in 2 : vector<1x7x64xf32>, vector<1x7x64xf32>, vector<1x7x64xf32>, vector<1x7x64xf32>, vector<1x7x64xf32>, vector<1x7x64xf32>, vector<1x7x64xf32> -> vector<1x7x448xf32>
    %169 = arith.truncf %168 : vector<1x7x448xf32> to vector<1x7x448xbf16>
    %cst_18 = arith.constant 0.000000e+00 : bf16
    %170 = vector.broadcast %cst_18 : bf16 to vector<1x7x64xbf16>
    %171 = tpu.concatenate %170, %169, %170 in 2 : vector<1x7x64xbf16>, vector<1x7x448xbf16>, vector<1x7x64xbf16> -> vector<1x7x576xbf16>
    %cst_19 = arith.constant 0.000000e+00 : bf16
    %172 = vector.broadcast %cst_19 : bf16 to vector<1x1x576xbf16>
    %173 = tpu.concatenate %172, %171, %172 in 1 : vector<1x1x576xbf16>, vector<1x7x576xbf16>, vector<1x1x576xbf16> -> vector<1x9x576xbf16>
    %174 = vector.extract_strided_slice %173 {offsets = [0, 0, 0], sizes = [1, 7, 576], strides = [1, 1, 1]} : vector<1x9x576xbf16> to vector<1x7x576xbf16>
    %175 = vector.extract_strided_slice %173 {offsets = [0, 1, 0], sizes = [1, 7, 576], strides = [1, 1, 1]} : vector<1x9x576xbf16> to vector<1x7x576xbf16>
    %176 = vector.extract_strided_slice %173 {offsets = [0, 2, 0], sizes = [1, 7, 576], strides = [1, 1, 1]} : vector<1x9x576xbf16> to vector<1x7x576xbf16>
    %177 = tpu.concatenate %174, %175, %176 in 2 : vector<1x7x576xbf16>, vector<1x7x576xbf16>, vector<1x7x576xbf16> -> vector<1x7x1728xbf16>
    %178 = vector.shape_cast %177 : vector<1x7x1728xbf16> to vector<7x1728xbf16>
    %c0_20 = arith.constant 0 : index
    %c0_21 = arith.constant 0 : index
    %179 = vector.load %arg6[%c0_20, %c0_21] : memref<1728x896xbf16, #tpu.memory_space<vmem>>, vector<1728x896xbf16>
    %cst_22 = arith.constant dense<0.000000e+00> : vector<7x896xf32>
    %180 = tpu.matmul %178, %179, %cst_22 {dimension_numbers = #tpu.dot_dimension_numbers<[1], [0], [0], [1], [0, 0, 1, 1], [], []>} : vector<7x1728xbf16>, vector<1728x896xbf16>, vector<7x896xf32> -> vector<7x896xf32>
    %c0_23 = arith.constant 0 : index
    %c0_24 = arith.constant 0 : index
    %181 = vector.load %arg7[%c0_23, %c0_24] : memref<1x896xf32, #tpu.memory_space<vmem>>, vector<1x896xf32>
    %182 = vector.broadcast %181 : vector<1x896xf32> to vector<7x896xf32>
    %183 = arith.addf %180, %182 : vector<7x896xf32>
    %cst_25 = arith.constant 0.000000e+00 : f32
    %184 = vector.broadcast %cst_25 : f32 to vector<7x896xf32>
    %185 = arith.cmpf oge, %183, %184 : vector<7x896xf32>
    %cst_26 = arith.constant 0.00999999977 : f32
    %186 = vector.broadcast %cst_26 : f32 to vector<7x896xf32>
    %187 = arith.mulf %186, %183 : vector<7x896xf32>
    %188 = arith.select %185, %183, %187 : vector<7x896xi1>, vector<7x896xf32>
    %189 = vector.shape_cast %188 : vector<7x896xf32> to vector<1x7x896xf32>
    %190 = vector.extract_strided_slice %189 {offsets = [0, 0, 0], sizes = [1, 1, 896], strides = [1, 1, 1]} : vector<1x7x896xf32> to vector<1x1x896xf32>
    %191 = vector.extract_strided_slice %189 {offsets = [0, 1, 0], sizes = [1, 1, 896], strides = [1, 1, 1]} : vector<1x7x896xf32> to vector<1x1x896xf32>
    %192 = arith.maximumf %190, %191 : vector<1x1x896xf32>
    %193 = vector.extract_strided_slice %189 {offsets = [0, 2, 0], sizes = [1, 1, 896], strides = [1, 1, 1]} : vector<1x7x896xf32> to vector<1x1x896xf32>
    %194 = vector.extract_strided_slice %189 {offsets = [0, 3, 0], sizes = [1, 1, 896], strides = [1, 1, 1]} : vector<1x7x896xf32> to vector<1x1x896xf32>
    %195 = arith.maximumf %193, %194 : vector<1x1x896xf32>
    %196 = vector.extract_strided_slice %189 {offsets = [0, 4, 0], sizes = [1, 1, 896], strides = [1, 1, 1]} : vector<1x7x896xf32> to vector<1x1x896xf32>
    %197 = vector.extract_strided_slice %189 {offsets = [0, 5, 0], sizes = [1, 1, 896], strides = [1, 1, 1]} : vector<1x7x896xf32> to vector<1x1x896xf32>
    %198 = arith.maximumf %196, %197 : vector<1x1x896xf32>
    %199 = tpu.concatenate %192, %195, %198 in 1 : vector<1x1x896xf32>, vector<1x1x896xf32>, vector<1x1x896xf32> -> vector<1x3x896xf32>
    %200 = vector.extract_strided_slice %199 {offsets = [0, 0, 0], sizes = [1, 3, 128], strides = [1, 1, 1]} : vector<1x3x896xf32> to vector<1x3x128xf32>
    %201 = vector.extract_strided_slice %199 {offsets = [0, 0, 128], sizes = [1, 3, 128], strides = [1, 1, 1]} : vector<1x3x896xf32> to vector<1x3x128xf32>
    %202 = arith.maximumf %200, %201 : vector<1x3x128xf32>
    %203 = vector.extract_strided_slice %199 {offsets = [0, 0, 256], sizes = [1, 3, 128], strides = [1, 1, 1]} : vector<1x3x896xf32> to vector<1x3x128xf32>
    %204 = vector.extract_strided_slice %199 {offsets = [0, 0, 384], sizes = [1, 3, 128], strides = [1, 1, 1]} : vector<1x3x896xf32> to vector<1x3x128xf32>
    %205 = arith.maximumf %203, %204 : vector<1x3x128xf32>
    %206 = vector.extract_strided_slice %199 {offsets = [0, 0, 512], sizes = [1, 3, 128], strides = [1, 1, 1]} : vector<1x3x896xf32> to vector<1x3x128xf32>
    %207 = vector.extract_strided_slice %199 {offsets = [0, 0, 640], sizes = [1, 3, 128], strides = [1, 1, 1]} : vector<1x3x896xf32> to vector<1x3x128xf32>
    %208 = arith.maximumf %206, %207 : vector<1x3x128xf32>
    %209 = tpu.concatenate %202, %205, %208 in 2 : vector<1x3x128xf32>, vector<1x3x128xf32>, vector<1x3x128xf32> -> vector<1x3x384xf32>
    %210 = vector.extract_strided_slice %209 {offsets = [0, 0, 0], sizes = [1, 1, 384], strides = [1, 1, 1]} : vector<1x3x384xf32> to vector<1x1x384xf32>
    %211 = vector.shape_cast %210 : vector<1x1x384xf32> to vector<1x384xf32>
    %212 = vector.extract_strided_slice %209 {offsets = [0, 1, 0], sizes = [1, 1, 384], strides = [1, 1, 1]} : vector<1x3x384xf32> to vector<1x1x384xf32>
    %213 = vector.shape_cast %212 : vector<1x1x384xf32> to vector<1x384xf32>
    %214 = vector.extract_strided_slice %209 {offsets = [0, 2, 0], sizes = [1, 1, 384], strides = [1, 1, 1]} : vector<1x3x384xf32> to vector<1x1x384xf32>
    %215 = vector.shape_cast %214 : vector<1x1x384xf32> to vector<1x384xf32>
    %216 = tpu.concatenate %211, %213, %215 in 1 : vector<1x384xf32>, vector<1x384xf32>, vector<1x384xf32> -> vector<1x1152xf32>
    %217 = arith.truncf %216 : vector<1x1152xf32> to vector<1x1152xbf16>
    %c0_27 = arith.constant 0 : index
    %c0_28 = arith.constant 0 : index
    %218 = vector.load %arg8[%c0_27, %c0_28] : memref<1152x256xbf16, #tpu.memory_space<vmem>>, vector<1152x256xbf16>
    %cst_29 = arith.constant dense<0.000000e+00> : vector<1x256xf32>
    %219 = tpu.matmul %217, %218, %cst_29 {dimension_numbers = #tpu.dot_dimension_numbers<[1], [0], [0], [1], [0, 0, 1, 1], [], []>} : vector<1x1152xbf16>, vector<1152x256xbf16>, vector<1x256xf32> -> vector<1x256xf32>
    %c0_30 = arith.constant 0 : index
    %c0_31 = arith.constant 0 : index
    %220 = vector.load %arg9[%c0_30, %c0_31] : memref<1x256xf32, #tpu.memory_space<vmem>>, vector<1x256xf32>
    %221 = arith.addf %219, %220 : vector<1x256xf32>
    %cst_32 = arith.constant 0.000000e+00 : f32
    %222 = vector.broadcast %cst_32 : f32 to vector<1x256xf32>
    %223 = arith.cmpf oge, %221, %222 : vector<1x256xf32>
    %cst_33 = arith.constant 0.00999999977 : f32
    %224 = vector.broadcast %cst_33 : f32 to vector<1x256xf32>
    %225 = arith.mulf %224, %221 : vector<1x256xf32>
    %226 = arith.select %223, %221, %225 : vector<1x256xi1>, vector<1x256xf32>
    %227 = arith.truncf %226 : vector<1x256xf32> to vector<1x256xbf16>
    %c0_34 = arith.constant 0 : index
    %c0_35 = arith.constant 0 : index
    %228 = vector.load %arg10[%c0_34, %c0_35] : memref<256x128xbf16, #tpu.memory_space<vmem>>, vector<256x128xbf16>
    %cst_36 = arith.constant dense<0.000000e+00> : vector<1x128xf32>
    %229 = tpu.matmul %227, %228, %cst_36 {dimension_numbers = #tpu.dot_dimension_numbers<[1], [0], [0], [1], [0, 0, 1, 1], [], []>} : vector<1x256xbf16>, vector<256x128xbf16>, vector<1x128xf32> -> vector<1x128xf32>
    %c0_37 = arith.constant 0 : index
    %c0_38 = arith.constant 0 : index
    %230 = vector.load %arg11[%c0_37, %c0_38] : memref<1x128xf32, #tpu.memory_space<vmem>>, vector<1x128xf32>
    %231 = arith.addf %229, %230 : vector<1x128xf32>
    %cst_39 = arith.constant 0.000000e+00 : f32
    %232 = vector.broadcast %cst_39 : f32 to vector<1x128xf32>
    %233 = arith.cmpf oge, %231, %232 : vector<1x128xf32>
    %cst_40 = arith.constant 0.00999999977 : f32
    %234 = vector.broadcast %cst_40 : f32 to vector<1x128xf32>
    %235 = arith.mulf %234, %231 : vector<1x128xf32>
    %236 = arith.select %233, %231, %235 : vector<1x128xi1>, vector<1x128xf32>
    %237 = arith.truncf %236 : vector<1x128xf32> to vector<1x128xbf16>
    %c0_41 = arith.constant 0 : index
    %c0_42 = arith.constant 0 : index
    %238 = vector.load %arg12[%c0_41, %c0_42] : memref<128x128xbf16, #tpu.memory_space<vmem>>, vector<128x128xbf16>
    %cst_43 = arith.constant dense<0.000000e+00> : vector<1x128xf32>
    %239 = tpu.matmul %237, %238, %cst_43 {dimension_numbers = #tpu.dot_dimension_numbers<[1], [0], [0], [1], [0, 0, 1, 1], [], []>} : vector<1x128xbf16>, vector<128x128xbf16>, vector<1x128xf32> -> vector<1x128xf32>
    %c0_44 = arith.constant 0 : index
    %c0_45 = arith.constant 0 : index
    %240 = vector.load %arg13[%c0_44, %c0_45] : memref<1x128xf32, #tpu.memory_space<vmem>>, vector<1x128xf32>
    %241 = arith.addf %239, %240 : vector<1x128xf32>
    %c0_46 = arith.constant 0 : index
    %c0_47 = arith.constant 0 : index
    %c0_48 = arith.constant 0 : index
    %242 = vector.load %arg14[%c0_46, %c0_47, %c0_48] : memref<1x1x128xf32, #tpu.memory_space<vmem>>, vector<1x1x128xf32>
    %243 = vector.shape_cast %242 : vector<1x1x128xf32> to vector<1x128xf32>
    %244 = vector.shape_cast %241 : vector<1x128xf32> to vector<1x1x128xf32>
    tpu.vector_store %arg14[%c0_46, %c0_47, %c0_48], %244 {strides = array<i32>} : memref<1x1x128xf32, #tpu.memory_space<vmem>>, vector<1x1x128xf32>,
    return
  }
  func.func @transform_0(%arg0: i32) -> (i32, i32, i32, i32) {
    %c0_i32 = arith.constant 0 : i32
    %c0_i32_0 = arith.constant 0 : i32
    %c0_i32_1 = arith.constant 0 : i32
    %c0_i32_2 = arith.constant 0 : i32
    return %arg0, %c0_i32, %c0_i32_0, %c0_i32_1 : i32, i32, i32, i32
  }
  func.func @transform_1(%arg0: i32) -> (i32, i32) {
    %c0_i32 = arith.constant 0 : i32
    %c0_i32_0 = arith.constant 0 : i32
    %c0_i32_1 = arith.constant 0 : i32
    return %c0_i32, %c0_i32_0 : i32, i32
  }
  func.func @transform_2(%arg0: i32) -> (i32, i32) {
    %c0_i32 = arith.constant 0 : i32
    %c0_i32_0 = arith.constant 0 : i32
    %c0_i32_1 = arith.constant 0 : i32
    return %c0_i32, %c0_i32_0 : i32, i32
  }
  func.func @transform_3(%arg0: i32) -> (i32, i32) {
    %c0_i32 = arith.constant 0 : i32
    %c0_i32_0 = arith.constant 0 : i32
    %c0_i32_1 = arith.constant 0 : i32
    return %c0_i32, %c0_i32_0 : i32, i32
  }
  func.func @transform_4(%arg0: i32) -> (i32, i32) {
    %c0_i32 = arith.constant 0 : i32
    %c0_i32_0 = arith.constant 0 : i32
    %c0_i32_1 = arith.constant 0 : i32
    return %c0_i32, %c0_i32_0 : i32, i32
  }
  func.func @transform_5(%arg0: i32) -> (i32, i32) {
    %c0_i32 = arith.constant 0 : i32
    %c0_i32_0 = arith.constant 0 : i32
    %c0_i32_1 = arith.constant 0 : i32
    return %c0_i32, %c0_i32_0 : i32, i32
  }
  func.func @transform_6(%arg0: i32) -> (i32, i32) {
    %c0_i32 = arith.constant 0 : i32
    %c0_i32_0 = arith.constant 0 : i32
    %c0_i32_1 = arith.constant 0 : i32
    return %c0_i32, %c0_i32_0 : i32, i32
  }
  func.func @transform_7(%arg0: i32) -> (i32, i32) {
    %c0_i32 = arith.constant 0 : i32
    %c0_i32_0 = arith.constant 0 : i32
    %c0_i32_1 = arith.constant 0 : i32
    return %c0_i32, %c0_i32_0 : i32, i32
  }
  func.func @transform_8(%arg0: i32) -> (i32, i32) {
    %c0_i32 = arith.constant 0 : i32
    %c0_i32_0 = arith.constant 0 : i32
    %c0_i32_1 = arith.constant 0 : i32
    return %c0_i32, %c0_i32_0 : i32, i32
  }
  func.func @transform_9(%arg0: i32) -> (i32, i32) {
    %c0_i32 = arith.constant 0 : i32
    %c0_i32_0 = arith.constant 0 : i32
    %c0_i32_1 = arith.constant 0 : i32
    return %c0_i32, %c0_i32_0 : i32, i32
  }
  func.func @transform_10(%arg0: i32) -> (i32, i32) {
    %c0_i32 = arith.constant 0 : i32
    %c0_i32_0 = arith.constant 0 : i32
    %c0_i32_1 = arith.constant 0 : i32
    return %c0_i32, %c0_i32_0 : i32, i32
  }
  func.func @transform_11(%arg0: i32) -> (i32, i32) {
    %c0_i32 = arith.constant 0 : i32
    %c0_i32_0 = arith.constant 0 : i32
    %c0_i32_1 = arith.constant 0 : i32
    return %c0_i32, %c0_i32_0 : i32, i32
  }
  func.func @transform_12(%arg0: i32) -> (i32, i32) {
    %c0_i32 = arith.constant 0 : i32
    %c0_i32_0 = arith.constant 0 : i32
    %c0_i32_1 = arith.constant 0 : i32
    return %c0_i32, %c0_i32_0 : i32, i32
  }
  func.func @transform_13(%arg0: i32) -> (i32, i32, i32) {
    %c0_i32 = arith.constant 0 : i32
    %c0_i32_0 = arith.constant 0 : i32
    %c0_i32_1 = arith.constant 0 : i32
    return %arg0, %c0_i32, %c0_i32_0 : i32, i32, i32
  }
}

</mosaic_0001>

<bundles_post_ra>
// kernel: forward.1
= control target key start
LH: loop header
LB: loop body
LE: loop exit
PB: predicated region body
PF: predicated region fallthrough
CT: control target
= control target key end

     0   :  { %s20557_s0 = inlined_call_operand.vmem [shape: bf16[2,1,30,30], index: 0, kind: input, shape index: {}]   ;;  %s20558_s1 = inlined_call_operand.hbm [shape: bf16[90,896], index: 1, kind: input, shape index: {}]   ;;  %s20559_s2 = inlined_call_operand.hbm [shape: f32[1,896], index: 2, kind: input, shape index: {}]   ;;  %s20560_s3 = inlined_call_operand.hbm [shape: bf16[1536,896], index: 3, kind: input, shape index: {}]   ;;  %s20561_s4 = inlined_call_operand.hbm [shape: f32[1,896], index: 4, kind: input, shape index: {}]   ;;  %s20562_s5 = inlined_call_operand.hbm [shape: bf16[1728,896], index: 5, kind: input, shape index: {}]   ;;  %s20563_s6 = inlined_call_operand.hbm [shape: f32[1,896], index: 6, kind: input, shape index: {}]   ;;  %s20564_s7 = inlined_call_operand.hbm [shape: bf16[1152,256], index: 7, kind: input, shape index: {}]   ;;  %s20565_s8 = inlined_call_operand.hbm [shape: f32[1,256], index: 8, kind: input, shape index: {}]   ;;  %s20566_s9 = inlined_call_operand.hbm [shape: bf16[256,128], index: 9, kind: input, shape index: {}]   ;;  %s20567_s10 = inlined_call_operand.hbm [shape: f32[1,128], index: 10, kind: input, shape index: {}]   ;;  %s20568_s11 = inlined_call_operand.hbm [shape: bf16[128,128], index: 11, kind: input, shape index: {}]   ;;  %s20569_s12 = inlined_call_operand.hbm [shape: f32[1,128], index: 12, kind: input, shape index: {}]   ;;  %s20570_s13 = inlined_call_operand.hbm [shape: f32[2,1,128], index: 13, kind: output, shape index: {}]  }
   0x1   :  { %20584 = sst [smem:[#allocation37_spill]] %s20559_s2 }
   0x2   :  { %20585 = sst [smem:[#allocation38_spill]] %s20561_s4 }
   0x3   :  { %20586 = sst [smem:[#allocation39_spill]] %s20570_s13 }
   0x4   :  { %18 = vsyncpa [#allocation3], 0 }
   0x5   :  { %19 = vsyncpa [#allocation6], 0 }
   0x6   :  { %20 = vsyncpa [#allocation9], 0 }
   0x7   :  { %21 = vsyncpa [#allocation12], 0 }
   0x8   :  { %22 = vsyncpa [#allocation15], 0 }
   0x9   :  { %23 = vsyncpa [#allocation18], 0 }
   0xa   :  { %24 = vsyncpa [#allocation21], 0 }
   0xb   :  { %25 = vsyncpa [#allocation4], 0 }
   0xc   :  { %27 = vsyncpa [#allocation4 + $0x1], 0  ;;  %s19111_s25 = smov 0   ;;  %s19113_s26 = smov 0  }
   0xd   :  { %s19115_s27 = smov 0   ;;  %s19117_s28 = smov 0  }
   0xe LB: > { %20587 = sst [smem:[#allocation31_spill]] %s19000_s25  ;;  %s19132_s29 = sadd.s32 4294967295, %s19012_s28   ;;  %s19012_s28 = sphi %s19117_s28, %s20656_s28   ;;  %s19008_s27 = sphi %s19115_s27, %s20658_s27   ;;  %s19004_s26 = sphi %s19113_s26, %s20660_s26   ;;  %s19000_s25 = sphi %s19111_s25, %s20659_s25  }
   0xf   : > { %20588 = sst [smem:[#allocation32_spill]] %s19008_s27  ;;  %s14105_s30 = sadd.s32 4294967294, %s19012_s28  }
  0x10   : > { %20589 = sst [smem:[#allocation33_spill]] %s19012_s28  ;;  %s19136_s14 = sadd.s32 1, %s19012_s28  }
  0x11   : > { %20590 = sst [smem:[#allocation34_spill]] %s19136_s14  ;;  %s318_s15 = sadd.s32 1, %s19008_s27 }
  0x12   : > { %s315_s16 = ssub.s32 %s19012_s28, %s19136_s14  ;;  %p328_p0 = scmp.ne.s32.totalorder %s19008_s27, %s19004_s26 }
  0x13   : > { %p316_p1 = scmp.eq.s32.totalorder %s315_s16, 0  ;;  %p329_p2 = scmp.eq.s32.totalorder %s19132_s29, 1 }
  0x14   : > { %p334_p3 = scmp.ne.s32.totalorder %s19004_s26, %s19000_s25  ;;  %p335_p4 = scmp.eq.s32.totalorder %s14105_s30, 1 }
  0x15   : > { %s19147_s17 = scalar_select %p316_p1, %s19008_s27, %s318_s15  }
  0x16   : > { %p19149_p5 = por %p329_p2, %p328_p0  ;;  %p19153_p6 = por %p335_p4, %p334_p3 }
  0x17   : > { %20591 = sst [smem:[#allocation35_spill]] %s19147_s17  ;;  %p14106_p7 = scmp.ge.s32.totalorder %s19012_s28, 1 }
  0x18   : > { %s20592_s18 = scalar_select %p19149_p5, 1, 0 }
  0x19   : > { %s20593_s19 = scalar_select %p19153_p6, 1, 0 }
  0x1a   : > { %p342_p8 = scmp.lt.s32.totalorder %s19012_s28, 3  ;;  %p20576_p9 = scmp.eq.s32.totalorder %s19132_s29, 0 }
  0x1b   : > { %20594 = sst [smem:[#allocation36_spill]] %s20593_s19  ;;  %s19014_s21 = smov [#allocation5]  }
  0x1c   : > { %p19160_p10 = pnand %p14106_p7, %p342_p8  ;;  %s368_s22 = sshll.u32 %s19014_s21, 4  ;;  %s369_s22 = int_to_ptr.vmem [resolvable:$true] %s368_s22 }
  0x1d   : > { %s19015_s23 = smov [#allocation8]   ;;  %s19016_s15 = smov [#allocation11]  }
  0x1e   : > { %s20595_s20 = scalar_select %p19160_p10, 1, 0 }
  0x1f   : > { %p16123_p11 = pneg %p19160_p10  ;;  %s392_s24 = sshll.u32 %s19015_s23, 4  ;;  %s19172_s24 = int_to_ptr.vmem [resolvable:$true] %s392_s24 }
  0x20   : > { %s416_s16 = sshll.u32 %s19016_s15, 4  ;;  %s20597_s2 = sld [smem:[#allocation37_spill]]  ;;  %s19174_s16 = int_to_ptr.vmem [resolvable:$true] %s416_s16 }
  0x21   : > { %p19168_p12 = pnand %p20576_p9, %p16123_p11 }
  0x23   : > { %p19184_p0 = pneg %p19168_p12 }
  0x26   : > { %s18586_s21 = scalar_lea.hbm %s20597_s2, 112 }
  0x27   : > { %p18587_p13 = scmp.ne.s32.totalorder %s20597_s2, %s18586_s21  ;;  %p18593_p3 = scmp.lt.u32.totalorder %s18586_s21, %s20597_s2 }
  0x29   : > { %p18589_p1 = pnand %p19184_p0, %p18587_p13 }
  0x2b   : > { %p18590_p2 = pneg %p18589_p1 }
  0x2d   : > { %p18595_p4 = pnand %p18593_p3, %p18590_p2 }
  0x2f   : > { %18598 = shalt.err (!%p18595_p4)
}
  0x30   : > { %s18599_s27 = scalar_lea.vmem %s369_s22, 112  ;;  %s18606_s14 = scalar_lea.vmem %s369_s22, 128 }
  0x31   : > { %p18600_p7 = scmp.ne.s32.totalorder %s369_s22, %s18599_s27  ;;  %p18607_p9 = scmp.lt.s32.totalorder %s369_s22, %s369_s22 }
  0x32   : > { %p18608_p6 = scmp.lt.s32.totalorder %s18606_s14, %s18599_s27 }
  0x33   : > { %p18602_p8 = pnand %p18600_p7, %p19184_p0 }
  0x34   : > { %p18609_p5 = por %p18608_p6, %p18607_p9 }
  0x35   : > { %p18603_p11 = pneg %p18602_p8 }
  0x37   : > { %p18610_p10 = pnand %p18609_p5, %p18603_p11 }
  0x39   : > { %18613 = shalt.err (!%p18610_p10)
}
  0x3a   : > { %16129 = dma.hbm_to_vmem [thread:$0]  (!%p19168_p12), %s20597_s2, 112, %s369_s22, [#allocation6]  }
  0x3b   : > { %s20599_s4 = sld [smem:[#allocation38_spill]] }
  0x41   : > { %s18614_s15 = scalar_lea.hbm %s20599_s4, 112 }
  0x42   : > { %p18615_p13 = scmp.ne.s32.totalorder %s20599_s4, %s18614_s15  ;;  %p18621_p5 = scmp.lt.u32.totalorder %s18614_s15, %s20599_s4 }
  0x44   : > { %p18617_p1 = pnand %p18615_p13, %p19184_p0 }
  0x46   : > { %p18618_p6 = pneg %p18617_p1 }
  0x48   : > { %p18623_p9 = pnand %p18621_p5, %p18618_p6 }
  0x4a   : > { %18626 = shalt.err (!%p18623_p9)
}
  0x4b   : > { %s18627_s22 = scalar_lea.vmem %s19172_s24, 112  ;;  %s18634_s13 = scalar_lea.vmem %s19172_s24, 128 }
  0x4c   : > { %p18628_p10 = scmp.ne.s32.totalorder %s19172_s24, %s18627_s22  ;;  %p18635_p4 = scmp.lt.s32.totalorder %s19172_s24, %s19172_s24 }
  0x4d   : > { %p18636_p7 = scmp.lt.s32.totalorder %s18634_s13, %s18627_s22 }
  0x4e   : > { %p18630_p2 = pnand %p18628_p10, %p19184_p0 }
  0x4f   : > { %p18637_p8 = por %p18636_p7, %p18635_p4 }
  0x50   : > { %p18631_p3 = pneg %p18630_p2 }
  0x52   : > { %p18638_p11 = pnand %p18637_p8, %p18631_p3 }
  0x54   : > { %18641 = shalt.err (!%p18638_p11)
}
  0x55   : > { %16135 = dma.hbm_to_vmem [thread:$0]  (!%p19168_p12), %s20599_s4, 112, %s19172_s24, [#allocation9]  }
  0x56   : > { %s18642_s21 = scalar_lea.hbm %s20563_s6, 112 }
  0x57   : > { %p18643_p13 = scmp.ne.s32.totalorder %s20563_s6, %s18642_s21  ;;  %p18649_p5 = scmp.lt.u32.totalorder %s18642_s21, %s20563_s6 }
  0x59   : > { %p18645_p1 = pnand %p18643_p13, %p19184_p0 }
  0x5b   : > { %p18646_p6 = pneg %p18645_p1 }
  0x5d   : > { %p18651_p9 = pnand %p18649_p5, %p18646_p6 }
  0x5f   : > { %18654 = shalt.err (!%p18651_p9)
}
  0x60   : > { %s18655_s24 = scalar_lea.vmem %s19174_s16, 112  ;;  %s18662_s13 = scalar_lea.vmem %s19174_s16, 128 }
  0x61   : > { %p18656_p10 = scmp.ne.s32.totalorder %s19174_s16, %s18655_s24  ;;  %p18663_p4 = scmp.lt.s32.totalorder %s19174_s16, %s19174_s16 }
  0x62   : > { %p18664_p7 = scmp.lt.s32.totalorder %s18662_s13, %s18655_s24 }
  0x63   : > { %p18658_p2 = pnand %p18656_p10, %p19184_p0 }
  0x64   : > { %p18665_p8 = por %p18664_p7, %p18663_p4 }
  0x65   : > { %p18659_p3 = pneg %p18658_p2 }
  0x67   : > { %p18666_p11 = pnand %p18665_p8, %p18659_p3 }
  0x69   : > { %18669 = shalt.err (!%p18666_p11)
}
  0x6a   : > { %16141 = dma.hbm_to_vmem [thread:$0]  (!%p19168_p12), %s20563_s6, 112, %s19174_s16, [#allocation12]  }
  0x6b   : > { %s19017_s19 = smov [#allocation14]   ;;  %s19018_s21 = smov [#allocation17]  }
  0x6c   : > { %s440_s25 = sshll.u32 %s19017_s19, 4  ;;  %s464_s15 = sshll.u32 %s19018_s21, 4  ;;  %s441_s25 = int_to_ptr.vmem [resolvable:$true] %s440_s25  ;;  %s465_s15 = int_to_ptr.vmem [resolvable:$true] %s464_s15 }
  0x6d   : > { %s18670_s22 = scalar_lea.hbm %s20565_s8, 32 }
  0x6e   : > { %p18671_p13 = scmp.ne.s32.totalorder %s20565_s8, %s18670_s22  ;;  %p18677_p5 = scmp.lt.u32.totalorder %s18670_s22, %s20565_s8 }
  0x70   : > { %p18673_p1 = pnand %p18671_p13, %p19184_p0 }
  0x72   : > { %p18674_p6 = pneg %p18673_p1 }
  0x74   : > { %p18679_p9 = pnand %p18677_p5, %p18674_p6 }
  0x76   : > { %18682 = shalt.err (!%p18679_p9)
}
  0x77   : > { %s18683_s16 = scalar_lea.vmem %s441_s25, 32  ;;  %p18691_p4 = scmp.lt.s32.totalorder %s441_s25, %s441_s25 }
  0x78   : > { %p18684_p10 = scmp.ne.s32.totalorder %s441_s25, %s18683_s16  ;;  %p18692_p7 = scmp.lt.s32.totalorder %s18683_s16, %s18683_s16 }
  0x7a   : > { %p18686_p2 = pnand %p18684_p10, %p19184_p0  ;;  %p18693_p8 = por %p18692_p7, %p18691_p4 }
  0x7c   : > { %p18687_p3 = pneg %p18686_p2 }
  0x7e   : > { %p18694_p11 = pnand %p18693_p8, %p18687_p3 }
  0x80   : > { %18697 = shalt.err (!%p18694_p11)
}
  0x81   : > { %16147 = dma.hbm_to_vmem [thread:$0]  (!%p19168_p12), %s20565_s8, 32, %s441_s25, [#allocation15]  }
  0x82   : > { %s18698_s27 = scalar_lea.hbm %s20567_s10, 16 }
  0x83   : > { %p18699_p13 = scmp.ne.s32.totalorder %s20567_s10, %s18698_s27  ;;  %p18705_p5 = scmp.lt.u32.totalorder %s18698_s27, %s20567_s10 }
  0x85   : > { %p18701_p1 = pnand %p18699_p13, %p19184_p0 }
  0x87   : > { %p18702_p6 = pneg %p18701_p1 }
  0x89   : > { %p18707_p9 = pnand %p18705_p5, %p18702_p6 }
  0x8b   : > { %18710 = shalt.err (!%p18707_p9)
}
  0x8c   : > { %s18711_s28 = scalar_lea.vmem %s465_s15, 16  ;;  %s18718_s25 = scalar_lea.vmem %s465_s15, 32 }
  0x8d   : > { %p18712_p10 = scmp.ne.s32.totalorder %s465_s15, %s18711_s28  ;;  %p18719_p4 = scmp.lt.s32.totalorder %s465_s15, %s465_s15 }
  0x8e   : > { %p18720_p7 = scmp.lt.s32.totalorder %s18718_s25, %s18711_s28 }
  0x8f   : > { %p18714_p2 = pnand %p18712_p10, %p19184_p0 }
  0x90   : > { %p18721_p8 = por %p18720_p7, %p18719_p4 }
  0x91   : > { %p18715_p3 = pneg %p18714_p2 }
  0x93   : > { %p18722_p11 = pnand %p18721_p8, %p18715_p3 }
  0x95   : > { %18725 = shalt.err (!%p18722_p11)
}
  0x96   : > { %16153 = dma.hbm_to_vmem [thread:$0]  (!%p19168_p12), %s20567_s10, 16, %s465_s15, [#allocation18]  }
  0x97   : > { %s19019_s19 = smov [#allocation2]   ;;  %s18726_s14 = scalar_lea.hbm %s20558_s1, 5376 }
  0x98   : > { %s354_s2 = sshll.u32 %s19019_s19, 4  ;;  %p18727_p13 = scmp.ne.s32.totalorder %s20558_s1, %s18726_s14  ;;  %s355_s2 = int_to_ptr.vmem [resolvable:$true] %s354_s2 }
  0x99   : > { %p18733_p5 = scmp.lt.u32.totalorder %s18726_s14, %s20558_s1 }
  0x9a   : > { %p18729_p1 = pnand %p18727_p13, %p19184_p0 }
  0x9c   : > { %p18730_p6 = pneg %p18729_p1 }
  0x9e   : > { %p18735_p9 = pnand %p18733_p5, %p18730_p6 }
  0xa0   : > { %18738 = shalt.err (!%p18735_p9)
}
  0xa1   : > { %s18739_s15 = scalar_lea.vmem %s355_s2, 5376  ;;  %p18747_p4 = scmp.lt.s32.totalorder %s355_s2, %s355_s2 }
  0xa2   : > { %p18740_p10 = scmp.ne.s32.totalorder %s355_s2, %s18739_s15  ;;  %p18748_p7 = scmp.lt.s32.totalorder %s18739_s15, %s18739_s15 }
  0xa4   : > { %p18742_p2 = pnand %p18740_p10, %p19184_p0  ;;  %p18749_p8 = por %p18748_p7, %p18747_p4 }
  0xa6   : > { %p18743_p3 = pneg %p18742_p2 }
  0xa8   : > { %p18750_p11 = pnand %p18749_p8, %p18743_p3 }
  0xaa   : > { %18753 = shalt.err (!%p18750_p11)
}
  0xab   : > { %s19020_s25 = smov 448   ;;  %s19021_s16 = smov 28  }
  0xac   : > { %16126 = dma.hbm_to_vmem [thread:$0]  (!%p19168_p12), %s20558_s1, 5376, %s355_s2, [#allocation3], %s19020_s25, %s19020_s25, %s19021_s16  }
  0xad   : > { %s19022_s21 = smov [#allocation7]   ;;  %s19023_s14 = smov [#allocation10]  }
  0xae   : > { %s378_s27 = sshll.u32 %s19022_s21, 4  ;;  %s402_s22 = sshll.u32 %s19023_s14, 4  ;;  %s379_s27 = int_to_ptr.vmem [resolvable:$true] %s378_s27  ;;  %s19305_s22 = int_to_ptr.vmem [resolvable:$true] %s402_s22 }
  0xaf   : > { %s18754_s28 = scalar_lea.hbm %s20560_s3, 86016 }
  0xb0   : > { %p18755_p13 = scmp.ne.s32.totalorder %s20560_s3, %s18754_s28  ;;  %p18761_p5 = scmp.lt.u32.totalorder %s18754_s28, %s20560_s3 }
  0xb2   : > { %p18757_p1 = pnand %p18755_p13, %p19184_p0 }
  0xb4   : > { %p18758_p6 = pneg %p18757_p1 }
  0xb6   : > { %p18763_p9 = pnand %p18761_p5, %p18758_p6 }
  0xb8   : > { %18766 = shalt.err (!%p18763_p9)
}
  0xb9   : > { %s18767_s19 = scalar_lea.vmem %s379_s27, 86016  ;;  %p18775_p4 = scmp.lt.s32.totalorder %s379_s27, %s379_s27 }
  0xba   : > { %p18768_p10 = scmp.ne.s32.totalorder %s379_s27, %s18767_s19  ;;  %p18776_p7 = scmp.lt.s32.totalorder %s18767_s19, %s18767_s19 }
  0xbc   : > { %p18770_p2 = pnand %p18768_p10, %p19184_p0  ;;  %p18777_p8 = por %p18776_p7, %p18775_p4 }
  0xbe   : > { %p18771_p3 = pneg %p18770_p2 }
  0xc0   : > { %p18778_p11 = pnand %p18777_p8, %p18771_p3 }
  0xc2   : > { %18781 = shalt.err (!%p18778_p11)
}
  0xc3   : > { %16132 = dma.hbm_to_vmem [thread:$0]  (!%p19168_p12), %s20560_s3, 86016, %s379_s27, [#allocation6], %s19020_s25, %s19020_s25, %s19021_s16  }
  0xc4   : > { %s18782_s13 = scalar_lea.hbm %s20562_s5, 96768 }
  0xc5   : > { %p18783_p13 = scmp.ne.s32.totalorder %s20562_s5, %s18782_s13  ;;  %p18789_p5 = scmp.lt.u32.totalorder %s18782_s13, %s20562_s5 }
  0xc7   : > { %p18785_p1 = pnand %p18783_p13, %p19184_p0 }
  0xc9   : > { %p18786_p6 = pneg %p18785_p1 }
  0xcb   : > { %p18791_p9 = pnand %p18789_p5, %p18786_p6 }
  0xcd   : > { %18794 = shalt.err (!%p18791_p9)
}
  0xce   : > { %s18795_s27 = scalar_lea.vmem %s19305_s22, 96768  ;;  %p18803_p4 = scmp.lt.s32.totalorder %s19305_s22, %s19305_s22 }
  0xcf   : > { %p18796_p10 = scmp.ne.s32.totalorder %s19305_s22, %s18795_s27  ;;  %p18804_p7 = scmp.lt.s32.totalorder %s18795_s27, %s18795_s27 }
  0xd1   : > { %p18798_p2 = pnand %p18796_p10, %p19184_p0  ;;  %p18805_p8 = por %p18804_p7, %p18803_p4 }
  0xd3   : > { %p18799_p3 = pneg %p18798_p2 }
  0xd5   : > { %p18806_p11 = pnand %p18805_p8, %p18799_p3 }
  0xd7   : > { %18809 = shalt.err (!%p18806_p11)
}
  0xd8   : > { %16138 = dma.hbm_to_vmem [thread:$0]  (!%p19168_p12), %s20562_s5, 96768, %s19305_s22, [#allocation9], %s19020_s25, %s19020_s25, %s19021_s16  }
  0xd9   : > { %s19024_s21 = smov [#allocation13]   ;;  %s18810_s28 = scalar_lea.hbm %s20564_s7, 18432 }
  0xda   : > { %s426_s14 = sshll.u32 %s19024_s21, 4  ;;  %p18811_p13 = scmp.ne.s32.totalorder %s20564_s7, %s18810_s28  ;;  %s427_s14 = int_to_ptr.vmem [resolvable:$true] %s426_s14 }
  0xdb   : > { %p18817_p5 = scmp.lt.u32.totalorder %s18810_s28, %s20564_s7 }
  0xdc   : > { %p18813_p1 = pnand %p18811_p13, %p19184_p0 }
  0xde   : > { %p18814_p6 = pneg %p18813_p1 }
  0xe0   : > { %p18819_p9 = pnand %p18817_p5, %p18814_p6 }
  0xe2   : > { %18822 = shalt.err (!%p18819_p9)
}
  0xe3   : > { %s18823_s25 = scalar_lea.vmem %s427_s14, 18432  ;;  %p18831_p4 = scmp.lt.s32.totalorder %s427_s14, %s427_s14 }
  0xe4   : > { %p18824_p10 = scmp.ne.s32.totalorder %s427_s14, %s18823_s25  ;;  %p18832_p7 = scmp.lt.s32.totalorder %s18823_s25, %s18823_s25 }
  0xe6   : > { %p18826_p2 = pnand %p18824_p10, %p19184_p0  ;;  %p18833_p8 = por %p18832_p7, %p18831_p4 }
  0xe8   : > { %p18827_p3 = pneg %p18826_p2 }
  0xea   : > { %p18834_p11 = pnand %p18833_p8, %p18827_p3 }
  0xec   : > { %18837 = shalt.err (!%p18834_p11)
}
  0xed   : > { %s19025_s16 = smov 128   ;;  %s19026_s22 = smov 8  }
  0xee   : > { %16144 = dma.hbm_to_vmem [thread:$0]  (!%p19168_p12), %s20564_s7, 18432, %s427_s14, [#allocation12], %s19025_s16, %s19025_s16, %s19026_s22  }
  0xef   : > { %s19027_s21 = smov [#allocation16]   ;;  %s18838_s15 = scalar_lea.hbm %s20566_s9, 2048 }
  0xf0   : > { %s450_s24 = sshll.u32 %s19027_s21, 4  ;;  %p18839_p13 = scmp.ne.s32.totalorder %s20566_s9, %s18838_s15  ;;  %s451_s24 = int_to_ptr.vmem [resolvable:$true] %s450_s24 }
  0xf1   : > { %p18845_p5 = scmp.lt.u32.totalorder %s18838_s15, %s20566_s9 }
  0xf2   : > { %p18841_p1 = pnand %p18839_p13, %p19184_p0 }
  0xf4   : > { %p18842_p6 = pneg %p18841_p1 }
  0xf6   : > { %p18847_p9 = pnand %p18845_p5, %p18842_p6 }
  0xf8   : > { %18850 = shalt.err (!%p18847_p9)
}
  0xf9   : > { %s18851_s14 = scalar_lea.vmem %s451_s24, 2048  ;;  %p18859_p4 = scmp.lt.s32.totalorder %s451_s24, %s451_s24 }
  0xfa   : > { %p18852_p10 = scmp.ne.s32.totalorder %s451_s24, %s18851_s14  ;;  %p18860_p7 = scmp.lt.s32.totalorder %s18851_s14, %s18851_s14 }
  0xfc   : > { %p18854_p2 = pnand %p18852_p10, %p19184_p0  ;;  %p18861_p8 = por %p18860_p7, %p18859_p4 }
  0xfe   : > { %p18855_p3 = pneg %p18854_p2 }
 0x100   : > { %p18862_p11 = pnand %p18861_p8, %p18855_p3 }
 0x102   : > { %18865 = shalt.err (!%p18862_p11)
}
 0x103   : > { %s19028_s16 = smov 64   ;;  %s19029_s22 = smov 4  }
 0x104   : > { %16150 = dma.hbm_to_vmem [thread:$0]  (!%p19168_p12), %s20566_s9, 2048, %s451_s24, [#allocation15], %s19028_s16, %s19028_s16, %s19029_s22  }
 0x105   : > { %s19030_s21 = smov [#allocation19]   ;;  %s19031_s28 = smov [#allocation20]  }
 0x106   : > { %s474_s13 = sshll.u32 %s19030_s21, 4  ;;  %s488_s15 = sshll.u32 %s19031_s28, 4  ;;  %s475_s13 = int_to_ptr.vmem [resolvable:$true] %s474_s13  ;;  %s19390_s15 = int_to_ptr.vmem [resolvable:$true] %s488_s15 }
 0x107   : > { %s18866_s27 = scalar_lea.hbm %s20568_s11, 1024 }
 0x108   : > { %p18867_p13 = scmp.ne.s32.totalorder %s20568_s11, %s18866_s27  ;;  %p18873_p5 = scmp.lt.u32.totalorder %s18866_s27, %s20568_s11 }
 0x10a   : > { %p18869_p1 = pnand %p18867_p13, %p19184_p0 }
 0x10c   : > { %p18870_p6 = pneg %p18869_p1 }
 0x10e   : > { %p18875_p9 = pnand %p18873_p5, %p18870_p6 }
 0x110   : > { %18878 = shalt.err (!%p18875_p9)
}
 0x111   : > { %s18879_s4 = scalar_lea.vmem %s475_s13, 1024  ;;  %p18887_p4 = scmp.lt.s32.totalorder %s475_s13, %s475_s13 }
 0x112   : > { %p18880_p10 = scmp.ne.s32.totalorder %s475_s13, %s18879_s4  ;;  %p18888_p7 = scmp.lt.s32.totalorder %s18879_s4, %s18879_s4 }
 0x114   : > { %p18882_p2 = pnand %p18880_p10, %p19184_p0  ;;  %p18889_p8 = por %p18888_p7, %p18887_p4 }
 0x116   : > { %p18883_p3 = pneg %p18882_p2 }
 0x118   : > { %p18890_p11 = pnand %p18889_p8, %p18883_p3 }
 0x11a   : > { %18893 = shalt.err (!%p18890_p11)
}
 0x11b   : > { %16156 = dma.hbm_to_vmem [thread:$0]  (!%p19168_p12), %s20568_s11, 1024, %s475_s13, [#allocation18], %s19028_s16, %s19028_s16, %s19029_s22  }
 0x11c   : > { %s18894_s27 = scalar_lea.hbm %s20569_s12, 16 }
 0x11d   : > { %p18895_p13 = scmp.ne.s32.totalorder %s20569_s12, %s18894_s27  ;;  %p18901_p5 = scmp.lt.u32.totalorder %s18894_s27, %s20569_s12 }
 0x11f   : > { %p18897_p1 = pnand %p18895_p13, %p19184_p0 }
 0x121   : > { %p18898_p6 = pneg %p18897_p1 }
 0x123   : > { %p18903_p9 = pnand %p18901_p5, %p18898_p6 }
 0x125   : > { %18906 = shalt.err (!%p18903_p9)
}
 0x126   : > { %s18907_s16 = scalar_lea.vmem %s19390_s15, 16  ;;  %s18914_s22 = scalar_lea.vmem %s19390_s15, 32 }
 0x127   : > { %p18908_p10 = scmp.ne.s32.totalorder %s19390_s15, %s18907_s16  ;;  %p18915_p4 = scmp.lt.s32.totalorder %s19390_s15, %s19390_s15 }
 0x128   : > { %p18916_p7 = scmp.lt.s32.totalorder %s18914_s22, %s18907_s16 }
 0x129   : > { %p18910_p2 = pnand %p18908_p10, %p19184_p0 }
 0x12a   : > { %p18917_p8 = por %p18916_p7, %p18915_p4 }
 0x12b   : > { %p18911_p3 = pneg %p18910_p2 }
 0x12d   : > { %p18918_p11 = pnand %p18917_p8, %p18911_p3 }
 0x12f   : > { %18921 = shalt.err (!%p18918_p11)
}
 0x130   : > { %16159 = dma.hbm_to_vmem [thread:$0]  (!%p19168_p12), %s20569_s12, 16, %s19390_s15, [#allocation21]  }
 0x131   : > { %p20600_p13 = scmp.ne.s32.totalorder %s20595_s20, 0 }
 0x132   : > { %p20601_p0 = scmp.eq.s32.totalorder (!%p20600_p13), %s19132_s29, 0 }
 0x133   : > { %509 = sbr.rel (%p20600_p13) target bundleno = 4274 (0x10b2), region = 72 }
 0x13a   : > { %18967 = dma.done.wait (%p20601_p0), [#allocation3], 5376   ;;  %p20602_p1 = pmov %p20601_p0 }
 0x13b   : > { %p20603_p6 = pmov %p20601_p0 }
 0x13c   : > { %18969 = vsyncadd (%p20602_p1), [#allocation3], 4294961920 }
 0x13d   : > { %18971 = dma.done.wait (%p20603_p6), [#allocation6], 86128   ;;  %p20604_p5 = pmov %p20601_p0 }
 0x13e   : > { %p20605_p9 = pmov %p20601_p0 }
 0x13f   : > { %18973 = vsyncadd (%p20604_p5), [#allocation6], 4294881168 }
 0x140   : > { %18975 = dma.done.wait (%p20605_p9), [#allocation9], 96880   ;;  %p20606_p12 = pmov %p20601_p0 }
 0x141   : > { %p20607_p10 = pmov %p20601_p0 }
 0x142   : > { %18977 = vsyncadd (%p20606_p12), [#allocation9], 4294870416 }
 0x143   : > { %18979 = dma.done.wait (%p20607_p10), [#allocation12], 18544   ;;  %p20608_p2 = pmov %p20601_p0 }
 0x144   : > { %p20609_p3 = pmov %p20601_p0 }
 0x145   : > { %18981 = vsyncadd (%p20608_p2), [#allocation12], 4294948752 }
 0x146   : > { %18983 = dma.done.wait (%p20609_p3), [#allocation15], 2080   ;;  %p20610_p4 = pmov %p20601_p0 }
 0x147   : > { %p20611_p7 = pmov %p20601_p0 }
 0x148   : > { %18985 = vsyncadd (%p20610_p4), [#allocation15], 4294965216 }
 0x149   : > { %18987 = dma.done.wait (%p20611_p7), [#allocation18], 1040   ;;  %p20612_p8 = pmov %p20601_p0 }
 0x14a   : > { %p20613_p11 = pmov %p20601_p0 }
 0x14b   : > { %18989 = vsyncadd (%p20612_p8), [#allocation18], 4294966256 }
 0x14c   : > { %18991 = dma.done.wait (%p20613_p11), [#allocation21], 16   ;;  %p20614_p13 = pmov %p20601_p0 }
 0x14d   : > { %p596_p0 = scmp.lt.s32.totalorder %s19132_s29, 1  ;;  %vm616_vm0 = vsmask.f32 7424  ;;  %v16354_v2 = vld [vmem:[#allocation2 + $0x4] ss:$28 sps:$4 sm:$0xff]   ;;  %v20581_v3 = vmov 0  }
 0x14e   : > { %18993 = vsyncadd (%p20614_p13), [#allocation21], 4294967280  ;;  %1007 = vmatprep.mubr.bf16.mxu0 %v20581_v3  ;;  %1060 = vmatprep.mubr.bf16.mxu1 %v20581_v3  ;;  %v16356_v8 = vld [vmem:[#allocation2 + $0xc] ss:$28 sps:$4 sm:$0xff]   ;;  %v16358_v9 = vld [vmem:[#allocation2] ss:$28 sps:$4 sm:$0xff]  }
 0x14f   : > { %s597_s20 = scalar_select %p596_p0, %s19132_s29, 1  ;;  %975 = vmatprep.subr.bf16.mxu0 %v16354_v2  ;;  %v16359_v12 = vld [vmem:[#allocation2 + $0x8] ss:$28 sps:$4 sm:$0xff]   ;;  %1028 = vmatprep.subr.bf16.mxu1 %v16356_v8  ;;  %v16360_v15 = vld [vmem:[#allocation2 + $0x3c] ss:$28 sps:$4 sm:$0xff]   ;;  %vm636_vm1 = vcmask 1046528  }
 0x150   : > { %976 = vmatpush1.bf16.msra.mxu0 %v16358_v9  ;;  %1029 = vmatpush1.bf16.msra.mxu1 %v16359_v12  ;;  %v16362_v18 = vld [vmem:[#allocation2 + $0x44] ss:$28 sps:$4 sm:$0xff]   ;;  %v16364_v19 = vld [vmem:[#allocation2 + $0x38] ss:$28 sps:$4 sm:$0xff]   ;;  %s19033_s28 = smov 30   ;;  %s19034_s17 = smov 60  }
 0x151   : > { %s15696_s30 = sshll.u32 %s597_s20, 4  ;;  %v16365_v20 = vld [vmem:[#allocation2 + $0x40] ss:$28 sps:$4 sm:$0xff]   ;;  %977 = vmatprep.subr.bf16.mxu0 %v16360_v15  ;;  %v16366_v21 = vld [vmem:[#allocation2 + $0x74] ss:$28 sps:$4 sm:$0xff]   ;;  %1030 = vmatprep.subr.bf16.mxu1 %v16362_v18  ;;  %vm953_vm2 = vcmask 1044480  }
 0x152   : > { %s600_s21 = scalar_lea.vmem %s20557_s0, %s15696_s30  ;;  %v16368_v23 = vld [vmem:[#allocation2 + $0x7c] ss:$28 sps:$4 sm:$0xff]   ;;  %v16370_v24 = vld [vmem:[#allocation2 + $0x70] ss:$28 sps:$4 sm:$0xff]   ;;  %v16376_v29 = vld [vmem:[#allocation2 + $0xa8] ss:$28 sps:$4 sm:$0xff]  }
 0x153   : > { %v19469_v0 = vld [vmem:[%s600_s21] sm:$0xff]   ;;  %v19471_v1 = vld [vmem:[%s600_s21 + $0x8] sm:$0x7f]   ;;  %v16371_v25 = vld [vmem:[#allocation2 + $0x78] ss:$28 sps:$4 sm:$0xff]   ;;  %vm644_vm3 = vcmask 244736  }
 0x154   : > { %v618_v4 = vshrl.u32 %v19469_v0, 16  ;;  %v620_v5 = vshll.u32 %v19469_v0, 16  ;;  %v625_v6 = vshll.u32 %v19471_v1, 16  ;;  %v629_v7 = vshrl.u32 %v19471_v1, 16  ;;  %978 = vmatpush1.bf16.msra.mxu0 %v16364_v19  ;;  %1031 = vmatpush1.bf16.msra.mxu1 %v16365_v20  ;;  %v16372_v27 = vld [vmem:[#allocation2 + $0xac] ss:$28 sps:$4 sm:$0xff]  }
 0x155   : > { %v637_v13 = vrot.slane %v19469_v0, 1  ;;  %v638_v14 = vrot.slane %v19471_v1, 1  ;;  %979 = vmatprep.subr.bf16.mxu0 %v16366_v21  ;;  %1032 = vmatprep.subr.bf16.mxu1 %v16368_v23  ;;  %v16374_v28 = vld [vmem:[#allocation2 + $0xb4] ss:$28 sps:$4 sm:$0xff]   ;;  %v16378_v31 = vld [vmem:[#allocation2 + $0xe4] ss:$28 sps:$4 sm:$0xff]  }
 0x156   : > { %v622_v10 = vrot.slane %v620_v5, 1  ;;  %v627_v11 = vrot.slane %v625_v6, 1  ;;  %v16377_v30 = vld [vmem:[#allocation2 + $0xb0] ss:$28 sps:$4 sm:$0xff]   ;;  %v16382_v33 = vld [vmem:[#allocation2 + $0xe0] ss:$28 sps:$4 sm:$0xff]   ;;  %v704_v6 = vlaneseq }
 0x157   : > { %v639_v26 = vsel %vm636_vm1, %v637_v13, %v638_v14  ;;  %v16380_v32 = vld [vmem:[#allocation2 + $0xec] ss:$28 sps:$4 sm:$0xff]   ;;  %v16384_v35 = vld [vmem:[#allocation2 + $0x11c] ss:$28 sps:$4 sm:$0x1f]   ;;  %vm649_vm4 = vcmask 490496  }
 0x158   : > { %v623_v16 = vor.u32 %v622_v10, %v618_v4  ;;  %v631_v17 = vor.u32 %v629_v7, %v627_v11  ;;  %980 = vmatpush1.bf16.msra.mxu0 %v16370_v24  ;;  %1033 = vmatpush1.bf16.msra.mxu1 %v16371_v25  ;;  %v16383_v34 = vld [vmem:[#allocation2 + $0xe8] ss:$28 sps:$4 sm:$0xff]   ;;  %v16388_v36 = vld [vmem:[#allocation2 + $0x118] ss:$28 sps:$4 sm:$0x1f]   ;;  %vm948_vm5 = vcmask 736256  }
 0x159   : > { %981 = vmatprep.subr.bf16.mxu0 %v16372_v27  ;;  %1034 = vmatprep.subr.bf16.mxu1 %v16374_v28  ;;  %v16386_v37 = vld [vmem:[#allocation2 + $0x124] ss:$28 sps:$4 sm:$0x1f]   ;;  %v955_v39 = vsel %vm953_vm2, %v16388_v36, 0  ;;  %v16392_v40 = vld [vmem:[#allocation2 + $0x14] ss:$28 sps:$4 sm:$0xff]  }
 0x15a   : > { %v628_v22 = vsel %vm616_vm0, %v623_v16, %v627_v11  ;;  %634 = vrot.lane.b32.xlu1 %v631_v17, %s19033_s28  ;;  %v16389_v38 = vld [vmem:[#allocation2 + $0x120] ss:$28 sps:$4 sm:$0x1f]   ;;  %v16393_v42 = vld [vmem:[#allocation2 + $0x18] ss:$28 sps:$4 sm:$0xff]   ;;  %v19509_v7 = vshrl.u32 %v704_v6, 7 }
 0x15b   : > { %632 = vrot.lane.b32.xlu0 %v628_v22, %s19033_s28  ;;  %v961_v41 = vsel %vm953_vm2, %v16389_v38, 0  ;;  %v16390_v44 = vld [vmem:[#allocation2 + $0x10] ss:$28 sps:$4 sm:$0xff]   ;;  %v16394_v51 = vld [vmem:[#allocation2 + $0x48] ss:$28 sps:$4 sm:$0xff]   ;;  %vm1575_vm7 = vcmask 1040384  }
 0x15c   : > { %982 = vmatpush1.bf16.msra.mxu0 %v16376_v29  ;;  %1035 = vmatpush1.bf16.msra.mxu1 %v16377_v30  ;;  %v16396_v45 = vld [vmem:[#allocation2 + $0x4c] ss:$28 sps:$4 sm:$0xff]   ;;  %v16400_v52 = vld [vmem:[#allocation2 + $0x84] ss:$28 sps:$4 sm:$0xff]   ;;  %v16404_v57 = vld [vmem:[#allocation2 + $0xbc] ss:$28 sps:$4 sm:$0xff]  }
 0x15d   : > { %983 = vmatprep.subr.bf16.mxu0 %v16378_v31  ;;  %1036 = vmatprep.subr.bf16.mxu1 %v16380_v32  ;;  %v16397_v46 = vld [vmem:[#allocation2 + $0x50] ss:$28 sps:$4 sm:$0xff]   ;;  %v16401_v53 = vld [vmem:[#allocation2 + $0x88] ss:$28 sps:$4 sm:$0xff]   ;;  %v16398_v54 = vld [vmem:[#allocation2 + $0x80] ss:$28 sps:$4 sm:$0xff]  }
 0x15e   : > { %642 = vrot.lane.b32.xlu1 %v638_v14, %s19034_s17  ;;  %v16405_v58 = vld [vmem:[#allocation2 + $0xc0] ss:$28 sps:$4 sm:$0xff]   ;;  %v16402_v60 = vld [vmem:[#allocation2 + $0xb8] ss:$28 sps:$4 sm:$0xff]   ;;  %v16406_v63 = vld [vmem:[#allocation2 + $0xf0] ss:$28 sps:$4 sm:$0xff]  }
 0x15f   : > { %640 = vrot.lane.b32.xlu0 %v639_v26, %s19034_s17  ;;  %v16408_v61 = vld [vmem:[#allocation2 + $0xf4] ss:$28 sps:$4 sm:$0xff]   ;;  %v16413_v2 = vld [vmem:[#allocation2 + $0x128] ss:$28 sps:$4 sm:$0x1f]   ;;  %v19514_v9 = vsub.s32 0, %v19509_v7 }
 0x160   : > { %984 = vmatpush1.bf16.msra.mxu0 %v16382_v33  ;;  %1037 = vmatpush1.bf16.msra.mxu1 %v16383_v34  ;;  %v16409_v62 = vld [vmem:[#allocation2 + $0xf8] ss:$28 sps:$4 sm:$0xff]   ;;  %v967_v4 = vsel %vm953_vm2, %v16413_v2, 0  ;;  %v19517_v10 = vsub.s32 2, %v19509_v7  ;;  %v19520_v11 = vsub.s32 1, %v19509_v7  ;;  %v19523_v12 = vsub.s32 3, %v19509_v7 }
 0x161   : > { %14179 = vmatprep.subr.msk.bf16.mxu0 %vm953_vm2, %v16384_v35  ;;  %14182 = vmatprep.subr.msk.bf16.mxu1 %vm953_vm2, %v16386_v37  ;;  %v19511_v8 = vld [vmem:[#allocation5] sm:$0xff]  ;;  %v19542_v19 = vsub.s32 4, %v19509_v7  ;;  %v20583_v24 = vsub.s32 6, %v19509_v7  ;;  %v19550_v29 = vsub.s32 5, %v19509_v7  ;;  %s19035_s2 = smov 96   ;;  %s19036_s27 = smov 64  }
 0x162   : > { %v19527_v13 = vrot.slane %v19511_v8, %v19514_v9  ;;  %v19531_v14 = vrot.slane %v19511_v8, %v19517_v10  ;;  %v19535_v15 = vrot.slane %v19511_v8, %v19520_v11  ;;  %v19539_v16 = vrot.slane %v19511_v8, %v19523_v12  ;;  %s19037_s25 = smov 32   ;;  %s594_s14 = sand.u32 1, %s19004_s26  }
 0x163   : > { %s15693_s19 = sshll.u32 %s19132_s29, 4  ;;  %s595_s24 = scalar_lea.vmem [#allocation22], %s594_s14 }
 0x164   : > { %986 = vmatpush1.bf16.msra.mxu0 %v955_v39  ;;  %1039 = vmatpush1.bf16.msra.mxu1 %v961_v41  ;;  %s13933_s16 = sshll.u32 %s595_s24, 4  ;;  %s20650_s4 = sld [smem:[#allocation39_spill]]  ;;  %s20517_s16 = int_to_ptr.vmem [resolvable:$true] %s13933_s16 }
 0x165   : > { %1081 = vmatprep.subr.bf16.mxu0 %v16392_v40  ;;  %15868 = vmatprep.subr.bf16.mxu1 %v16393_v42  ;;  %s13921_s30 = scalar_lea.sflag [#allocation4], %s594_s14  ;;  %s18922_s29 = scalar_lea.vmem %s20517_s16, 16 }
 0x166   : > { %p18923_p1 = scmp.ne.s32.totalorder %s20517_s16, %s18922_s29  ;;  %p20651_p6 = scmp.ne.s32.totalorder %s20592_s18, 0 }
 0x167   : > { %s19040_s23 = smov [#allocation22]  }
 0x168   : > { %p18924_p5 = pnand %p18923_p1, %p20651_p6  ;;  %s18926_s15 = sshll.u32 %s19040_s23, 4  ;;  %s18927_s15 = int_to_ptr.vmem [resolvable:$false] %s18926_s15 }
 0x169   : > { %s18928_s21 = scalar_lea.vmem %s18927_s15, 32  ;;  %p18929_p12 = scmp.lt.s32.totalorder %s20517_s16, %s18927_s15 }
 0x16a   : > { %s20515_s20 = scalar_lea.hbm %s20650_s4, %s15693_s19  ;;  %p18925_p9 = pneg %p18924_p5 }
 0x16b   : > { %p18930_p10 = scmp.lt.s32.totalorder %s18928_s21, %s18922_s29 }
 0x16d   : > { %p18931_p2 = por %p18930_p10, %p18929_p12 }
 0x16f   : > { %p18932_p3 = pnand %p18931_p2, %p18925_p9 }
 0x1cc   : > { %v635_v49 = vpop.permute.xlu1 %634 }
 0x1cd   : > { %v633_v43 = vpop.permute.xlu0 %632  ;;  %v648_v55 = vsel %vm644_vm3, %v19471_v1, %v635_v49  ;;  %v16412_v1 = vld [vmem:[#allocation2 + $0x130] ss:$28 sps:$4 sm:$0x1f]  }
 0x1ce   : > { %v646_v47 = vsel %vm644_vm3, %v19469_v0, %v633_v43  ;;  %v16410_v0 = vld [vmem:[#allocation2 + $0x12c] ss:$28 sps:$4 sm:$0x1f]   ;;  %v973_v5 = vsel %vm953_vm2, %v16412_v1, 0 }
 0x1d0   : > { %v643_v56 = vpop.permute.xlu1 %642 }
 0x1d1   : > { %v641_v48 = vpop.permute.xlu0 %640  ;;  %v653_v59 = vsel %vm649_vm4, %v648_v55, %v643_v56 }
 0x1d2   : > { %v651_v50 = vsel %vm649_vm4, %v646_v47, %v641_v48 }
 0x1d3   : > { %14180 = vmatmul.mubr.msk.bf16.vlgmr.msra.gmra.mrb[0].mxu0 %vm948_vm5, %v651_v50  ;;  %14183 = vmatmul.mubr.msk.bf16.vlgmr.msra.gmra.mrb[0].mxu1 %vm948_vm5, %v651_v50 }
 0x1d4   : > { %1082 = vmatpush1.bf16.msra.mxu0 %v16390_v44  ;;  %15869 = vmatpush3.bf16.msra.mxu1 %v16393_v42 }
 0x1d5   : > { %1083 = vmatprep.subr.bf16.mxu0 %v16396_v45  ;;  %15870 = vmatprep.subr.bf16.mxu1 %v16397_v46 }
 0x1d6   : > { %1017 = vmatprep.mubr.bf16.mxu0 %v20581_v3  ;;  %1070 = vmatprep.mubr.bf16.mxu1 %v20581_v3 }
 0x1d8   : > { %1084 = vmatpush1.bf16.msra.mxu0 %v16394_v51  ;;  %15871 = vmatpush3.bf16.msra.mxu1 %v16397_v46 }
 0x1d9   : > { %1085 = vmatprep.subr.bf16.mxu0 %v16400_v52  ;;  %15872 = vmatprep.subr.bf16.mxu1 %v16401_v53  ;;  %v19560_v52 = vrot.slane %v19511_v8, %v19542_v19 }
 0x1db   : > { %14181 = vmatmul.mubr.msk.bf16.gmra.mrb[4].mxu0 %vm948_vm5, %v653_v59  ;;  %14184 = vmatmul.mubr.msk.bf16.gmra.mrb[4].mxu1 %vm948_vm5, %v653_v59 }
 0x1dc   : > { %1086 = vmatpush1.bf16.msra.mxu0 %v16398_v54  ;;  %15873 = vmatpush3.bf16.msra.mxu1 %v16401_v53 }
 0x1dd   : > { %15880 = vmatprep.mubr.msk.bf16.mxu1 %vm948_vm5, %v651_v50  ;;  %1087 = vmatprep.subr.bf16.mxu0 %v16404_v57 }
 0x1de   : > { %15874 = vmatprep.subr.bf16.mxu1 %v16405_v58  ;;  %1113 = vmatprep.mubr.bf16.mxu0 %v20581_v3 }
 0x1e0   : > { %1088 = vmatpush1.bf16.msra.mxu0 %v16402_v60  ;;  %15875 = vmatpush3.bf16.msra.mxu1 %v16405_v58 }
 0x1e1   : > { %1089 = vmatprep.subr.bf16.mxu0 %v16408_v61  ;;  %15876 = vmatprep.subr.bf16.mxu1 %v16409_v62 }
 0x1e4   : > { %1090 = vmatpush1.bf16.msra.mxu0 %v16406_v63  ;;  %15877 = vmatpush3.bf16.msra.mxu1 %v16409_v62 }
 0x1e5   : > { %14185 = vmatprep.subr.msk.bf16.mxu0 %vm953_vm2, %v16410_v0  ;;  %16072 = vmatprep.subr.msk.bf16.mxu1 %vm953_vm2, %v16412_v1 }
 0x1e8   : > { %1092 = vmatpush1.bf16.msra.mxu0 %v967_v4  ;;  %15879 = vmatpush3.bf16.msra.mxu1 %v973_v5 }
 0x1eb   : > { %14186 = vmatmul.mubr.msk.bf16.vlgmr.msra.gmra.mrb[8].mxu0 %vm948_vm5, %v651_v50  ;;  %15881 = vmatmul.mubr.msk.bf16.vlgmr.msra.gmra.mrb[8].mxu1 %vm948_vm5, %v653_v59 }
 0x1ec   : > { %1123 = vmatprep.mubr.bf16.mxu0 %v20581_v3 }
 0x1f3   : > { %14187 = vmatmul.mubr.msk.bf16.gmra.mrb[12].mxu0 %vm948_vm5, %v653_v59 }
 0x2a6   : > { %v1009_v17 = vpop.f32.mrb[0].mxu0  ;;  %v1062_v18 = vpop.f32.mrb[0].mxu1 }
 0x2a7   : > { %v1010_v20 = vadd.f32 %v1009_v17, %v19527_v13  ;;  %v1063_v21 = vadd.f32 %v1062_v18, %v19531_v14  ;;  %v1011_v22 = vpop.f32.mrb[1].mxu0  ;;  %v1064_v23 = vpop.f32.mrb[1].mxu1 }
 0x2a8   : > { %v1012_v25 = vadd.f32 %v1011_v22, %v19535_v15  ;;  %v1065_v26 = vadd.f32 %v1064_v23, %v19539_v16  ;;  %v1013_v27 = vpop.f32.mrb[2].mxu0  ;;  %v1066_v28 = vpop.f32.mrb[2].mxu1 }
 0x2a9   : > { %vm1183_vm6 = vcmp.ge.f32.partialorder %v1010_v20, 0.0  ;;  %v1211_v30 = vmul.f32 0.01, %v1010_v20  ;;  %vm1185_vm8 = vcmp.ge.f32.partialorder %v1063_v21, 0.0  ;;  %v1213_v31 = vmul.f32 0.01, %v1063_v21 }
 0x2aa   : > { %vm1184_vm9 = vcmp.ge.f32.partialorder %v1012_v25, 0.0  ;;  %v1212_v32 = vmul.f32 0.01, %v1012_v25  ;;  %vm1186_vm10 = vcmp.ge.f32.partialorder %v1065_v26, 0.0  ;;  %v1214_v33 = vmul.f32 0.01, %v1065_v26 }
 0x2ab   : > { %v1239_v34 = vsel %vm1183_vm6, %v1010_v20, %v1211_v30  ;;  %v1241_v35 = vsel %vm1185_vm8, %v1063_v21, %v1213_v31  ;;  %v1014_v36 = vadd.f32 %v1013_v27, %v19527_v13  ;;  %v1067_v37 = vadd.f32 %v1066_v28, %v19531_v14  ;;  %v1015_v38 = vpop.f32.mrb[3].mxu0  ;;  %v1068_v39 = vpop.f32.mrb[3].mxu1 }
 0x2ac   : > { %v1274_v40 = vrot.slane %v1239_v34, 1  ;;  %v1276_v41 = vrot.slane %v1241_v35, 1  ;;  %v1240_v42 = vsel %vm1184_vm9, %v1012_v25, %v1212_v32  ;;  %v1242_v43 = vsel %vm1186_vm10, %v1065_v26, %v1214_v33 }
 0x2ad   : > { %v1275_v44 = vrot.slane %v1240_v42, 1  ;;  %v1277_v45 = vrot.slane %v1242_v43, 1  ;;  %vm1190_vm11 = vcmp.ge.f32.partialorder %v1014_v36, 0.0  ;;  %v1218_v46 = vmul.f32 0.01, %v1014_v36 }
 0x2ae   : > { %v19554_v47 = vmax.f32 %v1239_v34, %v1274_v40  ;;  %v19556_v48 = vmax.f32 %v1241_v35, %v1276_v41  ;;  %v1220_v49 = vmul.f32 0.01, %v1067_v37  ;;  %v1019_v50 = vpop.f32.mrb[4].mxu0  ;;  %v1072_v51 = vpop.f32.mrb[4].mxu1  ;;  %vm1192_vm12 = vcmp.ge.f32.partialorder %v1067_v37, 0.0 }
 0x2af   : > { %v19562_v53 = vmax.f32 %v1240_v42, %v1275_v44  ;;  %v19564_v54 = vmax.f32 %v1242_v43, %v1277_v45  ;;  %v1246_v55 = vsel %vm1190_vm11, %v1014_v36, %v1218_v46  ;;  %v1021_v56 = vpop.f32.mrb[5].mxu0  ;;  %v1074_v57 = vpop.f32.mrb[5].mxu1  ;;  %v1016_v61 = vadd.f32 %v1015_v38, %v19535_v15 }
 0x2b0   : > { %v1386_v58 = vrot.slane %v19554_v47, 1  ;;  %v1023_v62 = vpop.f32.mrb[6].mxu0  ;;  %v1076_v63 = vpop.f32.mrb[6].mxu1  ;;  %v1388_v0 = vrot.slane %v19556_v48, 1  ;;  %v1402_v1 = vrot.slane %v19556_v48, 2  ;;  %v1416_v2 = vrot.slane %v19556_v48, 3 }
 0x2b1   : > { %v1387_v4 = vrot.slane %v19562_v53, 1  ;;  %v19574_v5 = vpop.f32.mrb[7].mxu0  ;;  %v19576_v6 = vpop.f32.mrb[7].mxu1  ;;  %v1389_v20 = vrot.slane %v19564_v54, 1  ;;  %v19584_v21 = vrot.slane %v19511_v8, %v20583_v24  ;;  %v1302_v25 = vrot.slane %v1246_v55, 1 }
 0x2b2   : > { %v19590_v26 = vrot.slane %v19511_v8, %v19550_v29  ;;  %v19594_v27 = vsel %vm1575_vm7, %v19554_v47, %v1386_v58  ;;  %v1248_v28 = vsel %vm1192_vm12, %v1067_v37, %v1220_v49  ;;  %vm1191_vm13 = vcmp.ge.f32.partialorder %v1016_v61, 0.0 }
 0x2b3   : > { %v1219_v30 = vmul.f32 0.01, %v1016_v61  ;;  %v19597_v31 = vmax.f32 %v1246_v55, %v1302_v25  ;;  %v1304_v32 = vrot.slane %v1248_v28, 1  ;;  %v1069_v33 = vadd.f32 %v1068_v39, %v19539_v16 }
 0x2b4   : > { %v1020_v34 = vadd.f32 %v1019_v50, %v19527_v13  ;;  %v1073_v36 = vadd.f32 %v1072_v51, %v19531_v14  ;;  %v1022_v8 = vadd.f32 %v1021_v56, %v19535_v15  ;;  %v1075_v38 = vadd.f32 %v1074_v57, %v19539_v16 }
 0x2b5   : > { %v1247_v35 = vsel %vm1191_vm13, %v1016_v61, %v1219_v30  ;;  %v19605_v41 = vmax.f32 %v1248_v28, %v1304_v32  ;;  %vm1193_vm14 = vcmp.ge.f32.partialorder %v1069_v33, 0.0  ;;  %v1221_v42 = vmul.f32 0.01, %v1069_v33 }
 0x2b6   : > { %v1303_v37 = vrot.slane %v1247_v35, 1  ;;  %vm1197_vm15 = vcmp.ge.f32.partialorder %v1020_v34, 0.0  ;;  %v1225_v43 = vmul.f32 0.01, %v1020_v34  ;;  %vm1199_vm3 = vcmp.ge.f32.partialorder %v1073_v36, 0.0 }
 0x2b7   : > { %v19609_v39 = vsel %vm1575_vm7, %v19556_v48, %v1388_v0  ;;  %v1437_v44 = vrot.slane %v19605_v41, 4  ;;  %v1227_v45 = vmul.f32 0.01, %v1073_v36  ;;  %vm1198_vm4 = vcmp.ge.f32.partialorder %v1022_v8, 0.0 }
 0x2b8   : > { %v19612_v46 = vmax.f32 %v1247_v35, %v1303_v37  ;;  %v1249_v49 = vsel %vm1193_vm14, %v1069_v33, %v1221_v42  ;;  %v1253_v50 = vsel %vm1197_vm15, %v1020_v34, %v1225_v43  ;;  %v1226_v51 = vmul.f32 0.01, %v1022_v8 }
 0x2b9   : > { %v1305_v55 = vrot.slane %v1249_v49, 1  ;;  %v1330_v56 = vrot.slane %v1253_v50, 1  ;;  %v1255_v57 = vsel %vm1199_vm3, %v1073_v36, %v1227_v45  ;;  %vm1200_vm5 = vcmp.ge.f32.partialorder %v1075_v38, 0.0 }
 0x2ba   : > { %v1332_v58 = vrot.slane %v1255_v57, 1  ;;  %v1254_v61 = vsel %vm1198_vm4, %v1022_v8, %v1226_v51  ;;  %v1228_v25 = vmul.f32 0.01, %v1075_v38  ;;  %v1024_v28 = vadd.f32 %v1023_v62, %v19527_v13 }
 0x2bb   : > { %v19615_v0 = vmax.f32 %v1249_v49, %v1305_v55  ;;  %v19617_v30 = vmax.f32 %v1253_v50, %v1330_v56  ;;  %v1331_v32 = vrot.slane %v1254_v61, 1  ;;  %v1077_v35 = vadd.f32 %v1076_v63, %v19531_v14 }
 0x2bc   : > { %v19620_v37 = vmax.f32 %v1255_v57, %v1332_v58  ;;  %v1256_v33 = vsel %vm1200_vm5, %v1075_v38, %v1228_v25  ;;  %vm1204_vm6 = vcmp.ge.f32.partialorder %v1024_v28, 0.0  ;;  %v1232_v34 = vmul.f32 0.01, %v1024_v28 }
 0x2bd   : > { %v19625_v62 = vmax.f32 %v1254_v61, %v1331_v32  ;;  %v1333_v63 = vrot.slane %v1256_v33, 1  ;;  %vm1206_vm8 = vcmp.ge.f32.partialorder %v1077_v35, 0.0  ;;  %v1234_v3 = vmul.f32 0.01, %v1077_v35 }
 0x2be   : > { %v1115_v42 = vpop.f32.mrb[8].mxu0  ;;  %v15882_v36 = vpop.f32.mrb[8].mxu1  ;;  %v1500_v14 = vrot.slane %v19620_v37, 1  ;;  %v1260_v38 = vsel %vm1204_vm6, %v1024_v28, %v1232_v34  ;;  %v1514_v56 = vrot.slane %v19620_v37, 2  ;;  %v1026_v24 = vadd.f32 %v19574_v5, %v19535_v15 }
 0x2bf   : > { %v1117_v45 = vpop.f32.mrb[9].mxu0  ;;  %v1168_v49 = vpop.f32.mrb[9].mxu1  ;;  %v1358_v58 = vrot.slane %v1260_v38, 1  ;;  %v19637_v32 = vmax.f32 %v1256_v33, %v1333_v63  ;;  %v1079_v28 = vadd.f32 %v19576_v6, %v19539_v16  ;;  %v1116_v57 = vadd.f32 %v1115_v42, %v19560_v52 }
 0x2c0   : > { %v1119_v51 = vpop.f32.mrb[10].mxu0  ;;  %v19629_v55 = vpop.f32.mrb[10].mxu1  ;;  %v1177_v18 = vadd.f32 %v15882_v36, %v19584_v21  ;;  %v1262_v8 = vsel %vm1206_vm8, %v1077_v35, %v1234_v3  ;;  %vm1205_vm9 = vcmp.ge.f32.partialorder %v1026_v24, 0.0  ;;  %v1118_v33 = vadd.f32 %v1117_v45, %v19590_v26 }
 0x2c1   : > { %v19633_v25 = vpop.f32.mrb[11].mxu0  ;;  %v19635_v61 = vpop.f32.mrb[11].mxu1  ;;  %v19644_v43 = vmax.f32 %v1260_v38, %v1358_v58  ;;  %v1360_v5 = vrot.slane %v1262_v8, 1  ;;  %v1233_v16 = vmul.f32 0.01, %v1026_v24  ;;  %vm1207_vm10 = vcmp.ge.f32.partialorder %v1079_v28, 0.0 }
 0x2c2   : > { %v1235_v6 = vmul.f32 0.01, %v1079_v28  ;;  %vm1187_vm11 = vcmp.ge.f32.partialorder %v1116_v57, 0.0  ;;  %v1215_v38 = vmul.f32 0.01, %v1116_v57  ;;  %v19656_v42 = vsel %vm1575_vm7, %v19562_v53, %v1387_v4 }
 0x2c3   : > { %v1261_v3 = vsel %vm1205_vm9, %v1026_v24, %v1233_v16  ;;  %vm1203_vm12 = vcmp.ge.f32.partialorder %v1177_v18, 0.0  ;;  %v1231_v35 = vmul.f32 0.01, %v1177_v18  ;;  %v19660_v45 = vmax.f32 %v1262_v8, %v1360_v5 }
 0x2c4   : > { %v1359_v58 = vrot.slane %v1261_v3, 1  ;;  %v1263_v34 = vsel %vm1207_vm10, %v1079_v28, %v1235_v6  ;;  %v1243_v63 = vsel %vm1187_vm11, %v1116_v57, %v1215_v38  ;;  %vm1188_vm13 = vcmp.ge.f32.partialorder %v1118_v33, 0.0 }
 0x2c5   : > { %v1361_v22 = vrot.slane %v1263_v34, 1  ;;  %v1278_v15 = vrot.slane %v1243_v63, 1  ;;  %v1259_v24 = vsel %vm1203_vm12, %v1177_v18, %v1231_v35  ;;  %v1216_v16 = vmul.f32 0.01, %v1118_v33 }
 0x2c6   : > { %v19658_v36 = vpop.f32.mrb[12].mxu0  ;;  %v19667_v4 = vmax.f32 %v1261_v3, %v1359_v58  ;;  %v1169_v50 = vadd.f32 %v1168_v49, %v19584_v21  ;;  %v1336_v28 = vrot.slane %v1259_v24, 1  ;;  %v1120_v6 = vadd.f32 %v1119_v51, %v19560_v52 }
 0x2c7   : > { %v19662_v17 = vpop.f32.mrb[13].mxu0  ;;  %v19672_v5 = vmax.f32 %v1263_v34, %v1361_v22  ;;  %v19674_v57 = vmax.f32 %v1243_v63, %v1278_v15  ;;  %v1549_v38 = vrot.slane %v19660_v45, 4  ;;  %v1563_v23 = vrot.slane %v19660_v45, 5 }
 0x2c8   : > { %v19665_v40 = vpop.f32.mrb[14].mxu0  ;;  %v1244_v58 = vsel %vm1188_vm13, %v1118_v33, %v1216_v16  ;;  %vm1189_vm14 = vcmp.ge.f32.partialorder %v1169_v50, 0.0  ;;  %v19684_v34 = vmax.f32 %v1259_v24, %v1336_v28  ;;  %v1217_v51 = vmul.f32 0.01, %v1169_v50 }
 0x2c9   : > { %v19670_v8 = vpop.f32.mrb[15].mxu0  ;;  %v1390_v22 = vrot.slane %v19674_v57, 1  ;;  %v1279_v63 = vrot.slane %v1244_v58, 1  ;;  %vm1583_vm15 = vcmask 1041408   ;;  %v19690_v15 = vsel %vm1575_vm7, %v19564_v54, %v1389_v20 }
 0x2ca   : > { %vm1194_vm3 = vcmp.ge.f32.partialorder %v1120_v6, 0.0  ;;  %v1222_v33 = vmul.f32 0.01, %v1120_v6  ;;  %v1180_v16 = vadd.f32 %v19629_v55, %v19584_v21  ;;  %vm1591_vm4 = vcmask 1042432  }
 0x2cb   : > { %v19696_v28 = vmax.f32 %v1244_v58, %v1279_v63  ;;  %v1245_v3 = vsel %vm1189_vm14, %v1169_v50, %v1217_v51  ;;  %vm1599_vm5 = vcmask 1043456   ;;  %v19700_v20 = vsel %vm1575_vm7, %v19674_v57, %v1390_v22 }
 0x2cc   : > { %v1280_v35 = vrot.slane %v1245_v3, 1  ;;  %v1250_v49 = vsel %vm1194_vm3, %v1120_v6, %v1222_v33  ;;  %vm1210_vm6 = vcmp.ge.f32.partialorder %v1180_v16, 0.0  ;;  %v1238_v60 = vmul.f32 0.01, %v1180_v16 }
 0x2cd   : > { %v1391_v55 = vrot.slane %v19696_v28, 1  ;;  %v1306_v59 = vrot.slane %v1250_v49, 1  ;;  %vm1614_vm8 = vcmask 1045504   ;;  %v1122_v50 = vadd.f32 %v19633_v25, %v19590_v26 }
 0x2ce   : > { %v19704_v18 = vmax.f32 %v1245_v3, %v1280_v35  ;;  %v1266_v58 = vsel %vm1210_vm6, %v1180_v16, %v1238_v60  ;;  %v1172_v6 = vadd.f32 %v19635_v61, %v19584_v21  ;;  %v1451_v60 = vrot.slane %v19605_v41, 5 }
 0x2cf   : > { %v19712_v51 = vmax.f32 %v1250_v49, %v1306_v59  ;;  %v1364_v33 = vrot.slane %v1266_v58, 1  ;;  %vm1195_vm9 = vcmp.ge.f32.partialorder %v1122_v50, 0.0  ;;  %v19719_v25 = vsel %vm1575_vm7, %v19696_v28, %v1391_v55 }
 0x2d0   : > { %v1392_v24 = vrot.slane %v19704_v18, 1  ;;  %v1223_v61 = vmul.f32 0.01, %v1122_v50  ;;  %vm1196_vm10 = vcmp.ge.f32.partialorder %v1172_v6, 0.0  ;;  %v1224_v35 = vmul.f32 0.01, %v1172_v6 }
 0x2d1   : > { %v1439_v59 = vrot.slane %v19712_v51, 4  ;;  %v19724_v49 = vmax.f32 %v1266_v58, %v1364_v33  ;;  %v1465_v13 = vrot.slane %v19605_v41, 6  ;;  %v1528_v55 = vrot.slane %v19620_v37, 3 }
 0x2d2   : > { %v19728_v16 = vsel %vm1575_vm7, %v19704_v18, %v1392_v24  ;;  %v1251_v63 = vsel %vm1195_vm9, %v1122_v50, %v1223_v61  ;;  %v1252_v21 = vsel %vm1196_vm10, %v1172_v6, %v1224_v35  ;;  %v1586_v3 = vsel %vm1583_vm15, %v19609_v39, %v1402_v1 }
 0x2d3   : > { %v1307_v22 = vrot.slane %v1251_v63, 1  ;;  %v1632_v58 = vsel %vm1575_vm7, %v19620_v37, %v1500_v14  ;;  %v1308_v33 = vrot.slane %v1252_v21, 1  ;;  %v1479_v24 = vrot.slane %v19605_v41, 7 }
 0x2d4   : > { %v1594_v50 = vsel %vm1591_vm4, %v1586_v3, %v1416_v2  ;;  %v1639_v6 = vsel %vm1583_vm15, %v1632_v58, %v1514_v56  ;;  %v1553_v61 = vrot.slane %v19724_v49, 4  ;;  %v1449_v14 = vrot.slane %v19597_v31, 5 }
 0x2d5   : > { %v1602_v1 = vsel %vm1599_vm5, %v1594_v50, %v1437_v44  ;;  %v1646_v39 = vsel %vm1591_vm4, %v1639_v6, %v1528_v55  ;;  %v19753_v35 = vmax.f32 %v1251_v63, %v1307_v22  ;;  %v1463_v37 = vrot.slane %v19597_v31, 6 }
 0x2d6   : > { %v1609_v48 = vsel %vm953_vm2, %v1602_v1, %v1451_v60  ;;  %v1653_v2 = vsel %vm1599_vm5, %v1646_v39, %v1549_v38  ;;  %v19760_v56 = vmax.f32 %v1252_v21, %v1308_v33  ;;  %v1477_v63 = vrot.slane %v19597_v31, 7 }
 0x2d7   : > { %v1617_v41 = vsel %vm1614_vm8, %v1609_v48, %v1465_v13  ;;  %v19766_v44 = vsel %vm953_vm2, %v1653_v2, %v1563_v23  ;;  %v1526_v60 = vrot.slane %v19617_v30, 3  ;;  %v20615_v38 = vrot.slane %v19554_v47, 2 }
 0x2d8   : > { %v19770_v22 = vsel %vm636_vm1, %v1617_v41, %v1479_v24  ;;  %v20616_v3 = vrot.slane %v19617_v30, 1  ;;  %v20617_v45 = vrot.slane %v19554_v47, 3  ;;  %v20618_v58 = vrot.slane %v19617_v30, 2 }
 0x2d9   : > { %v1584_v21 = vsel %vm1583_vm15, %v19594_v27, %v20615_v38  ;;  %v16252_v23 = vpack.i.bf16 %v19766_v44, %v19770_v22  ;;  %v1452_v24 = vrot.slane %v19615_v0, 5  ;;  %v20619_v27 = vrot.slane %v19597_v31, 4 }
 0x2da   : > { %v1630_v13 = vsel %vm1575_vm7, %v19617_v30, %v20616_v3  ;;  %v1592_v55 = vsel %vm1591_vm4, %v1584_v21, %v20617_v45  ;;  %v1466_v1 = vrot.slane %v19615_v0, 6  ;;  %v1480_v39 = vrot.slane %v19615_v0, 7 }
 0x2db   : > { %v1637_v33 = vsel %vm1583_vm15, %v1630_v13, %v20618_v58  ;;  %v1600_v50 = vsel %vm1599_vm5, %v1592_v55, %v20619_v27  ;;  %16253 = vrot.lane.b32.xlu1 %v16252_v23, %s19035_s2  ;;  %v20620_v30 = vrot.slane %v19644_v43, 4  ;;  %v1529_v2 = vrot.slane %v19637_v32, 3 }
 0x2dc   : > { %v1644_v6 = vsel %vm1591_vm4, %v1637_v33, %v1526_v60  ;;  %v1607_v47 = vsel %vm953_vm2, %v1600_v50, %v1449_v14  ;;  %v20621_v31 = vrot.slane %v19564_v54, 2  ;;  %v20622_v38 = vrot.slane %v19644_v43, 5 }
 0x2dd   : > { %v1651_v48 = vsel %vm1599_vm5, %v1644_v6, %v20620_v30  ;;  %v1615_v60 = vsel %vm1614_vm8, %v1607_v47, %v1463_v37  ;;  %v20623_v14 = vrot.slane %v19564_v54, 3  ;;  %v20624_v13 = vrot.slane %v19637_v32, 1 }
 0x2de   : > { %v1587_v41 = vsel %vm1583_vm15, %v19690_v15, %v20621_v31  ;;  %v19810_v21 = vsel %vm953_vm2, %v1651_v48, %v20622_v38  ;;  %v19820_v45 = vsel %vm636_vm1, %v1615_v60, %v1477_v63  ;;  %v20625_v15 = vrot.slane %v19615_v0, 4 }
 0x2df   : > { %v1595_v3 = vsel %vm1591_vm4, %v1587_v41, %v20623_v14  ;;  %v1633_v23 = vsel %vm1575_vm7, %v19637_v32, %v20624_v13  ;;  %v20626_v43 = vrot.slane %v19637_v32, 2  ;;  %v1126_v54 = vadd.f32 %v19658_v36, %v19560_v52 }
 0x2e0   : > { %v1603_v37 = vsel %vm1599_vm5, %v1595_v3, %v20625_v15  ;;  %v16247_v58 = vpack.i.bf16 %v19810_v21, %v19820_v45  ;;  %v1450_v63 = vrot.slane %v19612_v46, 5  ;;  %v20627_v50 = vrot.slane %v19672_v5, 4 }
 0x2e1   : > { %v1640_v55 = vsel %vm1583_vm15, %v1633_v23, %v20626_v43  ;;  %v1610_v33 = vsel %vm953_vm2, %v1603_v37, %v1452_v24  ;;  %vm1201_vm11 = vcmp.ge.f32.partialorder %v1126_v54, 0.0  ;;  %v1229_v6 = vmul.f32 0.01, %v1126_v54 }
 0x2e2   : > { %v1647_v27 = vsel %vm1591_vm4, %v1640_v55, %v1529_v2  ;;  %v1618_v0 = vsel %vm1614_vm8, %v1610_v33, %v1466_v1  ;;  %16248 = vrot.lane.b32.xlu0 %v16247_v58, %s19035_s2  ;;  %v20628_v47 = vrot.slane %v19672_v5, 5  ;;  %v1464_v30 = vrot.slane %v19612_v46, 6 }
 0x2e3   : > { %v1654_v32 = vsel %vm1599_vm5, %v1647_v27, %v20627_v50  ;;  %v19841_v36 = vsel %vm636_vm1, %v1618_v0, %v1480_v39  ;;  %v1478_v1 = vrot.slane %v19612_v46, 7  ;;  %v1257_v2 = vsel %vm1201_vm11, %v1126_v54, %v1229_v6 }
 0x2e4   : > { %v19846_v24 = vsel %vm953_vm2, %v1654_v32, %v20628_v47  ;;  %v1527_v31 = vrot.slane %v19625_v62, 3  ;;  %v20629_v41 = vrot.slane %v19562_v53, 2  ;;  %v1334_v60 = vrot.slane %v1257_v2, 1 }
 0x2e5   : > { %v16262_v48 = vpack.i.bf16 %v19846_v24, %v19841_v36  ;;  %v20630_v5 = vrot.slane %v19562_v53, 3  ;;  %v20631_v14 = vrot.slane %v19625_v62, 1  ;;  %v1128_v13 = vadd.f32 %v19662_v17, %v19590_v26 }
 0x2e6   : > { %v1585_v39 = vsel %vm1583_vm15, %v19656_v42, %v20629_v41  ;;  %v20632_v23 = vrot.slane %v19612_v46, 4  ;;  %v20633_v42 = vrot.slane %v19625_v62, 2  ;;  %v1130_v37 = vadd.f32 %v19665_v40, %v19560_v52 }
 0x2e7   : > { %v1593_v38 = vsel %vm1591_vm4, %v1585_v39, %v20630_v5  ;;  %v1631_v3 = vsel %vm1575_vm7, %v19625_v62, %v20631_v14  ;;  %16263 = vrot.lane.b32.xlu1 %v16262_v48, %s19035_s2  ;;  %v1132_v43 = vadd.f32 %v19670_v8, %v19590_v26  ;;  %v1348_v55 = vmax.f32 %v1257_v2, %v1334_v60 }
 0x2e8   : > { %v1601_v15 = vsel %vm1599_vm5, %v1593_v38, %v20632_v23  ;;  %v1638_v53 = vsel %vm1583_vm15, %v1631_v3, %v20633_v42  ;;  %vm1202_vm12 = vcmp.ge.f32.partialorder %v1128_v13, 0.0  ;;  %v1440_v46 = vrot.slane %v19753_v35, 4 }
 0x2e9   : > { %v1608_v54 = vsel %vm953_vm2, %v1601_v15, %v1450_v63  ;;  %v1645_v17 = vsel %vm1591_vm4, %v1638_v53, %v1527_v31  ;;  %v20634_v62 = vrot.slane %v19667_v4, 4  ;;  %v1230_v27 = vmul.f32 0.01, %v1128_v13 }
 0x2ea   : > { %v1616_v58 = vsel %vm1614_vm8, %v1608_v54, %v1464_v30  ;;  %v1502_v0 = vrot.slane %v1348_v55, 1  ;;  %v20635_v26 = vrot.slane %v19667_v4, 5  ;;  %vm1208_vm13 = vcmp.ge.f32.partialorder %v1130_v37, 0.0 }
 0x2eb   : > { %v1652_v33 = vsel %vm1599_vm5, %v1645_v17, %v20634_v62  ;;  %v19885_v52 = vsel %vm636_vm1, %v1616_v58, %v1478_v1  ;;  %v1258_v63 = vsel %vm1202_vm12, %v1128_v13, %v1230_v27  ;;  %v1236_v50 = vmul.f32 0.01, %v1130_v37 }
 0x2ec   : > { %v19890_v40 = vsel %vm953_vm2, %v1652_v33, %v20635_v26  ;;  %vm1209_vm14 = vcmp.ge.f32.partialorder %v1132_v43, 0.0  ;;  %v1441_v32 = vrot.slane %v19760_v56, 4  ;;  %v1516_v6 = vrot.slane %v1348_v55, 2 }
 0x2ed   : > { %v16257_v8 = vpack.i.bf16 %v19890_v40, %v19885_v52  ;;  %v1335_v47 = vrot.slane %v1258_v63, 1  ;;  %v1237_v30 = vmul.f32 0.01, %v1132_v43  ;;  %v1264_v1 = vsel %vm1208_vm13, %v1130_v37, %v1236_v50 }
 0x2ee   : > { %v1453_v4 = vrot.slane %v19712_v51, 5  ;;  %v1467_v48 = vrot.slane %v19712_v51, 6  ;;  %v20636_v2 = vrot.slane %v19674_v57, 2  ;;  %v1362_v39 = vrot.slane %v1264_v1, 1 }
 0x2ef   : > { %16258 = vrot.lane.b32.xlu0 %v16257_v8, %s19035_s2  ;;  %v1349_v41 = vmax.f32 %v1258_v63, %v1335_v47  ;;  %v1265_v60 = vsel %vm1209_vm14, %v1132_v43, %v1237_v30  ;;  %v20637_v5 = vrot.slane %v19674_v57, 3  ;;  %v1481_v3 = vrot.slane %v19712_v51, 7 }
 0x2f0   : > { %v1588_v31 = vsel %vm1583_vm15, %v19700_v20, %v20636_v2  ;;  %v1363_v14 = vrot.slane %v1265_v60, 1  ;;  %v1634_v23 = vsel %vm1575_vm7, %v1348_v55, %v1502_v0  ;;  %v1376_v42 = vmax.f32 %v1264_v1, %v1362_v39 }
 0x2f1   : > { %v1596_v38 = vsel %vm1591_vm4, %v1588_v31, %v20637_v5  ;;  %v1503_v15 = vrot.slane %v1349_v41, 1  ;;  %v1530_v53 = vrot.slane %v1348_v55, 3  ;;  %v1517_v37 = vrot.slane %v1349_v41, 2 }
 0x2f2   : > { %v1604_v13 = vsel %vm1599_vm5, %v1596_v38, %v1439_v59  ;;  %v1377_v43 = vmax.f32 %v1265_v60, %v1363_v14  ;;  %v1641_v54 = vsel %vm1583_vm15, %v1634_v23, %v1516_v6  ;;  %v1551_v17 = vrot.slane %v1376_v42, 4 }
 0x2f3   : > { %v1611_v20 = vsel %vm953_vm2, %v1604_v13, %v1453_v4  ;;  %v1648_v51 = vsel %vm1591_vm4, %v1641_v54, %v1530_v53  ;;  %v1454_v59 = vrot.slane %v19753_v35, 5  ;;  %v1565_v62 = vrot.slane %v1376_v42, 5 }
 0x2f4   : > { %v1619_v57 = vsel %vm1614_vm8, %v1611_v20, %v1467_v48  ;;  %v1552_v33 = vrot.slane %v1377_v43, 4  ;;  %v1566_v27 = vrot.slane %v1377_v43, 5  ;;  %v1468_v55 = vrot.slane %v19753_v35, 6 }
 0x2f5   : > { %v19914_v58 = vsel %vm636_vm1, %v1619_v57, %v1481_v3  ;;  %v1655_v0 = vsel %vm1599_vm5, %v1648_v51, %v1551_v17  ;;  %v1531_v26 = vrot.slane %v1349_v41, 3  ;;  %v20638_v8 = vrot.slane %v19696_v28, 2 }
 0x2f6   : > { %v1635_v50 = vsel %vm1575_vm7, %v1349_v41, %v1503_v15  ;;  %v19926_v6 = vsel %vm953_vm2, %v1655_v0, %v1565_v62  ;;  %v1482_v47 = vrot.slane %v19753_v35, 7  ;;  %v20639_v30 = vrot.slane %v19696_v28, 3 }
 0x2f7   : > { %v1589_v63 = vsel %vm1583_vm15, %v19719_v25, %v20638_v8  ;;  %v1642_v4 = vsel %vm1583_vm15, %v1635_v50, %v1517_v37  ;;  %v16267_v48 = vpack.i.bf16 %v19926_v6, %v19914_v58  ;;  %v1455_v31 = vrot.slane %v19760_v56, 5 }
 0x2f8   : > { %v1597_v1 = vsel %vm1591_vm4, %v1589_v63, %v20639_v30  ;;  %v1649_v25 = vsel %vm1591_vm4, %v1642_v4, %v1531_v26  ;;  %v1532_v35 = vrot.slane %v19684_v34, 3  ;;  %v20640_v28 = vrot.slane %v19704_v18, 2 }
 0x2f9   : > { %v1605_v2 = vsel %vm1599_vm5, %v1597_v1, %v1440_v46  ;;  %v1656_v39 = vsel %vm1599_vm5, %v1649_v25, %v1552_v33  ;;  %16268 = vrot.lane.b32.xlu0 %v16267_v48, %s19035_s2  ;;  %v20641_v38 = vrot.slane %v19704_v18, 3  ;;  %v20642_v3 = vrot.slane %v19684_v34, 1  ;;  %v16417_v25 = vld [vmem:[#allocation7 + $0x8] ss:$28 sps:$4 sm:$0xff]  }
 0x2fa   : > { %v1612_v41 = vsel %vm953_vm2, %v1605_v2, %v1454_v59  ;;  %v1590_v60 = vsel %vm1583_vm15, %v19728_v16, %v20640_v28  ;;  %v19948_v46 = vsel %vm953_vm2, %v1656_v39, %v1566_v27  ;;  %v1469_v16 = vrot.slane %v19760_v56, 6  ;;  %v16416_v2 = vld [vmem:[#allocation7 + $0x4] ss:$28 sps:$4 sm:$0xff]  }
 0x2fb   : > { %v1620_v5 = vsel %vm1614_vm8, %v1612_v41, %v1468_v55  ;;  %v1598_v14 = vsel %vm1591_vm4, %v1590_v60, %v20641_v38  ;;  %v1636_v13 = vsel %vm1575_vm7, %v19684_v34, %v20642_v3  ;;  %v20643_v42 = vrot.slane %v19684_v34, 2  ;;  %v16422_v41 = vld [vmem:[#allocation7 + $0x3c] ss:$28 sps:$4 sm:$0xff]   ;;  %6205 = vmatprep.subr.bf16.mxu0 %v16416_v2  ;;  %v16428_v3 = vld [vmem:[#allocation7 + $0x74] ss:$28 sps:$4 sm:$0xff]  }
 0x2fc   : > { %v19958_v23 = vsel %vm636_vm1, %v1620_v5, %v1482_v47  ;;  %v1606_v15 = vsel %vm1599_vm5, %v1598_v14, %v1441_v32  ;;  %v1567_v18 = vrot.slane %v19724_v49, 5  ;;  %v1483_v20 = vrot.slane %v19760_v56, 7  ;;  %v16420_v60 = vld [vmem:[#allocation7 + $0x38] ss:$28 sps:$4 sm:$0xff]   ;;  %v16423_v14 = vld [vmem:[#allocation7 + $0x40] ss:$28 sps:$4 sm:$0xff]  }
 0x2fd   : > { %v1643_v53 = vsel %vm1583_vm15, %v1636_v13, %v20643_v42  ;;  %v1613_v37 = vsel %vm953_vm2, %v1606_v15, %v1455_v31  ;;  %v16431_v13 = vld [vmem:[#allocation7 + $0x7c] ss:$28 sps:$4 sm:$0xff]   ;;  %v16426_v15 = vld [vmem:[#allocation7 + $0x70] ss:$28 sps:$4 sm:$0xff]   ;;  %vm1812_vm3 = vcmask 523264   ;;  %vm1815_vm6 = vcmask 785408  }
 0x2fe   : > { %v1650_v43 = vsel %vm1591_vm4, %v1643_v53, %v1532_v35  ;;  %v1621_v57 = vsel %vm1614_vm8, %v1613_v37, %v1469_v16  ;;  %v16425_v35 = vld [vmem:[#allocation7 + $0x44] ss:$28 sps:$4 sm:$0xff]   ;;  %v16434_v42 = vld [vmem:[#allocation7 + $0xac] ss:$28 sps:$4 sm:$0xff]   ;;  %v16477_v2 = vld [vmem:[#allocation7 + $0x238] ss:$28 sps:$4 sm:$0xff]  }
 0x2ff   : > { %v1657_v54 = vsel %vm1599_vm5, %v1650_v43, %v1553_v61  ;;  %v19974_v32 = vsel %vm636_vm1, %v1621_v57, %v1483_v20  ;;  %v16432_v53 = vld [vmem:[#allocation7 + $0xa8] ss:$28 sps:$4 sm:$0xff]   ;;  %v16438_v43 = vld [vmem:[#allocation7 + $0xe0] ss:$28 sps:$4 sm:$0xff]   ;;  %vm1809_vm1 = vcmask 261120   ;;  %vm1894_vm10 = vcmask 1047552  }
 0x300   : > { %v19977_v34 = vsel %vm953_vm2, %v1657_v54, %v1567_v18  ;;  %v16435_v18 = vld [vmem:[#allocation7 + $0xb0] ss:$28 sps:$4 sm:$0xff]   ;;  %v16440_v20 = vld [vmem:[#allocation7 + $0xe4] ss:$28 sps:$4 sm:$0xff]   ;;  %v16446_v54 = vld [vmem:[#allocation7 + $0x11c] ss:$28 sps:$4 sm:$0xff]  }
 0x301   : > { %v16307_v28 = vpack.i.bf16 %v19977_v34, %v19974_v32  ;;  %v16443_v37 = vld [vmem:[#allocation7 + $0xec] ss:$28 sps:$4 sm:$0xff]   ;;  %vm1888_vm9 = vsmask.f32 256  ;;  %vm20065_vm12 = vmand %vm1894_vm10, %vm616_vm0 }
 0x302   : > { %v16441_v57 = vld [vmem:[#allocation7 + $0xe8] ss:$28 sps:$4 sm:$0xff]   ;;  %vm20060_vm11 = vmand %vm1575_vm7, %vm1888_vm9 }
 0x34d   : > { %v16254_v17 = vpop.permute.xlu1 %16253 }
 0x34e   : > { %v16256_v51 = vunpack.i.h.bf16 %v16254_v17  ;;  %v16255_v59 = vunpack.i.l.bf16 %v16254_v17  ;;  %v16449_v17 = vld [vmem:[#allocation7 + $0x124] ss:$28 sps:$4 sm:$0xff]  }
 0x350   : > { %v19980_v56 = vmax.f32 %v19766_v44, %v16256_v51  ;;  %v19983_v62 = vmax.f32 %v19770_v22, %v16255_v59  ;;  %v16444_v51 = vld [vmem:[#allocation7 + $0x118] ss:$28 sps:$4 sm:$0xff]   ;;  %v16447_v59 = vld [vmem:[#allocation7 + $0x120] ss:$28 sps:$4 sm:$0xff]  }
 0x352   : > { %v16277_v49 = vpack.i.bf16 %v19980_v56, %v19983_v62 }
 0x354   : > { %v16249_v33 = vpop.permute.xlu0 %16248  ;;  %16278 = vrot.lane.b32.xlu1 %v16277_v49, %s19035_s2  ;;  %v16455_v49 = vld [vmem:[#allocation7 + $0x15c] ss:$28 sps:$4 sm:$0xff]  }
 0x355   : > { %v16251_v61 = vunpack.i.h.bf16 %v16249_v33  ;;  %v16250_v27 = vunpack.i.l.bf16 %v16249_v33  ;;  %v16452_v33 = vld [vmem:[#allocation7 + $0x154] ss:$28 sps:$4 sm:$0xff]  }
 0x357   : > { %v19989_v55 = vmax.f32 %v19810_v21, %v16251_v61  ;;  %v19992_v0 = vmax.f32 %v19820_v45, %v16250_v27  ;;  %v16450_v61 = vld [vmem:[#allocation7 + $0x150] ss:$28 sps:$4 sm:$0xff]   ;;  %v16453_v27 = vld [vmem:[#allocation7 + $0x158] ss:$28 sps:$4 sm:$0xff]  }
 0x359   : > { %v16264_v26 = vpop.permute.xlu1 %16263  ;;  %v16272_v22 = vpack.i.bf16 %v19989_v55, %v19992_v0 }
 0x35a   : > { %v16266_v44 = vunpack.i.h.bf16 %v16264_v26  ;;  %v16265_v8 = vunpack.i.l.bf16 %v16264_v26  ;;  %v16458_v26 = vld [vmem:[#allocation7 + $0x18c] ss:$28 sps:$4 sm:$0xff]  }
 0x35b   : > { %16273 = vrot.lane.b32.xlu0 %v16272_v22, %s19035_s2  ;;  %v16459_v22 = vld [vmem:[#allocation7 + $0x190] ss:$28 sps:$4 sm:$0xff]  }
 0x35c   : > { %v1704_v63 = vmax.f32 %v19846_v24, %v16266_v44  ;;  %v1703_v50 = vmax.f32 %v19841_v36, %v16265_v8  ;;  %v16302_v36 = vpack.i.bf16 %v19948_v46, %v19958_v23  ;;  %v16414_v24 = vld [vmem:[#allocation7] ss:$28 sps:$4 sm:$0xff]   ;;  %v16461_v44 = vld [vmem:[#allocation7 + $0x194] ss:$28 sps:$4 sm:$0xff]   ;;  %v16456_v8 = vld [vmem:[#allocation7 + $0x188] ss:$28 sps:$4 sm:$0xff]  }
 0x35d   : > { %6206 = vmatpush1.bf16.msra.mxu0 %v16414_v24  ;;  %v16474_v24 = vld [vmem:[#allocation7 + $0x230] ss:$28 sps:$4 sm:$0xff]  }
 0x35e   : > { %v16287_v47 = vpack.i.bf16 %v1704_v63, %v1703_v50  ;;  %6207 = vmatprep.subr.bf16.mxu0 %v16422_v41  ;;  %v16464_v63 = vld [vmem:[#allocation7 + $0x1c4] ss:$28 sps:$4 sm:$0xff]   ;;  %v16467_v50 = vld [vmem:[#allocation7 + $0x1cc] ss:$28 sps:$4 sm:$0xff]  }
 0x35f   : > { %v16483_v41 = vld [vmem:[#allocation7 + $0x270] ss:$28 sps:$4 sm:$0xff]  }
 0x360   : > { %16288 = vrot.lane.b32.xlu1 %v16287_v47, %s19036_s27 }
 0x361   : > { %v16259_v30 = vpop.permute.xlu0 %16258  ;;  %6208 = vmatpush1.bf16.msra.mxu0 %v16420_v60  ;;  %v16491_v60 = vld [vmem:[#allocation7 + $0x2ac] ss:$28 sps:$4 sm:$0xff]  }
 0x362   : > { %v16261_v1 = vunpack.i.h.bf16 %v16259_v30  ;;  %v16260_v21 = vunpack.i.l.bf16 %v16259_v30  ;;  %6209 = vmatprep.subr.bf16.mxu0 %v16428_v3  ;;  %v16465_v30 = vld [vmem:[#allocation7 + $0x1c8] ss:$28 sps:$4 sm:$0xff]  }
 0x364   : > { %v1684_v45 = vmax.f32 %v19890_v40, %v16261_v1  ;;  %v1683_v4 = vmax.f32 %v19885_v52, %v16260_v21  ;;  %16298 = vrot.lane.b32.xlu1 %v16287_v47, %s19037_s25  ;;  %v16419_v40 = vld [vmem:[#allocation7 + $0xc] ss:$28 sps:$4 sm:$0xff]   ;;  %v16462_v47 = vld [vmem:[#allocation7 + $0x1c0] ss:$28 sps:$4 sm:$0xff]  }
 0x365   : > { %6463 = vmatprep.subr.bf16.mxu1 %v16419_v40  ;;  %6210 = vmatpush1.bf16.msra.mxu0 %v16426_v15  ;;  %v16470_v1 = vld [vmem:[#allocation7 + $0x1fc] ss:$28 sps:$4 sm:$0xff]   ;;  %v16473_v21 = vld [vmem:[#allocation7 + $0x204] ss:$28 sps:$4 sm:$0xff]  }
 0x366   : > { %v16282_v48 = vpack.i.bf16 %v1684_v45, %v1683_v4  ;;  %6464 = vmatpush1.bf16.msra.mxu1 %v16417_v25  ;;  %6211 = vmatprep.subr.bf16.mxu0 %v16434_v42  ;;  %v16468_v45 = vld [vmem:[#allocation7 + $0x1f8] ss:$28 sps:$4 sm:$0xff]   ;;  %v16471_v4 = vld [vmem:[#allocation7 + $0x200] ss:$28 sps:$4 sm:$0xff]   ;;  %v16482_v25 = vld [vmem:[#allocation7 + $0x26c] ss:$28 sps:$4 sm:$0xff]  }
 0x367   : > { %6465 = vmatprep.subr.bf16.mxu1 %v16425_v35  ;;  %v16480_v40 = vld [vmem:[#allocation7 + $0x268] ss:$28 sps:$4 sm:$0xff]  }
 0x368   : > { %16283 = vrot.lane.b32.xlu0 %v16282_v48, %s19036_s27  ;;  %16303 = vrot.lane.b32.xlu1 %v16302_v36, %s19035_s2  ;;  %v16479_v36 = vld [vmem:[#allocation7 + $0x23c] ss:$28 sps:$4 sm:$0xff]   ;;  %v16488_v35 = vld [vmem:[#allocation7 + $0x2a4] ss:$28 sps:$4 sm:$0xff]  }
 0x369   : > { %6212 = vmatpush1.bf16.msra.mxu0 %v16432_v53  ;;  %v16494_v53 = vld [vmem:[#allocation7 + $0x2dc] ss:$28 sps:$4 sm:$0xff]  }
 0x36a   : > { %6466 = vmatpush1.bf16.msra.mxu1 %v16423_v14  ;;  %6213 = vmatprep.subr.bf16.mxu0 %v16440_v20 }
 0x36b   : > { %v16269_v31 = vpop.permute.xlu0 %16268  ;;  %6467 = vmatprep.subr.bf16.mxu1 %v16431_v13 }
 0x36c   : > { %16293 = vrot.lane.b32.xlu0 %v16282_v48, %s19037_s25  ;;  %v16271_v52 = vunpack.i.h.bf16 %v16269_v31  ;;  %v16270_v39 = vunpack.i.l.bf16 %v16269_v31  ;;  %v16476_v48 = vld [vmem:[#allocation7 + $0x234] ss:$28 sps:$4 sm:$0xff]  }
 0x36d   : > { %6214 = vmatpush1.bf16.msra.mxu0 %v16438_v43  ;;  %v16485_v31 = vld [vmem:[#allocation7 + $0x274] ss:$28 sps:$4 sm:$0xff]  }
 0x36e   : > { %v20011_v5 = vmax.f32 %v19926_v6, %v16271_v52  ;;  %v20014_v38 = vmax.f32 %v19914_v58, %v16270_v39  ;;  %v16429_v6 = vld [vmem:[#allocation7 + $0x78] ss:$28 sps:$4 sm:$0xff]   ;;  %6215 = vmatprep.subr.bf16.mxu0 %v16446_v54  ;;  %v16486_v39 = vld [vmem:[#allocation7 + $0x2a0] ss:$28 sps:$4 sm:$0xff]  }
 0x36f   : > { %v16437_v58 = vld [vmem:[#allocation7 + $0xb4] ss:$28 sps:$4 sm:$0xff]   ;;  %6468 = vmatpush1.bf16.msra.mxu1 %v16429_v6  ;;  %v16497_v54 = vld [vmem:[#allocation7 + $0x2e4] ss:$28 sps:$4 sm:$0xff]  }
 0x370   : > { %16308 = vrot.lane.b32.xlu0 %v16307_v28, %s19035_s2  ;;  %v16312_v16 = vpack.i.bf16 %v20011_v5, %v20014_v38  ;;  %6469 = vmatprep.subr.bf16.mxu1 %v16437_v58  ;;  %v16489_v28 = vld [vmem:[#allocation7 + $0x2a8] ss:$28 sps:$4 sm:$0xff]   ;;  %v16492_v58 = vld [vmem:[#allocation7 + $0x2d8] ss:$28 sps:$4 sm:$0xff]  }
 0x371   : > { %6216 = vmatpush1.bf16.msra.mxu0 %v16444_v51 }
 0x372   : > { %16313 = vrot.lane.b32.xlu1 %v16312_v16, %s19035_s2  ;;  %6217 = vmatprep.subr.bf16.mxu0 %v16452_v33 }
 0x373   : > { %6470 = vmatpush1.bf16.msra.mxu1 %v16435_v18  ;;  %v16495_v18 = vld [vmem:[#allocation7 + $0x2e0] ss:$28 sps:$4 sm:$0xff]  }
 0x374   : > { %6471 = vmatprep.subr.bf16.mxu1 %v16443_v37 }
 0x375   : > { %6218 = vmatpush1.bf16.msra.mxu0 %v16450_v61 }
 0x376   : > { %6219 = vmatprep.subr.bf16.mxu0 %v16458_v26 }
 0x377   : > { %6472 = vmatpush1.bf16.msra.mxu1 %v16441_v57 }
 0x378   : > { %6473 = vmatprep.subr.bf16.mxu1 %v16449_v17 }
 0x379   : > { %6220 = vmatpush1.bf16.msra.mxu0 %v16456_v8 }
 0x37a   : > { %6221 = vmatprep.subr.bf16.mxu0 %v16464_v63 }
 0x37b   : > { %6474 = vmatpush1.bf16.msra.mxu1 %v16447_v59 }
 0x37c   : > { %6475 = vmatprep.subr.bf16.mxu1 %v16455_v49 }
 0x37d   : > { %6222 = vmatpush1.bf16.msra.mxu0 %v16462_v47 }
 0x37e   : > { %6223 = vmatprep.subr.bf16.mxu0 %v16470_v1 }
 0x37f   : > { %6476 = vmatpush1.bf16.msra.mxu1 %v16453_v27 }
 0x380   : > { %6477 = vmatprep.subr.bf16.mxu1 %v16461_v44 }
 0x381   : > { %6224 = vmatpush1.bf16.msra.mxu0 %v16468_v45 }
 0x382   : > { %6225 = vmatprep.subr.bf16.mxu0 %v16476_v48 }
 0x383   : > { %6478 = vmatpush1.bf16.msra.mxu1 %v16459_v22 }
 0x384   : > { %6479 = vmatprep.subr.bf16.mxu1 %v16467_v50 }
 0x385   : > { %6226 = vmatpush1.bf16.msra.mxu0 %v16474_v24 }
 0x386   : > { %6227 = vmatprep.subr.bf16.mxu0 %v16482_v25 }
 0x387   : > { %6480 = vmatpush1.bf16.msra.mxu1 %v16465_v30 }
 0x388   : > { %6481 = vmatprep.subr.bf16.mxu1 %v16473_v21 }
 0x389   : > { %6228 = vmatpush1.bf16.msra.mxu0 %v16480_v40  ;;  %v16501_v40 = vld [vmem:[#allocation7 + $0x318] ss:$28 sps:$4 sm:$0xff]  }
 0x38a   : > { %6229 = vmatprep.subr.bf16.mxu0 %v16488_v35 }
 0x38b   : > { %6482 = vmatpush1.bf16.msra.mxu1 %v16471_v4 }
 0x38c   : > { %6483 = vmatprep.subr.bf16.mxu1 %v16479_v36 }
 0x38d   : > { %6230 = vmatpush1.bf16.msra.mxu0 %v16486_v39 }
 0x38e   : > { %6231 = vmatprep.subr.bf16.mxu0 %v16494_v53 }
 0x38f   : > { %6484 = vmatpush1.bf16.msra.mxu1 %v16477_v2 }
 0x390   : > { %6485 = vmatprep.subr.bf16.mxu1 %v16485_v31  ;;  %v16498_v31 = vld [vmem:[#allocation7 + $0x310] ss:$28 sps:$4 sm:$0xff]  }
 0x391   : > { %6232 = vmatpush1.bf16.msra.mxu0 %v16492_v58 }
 0x393   : > { %6486 = vmatpush1.bf16.msra.mxu1 %v16483_v41 }
 0x394   : > { %6487 = vmatprep.subr.bf16.mxu1 %v16491_v60  ;;  %v16504_v60 = vld [vmem:[#allocation7 + $0x348] ss:$28 sps:$4 sm:$0xff]  }
 0x397   : > { %6488 = vmatpush1.bf16.msra.mxu1 %v16489_v28 }
 0x398   : > { %6489 = vmatprep.subr.bf16.mxu1 %v16497_v54 }
 0x39b   : > { %6490 = vmatpush1.bf16.msra.mxu1 %v16495_v18 }
 0x3c6   : > { %v16279_v52 = vpop.permute.xlu1 %16278 }
 0x3c7   : > { %v16281_v13 = vunpack.i.h.bf16 %v16279_v52  ;;  %v16280_v16 = vunpack.i.l.bf16 %v16279_v52  ;;  %v16509_v52 = vld [vmem:[#allocation7 + $0x354] ss:$28 sps:$4 sm:$0xff]  }
 0x3c9   : > { %v1819_v20 = vsel %vm1809_vm1, %v19980_v56, %v16281_v13  ;;  %v1818_v37 = vsel %vm1809_vm1, %v19983_v62, %v16280_v16  ;;  %v16515_v13 = vld [vmem:[#allocation7 + $0x38c] ss:$28 sps:$4 sm:$0xff]  }
 0x3cd   : > { %v16274_v14 = vpop.permute.xlu0 %16273 }
 0x3ce   : > { %v16276_v61 = vunpack.i.h.bf16 %v16274_v14  ;;  %v16275_v56 = vunpack.i.l.bf16 %v16274_v14  ;;  %v16507_v14 = vld [vmem:[#allocation7 + $0x350] ss:$28 sps:$4 sm:$0xff]  }
 0x3d0   : > { %v1811_v21 = vsel %vm1809_vm1, %v19989_v55, %v16276_v61  ;;  %v1810_v45 = vsel %vm1809_vm1, %v19992_v0, %v16275_v56  ;;  %v16503_v55 = vld [vmem:[#allocation7 + $0x31c] ss:$28 sps:$4 sm:$0xff]   ;;  %v16506_v0 = vld [vmem:[#allocation7 + $0x34c] ss:$28 sps:$4 sm:$0xff]  }
 0x3d1   : > { %6491 = vmatprep.subr.bf16.mxu1 %v16503_v55  ;;  %v16524_v55 = vld [vmem:[#allocation7 + $0x3f4] ss:$28 sps:$4 sm:$0xff]  }
 0x3d2   : > { %v16289_v3 = vpop.permute.xlu1 %16288  ;;  %6492 = vmatpush1.bf16.msra.mxu1 %v16501_v40  ;;  %v16521_v40 = vld [vmem:[#allocation7 + $0x3c4] ss:$28 sps:$4 sm:$0xff]  }
 0x3d3   : > { %v16291_v15 = vunpack.i.h.bf16 %v16289_v3  ;;  %v16290_v6 = vunpack.i.l.bf16 %v16289_v3  ;;  %v16512_v3 = vld [vmem:[#allocation7 + $0x384] ss:$28 sps:$4 sm:$0xff]   ;;  %6493 = vmatprep.subr.bf16.mxu1 %v16509_v52  ;;  %v16522_v52 = vld [vmem:[#allocation7 + $0x3f0] ss:$28 sps:$4 sm:$0xff]  }
 0x3d5   : > { %v1820_v17 = vsel %vm1812_vm3, %v1818_v37, %v16290_v6  ;;  %v1821_v51 = vsel %vm1812_vm3, %v1819_v20, %v16291_v15 }
 0x3d6   : > { %v16299_v42 = vpop.permute.xlu1 %16298  ;;  %6494 = vmatpush1.bf16.msra.mxu1 %v16507_v14  ;;  %v16531_v14 = vld [vmem:[#allocation7 + $0x430] ss:$28 sps:$4 sm:$0xff]  }
 0x3d7   : > { %v16301_v43 = vunpack.i.h.bf16 %v16299_v42  ;;  %v16300_v57 = vunpack.i.l.bf16 %v16299_v42  ;;  %6506 = vmatprep.subr.bf16.mxu1 %v16515_v13  ;;  %v16539_v13 = vld [vmem:[#allocation7 + $0x46c] ss:$28 sps:$4 sm:$0xff]  }
 0x3d9   : > { %v1822_v33 = vsel %vm1815_vm6, %v1820_v17, %v16300_v57  ;;  %v1823_v49 = vsel %vm1815_vm6, %v1821_v51, %v16301_v43 }
 0x3da   : > { %v16284_v59 = vpop.permute.xlu0 %16283  ;;  %v16304_v27 = vpop.permute.xlu1 %16303  ;;  %v1833_v26 = vpack.c.bf16 %v1823_v49, %v1822_v33 }
 0x3db   : > { %v16286_v62 = vunpack.i.h.bf16 %v16284_v59  ;;  %v16285_v44 = vunpack.i.l.bf16 %v16284_v59  ;;  %v16306_v8 = vunpack.i.h.bf16 %v16304_v27  ;;  %v16305_v22 = vunpack.i.l.bf16 %v16304_v27 }
 0x3dc   : > { %1842 = vrot.lane.b32.xlu1 %v1833_v26, %s19037_s25 }
 0x3dd   : > { %v1724_v30 = vmax.f32 %v19948_v46, %v16306_v8  ;;  %v1723_v1 = vmax.f32 %v19958_v23, %v16305_v22  ;;  %v1813_v4 = vsel %vm1812_vm3, %v1810_v45, %v16285_v44  ;;  %v1814_v48 = vsel %vm1812_vm3, %v1811_v21, %v16286_v62  ;;  %v16500_v46 = vld [vmem:[#allocation7 + $0x314] ss:$28 sps:$4 sm:$0xff]  }
 0x3de   : > { %v16294_v63 = vpop.permute.xlu0 %16293  ;;  %6233 = vmatprep.subr.bf16.mxu0 %v16500_v46  ;;  %v16518_v46 = vld [vmem:[#allocation7 + $0x3bc] ss:$28 sps:$4 sm:$0xff]  }
 0x3df   : > { %v16296_v50 = vunpack.i.h.bf16 %v16294_v63  ;;  %v16295_v47 = vunpack.i.l.bf16 %v16294_v63  ;;  %v16322_v36 = vpack.i.bf16 %v1724_v30, %v1723_v1  ;;  %6234 = vmatpush1.bf16.msra.mxu0 %v16498_v31  ;;  %v16513_v31 = vld [vmem:[#allocation7 + $0x388] ss:$28 sps:$4 sm:$0xff]  }
 0x3e0   : > { %6235 = vmatprep.subr.bf16.mxu0 %v16506_v0  ;;  %v16527_v0 = vld [vmem:[#allocation7 + $0x3fc] ss:$28 sps:$4 sm:$0xff]  }
 0x3e1   : > { %v1816_v2 = vsel %vm1815_vm6, %v1813_v4, %v16295_v47  ;;  %v1817_v25 = vsel %vm1815_vm6, %v1814_v48, %v16296_v50  ;;  %16323 = vrot.lane.b32.xlu1 %v16322_v36, %s19037_s25  ;;  %16318 = vrot.lane.b32.xlu0 %v16322_v36, %s19036_s27  ;;  %v16620_v47 = vld [vmem:[#allocation7 + $0x774] ss:$28 sps:$4 sm:$0xff]  }
 0x3e2   : > { %v16309_v24 = vpop.permute.xlu0 %16308  ;;  %v1832_v28 = vpack.c.bf16 %v1817_v25, %v1816_v2 }
 0x3e3   : > { %v16311_v23 = vunpack.i.h.bf16 %v16309_v24  ;;  %v16310_v41 = vunpack.i.l.bf16 %v16309_v24  ;;  %6236 = vmatpush1.bf16.msra.mxu0 %v16504_v60  ;;  %v16510_v24 = vld [vmem:[#allocation7 + $0x380] ss:$28 sps:$4 sm:$0xff]   ;;  %v16528_v60 = vld [vmem:[#allocation7 + $0x428] ss:$28 sps:$4 sm:$0xff]  }
 0x3e4   : > { %6248 = vmatprep.subr.bf16.mxu0 %v16512_v3  ;;  %v16536_v3 = vld [vmem:[#allocation7 + $0x464] ss:$28 sps:$4 sm:$0xff]  }
 0x3e5   : > { %v1734_v39 = vmax.f32 %v19977_v34, %v16311_v23  ;;  %v1733_v35 = vmax.f32 %v19974_v32, %v16310_v41  ;;  %1840 = vrot.lane.b32.xlu0 %v1832_v28, %s19037_s25  ;;  %v16314_v32 = vpop.permute.xlu1 %16313  ;;  %v16516_v23 = vld [vmem:[#allocation7 + $0x3b8] ss:$28 sps:$4 sm:$0xff]   ;;  %v16519_v41 = vld [vmem:[#allocation7 + $0x3c0] ss:$28 sps:$4 sm:$0xff]  }
 0x3e6   : > { %v16316_v15 = vunpack.i.h.bf16 %v16314_v32  ;;  %v16315_v6 = vunpack.i.l.bf16 %v16314_v32  ;;  %v16533_v28 = vld [vmem:[#allocation7 + $0x434] ss:$28 sps:$4 sm:$0xff]   ;;  %v16537_v32 = vld [vmem:[#allocation7 + $0x468] ss:$28 sps:$4 sm:$0xff]  }
 0x3e7   : > { %v16327_v16 = vpack.i.bf16 %v1734_v39, %v1733_v35 }
 0x3e8   : > { %v1825_v43 = vsel %vm1809_vm1, %v20011_v5, %v16316_v15  ;;  %v1824_v57 = vsel %vm1809_vm1, %v20014_v38, %v16315_v6  ;;  %v16542_v15 = vld [vmem:[#allocation7 + $0x49c] ss:$28 sps:$4 sm:$0xff]   ;;  %v16545_v6 = vld [vmem:[#allocation7 + $0x4a4] ss:$28 sps:$4 sm:$0xff]  }
 0x3e9   : > { %16328 = vrot.lane.b32.xlu0 %v16327_v16, %s19035_s2  ;;  %v16534_v16 = vld [vmem:[#allocation7 + $0x460] ss:$28 sps:$4 sm:$0xff]  }
 0x44e   : > { %v20045_v34 = vpop.permute.xlu1 %1842 }
 0x453   : > { %v16324_v42 = vpop.permute.xlu1 %16323  ;;  %v16319_v58 = vpop.permute.xlu0 %16318 }
 0x454   : > { %v16326_v53 = vunpack.i.h.bf16 %v16324_v42  ;;  %v16325_v18 = vunpack.i.l.bf16 %v16324_v42  ;;  %v16321_v20 = vunpack.i.h.bf16 %v16319_v58  ;;  %v16320_v37 = vunpack.i.l.bf16 %v16319_v58  ;;  %v16540_v42 = vld [vmem:[#allocation7 + $0x498] ss:$28 sps:$4 sm:$0xff]   ;;  %v16543_v58 = vld [vmem:[#allocation7 + $0x4a0] ss:$28 sps:$4 sm:$0xff]  }
 0x456   : > { %v1827_v54 = vsel %vm1812_vm3, %v1825_v43, %v16321_v20  ;;  %v1826_v17 = vsel %vm1812_vm3, %v1824_v57, %v16320_v37  ;;  %v16546_v20 = vld [vmem:[#allocation7 + $0x4d0] ss:$28 sps:$4 sm:$0xff]   ;;  %v16549_v37 = vld [vmem:[#allocation7 + $0x4d8] ss:$28 sps:$4 sm:$0xff]  }
 0x457   : > { %v1841_v51 = vpop.permute.xlu0 %1840  ;;  %v1828_v59 = vsel %vm1815_vm6, %v1826_v17, %v16325_v18  ;;  %v1829_v33 = vsel %vm1815_vm6, %v1827_v54, %v16326_v53  ;;  %v16548_v53 = vld [vmem:[#allocation7 + $0x4d4] ss:$28 sps:$4 sm:$0xff]   ;;  %v16551_v18 = vld [vmem:[#allocation7 + $0x4dc] ss:$28 sps:$4 sm:$0xff]   ;;  %v16554_v43 = vld [vmem:[#allocation7 + $0x50c] ss:$28 sps:$4 sm:$0xff]  }
 0x458   : > { %v1849_v49 = vsel %vm1809_vm1, %v1841_v51, %v20045_v34  ;;  %v1854_v61 = vsel %vm1809_vm1, 0, %v1841_v51  ;;  %v1834_v56 = vpack.c.bf16 %v1829_v33, %v1828_v59  ;;  %v16557_v57 = vld [vmem:[#allocation7 + $0x514] ss:$28 sps:$4 sm:$0xff]   ;;  %v16552_v54 = vld [vmem:[#allocation7 + $0x508] ss:$28 sps:$4 sm:$0xff]  }
 0x459   : > { %v1857_v5 = vshrl.u32 %v1854_v61, 16  ;;  %v1864_v27 = vshrl.u32 %v1849_v49, 16  ;;  %v1860_v26 = vshll.u32 %v1854_v61, 16  ;;  %v1867_v44 = vshll.u32 %v1849_v49, 16  ;;  %v16555_v17 = vld [vmem:[#allocation7 + $0x510] ss:$28 sps:$4 sm:$0xff]  }
 0x45a   : > { %1844 = vrot.lane.b32.xlu1 %v1834_v56, %s19037_s25  ;;  %v16560_v51 = vld [vmem:[#allocation7 + $0x544] ss:$28 sps:$4 sm:$0xff]   ;;  %v16563_v59 = vld [vmem:[#allocation7 + $0x54c] ss:$28 sps:$4 sm:$0xff]   ;;  %v16566_v61 = vld [vmem:[#allocation7 + $0x57c] ss:$28 sps:$4 sm:$0xff]  }
 0x45b   : > { %v1859_v38 = vrot.slane %v1857_v5, 7  ;;  %v1866_v62 = vrot.slane %v1864_v27, 7  ;;  %v16329_v8 = vpop.permute.xlu0 %16328  ;;  %v16558_v33 = vld [vmem:[#allocation7 + $0x540] ss:$28 sps:$4 sm:$0xff]   ;;  %v16561_v49 = vld [vmem:[#allocation7 + $0x548] ss:$28 sps:$4 sm:$0xff]  }
 0x45c   : > { %v16331_v63 = vunpack.i.h.bf16 %v16329_v8  ;;  %v16330_v50 = vunpack.i.l.bf16 %v16329_v8  ;;  %v16569_v56 = vld [vmem:[#allocation7 + $0x584] ss:$28 sps:$4 sm:$0xff]   ;;  %v16564_v5 = vld [vmem:[#allocation7 + $0x578] ss:$28 sps:$4 sm:$0xff]   ;;  %v16578_v8 = vld [vmem:[#allocation7 + $0x5ec] ss:$28 sps:$4 sm:$0xff]  }
 0x45d   : > { %v1862_v30 = vor.u32 %v1860_v26, %v1859_v38  ;;  %v1869_v1 = vor.u32 %v1867_v44, %v1866_v62  ;;  %v16567_v27 = vld [vmem:[#allocation7 + $0x580] ss:$28 sps:$4 sm:$0xff]   ;;  %v16572_v38 = vld [vmem:[#allocation7 + $0x5b4] ss:$28 sps:$4 sm:$0xff]  }
 0x45e   : > { %v1830_v21 = vsel %vm1809_vm1, %v1733_v35, %v16330_v50  ;;  %v1831_v45 = vsel %vm1809_vm1, %v1734_v39, %v16331_v63  ;;  %v16525_v39 = vld [vmem:[#allocation7 + $0x3f8] ss:$28 sps:$4 sm:$0xff]   ;;  %v16530_v35 = vld [vmem:[#allocation7 + $0x42c] ss:$28 sps:$4 sm:$0xff]  }
 0x45f   : > { %v1890_v4 = vsel %vm20060_vm11, 0, %v1862_v30  ;;  %v1891_v48 = vsel %vm20060_vm11, 0, %v1869_v1  ;;  %v1835_v36 = vpack.c.bf16 %v1831_v45, %v1830_v21  ;;  %v16575_v26 = vld [vmem:[#allocation7 + $0x5bc] ss:$28 sps:$4 sm:$0xff]   ;;  %v16570_v62 = vld [vmem:[#allocation7 + $0x5b0] ss:$28 sps:$4 sm:$0xff]  }
 0x460   : > { %v20077_v2 = vsel %vm20065_vm12, %v1890_v4, 0  ;;  %v20081_v25 = vsel %vm20065_vm12, %v1891_v48, 0  ;;  %v16573_v44 = vld [vmem:[#allocation7 + $0x5b8] ss:$28 sps:$4 sm:$0xff]   ;;  %v16576_v50 = vld [vmem:[#allocation7 + $0x5e8] ss:$28 sps:$4 sm:$0xff]  }
 0x461   : > { %6237 = vmatprep.mubr.bf16.mxu0 %v20081_v25  ;;  %6495 = vmatprep.mubr.bf16.mxu1 %v20081_v25  ;;  %v16581_v63 = vld [vmem:[#allocation7 + $0x5f4] ss:$28 sps:$4 sm:$0xff]   ;;  %v16584_v1 = vld [vmem:[#allocation7 + $0x624] ss:$28 sps:$4 sm:$0xff]   ;;  %v16587_v21 = vld [vmem:[#allocation7 + $0x62c] ss:$28 sps:$4 sm:$0xff]  }
 0x462   : > { %1846 = vrot.lane.b32.xlu0 %v1835_v36, %s19037_s25  ;;  %6238 = vmatmul.mubr.bf16.vlgmr.msra.gmra.mrb[16].mxu0 %v20077_v2  ;;  %v16579_v30 = vld [vmem:[#allocation7 + $0x5f0] ss:$28 sps:$4 sm:$0xff]   ;;  %v16582_v45 = vld [vmem:[#allocation7 + $0x620] ss:$28 sps:$4 sm:$0xff]   ;;  %v16585_v4 = vld [vmem:[#allocation7 + $0x628] ss:$28 sps:$4 sm:$0xff]  }
 0x463   : > { %6496 = vmatmul.mubr.bf16.vlgmr.msra.gmra.mrb[12].mxu1 %v20077_v2  ;;  %6249 = vmatpush1.bf16.msra.mxu0 %v16510_v24  ;;  %v16590_v48 = vld [vmem:[#allocation7 + $0x65c] ss:$28 sps:$4 sm:$0xff]   ;;  %v16593_v36 = vld [vmem:[#allocation7 + $0x664] ss:$28 sps:$4 sm:$0xff]  }
 0x464   : > { %6507 = vmatpush1.bf16.msra.mxu1 %v16513_v31  ;;  %6250 = vmatprep.subr.bf16.mxu0 %v16518_v46  ;;  %v16588_v24 = vld [vmem:[#allocation7 + $0x658] ss:$28 sps:$4 sm:$0xff]   ;;  %v16591_v31 = vld [vmem:[#allocation7 + $0x660] ss:$28 sps:$4 sm:$0xff]  }
 0x465   : > { %6508 = vmatprep.subr.bf16.mxu1 %v16521_v40  ;;  %v16596_v46 = vld [vmem:[#allocation7 + $0x694] ss:$28 sps:$4 sm:$0xff]   ;;  %v16599_v40 = vld [vmem:[#allocation7 + $0x69c] ss:$28 sps:$4 sm:$0xff]  }
 0x467   : > { %6251 = vmatpush1.bf16.msra.mxu0 %v16516_v23  ;;  %v16594_v23 = vld [vmem:[#allocation7 + $0x690] ss:$28 sps:$4 sm:$0xff]  }
 0x468   : > { %6509 = vmatpush1.bf16.msra.mxu1 %v16519_v41  ;;  %6252 = vmatprep.subr.bf16.mxu0 %v16524_v55  ;;  %v16597_v41 = vld [vmem:[#allocation7 + $0x698] ss:$28 sps:$4 sm:$0xff]   ;;  %v16602_v55 = vld [vmem:[#allocation7 + $0x6cc] ss:$28 sps:$4 sm:$0xff]  }
 0x469   : > { %6510 = vmatprep.subr.bf16.mxu1 %v16527_v0  ;;  %v16605_v0 = vld [vmem:[#allocation7 + $0x6d4] ss:$28 sps:$4 sm:$0xff]  }
 0x46b   : > { %6253 = vmatpush1.bf16.msra.mxu0 %v16522_v52  ;;  %v16600_v52 = vld [vmem:[#allocation7 + $0x6c8] ss:$28 sps:$4 sm:$0xff]  }
 0x46c   : > { %6511 = vmatpush1.bf16.msra.mxu1 %v16525_v39  ;;  %6254 = vmatprep.subr.bf16.mxu0 %v16530_v35  ;;  %v16603_v39 = vld [vmem:[#allocation7 + $0x6d0] ss:$28 sps:$4 sm:$0xff]   ;;  %v16608_v35 = vld [vmem:[#allocation7 + $0x704] ss:$28 sps:$4 sm:$0xff]  }
 0x46d   : > { %6512 = vmatprep.subr.bf16.mxu1 %v16533_v28  ;;  %v16611_v28 = vld [vmem:[#allocation7 + $0x70c] ss:$28 sps:$4 sm:$0xff]  }
 0x46f   : > { %6255 = vmatpush1.bf16.msra.mxu0 %v16528_v60 }
 0x470   : > { %6513 = vmatpush1.bf16.msra.mxu1 %v16531_v14  ;;  %6256 = vmatprep.subr.bf16.mxu0 %v16536_v3 }
 0x471   : > { %6514 = vmatprep.subr.bf16.mxu1 %v16539_v13 }
 0x473   : > { %6257 = vmatpush1.bf16.msra.mxu0 %v16534_v16 }
 0x474   : > { %6515 = vmatpush1.bf16.msra.mxu1 %v16537_v32  ;;  %6258 = vmatprep.subr.bf16.mxu0 %v16542_v15 }
 0x475   : > { %6516 = vmatprep.subr.bf16.mxu1 %v16545_v6 }
 0x477   : > { %6259 = vmatpush1.bf16.msra.mxu0 %v16540_v42 }
 0x478   : > { %6517 = vmatpush1.bf16.msra.mxu1 %v16543_v58  ;;  %6260 = vmatprep.subr.bf16.mxu0 %v16548_v53  ;;  %v1910_v53 = vshll.u32 %v20081_v25, 16 }
 0x479   : > { %6518 = vmatprep.subr.bf16.mxu1 %v16551_v18 }
 0x47b   : > { %6261 = vmatpush1.bf16.msra.mxu0 %v16546_v20 }
 0x47c   : > { %6519 = vmatpush1.bf16.msra.mxu1 %v16549_v37  ;;  %6262 = vmatprep.subr.bf16.mxu0 %v16554_v43 }
 0x47d   : > { %6520 = vmatprep.subr.bf16.mxu1 %v16557_v57  ;;  %v1912_v57 = vrot.slane %v1910_v53, 1  ;;  %v16677_v53 = vld [vmem:[#allocation7 + $0x974] ss:$28 sps:$4 sm:$0xff]  }
 0x47f   : > { %6263 = vmatpush1.bf16.msra.mxu0 %v16552_v54  ;;  %v16606_v54 = vld [vmem:[#allocation7 + $0x700] ss:$28 sps:$4 sm:$0xff]  }
 0x480   : > { %6521 = vmatpush1.bf16.msra.mxu1 %v16555_v17  ;;  %6264 = vmatprep.subr.bf16.mxu0 %v16560_v51  ;;  %v16609_v17 = vld [vmem:[#allocation7 + $0x708] ss:$28 sps:$4 sm:$0xff]  }
 0x481   : > { %6522 = vmatprep.subr.bf16.mxu1 %v16563_v59  ;;  %v1908_v59 = vshrl.u32 %v20081_v25, 16 }
 0x483   : > { %6265 = vmatpush1.bf16.msra.mxu0 %v16558_v33 }
 0x484   : > { %6523 = vmatpush1.bf16.msra.mxu1 %v16561_v49  ;;  %6266 = vmatprep.subr.bf16.mxu0 %v16566_v61  ;;  %v16614_v49 = vld [vmem:[#allocation7 + $0x73c] ss:$28 sps:$4 sm:$0xff]   ;;  %v16617_v61 = vld [vmem:[#allocation7 + $0x744] ss:$28 sps:$4 sm:$0xff]  }
 0x485   : > { %6524 = vmatprep.subr.bf16.mxu1 %v16569_v56  ;;  %v20110_v56 = vor.u32 %v1912_v57, %v1908_v59  ;;  %v16678_v57 = vld [vmem:[#allocation7 + $0x9a0] ss:$28 sps:$4 sm:$0xff]   ;;  %v16684_v59 = vld [vmem:[#allocation7 + $0x9d8] ss:$28 sps:$4 sm:$0xff]  }
 0x487   : > { %6267 = vmatpush1.bf16.msra.mxu0 %v16564_v5  ;;  %v16612_v5 = vld [vmem:[#allocation7 + $0x738] ss:$28 sps:$4 sm:$0xff]  }
 0x488   : > { %6525 = vmatpush1.bf16.msra.mxu1 %v16567_v27  ;;  %6268 = vmatprep.subr.bf16.mxu0 %v16572_v38  ;;  %v16615_v27 = vld [vmem:[#allocation7 + $0x740] ss:$28 sps:$4 sm:$0xff]  }
 0x489   : > { %6526 = vmatprep.subr.bf16.mxu1 %v16575_v26  ;;  %v16623_v38 = vld [vmem:[#allocation7 + $0x77c] ss:$28 sps:$4 sm:$0xff]   ;;  %v16618_v26 = vld [vmem:[#allocation7 + $0x770] ss:$28 sps:$4 sm:$0xff]  }
 0x48b   : > { %6269 = vmatpush1.bf16.msra.mxu0 %v16570_v62  ;;  %v16621_v62 = vld [vmem:[#allocation7 + $0x778] ss:$28 sps:$4 sm:$0xff]  }
 0x48c   : > { %6527 = vmatpush1.bf16.msra.mxu1 %v16573_v44  ;;  %6270 = vmatprep.subr.bf16.mxu0 %v16578_v8  ;;  %v16626_v44 = vld [vmem:[#allocation7 + $0x7ac] ss:$28 sps:$4 sm:$0xff]   ;;  %v16629_v8 = vld [vmem:[#allocation7 + $0x7b4] ss:$28 sps:$4 sm:$0xff]  }
 0x48d   : > { %6528 = vmatprep.subr.bf16.mxu1 %v16581_v63  ;;  %v16624_v63 = vld [vmem:[#allocation7 + $0x7a8] ss:$28 sps:$4 sm:$0xff]  }
 0x48f   : > { %6271 = vmatpush1.bf16.msra.mxu0 %v16576_v50  ;;  %v16627_v50 = vld [vmem:[#allocation7 + $0x7b0] ss:$28 sps:$4 sm:$0xff]  }
 0x490   : > { %6529 = vmatpush1.bf16.msra.mxu1 %v16579_v30  ;;  %6272 = vmatprep.subr.bf16.mxu0 %v16584_v1  ;;  %v16632_v30 = vld [vmem:[#allocation7 + $0x7e4] ss:$28 sps:$4 sm:$0xff]   ;;  %v16635_v1 = vld [vmem:[#allocation7 + $0x7ec] ss:$28 sps:$4 sm:$0xff]  }
 0x491   : > { %6530 = vmatprep.subr.bf16.mxu1 %v16587_v21  ;;  %v16630_v21 = vld [vmem:[#allocation7 + $0x7e0] ss:$28 sps:$4 sm:$0xff]  }
 0x493   : > { %6273 = vmatpush1.bf16.msra.mxu0 %v16582_v45  ;;  %v16633_v45 = vld [vmem:[#allocation7 + $0x7e8] ss:$28 sps:$4 sm:$0xff]  }
 0x494   : > { %6531 = vmatpush1.bf16.msra.mxu1 %v16585_v4  ;;  %6274 = vmatprep.subr.bf16.mxu0 %v16590_v48  ;;  %v16638_v4 = vld [vmem:[#allocation7 + $0x81c] ss:$28 sps:$4 sm:$0xff]   ;;  %v16641_v48 = vld [vmem:[#allocation7 + $0x824] ss:$28 sps:$4 sm:$0xff]  }
 0x495   : > { %6532 = vmatprep.subr.bf16.mxu1 %v16593_v36  ;;  %v16636_v36 = vld [vmem:[#allocation7 + $0x818] ss:$28 sps:$4 sm:$0xff]  }
 0x497   : > { %6275 = vmatpush1.bf16.msra.mxu0 %v16588_v24  ;;  %v16639_v24 = vld [vmem:[#allocation7 + $0x820] ss:$28 sps:$4 sm:$0xff]  }
 0x498   : > { %6533 = vmatpush1.bf16.msra.mxu1 %v16591_v31  ;;  %6276 = vmatprep.subr.bf16.mxu0 %v16596_v46  ;;  %v16644_v31 = vld [vmem:[#allocation7 + $0x854] ss:$28 sps:$4 sm:$0xff]   ;;  %v16647_v46 = vld [vmem:[#allocation7 + $0x85c] ss:$28 sps:$4 sm:$0xff]  }
 0x499   : > { %6534 = vmatprep.subr.bf16.mxu1 %v16599_v40  ;;  %v16642_v40 = vld [vmem:[#allocation7 + $0x850] ss:$28 sps:$4 sm:$0xff]  }
 0x49b   : > { %6277 = vmatpush1.bf16.msra.mxu0 %v16594_v23  ;;  %v16645_v23 = vld [vmem:[#allocation7 + $0x858] ss:$28 sps:$4 sm:$0xff]  }
 0x49c   : > { %6535 = vmatpush1.bf16.msra.mxu1 %v16597_v41  ;;  %6278 = vmatprep.subr.bf16.mxu0 %v16602_v55  ;;  %v16650_v41 = vld [vmem:[#allocation7 + $0x88c] ss:$28 sps:$4 sm:$0xff]   ;;  %v16653_v55 = vld [vmem:[#allocation7 + $0x894] ss:$28 sps:$4 sm:$0xff]  }
 0x49d   : > { %6536 = vmatprep.subr.bf16.mxu1 %v16605_v0  ;;  %v16648_v0 = vld [vmem:[#allocation7 + $0x888] ss:$28 sps:$4 sm:$0xff]  }
 0x49f   : > { %6279 = vmatpush1.bf16.msra.mxu0 %v16600_v52  ;;  %v16651_v52 = vld [vmem:[#allocation7 + $0x890] ss:$28 sps:$4 sm:$0xff]  }
 0x4a0   : > { %6537 = vmatpush1.bf16.msra.mxu1 %v16603_v39  ;;  %6291 = vmatprep.subr.bf16.mxu0 %v16608_v35  ;;  %v16656_v39 = vld [vmem:[#allocation7 + $0x8c4] ss:$28 sps:$4 sm:$0xff]   ;;  %v16659_v35 = vld [vmem:[#allocation7 + $0x8cc] ss:$28 sps:$4 sm:$0xff]  }
 0x4a1   : > { %6549 = vmatprep.subr.bf16.mxu1 %v16611_v28  ;;  %v16654_v28 = vld [vmem:[#allocation7 + $0x8c0] ss:$28 sps:$4 sm:$0xff]  }
 0x4cc   : > { %v1845_v60 = vpop.permute.xlu1 %1844 }
 0x4cd   : > { %v1850_v14 = vsel %vm1809_vm1, %v20045_v34, %v1845_v60 }
 0x4ce   : > { %v1871_v3 = vshrl.u32 %v1850_v14, 16  ;;  %v1874_v15 = vshll.u32 %v1850_v14, 16  ;;  %v16662_v14 = vld [vmem:[#allocation7 + $0x8fc] ss:$28 sps:$4 sm:$0xff]  }
 0x4d0   : > { %v1873_v13 = vrot.slane %v1871_v3, 7  ;;  %v16665_v3 = vld [vmem:[#allocation7 + $0x904] ss:$28 sps:$4 sm:$0xff]  }
 0x4d2   : > { %v1876_v58 = vor.u32 %v1874_v15, %v1873_v13  ;;  %v16660_v13 = vld [vmem:[#allocation7 + $0x8f8] ss:$28 sps:$4 sm:$0xff]  }
 0x4d3   : > { %v16671_v15 = vld [vmem:[#allocation7 + $0x93c] ss:$28 sps:$4 sm:$0xff]  }
 0x4d4   : > { %v1847_v16 = vpop.permute.xlu0 %1846  ;;  %v1892_v43 = vsel %vm20060_vm11, 0, %v1876_v58  ;;  %v16674_v58 = vld [vmem:[#allocation7 + $0x96c] ss:$28 sps:$4 sm:$0xff]  }
 0x4d5   : > { %v1851_v32 = vsel %vm1809_vm1, %v1845_v60, %v1847_v16  ;;  %v20104_v33 = vsel %vm20065_vm12, %v1892_v43, 0  ;;  %v16657_v60 = vld [vmem:[#allocation7 + $0x8c8] ss:$28 sps:$4 sm:$0xff]   ;;  %v16663_v16 = vld [vmem:[#allocation7 + $0x900] ss:$28 sps:$4 sm:$0xff]  }
 0x4d6   : > { %v1856_v6 = vsel %vm1815_vm6, %v1851_v32, 0  ;;  %v16668_v32 = vld [vmem:[#allocation7 + $0x934] ss:$28 sps:$4 sm:$0xff]   ;;  %v16683_v43 = vld [vmem:[#allocation7 + $0x9ac] ss:$28 sps:$4 sm:$0xff]  }
 0x4d7   : > { %v1877_v42 = vshrl.u32 %v1856_v6, 16  ;;  %v1880_v20 = vshll.u32 %v1856_v6, 16  ;;  %v16666_v6 = vld [vmem:[#allocation7 + $0x930] ss:$28 sps:$4 sm:$0xff]  }
 0x4d9   : > { %v1879_v18 = vrot.slane %v1877_v42, 7  ;;  %v16669_v42 = vld [vmem:[#allocation7 + $0x938] ss:$28 sps:$4 sm:$0xff]  }
 0x4db   : > { %v1882_v37 = vor.u32 %v1880_v20, %v1879_v18  ;;  %v16672_v18 = vld [vmem:[#allocation7 + $0x968] ss:$28 sps:$4 sm:$0xff]   ;;  %v16675_v20 = vld [vmem:[#allocation7 + $0x970] ss:$28 sps:$4 sm:$0xff]  }
 0x4dd   : > { %v1893_v34 = vsel %vm20060_vm11, 0, %v1882_v37  ;;  %v16680_v37 = vld [vmem:[#allocation7 + $0x9a4] ss:$28 sps:$4 sm:$0xff]  }
 0x4de   : > { %v20099_v51 = vsel %vm20065_vm12, %v1893_v34, 0  ;;  %v16681_v34 = vld [vmem:[#allocation7 + $0x9a8] ss:$28 sps:$4 sm:$0xff]  }
 0x4df   : > { %6280 = vmatprep.mubr.bf16.mxu0 %v20099_v51  ;;  %6538 = vmatprep.mubr.bf16.mxu1 %v20099_v51 }
 0x4e0   : > { %6281 = vmatmul.mubr.bf16.vlgmr.msra.gmra.mrb[16].mxu0 %v20104_v33  ;;  %6539 = vmatmul.mubr.bf16.vlgmr.msra.gmra.mrb[12].mxu1 %v20104_v33 }
 0x4e1   : > { %6292 = vmatpush1.bf16.msra.mxu0 %v16606_v54  ;;  %6550 = vmatpush1.bf16.msra.mxu1 %v16609_v17  ;;  %v16686_v54 = vld [vmem:[#allocation7 + $0x9dc] ss:$28 sps:$4 sm:$0xff]   ;;  %v16689_v17 = vld [vmem:[#allocation7 + $0x9e4] ss:$28 sps:$4 sm:$0xff]  }
 0x4e2   : > { %6323 = vmatprep.mubr.bf16.mxu0 %v20110_v56  ;;  %6581 = vmatprep.mubr.bf16.mxu1 %v20110_v56 }
 0x4e3   : > { %6293 = vmatprep.subr.bf16.mxu0 %v16614_v49  ;;  %6551 = vmatprep.subr.bf16.mxu1 %v16617_v61  ;;  %v16687_v49 = vld [vmem:[#allocation7 + $0x9e0] ss:$28 sps:$4 sm:$0xff]   ;;  %v16692_v61 = vld [vmem:[#allocation7 + $0xa14] ss:$28 sps:$4 sm:$0xff]  }
 0x4e5   : > { %6294 = vmatpush1.bf16.msra.mxu0 %v16612_v5  ;;  %6552 = vmatpush1.bf16.msra.mxu1 %v16615_v27  ;;  %v16695_v5 = vld [vmem:[#allocation7 + $0xa1c] ss:$28 sps:$4 sm:$0xff]   ;;  %v16690_v27 = vld [vmem:[#allocation7 + $0xa10] ss:$28 sps:$4 sm:$0xff]  }
 0x4e6   : > { %6295 = vmatprep.subr.bf16.mxu0 %v16620_v47  ;;  %6553 = vmatprep.subr.bf16.mxu1 %v16623_v38  ;;  %v16693_v47 = vld [vmem:[#allocation7 + $0xa18] ss:$28 sps:$4 sm:$0xff]   ;;  %v16698_v38 = vld [vmem:[#allocation7 + $0xa4c] ss:$28 sps:$4 sm:$0xff]  }
 0x4e9   : > { %6296 = vmatpush1.bf16.msra.mxu0 %v16618_v26  ;;  %6554 = vmatpush1.bf16.msra.mxu1 %v16621_v62  ;;  %v16701_v26 = vld [vmem:[#allocation7 + $0xa54] ss:$28 sps:$4 sm:$0xff]   ;;  %v1903_v62 = vshll.u32 %v20077_v2, 16 }
 0x4ea   : > { %6297 = vmatprep.subr.bf16.mxu0 %v16626_v44  ;;  %6555 = vmatprep.subr.bf16.mxu1 %v16629_v8  ;;  %v1924_v44 = vshll.u32 %v20099_v51, 16  ;;  %v16696_v8 = vld [vmem:[#allocation7 + $0xa48] ss:$28 sps:$4 sm:$0xff]  }
 0x4ed   : > { %6298 = vmatpush1.bf16.msra.mxu0 %v16624_v63  ;;  %6556 = vmatpush1.bf16.msra.mxu1 %v16627_v50  ;;  %v16699_v63 = vld [vmem:[#allocation7 + $0xa50] ss:$28 sps:$4 sm:$0xff]   ;;  %v1905_v50 = vrot.slane %v1903_v62, 1  ;;  %v16767_v62 = vld [vmem:[#allocation7 + $0xcbc] ss:$28 sps:$4 sm:$0xff]  }
 0x4ee   : > { %6299 = vmatprep.subr.bf16.mxu0 %v16632_v30  ;;  %6557 = vmatprep.subr.bf16.mxu1 %v16635_v1  ;;  %v16704_v30 = vld [vmem:[#allocation7 + $0xa84] ss:$28 sps:$4 sm:$0xff]   ;;  %v16707_v1 = vld [vmem:[#allocation7 + $0xa8c] ss:$28 sps:$4 sm:$0xff]  }
 0x4f1   : > { %6300 = vmatpush1.bf16.msra.mxu0 %v16630_v21  ;;  %6558 = vmatpush1.bf16.msra.mxu1 %v16633_v45  ;;  %v1926_v21 = vrot.slane %v1924_v44, 1  ;;  %v1901_v45 = vshrl.u32 %v20077_v2, 16  ;;  %v16762_v44 = vld [vmem:[#allocation7 + $0xcb0] ss:$28 sps:$4 sm:$0xff]  }
 0x4f2   : > { %6301 = vmatprep.subr.bf16.mxu0 %v16638_v4  ;;  %6559 = vmatprep.subr.bf16.mxu1 %v16641_v48  ;;  %v16702_v4 = vld [vmem:[#allocation7 + $0xa80] ss:$28 sps:$4 sm:$0xff]   ;;  %v1922_v48 = vshrl.u32 %v20099_v51, 16 }
 0x4f5   : > { %6302 = vmatpush1.bf16.msra.mxu0 %v16636_v36  ;;  %6560 = vmatpush1.bf16.msra.mxu1 %v16639_v24  ;;  %v20118_v36 = vor.u32 %v1905_v50, %v1901_v45  ;;  %v16705_v24 = vld [vmem:[#allocation7 + $0xa88] ss:$28 sps:$4 sm:$0xff]   ;;  %v16773_v50 = vld [vmem:[#allocation7 + $0xcf4] ss:$28 sps:$4 sm:$0xff]  }
 0x4f6   : > { %6303 = vmatprep.subr.bf16.mxu0 %v16644_v31  ;;  %6561 = vmatprep.subr.bf16.mxu1 %v16647_v46  ;;  %v20120_v31 = vor.u32 %v1926_v21, %v1922_v48  ;;  %v16710_v46 = vld [vmem:[#allocation7 + $0xabc] ss:$28 sps:$4 sm:$0xff]   ;;  %v16776_v21 = vld [vmem:[#allocation7 + $0xd24] ss:$28 sps:$4 sm:$0xff]   ;;  %v16779_v45 = vld [vmem:[#allocation7 + $0xd2c] ss:$28 sps:$4 sm:$0xff]  }
 0x4f7   : > { %v16777_v48 = vld [vmem:[#allocation7 + $0xd28] ss:$28 sps:$4 sm:$0xff]  }
 0x4f9   : > { %6304 = vmatpush1.bf16.msra.mxu0 %v16642_v40  ;;  %6562 = vmatpush1.bf16.msra.mxu1 %v16645_v23  ;;  %v16713_v40 = vld [vmem:[#allocation7 + $0xac4] ss:$28 sps:$4 sm:$0xff]   ;;  %v16708_v23 = vld [vmem:[#allocation7 + $0xab8] ss:$28 sps:$4 sm:$0xff]  }
 0x4fa   : > { %6305 = vmatprep.subr.bf16.mxu0 %v16650_v41  ;;  %6563 = vmatprep.subr.bf16.mxu1 %v16653_v55  ;;  %v16711_v41 = vld [vmem:[#allocation7 + $0xac0] ss:$28 sps:$4 sm:$0xff]   ;;  %v16716_v55 = vld [vmem:[#allocation7 + $0xaf4] ss:$28 sps:$4 sm:$0xff]  }
 0x4fd   : > { %6306 = vmatpush1.bf16.msra.mxu0 %v16648_v0  ;;  %6564 = vmatpush1.bf16.msra.mxu1 %v16651_v52  ;;  %v16719_v0 = vld [vmem:[#allocation7 + $0xafc] ss:$28 sps:$4 sm:$0xff]   ;;  %v16714_v52 = vld [vmem:[#allocation7 + $0xaf0] ss:$28 sps:$4 sm:$0xff]  }
 0x4fe   : > { %6307 = vmatprep.subr.bf16.mxu0 %v16656_v39  ;;  %6565 = vmatprep.subr.bf16.mxu1 %v16659_v35  ;;  %v16717_v39 = vld [vmem:[#allocation7 + $0xaf8] ss:$28 sps:$4 sm:$0xff]   ;;  %v16722_v35 = vld [vmem:[#allocation7 + $0xb2c] ss:$28 sps:$4 sm:$0xff]  }
 0x501   : > { %6308 = vmatpush1.bf16.msra.mxu0 %v16654_v28  ;;  %6566 = vmatpush1.bf16.msra.mxu1 %v16657_v60  ;;  %v16725_v28 = vld [vmem:[#allocation7 + $0xb34] ss:$28 sps:$4 sm:$0xff]   ;;  %v16720_v60 = vld [vmem:[#allocation7 + $0xb28] ss:$28 sps:$4 sm:$0xff]  }
 0x502   : > { %6309 = vmatprep.subr.bf16.mxu0 %v16662_v14  ;;  %6567 = vmatprep.subr.bf16.mxu1 %v16665_v3  ;;  %v16723_v14 = vld [vmem:[#allocation7 + $0xb30] ss:$28 sps:$4 sm:$0xff]   ;;  %v16728_v3 = vld [vmem:[#allocation7 + $0xb64] ss:$28 sps:$4 sm:$0xff]  }
 0x505   : > { %6310 = vmatpush1.bf16.msra.mxu0 %v16660_v13  ;;  %6568 = vmatpush1.bf16.msra.mxu1 %v16663_v16  ;;  %v16731_v13 = vld [vmem:[#allocation7 + $0xb6c] ss:$28 sps:$4 sm:$0xff]   ;;  %v16726_v16 = vld [vmem:[#allocation7 + $0xb60] ss:$28 sps:$4 sm:$0xff]  }
 0x506   : > { %6311 = vmatprep.subr.bf16.mxu0 %v16668_v32  ;;  %6569 = vmatprep.subr.bf16.mxu1 %v16671_v15  ;;  %v16729_v32 = vld [vmem:[#allocation7 + $0xb68] ss:$28 sps:$4 sm:$0xff]   ;;  %v16734_v15 = vld [vmem:[#allocation7 + $0xb9c] ss:$28 sps:$4 sm:$0xff]  }
 0x509   : > { %6312 = vmatpush1.bf16.msra.mxu0 %v16666_v6  ;;  %6570 = vmatpush1.bf16.msra.mxu1 %v16669_v42  ;;  %v16737_v6 = vld [vmem:[#allocation7 + $0xba4] ss:$28 sps:$4 sm:$0xff]   ;;  %v16732_v42 = vld [vmem:[#allocation7 + $0xb98] ss:$28 sps:$4 sm:$0xff]  }
 0x50a   : > { %6313 = vmatprep.subr.bf16.mxu0 %v16674_v58  ;;  %6571 = vmatprep.subr.bf16.mxu1 %v16677_v53  ;;  %v16735_v58 = vld [vmem:[#allocation7 + $0xba0] ss:$28 sps:$4 sm:$0xff]   ;;  %v16740_v53 = vld [vmem:[#allocation7 + $0xbd4] ss:$28 sps:$4 sm:$0xff]  }
 0x50d   : > { %6314 = vmatpush1.bf16.msra.mxu0 %v16672_v18  ;;  %6572 = vmatpush1.bf16.msra.mxu1 %v16675_v20  ;;  %v16743_v18 = vld [vmem:[#allocation7 + $0xbdc] ss:$28 sps:$4 sm:$0xff]   ;;  %v16738_v20 = vld [vmem:[#allocation7 + $0xbd0] ss:$28 sps:$4 sm:$0xff]  }
 0x50e   : > { %6315 = vmatprep.subr.bf16.mxu0 %v16680_v37  ;;  %6573 = vmatprep.subr.bf16.mxu1 %v16683_v43  ;;  %v16741_v37 = vld [vmem:[#allocation7 + $0xbd8] ss:$28 sps:$4 sm:$0xff]   ;;  %v16746_v43 = vld [vmem:[#allocation7 + $0xc0c] ss:$28 sps:$4 sm:$0xff]  }
 0x511   : > { %6316 = vmatpush1.bf16.msra.mxu0 %v16678_v57  ;;  %6574 = vmatpush1.bf16.msra.mxu1 %v16681_v34  ;;  %v16749_v57 = vld [vmem:[#allocation7 + $0xc14] ss:$28 sps:$4 sm:$0xff]   ;;  %v16744_v34 = vld [vmem:[#allocation7 + $0xc08] ss:$28 sps:$4 sm:$0xff]  }
 0x512   : > { %6317 = vmatprep.subr.bf16.mxu0 %v16686_v54  ;;  %6575 = vmatprep.subr.bf16.mxu1 %v16689_v17  ;;  %v16747_v54 = vld [vmem:[#allocation7 + $0xc10] ss:$28 sps:$4 sm:$0xff]   ;;  %v16752_v17 = vld [vmem:[#allocation7 + $0xc44] ss:$28 sps:$4 sm:$0xff]  }
 0x515   : > { %6318 = vmatpush1.bf16.msra.mxu0 %v16684_v59  ;;  %6576 = vmatpush1.bf16.msra.mxu1 %v16687_v49  ;;  %v16755_v59 = vld [vmem:[#allocation7 + $0xc4c] ss:$28 sps:$4 sm:$0xff]   ;;  %v16750_v49 = vld [vmem:[#allocation7 + $0xc40] ss:$28 sps:$4 sm:$0xff]  }
 0x516   : > { %6319 = vmatprep.subr.bf16.mxu0 %v16692_v61  ;;  %6577 = vmatprep.subr.bf16.mxu1 %v16695_v5  ;;  %v16753_v61 = vld [vmem:[#allocation7 + $0xc48] ss:$28 sps:$4 sm:$0xff]   ;;  %v16758_v5 = vld [vmem:[#allocation7 + $0xc7c] ss:$28 sps:$4 sm:$0xff]  }
 0x519   : > { %6320 = vmatpush1.bf16.msra.mxu0 %v16690_v27  ;;  %6578 = vmatpush1.bf16.msra.mxu1 %v16693_v47  ;;  %v16761_v27 = vld [vmem:[#allocation7 + $0xc84] ss:$28 sps:$4 sm:$0xff]   ;;  %v16756_v47 = vld [vmem:[#allocation7 + $0xc78] ss:$28 sps:$4 sm:$0xff]  }
 0x51a   : > { %6321 = vmatprep.subr.bf16.mxu0 %v16698_v38  ;;  %6579 = vmatprep.subr.bf16.mxu1 %v16701_v26  ;;  %v16759_v38 = vld [vmem:[#allocation7 + $0xc80] ss:$28 sps:$4 sm:$0xff]   ;;  %v16764_v26 = vld [vmem:[#allocation7 + $0xcb4] ss:$28 sps:$4 sm:$0xff]  }
 0x51d   : > { %6322 = vmatpush1.bf16.msra.mxu0 %v16696_v8  ;;  %6580 = vmatpush1.bf16.msra.mxu1 %v16699_v63  ;;  %v16765_v8 = vld [vmem:[#allocation7 + $0xcb8] ss:$28 sps:$4 sm:$0xff]   ;;  %v16770_v63 = vld [vmem:[#allocation7 + $0xcec] ss:$28 sps:$4 sm:$0xff]  }
 0x51e   : > { %6334 = vmatprep.subr.bf16.mxu0 %v16704_v30  ;;  %6592 = vmatprep.subr.bf16.mxu1 %v16707_v1  ;;  %v16768_v30 = vld [vmem:[#allocation7 + $0xce8] ss:$28 sps:$4 sm:$0xff]   ;;  %v16771_v1 = vld [vmem:[#allocation7 + $0xcf0] ss:$28 sps:$4 sm:$0xff]  }
 0x520   : > { %6324 = vmatmul.mubr.bf16.vlgmr.msra.gmra.mrb[16].mxu0 %v20118_v36  ;;  %6582 = vmatmul.mubr.bf16.vlgmr.msra.gmra.mrb[12].mxu1 %v20118_v36 }
 0x521   : > { %6335 = vmatpush1.bf16.msra.mxu0 %v16702_v4  ;;  %6366 = vmatprep.mubr.bf16.mxu0 %v20120_v31  ;;  %v16774_v4 = vld [vmem:[#allocation7 + $0xd20] ss:$28 sps:$4 sm:$0xff]  }
 0x522   : > { %6593 = vmatpush1.bf16.msra.mxu1 %v16705_v24  ;;  %6624 = vmatprep.mubr.bf16.mxu1 %v20120_v31  ;;  %v16782_v24 = vld [vmem:[#allocation7 + $0xd5c] ss:$28 sps:$4 sm:$0xff]  }
 0x523   : > { %6336 = vmatprep.subr.bf16.mxu0 %v16710_v46  ;;  %6594 = vmatprep.subr.bf16.mxu1 %v16713_v40  ;;  %v16785_v46 = vld [vmem:[#allocation7 + $0xd64] ss:$28 sps:$4 sm:$0xff]   ;;  %v16780_v40 = vld [vmem:[#allocation7 + $0xd58] ss:$28 sps:$4 sm:$0xff]  }
 0x525   : > { %6337 = vmatpush1.bf16.msra.mxu0 %v16708_v23  ;;  %v16783_v23 = vld [vmem:[#allocation7 + $0xd60] ss:$28 sps:$4 sm:$0xff]  }
 0x526   : > { %6595 = vmatpush1.bf16.msra.mxu1 %v16711_v41  ;;  %6338 = vmatprep.subr.bf16.mxu0 %v16716_v55  ;;  %v16788_v41 = vld [vmem:[#allocation7 + $0xd94] ss:$28 sps:$4 sm:$0xff]   ;;  %v16791_v55 = vld [vmem:[#allocation7 + $0xd9c] ss:$28 sps:$4 sm:$0xff]  }
 0x527   : > { %6596 = vmatprep.subr.bf16.mxu1 %v16719_v0  ;;  %v16786_v0 = vld [vmem:[#allocation7 + $0xd90] ss:$28 sps:$4 sm:$0xff]  }
 0x529   : > { %6339 = vmatpush1.bf16.msra.mxu0 %v16714_v52  ;;  %v16789_v52 = vld [vmem:[#allocation7 + $0xd98] ss:$28 sps:$4 sm:$0xff]  }
 0x52a   : > { %6597 = vmatpush1.bf16.msra.mxu1 %v16717_v39  ;;  %6340 = vmatprep.subr.bf16.mxu0 %v16722_v35  ;;  %v16794_v39 = vld [vmem:[#allocation7 + $0xdcc] ss:$28 sps:$4 sm:$0xff]   ;;  %v1917_v35 = vshll.u32 %v20104_v33, 16 }
 0x52b   : > { %6598 = vmatprep.subr.bf16.mxu1 %v16725_v28  ;;  %v16797_v28 = vld [vmem:[#allocation7 + $0xdd4] ss:$28 sps:$4 sm:$0xff]  }
 0x52d   : > { %6341 = vmatpush1.bf16.msra.mxu0 %v16720_v60  ;;  %v16792_v60 = vld [vmem:[#allocation7 + $0xdc8] ss:$28 sps:$4 sm:$0xff]  }
 0x52e   : > { %6599 = vmatpush1.bf16.msra.mxu1 %v16723_v14  ;;  %6342 = vmatprep.subr.bf16.mxu0 %v16728_v3  ;;  %v16795_v14 = vld [vmem:[#allocation7 + $0xdd0] ss:$28 sps:$4 sm:$0xff]   ;;  %v1919_v3 = vrot.slane %v1917_v35, 1  ;;  %v16863_v35 = vld [vmem:[#allocation7 + $0x103c] ss:$28 sps:$4 sm:$0xff]  }
 0x52f   : > { %6600 = vmatprep.subr.bf16.mxu1 %v16731_v13  ;;  %v16800_v13 = vld [vmem:[#allocation7 + $0xe04] ss:$28 sps:$4 sm:$0xff]  }
 0x531   : > { %6343 = vmatpush1.bf16.msra.mxu0 %v16726_v16  ;;  %v16803_v16 = vld [vmem:[#allocation7 + $0xe0c] ss:$28 sps:$4 sm:$0xff]  }
 0x532   : > { %6601 = vmatpush1.bf16.msra.mxu1 %v16729_v32  ;;  %6344 = vmatprep.subr.bf16.mxu0 %v16734_v15  ;;  %v1915_v32 = vshrl.u32 %v20104_v33, 16  ;;  %v16798_v15 = vld [vmem:[#allocation7 + $0xe00] ss:$28 sps:$4 sm:$0xff]  }
 0x533   : > { %6602 = vmatprep.subr.bf16.mxu1 %v16737_v6 }
 0x534   : > { %v20128_v6 = vor.u32 %v1919_v3, %v1915_v32  ;;  %v16869_v3 = vld [vmem:[#allocation7 + $0x1074] ss:$28 sps:$4 sm:$0xff]   ;;  %v16872_v32 = vld [vmem:[#allocation7 + $0x10a4] ss:$28 sps:$4 sm:$0xff]  }
 0x535   : > { %6345 = vmatpush1.bf16.msra.mxu0 %v16732_v42  ;;  %v16801_v42 = vld [vmem:[#allocation7 + $0xe08] ss:$28 sps:$4 sm:$0xff]  }
 0x536   : > { %6603 = vmatpush1.bf16.msra.mxu1 %v16735_v58  ;;  %6346 = vmatprep.subr.bf16.mxu0 %v16740_v53  ;;  %v16806_v58 = vld [vmem:[#allocation7 + $0xe3c] ss:$28 sps:$4 sm:$0xff]   ;;  %v20132_v53 = vrot.slane %v20081_v25, 1 }
 0x537   : > { %6604 = vmatprep.subr.bf16.mxu1 %v16743_v18  ;;  %v16809_v18 = vld [vmem:[#allocation7 + $0xe44] ss:$28 sps:$4 sm:$0xff]  }
 0x539   : > { %6347 = vmatpush1.bf16.msra.mxu0 %v16738_v20  ;;  %v16804_v20 = vld [vmem:[#allocation7 + $0xe38] ss:$28 sps:$4 sm:$0xff]  }
 0x53a   : > { %6605 = vmatpush1.bf16.msra.mxu1 %v16741_v37  ;;  %6348 = vmatprep.subr.bf16.mxu0 %v16746_v43  ;;  %v16807_v37 = vld [vmem:[#allocation7 + $0xe40] ss:$28 sps:$4 sm:$0xff]   ;;  %v16812_v43 = vld [vmem:[#allocation7 + $0xe74] ss:$28 sps:$4 sm:$0xff]  }
 0x53b   : > { %6606 = vmatprep.subr.bf16.mxu1 %v16749_v57  ;;  %v16815_v57 = vld [vmem:[#allocation7 + $0xe7c] ss:$28 sps:$4 sm:$0xff]  }
 0x53d   : > { %6349 = vmatpush1.bf16.msra.mxu0 %v16744_v34  ;;  %v16810_v34 = vld [vmem:[#allocation7 + $0xe70] ss:$28 sps:$4 sm:$0xff]  }
 0x53e   : > { %6607 = vmatpush1.bf16.msra.mxu1 %v16747_v54  ;;  %6350 = vmatprep.subr.bf16.mxu0 %v16752_v17  ;;  %v16813_v54 = vld [vmem:[#allocation7 + $0xe78] ss:$28 sps:$4 sm:$0xff]   ;;  %v16818_v17 = vld [vmem:[#allocation7 + $0xeac] ss:$28 sps:$4 sm:$0xff]  }
 0x53f   : > { %6608 = vmatprep.subr.bf16.mxu1 %v16755_v59  ;;  %v16821_v59 = vld [vmem:[#allocation7 + $0xeb4] ss:$28 sps:$4 sm:$0xff]  }
 0x541   : > { %6351 = vmatpush1.bf16.msra.mxu0 %v16750_v49  ;;  %v16816_v49 = vld [vmem:[#allocation7 + $0xea8] ss:$28 sps:$4 sm:$0xff]  }
 0x542   : > { %6609 = vmatpush1.bf16.msra.mxu1 %v16753_v61  ;;  %6352 = vmatprep.subr.bf16.mxu0 %v16758_v5  ;;  %v16819_v61 = vld [vmem:[#allocation7 + $0xeb0] ss:$28 sps:$4 sm:$0xff]   ;;  %v16824_v5 = vld [vmem:[#allocation7 + $0xee4] ss:$28 sps:$4 sm:$0xff]  }
 0x543   : > { %6610 = vmatprep.subr.bf16.mxu1 %v16761_v27  ;;  %v16827_v27 = vld [vmem:[#allocation7 + $0xeec] ss:$28 sps:$4 sm:$0xff]  }
 0x545   : > { %6353 = vmatpush1.bf16.msra.mxu0 %v16756_v47  ;;  %v16822_v47 = vld [vmem:[#allocation7 + $0xee0] ss:$28 sps:$4 sm:$0xff]  }
 0x546   : > { %6611 = vmatpush1.bf16.msra.mxu1 %v16759_v38  ;;  %6354 = vmatprep.subr.bf16.mxu0 %v16764_v26  ;;  %v16825_v38 = vld [vmem:[#allocation7 + $0xee8] ss:$28 sps:$4 sm:$0xff]   ;;  %v16830_v26 = vld [vmem:[#allocation7 + $0xf1c] ss:$28 sps:$4 sm:$0xff]  }
 0x547   : > { %6612 = vmatprep.subr.bf16.mxu1 %v16767_v62  ;;  %v16833_v62 = vld [vmem:[#allocation7 + $0xf24] ss:$28 sps:$4 sm:$0xff]  }
 0x549   : > { %6355 = vmatpush1.bf16.msra.mxu0 %v16762_v44  ;;  %v16828_v44 = vld [vmem:[#allocation7 + $0xf18] ss:$28 sps:$4 sm:$0xff]  }
 0x54a   : > { %6613 = vmatpush1.bf16.msra.mxu1 %v16765_v8  ;;  %6356 = vmatprep.subr.bf16.mxu0 %v16770_v63  ;;  %v16831_v8 = vld [vmem:[#allocation7 + $0xf20] ss:$28 sps:$4 sm:$0xff]   ;;  %v16836_v63 = vld [vmem:[#allocation7 + $0xf54] ss:$28 sps:$4 sm:$0xff]  }
 0x54b   : > { %6614 = vmatprep.subr.bf16.mxu1 %v16773_v50  ;;  %v16839_v50 = vld [vmem:[#allocation7 + $0xf5c] ss:$28 sps:$4 sm:$0xff]  }
 0x54d   : > { %6357 = vmatpush1.bf16.msra.mxu0 %v16768_v30  ;;  %v16834_v30 = vld [vmem:[#allocation7 + $0xf50] ss:$28 sps:$4 sm:$0xff]  }
 0x54e   : > { %6615 = vmatpush1.bf16.msra.mxu1 %v16771_v1  ;;  %6358 = vmatprep.subr.bf16.mxu0 %v16776_v21  ;;  %v16837_v1 = vld [vmem:[#allocation7 + $0xf58] ss:$28 sps:$4 sm:$0xff]   ;;  %v16842_v21 = vld [vmem:[#allocation7 + $0xf8c] ss:$28 sps:$4 sm:$0xff]  }
 0x54f   : > { %6616 = vmatprep.subr.bf16.mxu1 %v16779_v45  ;;  %v16845_v45 = vld [vmem:[#allocation7 + $0xf94] ss:$28 sps:$4 sm:$0xff]  }
 0x551   : > { %6359 = vmatpush1.bf16.msra.mxu0 %v16774_v4  ;;  %v16840_v4 = vld [vmem:[#allocation7 + $0xf88] ss:$28 sps:$4 sm:$0xff]  }
 0x552   : > { %6617 = vmatpush1.bf16.msra.mxu1 %v16777_v48  ;;  %6360 = vmatprep.subr.bf16.mxu0 %v16782_v24  ;;  %v16843_v48 = vld [vmem:[#allocation7 + $0xf90] ss:$28 sps:$4 sm:$0xff]   ;;  %v16848_v24 = vld [vmem:[#allocation7 + $0xfc4] ss:$28 sps:$4 sm:$0xff]  }
 0x553   : > { %6618 = vmatprep.subr.bf16.mxu1 %v16785_v46  ;;  %v16851_v46 = vld [vmem:[#allocation7 + $0xfcc] ss:$28 sps:$4 sm:$0xff]  }
 0x555   : > { %6361 = vmatpush1.bf16.msra.mxu0 %v16780_v40  ;;  %v16846_v40 = vld [vmem:[#allocation7 + $0xfc0] ss:$28 sps:$4 sm:$0xff]  }
 0x556   : > { %6619 = vmatpush1.bf16.msra.mxu1 %v16783_v23  ;;  %6362 = vmatprep.subr.bf16.mxu0 %v16788_v41  ;;  %v16849_v23 = vld [vmem:[#allocation7 + $0xfc8] ss:$28 sps:$4 sm:$0xff]   ;;  %v16854_v41 = vld [vmem:[#allocation7 + $0xffc] ss:$28 sps:$4 sm:$0xff]  }
 0x557   : > { %6620 = vmatprep.subr.bf16.mxu1 %v16791_v55  ;;  %v16857_v55 = vld [vmem:[#allocation7 + $0x1004] ss:$28 sps:$4 sm:$0xff]  }
 0x559   : > { %6363 = vmatpush1.bf16.msra.mxu0 %v16786_v0  ;;  %v16852_v0 = vld [vmem:[#allocation7 + $0xff8] ss:$28 sps:$4 sm:$0xff]  }
 0x55a   : > { %6621 = vmatpush1.bf16.msra.mxu1 %v16789_v52  ;;  %6364 = vmatprep.subr.bf16.mxu0 %v16794_v39  ;;  %v16855_v52 = vld [vmem:[#allocation7 + $0x1000] ss:$28 sps:$4 sm:$0xff]   ;;  %v16860_v39 = vld [vmem:[#allocation7 + $0x1034] ss:$28 sps:$4 sm:$0xff]  }
 0x55b   : > { %6622 = vmatprep.subr.bf16.mxu1 %v16797_v28  ;;  %v16858_v28 = vld [vmem:[#allocation7 + $0x1030] ss:$28 sps:$4 sm:$0xff]  }
 0x55d   : > { %6365 = vmatpush1.bf16.msra.mxu0 %v16792_v60  ;;  %v16861_v60 = vld [vmem:[#allocation7 + $0x1038] ss:$28 sps:$4 sm:$0xff]  }
 0x55e   : > { %6623 = vmatpush1.bf16.msra.mxu1 %v16795_v14  ;;  %6377 = vmatprep.subr.bf16.mxu0 %v16800_v13  ;;  %v16866_v14 = vld [vmem:[#allocation7 + $0x106c] ss:$28 sps:$4 sm:$0xff]  }
 0x55f   : > { %6635 = vmatprep.subr.bf16.mxu1 %v16803_v16  ;;  %v16864_v13 = vld [vmem:[#allocation7 + $0x1068] ss:$28 sps:$4 sm:$0xff]   ;;  %v16867_v16 = vld [vmem:[#allocation7 + $0x1070] ss:$28 sps:$4 sm:$0xff]  }
 0x560   : > { %6367 = vmatmul.mubr.bf16.vlgmr.msra.gmra.mrb[16].mxu0 %v20128_v6 }
 0x561   : > { %6625 = vmatmul.mubr.bf16.vlgmr.msra.gmra.mrb[12].mxu1 %v20128_v6  ;;  %6378 = vmatpush1.bf16.msra.mxu0 %v16798_v15  ;;  %v16875_v15 = vld [vmem:[#allocation7 + $0x10ac] ss:$28 sps:$4 sm:$0xff]  }
 0x562   : > { %6409 = vmatprep.mubr.bf16.mxu0 %v20132_v53  ;;  %6636 = vmatpush1.bf16.msra.mxu1 %v16801_v42  ;;  %v16870_v42 = vld [vmem:[#allocation7 + $0x10a0] ss:$28 sps:$4 sm:$0xff]  }
 0x563   : > { %6667 = vmatprep.mubr.bf16.mxu1 %v20132_v53  ;;  %6379 = vmatprep.subr.bf16.mxu0 %v16806_v58  ;;  %v16873_v58 = vld [vmem:[#allocation7 + $0x10a8] ss:$28 sps:$4 sm:$0xff]  }
 0x564   : > { %6637 = vmatprep.subr.bf16.mxu1 %v16809_v18  ;;  %v16878_v18 = vld [vmem:[#allocation7 + $0x10dc] ss:$28 sps:$4 sm:$0xff]  }
 0x565   : > { %6380 = vmatpush1.bf16.msra.mxu0 %v16804_v20  ;;  %v16881_v20 = vld [vmem:[#allocation7 + $0x10e4] ss:$28 sps:$4 sm:$0xff]  }
 0x566   : > { %6638 = vmatpush1.bf16.msra.mxu1 %v16807_v37  ;;  %6381 = vmatprep.subr.bf16.mxu0 %v16812_v43  ;;  %v16876_v37 = vld [vmem:[#allocation7 + $0x10d8] ss:$28 sps:$4 sm:$0xff]   ;;  %v16879_v43 = vld [vmem:[#allocation7 + $0x10e0] ss:$28 sps:$4 sm:$0xff]  }
 0x567   : > { %6639 = vmatprep.subr.bf16.mxu1 %v16815_v57  ;;  %v16884_v57 = vld [vmem:[#allocation7 + $0x1114] ss:$28 sps:$4 sm:$0xff]  }
 0x569   : > { %6382 = vmatpush1.bf16.msra.mxu0 %v16810_v34  ;;  %v16887_v34 = vld [vmem:[#allocation7 + $0x111c] ss:$28 sps:$4 sm:$0xff]  }
 0x56a   : > { %6640 = vmatpush1.bf16.msra.mxu1 %v16813_v54  ;;  %6383 = vmatprep.subr.bf16.mxu0 %v16818_v17  ;;  %v16882_v54 = vld [vmem:[#allocation7 + $0x1110] ss:$28 sps:$4 sm:$0xff]   ;;  %v16885_v17 = vld [vmem:[#allocation7 + $0x1118] ss:$28 sps:$4 sm:$0xff]  }
 0x56b   : > { %6641 = vmatprep.subr.bf16.mxu1 %v16821_v59  ;;  %v16890_v59 = vld [vmem:[#allocation7 + $0x114c] ss:$28 sps:$4 sm:$0xff]  }
 0x56d   : > { %6384 = vmatpush1.bf16.msra.mxu0 %v16816_v49  ;;  %v16893_v49 = vld [vmem:[#allocation7 + $0x1154] ss:$28 sps:$4 sm:$0xff]  }
 0x56e   : > { %6642 = vmatpush1.bf16.msra.mxu1 %v16819_v61  ;;  %6385 = vmatprep.subr.bf16.mxu0 %v16824_v5  ;;  %v16888_v61 = vld [vmem:[#allocation7 + $0x1148] ss:$28 sps:$4 sm:$0xff]   ;;  %v16891_v5 = vld [vmem:[#allocation7 + $0x1150] ss:$28 sps:$4 sm:$0xff]  }
 0x56f   : > { %6643 = vmatprep.subr.bf16.mxu1 %v16827_v27  ;;  %v16896_v27 = vld [vmem:[#allocation7 + $0x1184] ss:$28 sps:$4 sm:$0xff]  }
 0x571   : > { %6386 = vmatpush1.bf16.msra.mxu0 %v16822_v47  ;;  %v16899_v47 = vld [vmem:[#allocation7 + $0x118c] ss:$28 sps:$4 sm:$0xff]  }
 0x572   : > { %6644 = vmatpush1.bf16.msra.mxu1 %v16825_v38  ;;  %6387 = vmatprep.subr.bf16.mxu0 %v16830_v26  ;;  %v16894_v38 = vld [vmem:[#allocation7 + $0x1180] ss:$28 sps:$4 sm:$0xff]   ;;  %v20138_v26 = vrot.slane %v20077_v2, 1 }
 0x573   : > { %6645 = vmatprep.subr.bf16.mxu1 %v16833_v62  ;;  %v16897_v62 = vld [vmem:[#allocation7 + $0x1188] ss:$28 sps:$4 sm:$0xff]  }
 0x575   : > { %6388 = vmatpush1.bf16.msra.mxu0 %v16828_v44  ;;  %v16902_v44 = vld [vmem:[#allocation7 + $0x11bc] ss:$28 sps:$4 sm:$0xff]  }
 0x576   : > { %6646 = vmatpush1.bf16.msra.mxu1 %v16831_v8  ;;  %6389 = vmatprep.subr.bf16.mxu0 %v16836_v63  ;;  %v20142_v8 = vrot.slane %v20099_v51, 1  ;;  %v16905_v63 = vld [vmem:[#allocation7 + $0x11c4] ss:$28 sps:$4 sm:$0xff]  }
 0x577   : > { %6647 = vmatprep.subr.bf16.mxu1 %v16839_v50  ;;  %v16900_v50 = vld [vmem:[#allocation7 + $0x11b8] ss:$28 sps:$4 sm:$0xff]  }
 0x579   : > { %6390 = vmatpush1.bf16.msra.mxu0 %v16834_v30  ;;  %v16903_v30 = vld [vmem:[#allocation7 + $0x11c0] ss:$28 sps:$4 sm:$0xff]  }
 0x57a   : > { %6648 = vmatpush1.bf16.msra.mxu1 %v16837_v1  ;;  %6391 = vmatprep.subr.bf16.mxu0 %v16842_v21  ;;  %v16908_v1 = vld [vmem:[#allocation7 + $0x11f4] ss:$28 sps:$4 sm:$0xff]   ;;  %v16911_v21 = vld [vmem:[#allocation7 + $0x11fc] ss:$28 sps:$4 sm:$0xff]  }
 0x57b   : > { %6649 = vmatprep.subr.bf16.mxu1 %v16845_v45  ;;  %v16906_v45 = vld [vmem:[#allocation7 + $0x11f0] ss:$28 sps:$4 sm:$0xff]  }
 0x57d   : > { %6392 = vmatpush1.bf16.msra.mxu0 %v16840_v4  ;;  %v16909_v4 = vld [vmem:[#allocation7 + $0x11f8] ss:$28 sps:$4 sm:$0xff]  }
 0x57e   : > { %6650 = vmatpush1.bf16.msra.mxu1 %v16843_v48  ;;  %6393 = vmatprep.subr.bf16.mxu0 %v16848_v24  ;;  %v16914_v48 = vld [vmem:[#allocation7 + $0x122c] ss:$28 sps:$4 sm:$0xff]   ;;  %v16917_v24 = vld [vmem:[#allocation7 + $0x1234] ss:$28 sps:$4 sm:$0xff]  }
 0x57f   : > { %6651 = vmatprep.subr.bf16.mxu1 %v16851_v46  ;;  %v16912_v46 = vld [vmem:[#allocation7 + $0x1228] ss:$28 sps:$4 sm:$0xff]  }
 0x581   : > { %6394 = vmatpush1.bf16.msra.mxu0 %v16846_v40  ;;  %v16915_v40 = vld [vmem:[#allocation7 + $0x1230] ss:$28 sps:$4 sm:$0xff]  }
 0x582   : > { %6652 = vmatpush1.bf16.msra.mxu1 %v16849_v23  ;;  %6395 = vmatprep.subr.bf16.mxu0 %v16854_v41  ;;  %v16920_v23 = vld [vmem:[#allocation7 + $0x1264] ss:$28 sps:$4 sm:$0xff]   ;;  %v16923_v41 = vld [vmem:[#allocation7 + $0x126c] ss:$28 sps:$4 sm:$0xff]  }
 0x583   : > { %6653 = vmatprep.subr.bf16.mxu1 %v16857_v55  ;;  %v16918_v55 = vld [vmem:[#allocation7 + $0x1260] ss:$28 sps:$4 sm:$0xff]  }
 0x585   : > { %6396 = vmatpush1.bf16.msra.mxu0 %v16852_v0  ;;  %v16921_v0 = vld [vmem:[#allocation7 + $0x1268] ss:$28 sps:$4 sm:$0xff]  }
 0x586   : > { %6654 = vmatpush1.bf16.msra.mxu1 %v16855_v52  ;;  %6397 = vmatprep.subr.bf16.mxu0 %v16860_v39  ;;  %v16926_v52 = vld [vmem:[#allocation7 + $0x129c] ss:$28 sps:$4 sm:$0xff]   ;;  %v16929_v39 = vld [vmem:[#allocation7 + $0x12a4] ss:$28 sps:$4 sm:$0xff]  }
 0x587   : > { %6655 = vmatprep.subr.bf16.mxu1 %v16863_v35  ;;  %v16924_v35 = vld [vmem:[#allocation7 + $0x1298] ss:$28 sps:$4 sm:$0xff]  }
 0x589   : > { %6398 = vmatpush1.bf16.msra.mxu0 %v16858_v28  ;;  %v16927_v28 = vld [vmem:[#allocation7 + $0x12a0] ss:$28 sps:$4 sm:$0xff]  }
 0x58a   : > { %6656 = vmatpush1.bf16.msra.mxu1 %v16861_v60  ;;  %6399 = vmatprep.subr.bf16.mxu0 %v16866_v14  ;;  %v16932_v60 = vld [vmem:[#allocation7 + $0x12d4] ss:$28 sps:$4 sm:$0xff]   ;;  %v16935_v14 = vld [vmem:[#allocation7 + $0x12dc] ss:$28 sps:$4 sm:$0xff]  }
 0x58b   : > { %6657 = vmatprep.subr.bf16.mxu1 %v16869_v3  ;;  %v16930_v3 = vld [vmem:[#allocation7 + $0x12d0] ss:$28 sps:$4 sm:$0xff]  }
 0x58d   : > { %6400 = vmatpush1.bf16.msra.mxu0 %v16864_v13  ;;  %v16933_v13 = vld [vmem:[#allocation7 + $0x12d8] ss:$28 sps:$4 sm:$0xff]  }
 0x58e   : > { %6658 = vmatpush1.bf16.msra.mxu1 %v16867_v16  ;;  %6401 = vmatprep.subr.bf16.mxu0 %v16872_v32  ;;  %v16938_v16 = vld [vmem:[#allocation7 + $0x130c] ss:$28 sps:$4 sm:$0xff]   ;;  %v16941_v32 = vld [vmem:[#allocation7 + $0x1314] ss:$28 sps:$4 sm:$0xff]  }
 0x58f   : > { %6659 = vmatprep.subr.bf16.mxu1 %v16875_v15  ;;  %v16936_v15 = vld [vmem:[#allocation7 + $0x1308] ss:$28 sps:$4 sm:$0xff]  }
 0x591   : > { %6402 = vmatpush1.bf16.msra.mxu0 %v16870_v42  ;;  %v16939_v42 = vld [vmem:[#allocation7 + $0x1310] ss:$28 sps:$4 sm:$0xff]  }
 0x592   : > { %6660 = vmatpush1.bf16.msra.mxu1 %v16873_v58  ;;  %6403 = vmatprep.subr.bf16.mxu0 %v16878_v18  ;;  %v16944_v58 = vld [vmem:[#allocation7 + $0x1344] ss:$28 sps:$4 sm:$0xff]   ;;  %v16947_v18 = vld [vmem:[#allocation7 + $0x134c] ss:$28 sps:$4 sm:$0xff]  }
 0x593   : > { %6661 = vmatprep.subr.bf16.mxu1 %v16881_v20  ;;  %v16942_v20 = vld [vmem:[#allocation7 + $0x1340] ss:$28 sps:$4 sm:$0xff]  }
 0x595   : > { %6404 = vmatpush1.bf16.msra.mxu0 %v16876_v37  ;;  %v16945_v37 = vld [vmem:[#allocation7 + $0x1348] ss:$28 sps:$4 sm:$0xff]  }
 0x596   : > { %6662 = vmatpush1.bf16.msra.mxu1 %v16879_v43  ;;  %6405 = vmatprep.subr.bf16.mxu0 %v16884_v57  ;;  %v16950_v43 = vld [vmem:[#allocation7 + $0x137c] ss:$28 sps:$4 sm:$0xff]   ;;  %v16953_v57 = vld [vmem:[#allocation7 + $0x1384] ss:$28 sps:$4 sm:$0xff]  }
 0x597   : > { %6663 = vmatprep.subr.bf16.mxu1 %v16887_v34  ;;  %v16948_v34 = vld [vmem:[#allocation7 + $0x1378] ss:$28 sps:$4 sm:$0xff]  }
 0x599   : > { %6406 = vmatpush1.bf16.msra.mxu0 %v16882_v54  ;;  %v16951_v54 = vld [vmem:[#allocation7 + $0x1380] ss:$28 sps:$4 sm:$0xff]  }
 0x59a   : > { %6664 = vmatpush1.bf16.msra.mxu1 %v16885_v17  ;;  %6407 = vmatprep.subr.bf16.mxu0 %v16890_v59  ;;  %v16956_v17 = vld [vmem:[#allocation7 + $0x13b4] ss:$28 sps:$4 sm:$0xff]   ;;  %v16959_v59 = vld [vmem:[#allocation7 + $0x13bc] ss:$28 sps:$4 sm:$0xff]  }
 0x59b   : > { %6665 = vmatprep.subr.bf16.mxu1 %v16893_v49  ;;  %v16954_v49 = vld [vmem:[#allocation7 + $0x13b0] ss:$28 sps:$4 sm:$0xff]  }
 0x59d   : > { %6408 = vmatpush1.bf16.msra.mxu0 %v16888_v61  ;;  %v16957_v61 = vld [vmem:[#allocation7 + $0x13b8] ss:$28 sps:$4 sm:$0xff]  }
 0x59e   : > { %6666 = vmatpush1.bf16.msra.mxu1 %v16891_v5  ;;  %6420 = vmatprep.subr.bf16.mxu0 %v16896_v27  ;;  %v16962_v5 = vld [vmem:[#allocation7 + $0x13ec] ss:$28 sps:$4 sm:$0xff]   ;;  %v16965_v27 = vld [vmem:[#allocation7 + $0x13f4] ss:$28 sps:$4 sm:$0xff]  }
 0x59f   : > { %6678 = vmatprep.subr.bf16.mxu1 %v16899_v47  ;;  %v16960_v47 = vld [vmem:[#allocation7 + $0x13e8] ss:$28 sps:$4 sm:$0xff]  }
 0x5a0   : > { %6410 = vmatmul.mubr.bf16.vlgmr.msra.gmra.mrb[16].mxu0 %v20138_v26 }
 0x5a1   : > { %6668 = vmatmul.mubr.bf16.vlgmr.msra.gmra.mrb[12].mxu1 %v20138_v26  ;;  %6421 = vmatpush1.bf16.msra.mxu0 %v16894_v38  ;;  %v16963_v38 = vld [vmem:[#allocation7 + $0x13f0] ss:$28 sps:$4 sm:$0xff]  }
 0x5a2   : > { %6452 = vmatprep.mubr.bf16.mxu0 %v20142_v8  ;;  %6679 = vmatpush1.bf16.msra.mxu1 %v16897_v62  ;;  %v16968_v62 = vld [vmem:[#allocation7 + $0x1424] ss:$28 sps:$4 sm:$0xff]  }
 0x5a3   : > { %6710 = vmatprep.mubr.bf16.mxu1 %v20142_v8  ;;  %6422 = vmatprep.subr.bf16.mxu0 %v16902_v44  ;;  %v16971_v44 = vld [vmem:[#allocation7 + $0x142c] ss:$28 sps:$4 sm:$0xff]  }
 0x5a4   : > { %6680 = vmatprep.subr.bf16.mxu1 %v16905_v63  ;;  %v16966_v63 = vld [vmem:[#allocation7 + $0x1420] ss:$28 sps:$4 sm:$0xff]  }
 0x5a5   : > { %6423 = vmatpush1.bf16.msra.mxu0 %v16900_v50  ;;  %v16969_v50 = vld [vmem:[#allocation7 + $0x1428] ss:$28 sps:$4 sm:$0xff]  }
 0x5a6   : > { %6681 = vmatpush1.bf16.msra.mxu1 %v16903_v30  ;;  %6424 = vmatprep.subr.bf16.mxu0 %v16908_v1  ;;  %v16974_v30 = vld [vmem:[#allocation7 + $0x145c] ss:$28 sps:$4 sm:$0xff]   ;;  %v16977_v1 = vld [vmem:[#allocation7 + $0x1464] ss:$28 sps:$4 sm:$0xff]  }
 0x5a7   : > { %6682 = vmatprep.subr.bf16.mxu1 %v16911_v21  ;;  %v16972_v21 = vld [vmem:[#allocation7 + $0x1458] ss:$28 sps:$4 sm:$0xff]  }
 0x5a9   : > { %6425 = vmatpush1.bf16.msra.mxu0 %v16906_v45  ;;  %v16975_v45 = vld [vmem:[#allocation7 + $0x1460] ss:$28 sps:$4 sm:$0xff]  }
 0x5aa   : > { %6683 = vmatpush1.bf16.msra.mxu1 %v16909_v4  ;;  %6426 = vmatprep.subr.bf16.mxu0 %v16914_v48  ;;  %v16980_v4 = vld [vmem:[#allocation7 + $0x1494] ss:$28 sps:$4 sm:$0xff]   ;;  %v16983_v48 = vld [vmem:[#allocation7 + $0x149c] ss:$28 sps:$4 sm:$0xff]  }
 0x5ab   : > { %6684 = vmatprep.subr.bf16.mxu1 %v16917_v24  ;;  %v16978_v24 = vld [vmem:[#allocation7 + $0x1490] ss:$28 sps:$4 sm:$0xff]  }
 0x5ad   : > { %6427 = vmatpush1.bf16.msra.mxu0 %v16912_v46  ;;  %v16981_v46 = vld [vmem:[#allocation7 + $0x1498] ss:$28 sps:$4 sm:$0xff]  }
 0x5ae   : > { %6685 = vmatpush1.bf16.msra.mxu1 %v16915_v40  ;;  %6428 = vmatprep.subr.bf16.mxu0 %v16920_v23  ;;  %v16986_v40 = vld [vmem:[#allocation7 + $0x14cc] ss:$28 sps:$4 sm:$0xff]   ;;  %v16989_v23 = vld [vmem:[#allocation7 + $0x14d4] ss:$28 sps:$4 sm:$0xff]  }
 0x5af   : > { %6686 = vmatprep.subr.bf16.mxu1 %v16923_v41  ;;  %v16984_v41 = vld [vmem:[#allocation7 + $0x14c8] ss:$28 sps:$4 sm:$0xff]  }
 0x5b1   : > { %6429 = vmatpush1.bf16.msra.mxu0 %v16918_v55  ;;  %v16987_v55 = vld [vmem:[#allocation7 + $0x14d0] ss:$28 sps:$4 sm:$0xff]  }
 0x5b2   : > { %6687 = vmatpush1.bf16.msra.mxu1 %v16921_v0  ;;  %6430 = vmatprep.subr.bf16.mxu0 %v16926_v52  ;;  %v16992_v0 = vld [vmem:[#allocation7 + $0x14] ss:$28 sps:$4 sm:$0xff]  }
 0x5b3   : > { %6688 = vmatprep.subr.bf16.mxu1 %v16929_v39  ;;  %v16993_v52 = vld [vmem:[#allocation7 + $0x1d8] ss:$28 sps:$4 sm:$0xff]   ;;  %v16990_v39 = vld [vmem:[#allocation7 + $0x10] ss:$28 sps:$4 sm:$0xff]  }
 0x5b5   : > { %6431 = vmatpush1.bf16.msra.mxu0 %v16924_v35  ;;  %v20148_v35 = vrot.slane %v20104_v33, 1 }
 0x5b6   : > { %6689 = vmatpush1.bf16.msra.mxu1 %v16927_v28  ;;  %6432 = vmatprep.subr.bf16.mxu0 %v16932_v60  ;;  %v16994_v28 = vld [vmem:[#allocation7 + $0x18] ss:$28 sps:$4 sm:$0xff]   ;;  %v16997_v60 = vld [vmem:[#allocation7 + $0x4c] ss:$28 sps:$4 sm:$0xff]  }
 0x5b7   : > { %6690 = vmatprep.subr.bf16.mxu1 %v16935_v14  ;;  %v16998_v14 = vld [vmem:[#allocation7 + $0x210] ss:$28 sps:$4 sm:$0xff]  }
 0x5b9   : > { %6433 = vmatpush1.bf16.msra.mxu0 %v16930_v3  ;;  %v16995_v3 = vld [vmem:[#allocation7 + $0x48] ss:$28 sps:$4 sm:$0xff]  }
 0x5ba   : > { %6691 = vmatpush1.bf16.msra.mxu1 %v16933_v13  ;;  %6434 = vmatprep.subr.bf16.mxu0 %v16938_v16  ;;  %v16999_v13 = vld [vmem:[#allocation7 + $0x50] ss:$28 sps:$4 sm:$0xff]   ;;  %v17002_v16 = vld [vmem:[#allocation7 + $0x84] ss:$28 sps:$4 sm:$0xff]  }
 0x5bb   : > { %6692 = vmatprep.subr.bf16.mxu1 %v16941_v32  ;;  %v17003_v32 = vld [vmem:[#allocation7 + $0x248] ss:$28 sps:$4 sm:$0xff]  }
 0x5bd   : > { %6435 = vmatpush1.bf16.msra.mxu0 %v16936_v15  ;;  %v17000_v15 = vld [vmem:[#allocation7 + $0x80] ss:$28 sps:$4 sm:$0xff]  }
 0x5be   : > { %6693 = vmatpush1.bf16.msra.mxu1 %v16939_v42  ;;  %6436 = vmatprep.subr.bf16.mxu0 %v16944_v58  ;;  %v17004_v42 = vld [vmem:[#allocation7 + $0x88] ss:$28 sps:$4 sm:$0xff]   ;;  %v17007_v58 = vld [vmem:[#allocation7 + $0xbc] ss:$28 sps:$4 sm:$0xff]  }
 0x5bf   : > { %6694 = vmatprep.subr.bf16.mxu1 %v16947_v18  ;;  %v17008_v18 = vld [vmem:[#allocation7 + $0x280] ss:$28 sps:$4 sm:$0xff]  }
 0x5c1   : > { %6437 = vmatpush1.bf16.msra.mxu0 %v16942_v20  ;;  %v17005_v20 = vld [vmem:[#allocation7 + $0xb8] ss:$28 sps:$4 sm:$0xff]  }
 0x5c2   : > { %6695 = vmatpush1.bf16.msra.mxu1 %v16945_v37  ;;  %6438 = vmatprep.subr.bf16.mxu0 %v16950_v43  ;;  %v17009_v37 = vld [vmem:[#allocation7 + $0xc0] ss:$28 sps:$4 sm:$0xff]   ;;  %v17012_v43 = vld [vmem:[#allocation7 + $0xf4] ss:$28 sps:$4 sm:$0xff]  }
 0x5c3   : > { %6696 = vmatprep.subr.bf16.mxu1 %v16953_v57  ;;  %v17013_v57 = vld [vmem:[#allocation7 + $0x2b8] ss:$28 sps:$4 sm:$0xff]  }
 0x5c5   : > { %6439 = vmatpush1.bf16.msra.mxu0 %v16948_v34  ;;  %v17014_v34 = vld [vmem:[#allocation7 + $0xf8] ss:$28 sps:$4 sm:$0xff]  }
 0x5c6   : > { %6697 = vmatpush1.bf16.msra.mxu1 %v16951_v54  ;;  %6440 = vmatprep.subr.bf16.mxu0 %v16956_v17  ;;  %v17017_v54 = vld [vmem:[#allocation7 + $0x12c] ss:$28 sps:$4 sm:$0xff]  }
 0x5c7   : > { %6698 = vmatprep.subr.bf16.mxu1 %v16959_v59  ;;  %v17018_v17 = vld [vmem:[#allocation7 + $0x2f0] ss:$28 sps:$4 sm:$0xff]   ;;  %v17015_v59 = vld [vmem:[#allocation7 + $0x128] ss:$28 sps:$4 sm:$0xff]  }
 0x5c9   : > { %6441 = vmatpush1.bf16.msra.mxu0 %v16954_v49  ;;  %v17019_v49 = vld [vmem:[#allocation7 + $0x130] ss:$28 sps:$4 sm:$0xff]  }
 0x5ca   : > { %6699 = vmatpush1.bf16.msra.mxu1 %v16957_v61  ;;  %6442 = vmatprep.subr.bf16.mxu0 %v16962_v5  ;;  %v17022_v61 = vld [vmem:[#allocation7 + $0x164] ss:$28 sps:$4 sm:$0xff]  }
 0x5cb   : > { %6700 = vmatprep.subr.bf16.mxu1 %v16965_v27  ;;  %v17023_v5 = vld [vmem:[#allocation7 + $0x328] ss:$28 sps:$4 sm:$0xff]   ;;  %v17020_v27 = vld [vmem:[#allocation7 + $0x160] ss:$28 sps:$4 sm:$0xff]  }
 0x5cd   : > { %6443 = vmatpush1.bf16.msra.mxu0 %v16960_v47  ;;  %v17024_v47 = vld [vmem:[#allocation7 + $0x168] ss:$28 sps:$4 sm:$0xff]  }
 0x5ce   : > { %6701 = vmatpush1.bf16.msra.mxu1 %v16963_v38  ;;  %6444 = vmatprep.subr.bf16.mxu0 %v16968_v62  ;;  %v17027_v38 = vld [vmem:[#allocation7 + $0x19c] ss:$28 sps:$4 sm:$0xff]  }
 0x5cf   : > { %6702 = vmatprep.subr.bf16.mxu1 %v16971_v44  ;;  %v17028_v62 = vld [vmem:[#allocation7 + $0x360] ss:$28 sps:$4 sm:$0xff]   ;;  %v17025_v44 = vld [vmem:[#allocation7 + $0x198] ss:$28 sps:$4 sm:$0xff]  }
 0x5d1   : > { %6445 = vmatpush1.bf16.msra.mxu0 %v16966_v63  ;;  %v17029_v63 = vld [vmem:[#allocation7 + $0x1a0] ss:$28 sps:$4 sm:$0xff]  }
 0x5d2   : > { %6703 = vmatpush1.bf16.msra.mxu1 %v16969_v50  ;;  %6446 = vmatprep.subr.bf16.mxu0 %v16974_v30  ;;  %v17032_v50 = vld [vmem:[#allocation7 + $0x1d4] ss:$28 sps:$4 sm:$0xff]  }
 0x5d3   : > { %6704 = vmatprep.subr.bf16.mxu1 %v16977_v1  ;;  %v17033_v30 = vld [vmem:[#allocation7 + $0x558] ss:$28 sps:$4 sm:$0xff]   ;;  %v17030_v1 = vld [vmem:[#allocation7 + $0x1d0] ss:$28 sps:$4 sm:$0xff]  }
 0x5d5   : > { %6447 = vmatpush1.bf16.msra.mxu0 %v16972_v21  ;;  %v17034_v21 = vld [vmem:[#allocation7 + $0x398] ss:$28 sps:$4 sm:$0xff]  }
 0x5d6   : > { %6705 = vmatpush1.bf16.msra.mxu1 %v16975_v45  ;;  %6448 = vmatprep.subr.bf16.mxu0 %v16980_v4  ;;  %v17037_v45 = vld [vmem:[#allocation7 + $0x20c] ss:$28 sps:$4 sm:$0xff]  }
 0x5d7   : > { %6706 = vmatprep.subr.bf16.mxu1 %v16983_v48  ;;  %v17038_v4 = vld [vmem:[#allocation7 + $0x590] ss:$28 sps:$4 sm:$0xff]   ;;  %v17035_v48 = vld [vmem:[#allocation7 + $0x208] ss:$28 sps:$4 sm:$0xff]  }
 0x5d9   : > { %6449 = vmatpush1.bf16.msra.mxu0 %v16978_v24  ;;  %v17039_v24 = vld [vmem:[#allocation7 + $0x3d0] ss:$28 sps:$4 sm:$0xff]  }
 0x5da   : > { %6707 = vmatpush1.bf16.msra.mxu1 %v16981_v46  ;;  %6450 = vmatprep.subr.bf16.mxu0 %v16986_v40  ;;  %v17042_v46 = vld [vmem:[#allocation7 + $0x244] ss:$28 sps:$4 sm:$0xff]  }
 0x5db   : > { %6708 = vmatprep.subr.bf16.mxu1 %v16989_v23  ;;  %v17043_v40 = vld [vmem:[#allocation7 + $0x5c8] ss:$28 sps:$4 sm:$0xff]   ;;  %v17040_v23 = vld [vmem:[#allocation7 + $0x240] ss:$28 sps:$4 sm:$0xff]  }
 0x5dd   : > { %6451 = vmatpush1.bf16.msra.mxu0 %v16984_v41  ;;  %v17044_v41 = vld [vmem:[#allocation7 + $0x408] ss:$28 sps:$4 sm:$0xff]  }
 0x5de   : > { %6709 = vmatpush1.bf16.msra.mxu1 %v16987_v55  ;;  %6721 = vmatprep.subr.bf16.mxu0 %v16992_v0  ;;  %v17047_v55 = vld [vmem:[#allocation7 + $0x27c] ss:$28 sps:$4 sm:$0xff]  }
 0x5df   : > { %15705 = vmatprep.subr.bf16.mxu1 %v16993_v52  ;;  %v17048_v0 = vld [vmem:[#allocation7 + $0x600] ss:$28 sps:$4 sm:$0xff]   ;;  %v17045_v52 = vld [vmem:[#allocation7 + $0x278] ss:$28 sps:$4 sm:$0xff]  }
 0x5e0   : > { %6453 = vmatmul.mubr.bf16.vlgmr.msra.gmra.mrb[16].mxu0 %v20148_v35 }
 0x5e1   : > { %6711 = vmatmul.mubr.bf16.vlgmr.msra.gmra.mrb[12].mxu1 %v20148_v35  ;;  %6722 = vmatpush1.bf16.msra.mxu0 %v16990_v39  ;;  %v17049_v39 = vld [vmem:[#allocation7 + $0x440] ss:$28 sps:$4 sm:$0xff]  }
 0x5e2   : > { %6753 = vmatprep.mubr.bf16.mxu0 %v20081_v25  ;;  %15706 = vmatpush3.bf16.msra.mxu1 %v16994_v28  ;;  %v17052_v28 = vld [vmem:[#allocation7 + $0x2b4] ss:$28 sps:$4 sm:$0xff]  }
 0x5e3   : > { %7011 = vmatprep.mubr.bf16.mxu1 %v20081_v25  ;;  %6723 = vmatprep.subr.bf16.mxu0 %v16997_v60  ;;  %v17010_v25 = vld [vmem:[#allocation7 + $0xf0] ss:$28 sps:$4 sm:$0xff]   ;;  %v17053_v60 = vld [vmem:[#allocation7 + $0x638] ss:$28 sps:$4 sm:$0xff]  }
 0x5e4   : > { %15707 = vmatprep.subr.bf16.mxu1 %v16998_v14  ;;  %v17050_v14 = vld [vmem:[#allocation7 + $0x2b0] ss:$28 sps:$4 sm:$0xff]  }
 0x5e5   : > { %6724 = vmatpush1.bf16.msra.mxu0 %v16995_v3  ;;  %v17054_v3 = vld [vmem:[#allocation7 + $0x478] ss:$28 sps:$4 sm:$0xff]  }
 0x5e6   : > { %15708 = vmatpush3.bf16.msra.mxu1 %v16999_v13  ;;  %6725 = vmatprep.subr.bf16.mxu0 %v17002_v16  ;;  %v17057_v13 = vld [vmem:[#allocation7 + $0x2ec] ss:$28 sps:$4 sm:$0xff]  }
 0x5e7   : > { %15709 = vmatprep.subr.bf16.mxu1 %v17003_v32  ;;  %v17058_v16 = vld [vmem:[#allocation7 + $0x670] ss:$28 sps:$4 sm:$0xff]   ;;  %v17055_v32 = vld [vmem:[#allocation7 + $0x2e8] ss:$28 sps:$4 sm:$0xff]  }
 0x5e9   : > { %6726 = vmatpush1.bf16.msra.mxu0 %v17000_v15  ;;  %v17059_v15 = vld [vmem:[#allocation7 + $0x4b0] ss:$28 sps:$4 sm:$0xff]  }
 0x5ea   : > { %15710 = vmatpush3.bf16.msra.mxu1 %v17004_v42  ;;  %6727 = vmatprep.subr.bf16.mxu0 %v17007_v58  ;;  %v17062_v42 = vld [vmem:[#allocation7 + $0x324] ss:$28 sps:$4 sm:$0xff]  }
 0x5eb   : > { %15711 = vmatprep.subr.bf16.mxu1 %v17008_v18  ;;  %v17063_v58 = vld [vmem:[#allocation7 + $0x6a8] ss:$28 sps:$4 sm:$0xff]   ;;  %v17060_v18 = vld [vmem:[#allocation7 + $0x320] ss:$28 sps:$4 sm:$0xff]  }
 0x5ed   : > { %6728 = vmatpush1.bf16.msra.mxu0 %v17005_v20  ;;  %v17064_v20 = vld [vmem:[#allocation7 + $0x4e8] ss:$28 sps:$4 sm:$0xff]  }
 0x5ee   : > { %15712 = vmatpush3.bf16.msra.mxu1 %v17009_v37  ;;  %6729 = vmatprep.subr.bf16.mxu0 %v17012_v43  ;;  %v17067_v37 = vld [vmem:[#allocation7 + $0x35c] ss:$28 sps:$4 sm:$0xff]  }
 0x5ef   : > { %15713 = vmatprep.subr.bf16.mxu1 %v17013_v57  ;;  %v17068_v43 = vld [vmem:[#allocation7 + $0x6e0] ss:$28 sps:$4 sm:$0xff]   ;;  %v17065_v57 = vld [vmem:[#allocation7 + $0x358] ss:$28 sps:$4 sm:$0xff]  }
 0x5f1   : > { %6730 = vmatpush1.bf16.msra.mxu0 %v17010_v25  ;;  %v17069_v25 = vld [vmem:[#allocation7 + $0x520] ss:$28 sps:$4 sm:$0xff]  }
 0x5f2   : > { %15714 = vmatpush3.bf16.msra.mxu1 %v17014_v34  ;;  %6731 = vmatprep.subr.bf16.mxu0 %v17017_v54  ;;  %v17072_v34 = vld [vmem:[#allocation7 + $0x394] ss:$28 sps:$4 sm:$0xff]  }
 0x5f3   : > { %15715 = vmatprep.subr.bf16.mxu1 %v17018_v17  ;;  %v17073_v54 = vld [vmem:[#allocation7 + $0x8d8] ss:$28 sps:$4 sm:$0xff]   ;;  %v17070_v17 = vld [vmem:[#allocation7 + $0x390] ss:$28 sps:$4 sm:$0xff]  }
 0x5f5   : > { %6732 = vmatpush1.bf16.msra.mxu0 %v17015_v59  ;;  %v17074_v59 = vld [vmem:[#allocation7 + $0x718] ss:$28 sps:$4 sm:$0xff]  }
 0x5f6   : > { %15716 = vmatpush3.bf16.msra.mxu1 %v17019_v49  ;;  %6733 = vmatprep.subr.bf16.mxu0 %v17022_v61  ;;  %v17077_v49 = vld [vmem:[#allocation7 + $0x3cc] ss:$28 sps:$4 sm:$0xff]  }
 0x5f7   : > { %15717 = vmatprep.subr.bf16.mxu1 %v17023_v5  ;;  %v17078_v61 = vld [vmem:[#allocation7 + $0x910] ss:$28 sps:$4 sm:$0xff]   ;;  %v17075_v5 = vld [vmem:[#allocation7 + $0x3c8] ss:$28 sps:$4 sm:$0xff]  }
 0x5f9   : > { %6734 = vmatpush1.bf16.msra.mxu0 %v17020_v27  ;;  %v17079_v27 = vld [vmem:[#allocation7 + $0x750] ss:$28 sps:$4 sm:$0xff]  }
 0x5fa   : > { %15718 = vmatpush3.bf16.msra.mxu1 %v17024_v47  ;;  %6735 = vmatprep.subr.bf16.mxu0 %v17027_v38  ;;  %v17082_v47 = vld [vmem:[#allocation7 + $0x404] ss:$28 sps:$4 sm:$0xff]  }
 0x5fb   : > { %15719 = vmatprep.subr.bf16.mxu1 %v17028_v62  ;;  %v17083_v38 = vld [vmem:[#allocation7 + $0x948] ss:$28 sps:$4 sm:$0xff]   ;;  %v17080_v62 = vld [vmem:[#allocation7 + $0x400] ss:$28 sps:$4 sm:$0xff]  }
 0x5fd   : > { %6736 = vmatpush1.bf16.msra.mxu0 %v17025_v44  ;;  %v17087_v44 = vld [vmem:[#allocation7 + $0x43c] ss:$28 sps:$4 sm:$0xff]  }
 0x5fe   : > { %15720 = vmatpush3.bf16.msra.mxu1 %v17029_v63  ;;  %6737 = vmatprep.subr.bf16.mxu0 %v17032_v50  ;;  %v17088_v63 = vld [vmem:[#allocation7 + $0x980] ss:$28 sps:$4 sm:$0xff]   ;;  %v17085_v50 = vld [vmem:[#allocation7 + $0x438] ss:$28 sps:$4 sm:$0xff]  }
 0x5ff   : > { %15727 = vmatprep.subr.bf16.mxu1 %v17033_v30  ;;  %v17092_v30 = vld [vmem:[#allocation7 + $0x474] ss:$28 sps:$4 sm:$0xff]  }
 0x601   : > { %7012 = vmatmul.mubr.bf16.vlgmr.msra.gmra.mrb[16].mxu1 %v20077_v2  ;;  %6738 = vmatpush1.bf16.msra.mxu0 %v17030_v1  ;;  %v17093_v1 = vld [vmem:[#allocation7 + $0x9b8] ss:$28 sps:$4 sm:$0xff]  }
 0x602   : > { %15728 = vmatpush3.bf16.msra.mxu1 %v17034_v21  ;;  %7052 = vmatprep.mubr.bf16.mxu1 %v20099_v51  ;;  %v17090_v21 = vld [vmem:[#allocation7 + $0x470] ss:$28 sps:$4 sm:$0xff]  }
 0x603   : > { %6739 = vmatprep.subr.bf16.mxu0 %v17037_v45  ;;  %15729 = vmatprep.subr.bf16.mxu1 %v17038_v4  ;;  %v17094_v45 = vld [vmem:[#allocation7 + $0x7f8] ss:$28 sps:$4 sm:$0xff]   ;;  %v17097_v4 = vld [vmem:[#allocation7 + $0x4ac] ss:$28 sps:$4 sm:$0xff]  }
 0x605   : > { %6740 = vmatpush1.bf16.msra.mxu0 %v17035_v48  ;;  %v17098_v48 = vld [vmem:[#allocation7 + $0x9f0] ss:$28 sps:$4 sm:$0xff]  }
 0x606   : > { %15730 = vmatpush3.bf16.msra.mxu1 %v17039_v24  ;;  %6741 = vmatprep.subr.bf16.mxu0 %v17042_v46  ;;  %v17095_v24 = vld [vmem:[#allocation7 + $0x4a8] ss:$28 sps:$4 sm:$0xff]   ;;  %v17099_v46 = vld [vmem:[#allocation7 + $0x830] ss:$28 sps:$4 sm:$0xff]  }
 0x607   : > { %15731 = vmatprep.subr.bf16.mxu1 %v17043_v40  ;;  %v17102_v40 = vld [vmem:[#allocation7 + $0x4e4] ss:$28 sps:$4 sm:$0xff]  }
 0x609   : > { %6742 = vmatpush1.bf16.msra.mxu0 %v17040_v23  ;;  %v17103_v23 = vld [vmem:[#allocation7 + $0xa28] ss:$28 sps:$4 sm:$0xff]  }
 0x60a   : > { %15732 = vmatpush3.bf16.msra.mxu1 %v17044_v41  ;;  %6743 = vmatprep.subr.bf16.mxu0 %v17047_v55  ;;  %v17100_v41 = vld [vmem:[#allocation7 + $0x4e0] ss:$28 sps:$4 sm:$0xff]   ;;  %v17104_v55 = vld [vmem:[#allocation7 + $0x868] ss:$28 sps:$4 sm:$0xff]  }
 0x60b   : > { %15733 = vmatprep.subr.bf16.mxu1 %v17048_v0  ;;  %v17107_v0 = vld [vmem:[#allocation7 + $0x51c] ss:$28 sps:$4 sm:$0xff]  }
 0x60d   : > { %6744 = vmatpush1.bf16.msra.mxu0 %v17045_v52  ;;  %v17108_v52 = vld [vmem:[#allocation7 + $0xa60] ss:$28 sps:$4 sm:$0xff]  }
 0x60e   : > { %15734 = vmatpush3.bf16.msra.mxu1 %v17049_v39  ;;  %6745 = vmatprep.subr.bf16.mxu0 %v17052_v28  ;;  %v17105_v39 = vld [vmem:[#allocation7 + $0x518] ss:$28 sps:$4 sm:$0xff]   ;;  %v17109_v28 = vld [vmem:[#allocation7 + $0x8a0] ss:$28 sps:$4 sm:$0xff]  }
 0x60f   : > { %15735 = vmatprep.subr.bf16.mxu1 %v17053_v60  ;;  %v17112_v60 = vld [vmem:[#allocation7 + $0x554] ss:$28 sps:$4 sm:$0xff]  }
 0x611   : > { %6746 = vmatpush1.bf16.msra.mxu0 %v17050_v14  ;;  %v17113_v14 = vld [vmem:[#allocation7 + $0xc58] ss:$28 sps:$4 sm:$0xff]  }
 0x612   : > { %15736 = vmatpush3.bf16.msra.mxu1 %v17054_v3  ;;  %6747 = vmatprep.subr.bf16.mxu0 %v17057_v13  ;;  %v17110_v3 = vld [vmem:[#allocation7 + $0x550] ss:$28 sps:$4 sm:$0xff]   ;;  %v17114_v13 = vld [vmem:[#allocation7 + $0xa98] ss:$28 sps:$4 sm:$0xff]  }
 0x613   : > { %15737 = vmatprep.subr.bf16.mxu1 %v17058_v16  ;;  %v17117_v16 = vld [vmem:[#allocation7 + $0x58c] ss:$28 sps:$4 sm:$0xff]  }
 0x615   : > { %6748 = vmatpush1.bf16.msra.mxu0 %v17055_v32  ;;  %v17118_v32 = vld [vmem:[#allocation7 + $0xc90] ss:$28 sps:$4 sm:$0xff]  }
 0x616   : > { %15738 = vmatpush3.bf16.msra.mxu1 %v17059_v15  ;;  %6749 = vmatprep.subr.bf16.mxu0 %v17062_v42  ;;  %v17115_v15 = vld [vmem:[#allocation7 + $0x588] ss:$28 sps:$4 sm:$0xff]   ;;  %v17119_v42 = vld [vmem:[#allocation7 + $0xad0] ss:$28 sps:$4 sm:$0xff]  }
 0x617   : > { %15739 = vmatprep.subr.bf16.mxu1 %v17063_v58  ;;  %v17122_v58 = vld [vmem:[#allocation7 + $0x5c4] ss:$28 sps:$4 sm:$0xff]  }
 0x619   : > { %6750 = vmatpush1.bf16.msra.mxu0 %v17060_v18  ;;  %v17123_v18 = vld [vmem:[#allocation7 + $0xcc8] ss:$28 sps:$4 sm:$0xff]  }
 0x61a   : > { %15740 = vmatpush3.bf16.msra.mxu1 %v17064_v20  ;;  %6751 = vmatprep.subr.bf16.mxu0 %v17067_v37  ;;  %v17120_v20 = vld [vmem:[#allocation7 + $0x5c0] ss:$28 sps:$4 sm:$0xff]   ;;  %v17124_v37 = vld [vmem:[#allocation7 + $0xb08] ss:$28 sps:$4 sm:$0xff]  }
 0x61b   : > { %15741 = vmatprep.subr.bf16.mxu1 %v17068_v43  ;;  %v17127_v43 = vld [vmem:[#allocation7 + $0x5fc] ss:$28 sps:$4 sm:$0xff]  }
 0x61d   : > { %6752 = vmatpush1.bf16.msra.mxu0 %v17065_v57  ;;  %v17128_v57 = vld [vmem:[#allocation7 + $0xd00] ss:$28 sps:$4 sm:$0xff]  }
 0x61e   : > { %15742 = vmatpush3.bf16.msra.mxu1 %v17069_v25  ;;  %6764 = vmatprep.subr.bf16.mxu0 %v17072_v34  ;;  %v17125_v25 = vld [vmem:[#allocation7 + $0x5f8] ss:$28 sps:$4 sm:$0xff]   ;;  %v17129_v34 = vld [vmem:[#allocation7 + $0xb40] ss:$28 sps:$4 sm:$0xff]  }
 0x61f   : > { %15749 = vmatprep.subr.bf16.mxu1 %v17073_v54  ;;  %v17132_v54 = vld [vmem:[#allocation7 + $0x634] ss:$28 sps:$4 sm:$0xff]  }
 0x620   : > { %6754 = vmatmul.mubr.bf16.vlgmr.msra.gmra.mrb[20].mxu0 %v20077_v2  ;;  %v17084_v2 = vld [vmem:[#allocation7 + $0x788] ss:$28 sps:$4 sm:$0xff]  }
 0x621   : > { %7053 = vmatmul.mubr.bf16.vlgmr.msra.gmra.mrb[20].mxu1 %v20104_v33  ;;  %6765 = vmatpush1.bf16.msra.mxu0 %v17070_v17  ;;  %v17133_v17 = vld [vmem:[#allocation7 + $0xd38] ss:$28 sps:$4 sm:$0xff]  }
 0x622   : > { %6796 = vmatprep.mubr.bf16.mxu0 %v20099_v51  ;;  %15750 = vmatpush3.bf16.msra.mxu1 %v17074_v59  ;;  %v17089_v51 = vld [vmem:[#allocation7 + $0x7c0] ss:$28 sps:$4 sm:$0xff]   ;;  %v17130_v59 = vld [vmem:[#allocation7 + $0x630] ss:$28 sps:$4 sm:$0xff]  }
 0x623   : > { %7093 = vmatprep.mubr.bf16.mxu1 %v20110_v56  ;;  %6766 = vmatprep.subr.bf16.mxu0 %v17077_v49  ;;  %v17134_v49 = vld [vmem:[#allocation7 + $0xb78] ss:$28 sps:$4 sm:$0xff]  }
 0x624   : > { %15751 = vmatprep.subr.bf16.mxu1 %v17078_v61  ;;  %v17137_v61 = vld [vmem:[#allocation7 + $0x66c] ss:$28 sps:$4 sm:$0xff]  }
 0x625   : > { %6767 = vmatpush1.bf16.msra.mxu0 %v17075_v5  ;;  %v17138_v5 = vld [vmem:[#allocation7 + $0xd70] ss:$28 sps:$4 sm:$0xff]  }
 0x626   : > { %15752 = vmatpush3.bf16.msra.mxu1 %v17079_v27  ;;  %6768 = vmatprep.subr.bf16.mxu0 %v17082_v47  ;;  %v17135_v27 = vld [vmem:[#allocation7 + $0x668] ss:$28 sps:$4 sm:$0xff]   ;;  %v17139_v47 = vld [vmem:[#allocation7 + $0xbb0] ss:$28 sps:$4 sm:$0xff]  }
 0x627   : > { %15753 = vmatprep.subr.bf16.mxu1 %v17083_v38  ;;  %v17142_v38 = vld [vmem:[#allocation7 + $0x6a4] ss:$28 sps:$4 sm:$0xff]  }
 0x629   : > { %6769 = vmatpush1.bf16.msra.mxu0 %v17080_v62  ;;  %v17143_v62 = vld [vmem:[#allocation7 + $0xda8] ss:$28 sps:$4 sm:$0xff]  }
 0x62a   : > { %15754 = vmatpush3.bf16.msra.mxu1 %v17084_v2  ;;  %6770 = vmatprep.subr.bf16.mxu0 %v17087_v44  ;;  %v17140_v2 = vld [vmem:[#allocation7 + $0x6a0] ss:$28 sps:$4 sm:$0xff]   ;;  %v17144_v44 = vld [vmem:[#allocation7 + $0xbe8] ss:$28 sps:$4 sm:$0xff]  }
 0x62b   : > { %15755 = vmatprep.subr.bf16.mxu1 %v17088_v63  ;;  %v17147_v63 = vld [vmem:[#allocation7 + $0x6dc] ss:$28 sps:$4 sm:$0xff]  }
 0x62d   : > { %6771 = vmatpush1.bf16.msra.mxu0 %v17085_v50  ;;  %v17148_v50 = vld [vmem:[#allocation7 + $0xde0] ss:$28 sps:$4 sm:$0xff]  }
 0x62e   : > { %15756 = vmatpush3.bf16.msra.mxu1 %v17089_v51  ;;  %6772 = vmatprep.subr.bf16.mxu0 %v17092_v30  ;;  %v17145_v51 = vld [vmem:[#allocation7 + $0x6d8] ss:$28 sps:$4 sm:$0xff]   ;;  %v17149_v30 = vld [vmem:[#allocation7 + $0xc20] ss:$28 sps:$4 sm:$0xff]  }
 0x62f   : > { %15757 = vmatprep.subr.bf16.mxu1 %v17093_v1  ;;  %v17152_v1 = vld [vmem:[#allocation7 + $0x714] ss:$28 sps:$4 sm:$0xff]  }
 0x631   : > { %6773 = vmatpush1.bf16.msra.mxu0 %v17090_v21  ;;  %v17153_v21 = vld [vmem:[#allocation7 + $0xfd8] ss:$28 sps:$4 sm:$0xff]  }
 0x632   : > { %15758 = vmatpush3.bf16.msra.mxu1 %v17094_v45  ;;  %6774 = vmatprep.subr.bf16.mxu0 %v17097_v4  ;;  %v17150_v45 = vld [vmem:[#allocation7 + $0x710] ss:$28 sps:$4 sm:$0xff]   ;;  %v17154_v4 = vld [vmem:[#allocation7 + $0xe18] ss:$28 sps:$4 sm:$0xff]  }
 0x633   : > { %15759 = vmatprep.subr.bf16.mxu1 %v17098_v48  ;;  %v17157_v48 = vld [vmem:[#allocation7 + $0x74c] ss:$28 sps:$4 sm:$0xff]  }
 0x635   : > { %6775 = vmatpush1.bf16.msra.mxu0 %v17095_v24  ;;  %v17158_v24 = vld [vmem:[#allocation7 + $0x1010] ss:$28 sps:$4 sm:$0xff]  }
 0x636   : > { %15760 = vmatpush3.bf16.msra.mxu1 %v17099_v46  ;;  %6776 = vmatprep.subr.bf16.mxu0 %v17102_v40  ;;  %v17155_v46 = vld [vmem:[#allocation7 + $0x748] ss:$28 sps:$4 sm:$0xff]   ;;  %v17159_v40 = vld [vmem:[#allocation7 + $0xe50] ss:$28 sps:$4 sm:$0xff]  }
 0x637   : > { %15761 = vmatprep.subr.bf16.mxu1 %v17103_v23  ;;  %v17162_v23 = vld [vmem:[#allocation7 + $0x784] ss:$28 sps:$4 sm:$0xff]  }
 0x639   : > { %6777 = vmatpush1.bf16.msra.mxu0 %v17100_v41  ;;  %v17163_v41 = vld [vmem:[#allocation7 + $0x1048] ss:$28 sps:$4 sm:$0xff]  }
 0x63a   : > { %15762 = vmatpush3.bf16.msra.mxu1 %v17104_v55  ;;  %6778 = vmatprep.subr.bf16.mxu0 %v17107_v0  ;;  %v17160_v55 = vld [vmem:[#allocation7 + $0x780] ss:$28 sps:$4 sm:$0xff]  }
 0x63b   : > { %15763 = vmatprep.subr.bf16.mxu1 %v17108_v52  ;;  %v17167_v0 = vld [vmem:[#allocation7 + $0x7bc] ss:$28 sps:$4 sm:$0xff]  }
 0x63c   : > { %v17168_v52 = vld [vmem:[#allocation7 + $0x1080] ss:$28 sps:$4 sm:$0xff]  }
 0x63d   : > { %6779 = vmatpush1.bf16.msra.mxu0 %v17105_v39  ;;  %v17165_v39 = vld [vmem:[#allocation7 + $0x7b8] ss:$28 sps:$4 sm:$0xff]  }
 0x63e   : > { %15764 = vmatpush3.bf16.msra.mxu1 %v17109_v28  ;;  %6780 = vmatprep.subr.bf16.mxu0 %v17112_v60  ;;  %v17172_v28 = vld [vmem:[#allocation7 + $0x7f4] ss:$28 sps:$4 sm:$0xff]  }
 0x63f   : > { %15771 = vmatprep.subr.bf16.mxu1 %v17113_v14  ;;  %v17173_v60 = vld [vmem:[#allocation7 + $0x10b8] ss:$28 sps:$4 sm:$0xff]   ;;  %v17170_v14 = vld [vmem:[#allocation7 + $0x7f0] ss:$28 sps:$4 sm:$0xff]  }
 0x641   : > { %7094 = vmatmul.mubr.bf16.vlgmr.msra.gmra.mrb[24].mxu1 %v20118_v36  ;;  %6781 = vmatpush1.bf16.msra.mxu0 %v17110_v3  ;;  %v17174_v3 = vld [vmem:[#allocation7 + $0xef8] ss:$28 sps:$4 sm:$0xff]  }
 0x642   : > { %15772 = vmatpush3.bf16.msra.mxu1 %v17114_v13  ;;  %7134 = vmatprep.mubr.bf16.mxu1 %v20120_v31  ;;  %v17177_v13 = vld [vmem:[#allocation7 + $0x82c] ss:$28 sps:$4 sm:$0xff]  }
 0x643   : > { %6782 = vmatprep.subr.bf16.mxu0 %v17117_v16  ;;  %15773 = vmatprep.subr.bf16.mxu1 %v17118_v32  ;;  %v17178_v16 = vld [vmem:[#allocation7 + $0x10f0] ss:$28 sps:$4 sm:$0xff]   ;;  %v17175_v32 = vld [vmem:[#allocation7 + $0x828] ss:$28 sps:$4 sm:$0xff]  }
 0x645   : > { %6783 = vmatpush1.bf16.msra.mxu0 %v17115_v15  ;;  %v17179_v15 = vld [vmem:[#allocation7 + $0xf30] ss:$28 sps:$4 sm:$0xff]  }
 0x646   : > { %15774 = vmatpush3.bf16.msra.mxu1 %v17119_v42  ;;  %6784 = vmatprep.subr.bf16.mxu0 %v17122_v58  ;;  %v17182_v42 = vld [vmem:[#allocation7 + $0x864] ss:$28 sps:$4 sm:$0xff]  }
 0x647   : > { %15775 = vmatprep.subr.bf16.mxu1 %v17123_v18  ;;  %v17183_v58 = vld [vmem:[#allocation7 + $0x1128] ss:$28 sps:$4 sm:$0xff]   ;;  %v17180_v18 = vld [vmem:[#allocation7 + $0x860] ss:$28 sps:$4 sm:$0xff]  }
 0x649   : > { %6785 = vmatpush1.bf16.msra.mxu0 %v17120_v20  ;;  %v17184_v20 = vld [vmem:[#allocation7 + $0xf68] ss:$28 sps:$4 sm:$0xff]  }
 0x64a   : > { %15776 = vmatpush3.bf16.msra.mxu1 %v17124_v37  ;;  %6786 = vmatprep.subr.bf16.mxu0 %v17127_v43  ;;  %v17187_v37 = vld [vmem:[#allocation7 + $0x89c] ss:$28 sps:$4 sm:$0xff]  }
 0x64b   : > { %15777 = vmatprep.subr.bf16.mxu1 %v17128_v57  ;;  %v17188_v43 = vld [vmem:[#allocation7 + $0x1160] ss:$28 sps:$4 sm:$0xff]   ;;  %v17185_v57 = vld [vmem:[#allocation7 + $0x898] ss:$28 sps:$4 sm:$0xff]  }
 0x64d   : > { %6787 = vmatpush1.bf16.msra.mxu0 %v17125_v25  ;;  %v17189_v25 = vld [vmem:[#allocation7 + $0xfa0] ss:$28 sps:$4 sm:$0xff]  }
 0x64e   : > { %15778 = vmatpush3.bf16.msra.mxu1 %v17129_v34  ;;  %6788 = vmatprep.subr.bf16.mxu0 %v17132_v54  ;;  %v17192_v34 = vld [vmem:[#allocation7 + $0x8d4] ss:$28 sps:$4 sm:$0xff]  }
 0x64f   : > { %15779 = vmatprep.subr.bf16.mxu1 %v17133_v17  ;;  %v17193_v54 = vld [vmem:[#allocation7 + $0x1358] ss:$28 sps:$4 sm:$0xff]   ;;  %v17190_v17 = vld [vmem:[#allocation7 + $0x8d0] ss:$28 sps:$4 sm:$0xff]  }
 0x651   : > { %6789 = vmatpush1.bf16.msra.mxu0 %v17130_v59  ;;  %v17194_v59 = vld [vmem:[#allocation7 + $0x1198] ss:$28 sps:$4 sm:$0xff]  }
 0x652   : > { %15780 = vmatpush3.bf16.msra.mxu1 %v17134_v49  ;;  %6790 = vmatprep.subr.bf16.mxu0 %v17137_v61  ;;  %v17197_v49 = vld [vmem:[#allocation7 + $0x90c] ss:$28 sps:$4 sm:$0xff]  }
 0x653   : > { %15781 = vmatprep.subr.bf16.mxu1 %v17138_v5  ;;  %v17198_v61 = vld [vmem:[#allocation7 + $0x1390] ss:$28 sps:$4 sm:$0xff]   ;;  %v17195_v5 = vld [vmem:[#allocation7 + $0x908] ss:$28 sps:$4 sm:$0xff]  }
 0x655   : > { %6791 = vmatpush1.bf16.msra.mxu0 %v17135_v27  ;;  %v17199_v27 = vld [vmem:[#allocation7 + $0x11d0] ss:$28 sps:$4 sm:$0xff]  }
 0x656   : > { %15782 = vmatpush3.bf16.msra.mxu1 %v17139_v47  ;;  %6792 = vmatprep.subr.bf16.mxu0 %v17142_v38  ;;  %v17202_v47 = vld [vmem:[#allocation7 + $0x944] ss:$28 sps:$4 sm:$0xff]  }
 0x657   : > { %15783 = vmatprep.subr.bf16.mxu1 %v17143_v62  ;;  %v17203_v38 = vld [vmem:[#allocation7 + $0x13c8] ss:$28 sps:$4 sm:$0xff]   ;;  %v17200_v62 = vld [vmem:[#allocation7 + $0x940] ss:$28 sps:$4 sm:$0xff]  }
 0x659   : > { %6793 = vmatpush1.bf16.msra.mxu0 %v17140_v2  ;;  %v17204_v2 = vld [vmem:[#allocation7 + $0x1208] ss:$28 sps:$4 sm:$0xff]  }
 0x65a   : > { %15784 = vmatpush3.bf16.msra.mxu1 %v17144_v44  ;;  %6794 = vmatprep.subr.bf16.mxu0 %v17147_v63  ;;  %v17207_v44 = vld [vmem:[#allocation7 + $0x97c] ss:$28 sps:$4 sm:$0xff]  }
 0x65b   : > { %15785 = vmatprep.subr.bf16.mxu1 %v17148_v50  ;;  %v17208_v63 = vld [vmem:[#allocation7 + $0x1400] ss:$28 sps:$4 sm:$0xff]   ;;  %v17205_v50 = vld [vmem:[#allocation7 + $0x978] ss:$28 sps:$4 sm:$0xff]  }
 0x65d   : > { %6795 = vmatpush1.bf16.msra.mxu0 %v17145_v51  ;;  %v17209_v51 = vld [vmem:[#allocation7 + $0x1240] ss:$28 sps:$4 sm:$0xff]  }
 0x65e   : > { %15786 = vmatpush3.bf16.msra.mxu1 %v17149_v30  ;;  %6807 = vmatprep.subr.bf16.mxu0 %v17152_v1  ;;  %v17212_v30 = vld [vmem:[#allocation7 + $0x9b4] ss:$28 sps:$4 sm:$0xff]  }
 0x65f   : > { %15793 = vmatprep.subr.bf16.mxu1 %v17153_v21  ;;  %v17213_v1 = vld [vmem:[#allocation7 + $0x1438] ss:$28 sps:$4 sm:$0xff]   ;;  %v17210_v21 = vld [vmem:[#allocation7 + $0x9b0] ss:$28 sps:$4 sm:$0xff]  }
 0x660   : > { %6797 = vmatmul.mubr.bf16.vlgmr.msra.gmra.mrb[20].mxu0 %v20104_v33  ;;  %v17164_v33 = vld [vmem:[#allocation7 + $0xe88] ss:$28 sps:$4 sm:$0xff]  }
 0x661   : > { %7135 = vmatmul.mubr.bf16.vlgmr.msra.gmra.mrb[28].mxu1 %v20128_v6  ;;  %6808 = vmatpush1.bf16.msra.mxu0 %v17150_v45  ;;  %v17214_v45 = vld [vmem:[#allocation7 + $0x1278] ss:$28 sps:$4 sm:$0xff]  }
 0x662   : > { %6839 = vmatprep.mubr.bf16.mxu0 %v20110_v56  ;;  %15794 = vmatpush3.bf16.msra.mxu1 %v17154_v4  ;;  %v17169_v56 = vld [vmem:[#allocation7 + $0xec0] ss:$28 sps:$4 sm:$0xff]   ;;  %v17217_v4 = vld [vmem:[#allocation7 + $0x9ec] ss:$28 sps:$4 sm:$0xff]  }
 0x663   : > { %7175 = vmatprep.mubr.bf16.mxu1 %v20132_v53  ;;  %6809 = vmatprep.subr.bf16.mxu0 %v17157_v48  ;;  %v17218_v48 = vld [vmem:[#allocation7 + $0x1470] ss:$28 sps:$4 sm:$0xff]  }
 0x664   : > { %15795 = vmatprep.subr.bf16.mxu1 %v17158_v24  ;;  %v17215_v24 = vld [vmem:[#allocation7 + $0x9e8] ss:$28 sps:$4 sm:$0xff]  }
 0x665   : > { %6810 = vmatpush1.bf16.msra.mxu0 %v17155_v46  ;;  %v17219_v46 = vld [vmem:[#allocation7 + $0x12b0] ss:$28 sps:$4 sm:$0xff]  }
 0x666   : > { %15796 = vmatpush3.bf16.msra.mxu1 %v17159_v40  ;;  %6811 = vmatprep.subr.bf16.mxu0 %v17162_v23  ;;  %v17222_v40 = vld [vmem:[#allocation7 + $0xa24] ss:$28 sps:$4 sm:$0xff]  }
 0x667   : > { %15797 = vmatprep.subr.bf16.mxu1 %v17163_v41  ;;  %v17223_v23 = vld [vmem:[#allocation7 + $0x14a8] ss:$28 sps:$4 sm:$0xff]   ;;  %v17220_v41 = vld [vmem:[#allocation7 + $0xa20] ss:$28 sps:$4 sm:$0xff]  }
 0x669   : > { %6812 = vmatpush1.bf16.msra.mxu0 %v17160_v55  ;;  %v17224_v55 = vld [vmem:[#allocation7 + $0x12e8] ss:$28 sps:$4 sm:$0xff]  }
 0x66a   : > { %15798 = vmatpush3.bf16.msra.mxu1 %v17164_v33  ;;  %6813 = vmatprep.subr.bf16.mxu0 %v17167_v0  ;;  %v17227_v33 = vld [vmem:[#allocation7 + $0xa5c] ss:$28 sps:$4 sm:$0xff]  }
 0x66b   : > { %15799 = vmatprep.subr.bf16.mxu1 %v17168_v52  ;;  %v17228_v0 = vld [vmem:[#allocation7 + $0x14e0] ss:$28 sps:$4 sm:$0xff]   ;;  %v17225_v52 = vld [vmem:[#allocation7 + $0xa58] ss:$28 sps:$4 sm:$0xff]  }
 0x66d   : > { %6814 = vmatpush1.bf16.msra.mxu0 %v17165_v39  ;;  %v17229_v39 = vld [vmem:[#allocation7 + $0x1320] ss:$28 sps:$4 sm:$0xff]  }
 0x66e   : > { %15800 = vmatpush3.bf16.msra.mxu1 %v17169_v56  ;;  %6815 = vmatprep.subr.bf16.mxu0 %v17172_v28  ;;  %v17232_v56 = vld [vmem:[#allocation7 + $0xa94] ss:$28 sps:$4 sm:$0xff]  }
 0x66f   : > { %15801 = vmatprep.subr.bf16.mxu1 %v17173_v60  ;;  %v17230_v28 = vld [vmem:[#allocation7 + $0xa90] ss:$28 sps:$4 sm:$0xff]  }
 0x670   : > { %v17235_v60 = vld [vmem:[#allocation7 + $0xacc] ss:$28 sps:$4 sm:$0xff]  }
 0x671   : > { %6816 = vmatpush1.bf16.msra.mxu0 %v17170_v14  ;;  %v17233_v14 = vld [vmem:[#allocation7 + $0xac8] ss:$28 sps:$4 sm:$0xff]  }
 0x672   : > { %15802 = vmatpush3.bf16.msra.mxu1 %v17174_v3  ;;  %6817 = vmatprep.subr.bf16.mxu0 %v17177_v13  ;;  %v17238_v3 = vld [vmem:[#allocation7 + $0xb04] ss:$28 sps:$4 sm:$0xff]  }
 0x673   : > { %15803 = vmatprep.subr.bf16.mxu1 %v17178_v16  ;;  %v17236_v13 = vld [vmem:[#allocation7 + $0xb00] ss:$28 sps:$4 sm:$0xff]  }
 0x674   : > { %v17241_v16 = vld [vmem:[#allocation7 + $0xb3c] ss:$28 sps:$4 sm:$0xff]  }
 0x675   : > { %6818 = vmatpush1.bf16.msra.mxu0 %v17175_v32  ;;  %v17239_v32 = vld [vmem:[#allocation7 + $0xb38] ss:$28 sps:$4 sm:$0xff]  }
 0x676   : > { %15804 = vmatpush3.bf16.msra.mxu1 %v17179_v15  ;;  %6819 = vmatprep.subr.bf16.mxu0 %v17182_v42  ;;  %v17244_v15 = vld [vmem:[#allocation7 + $0xb74] ss:$28 sps:$4 sm:$0xff]  }
 0x677   : > { %15805 = vmatprep.subr.bf16.mxu1 %v17183_v58  ;;  %v17242_v42 = vld [vmem:[#allocation7 + $0xb70] ss:$28 sps:$4 sm:$0xff]   ;;  %v20171_v58 = vld [vmem:[#allocation8] sm:$0xff] }
 0x679   : > { %6820 = vmatpush1.bf16.msra.mxu0 %v17180_v18  ;;  %v2717_v18 = vrot.slane %v20171_v58, %v19514_v9 }
 0x67a   : > { %15806 = vmatpush3.bf16.msra.mxu1 %v17184_v20  ;;  %6821 = vmatprep.subr.bf16.mxu0 %v17187_v37  ;;  %v2721_v20 = vrot.slane %v20171_v58, %v19520_v11  ;;  %v17245_v37 = vld [vmem:[#allocation7 + $0xba8] ss:$28 sps:$4 sm:$0xff]  }
 0x67b   : > { %15807 = vmatprep.subr.bf16.mxu1 %v17188_v43  ;;  %v20181_v43 = vrot.slane %v20171_v58, %v19523_v12 }
 0x67d   : > { %6822 = vmatpush1.bf16.msra.mxu0 %v17185_v57  ;;  %v17250_v57 = vld [vmem:[#allocation7 + $0xbe4] ss:$28 sps:$4 sm:$0xff]  }
 0x67e   : > { %15808 = vmatpush3.bf16.msra.mxu1 %v17189_v25  ;;  %6823 = vmatprep.subr.bf16.mxu0 %v17192_v34 }
 0x67f   : > { %15815 = vmatprep.subr.bf16.mxu1 %v17193_v54 }
 0x681   : > { %7176 = vmatmul.mubr.bf16.vlgmr.msra.gmra.mrb[32].mxu1 %v20138_v26  ;;  %6824 = vmatpush1.bf16.msra.mxu0 %v17190_v17 }
 0x682   : > { %15816 = vmatpush3.bf16.msra.mxu1 %v17194_v59  ;;  %7216 = vmatprep.mubr.bf16.mxu1 %v20142_v8 }
 0x683   : > { %6825 = vmatprep.subr.bf16.mxu0 %v17197_v49  ;;  %15817 = vmatprep.subr.bf16.mxu1 %v17198_v61 }
 0x685   : > { %6826 = vmatpush1.bf16.msra.mxu0 %v17195_v5 }
 0x686   : > { %15818 = vmatpush3.bf16.msra.mxu1 %v17199_v27  ;;  %6827 = vmatprep.subr.bf16.mxu0 %v17202_v47  ;;  %v17248_v27 = vld [vmem:[#allocation7 + $0xbe0] ss:$28 sps:$4 sm:$0xff]  }
 0x687   : > { %15819 = vmatprep.subr.bf16.mxu1 %v17203_v38  ;;  %v17253_v47 = vld [vmem:[#allocation7 + $0xc1c] ss:$28 sps:$4 sm:$0xff]  }
 0x689   : > { %6828 = vmatpush1.bf16.msra.mxu0 %v17200_v62 }
 0x68a   : > { %15820 = vmatpush3.bf16.msra.mxu1 %v17204_v2  ;;  %6829 = vmatprep.subr.bf16.mxu0 %v17207_v44 }
 0x68b   : > { %15821 = vmatprep.subr.bf16.mxu1 %v17208_v63 }
 0x68d   : > { %6830 = vmatpush1.bf16.msra.mxu0 %v17205_v50 }
 0x68e   : > { %15822 = vmatpush3.bf16.msra.mxu1 %v17209_v51  ;;  %6831 = vmatprep.subr.bf16.mxu0 %v17212_v30 }
 0x68f   : > { %15823 = vmatprep.subr.bf16.mxu1 %v17213_v1 }
 0x691   : > { %6832 = vmatpush1.bf16.msra.mxu0 %v17210_v21 }
 0x692   : > { %15824 = vmatpush3.bf16.msra.mxu1 %v17214_v45  ;;  %6833 = vmatprep.subr.bf16.mxu0 %v17217_v4 }
 0x693   : > { %15825 = vmatprep.subr.bf16.mxu1 %v17218_v48 }
 0x695   : > { %6834 = vmatpush1.bf16.msra.mxu0 %v17215_v24 }
 0x696   : > { %15826 = vmatpush3.bf16.msra.mxu1 %v17219_v46  ;;  %6835 = vmatprep.subr.bf16.mxu0 %v17222_v40  ;;  %v17251_v46 = vld [vmem:[#allocation7 + $0xc18] ss:$28 sps:$4 sm:$0xff]  }
 0x697   : > { %15827 = vmatprep.subr.bf16.mxu1 %v17223_v23 }
 0x699   : > { %6836 = vmatpush1.bf16.msra.mxu0 %v17220_v41 }
 0x69a   : > { %15828 = vmatpush3.bf16.msra.mxu1 %v17224_v55  ;;  %6837 = vmatprep.subr.bf16.mxu0 %v17227_v33  ;;  %v17256_v33 = vld [vmem:[#allocation7 + $0xc54] ss:$28 sps:$4 sm:$0xff]  }
 0x69b   : > { %15829 = vmatprep.subr.bf16.mxu1 %v17228_v0 }
 0x69d   : > { %6838 = vmatpush1.bf16.msra.mxu0 %v17225_v52 }
 0x69e   : > { %15830 = vmatpush3.bf16.msra.mxu1 %v17229_v39  ;;  %6850 = vmatprep.subr.bf16.mxu0 %v17232_v56 }
 0x6a0   : > { %6840 = vmatmul.mubr.bf16.vlgmr.msra.gmra.mrb[20].mxu0 %v20118_v36  ;;  %v17247_v36 = vld [vmem:[#allocation7 + $0xbac] ss:$28 sps:$4 sm:$0xff]  }
 0x6a1   : > { %7217 = vmatmul.mubr.bf16.vlgmr.msra.gmra.mrb[36].mxu1 %v20148_v35  ;;  %6851 = vmatpush1.bf16.msra.mxu0 %v17230_v28 }
 0x6a2   : > { %6882 = vmatprep.mubr.bf16.mxu0 %v20120_v31  ;;  %6852 = vmatprep.subr.bf16.mxu0 %v17235_v60  ;;  %v2725_v31 = vrot.slane %v20171_v58, %v19517_v10 }
 0x6a5   : > { %6853 = vmatpush1.bf16.msra.mxu0 %v17233_v14 }
 0x6a6   : > { %6854 = vmatprep.subr.bf16.mxu0 %v17238_v3 }
 0x6a9   : > { %6855 = vmatpush1.bf16.msra.mxu0 %v17236_v13 }
 0x6aa   : > { %6856 = vmatprep.subr.bf16.mxu0 %v17241_v16  ;;  %v17254_v16 = vld [vmem:[#allocation7 + $0xc50] ss:$28 sps:$4 sm:$0xff]  }
 0x6ad   : > { %6857 = vmatpush1.bf16.msra.mxu0 %v17239_v32 }
 0x6ae   : > { %6858 = vmatprep.subr.bf16.mxu0 %v17244_v15 }
 0x6b1   : > { %6859 = vmatpush1.bf16.msra.mxu0 %v17242_v42 }
 0x6b2   : > { %6860 = vmatprep.subr.bf16.mxu0 %v17247_v36 }
 0x6b3   : > { %v6454_v25 = vpop.f32.mrb[16].mxu0 }
 0x6b4   : > { %v15904_v34 = vadd.f32 %v6454_v25, %v2717_v18  ;;  %v6712_v54 = vpop.f32.mrb[12].mxu1  ;;  %v6456_v17 = vpop.f32.mrb[17].mxu0 }
 0x6b5   : > { %v15908_v59 = vadd.f32 %v6712_v54, %v2725_v31  ;;  %v15905_v49 = vadd.f32 %v6456_v17, %v2721_v20  ;;  %v6714_v61 = vpop.f32.mrb[13].mxu1  ;;  %v6458_v5 = vpop.f32.mrb[18].mxu0  ;;  %6861 = vmatpush1.bf16.msra.mxu0 %v17245_v37 }
 0x6b6   : > { %vm7225_vm0 = vcmp.ge.f32.partialorder %v15904_v34, 0.0  ;;  %v7239_v38 = vmul.f32 0.01, %v15904_v34  ;;  %v15909_v62 = vadd.f32 %v6714_v61, %v20181_v43  ;;  %v15906_v2 = vadd.f32 %v6458_v5, %v2717_v18  ;;  %v6716_v44 = vpop.f32.mrb[14].mxu1  ;;  %v6460_v63 = vpop.f32.mrb[19].mxu0  ;;  %6862 = vmatprep.subr.bf16.mxu0 %v17250_v57 }
 0x6b7   : > { %vm7227_vm13 = vcmp.ge.f32.partialorder %v15908_v59, 0.0  ;;  %v7241_v50 = vmul.f32 0.01, %v15908_v59  ;;  %vm7226_vm14 = vcmp.ge.f32.partialorder %v15905_v49, 0.0  ;;  %v7240_v51 = vmul.f32 0.01, %v15905_v49 }
 0x6b8   : > { %v7253_v30 = vsel %vm7225_vm0, %v15904_v34, %v7239_v38  ;;  %vm7228_vm1 = vcmp.ge.f32.partialorder %v15909_v62, 0.0  ;;  %v7242_v1 = vmul.f32 0.01, %v15909_v62  ;;  %vm7232_vm6 = vcmp.ge.f32.partialorder %v15906_v2, 0.0  ;;  %v6718_v21 = vpop.f32.mrb[15].mxu1 }
 0x6b9   : > { %v7274_v45 = vrot.slane %v7253_v30, 1  ;;  %v7255_v4 = vsel %vm7227_vm13, %v15908_v59, %v7241_v50  ;;  %v7254_v48 = vsel %vm7226_vm14, %v15905_v49, %v7240_v51  ;;  %v7246_v24 = vmul.f32 0.01, %v15906_v2  ;;  %6863 = vmatpush1.bf16.msra.mxu0 %v17248_v27  ;;  %v17259_v18 = vld [vmem:[#allocation7 + $0xc8c] ss:$28 sps:$4 sm:$0xff]  }
 0x6ba   : > { %v7276_v40 = vrot.slane %v7255_v4, 1  ;;  %v7275_v23 = vrot.slane %v7254_v48, 1  ;;  %v7256_v41 = vsel %vm7228_vm1, %v15909_v62, %v7242_v1  ;;  %v15910_v55 = vadd.f32 %v6716_v44, %v2725_v31  ;;  %6864 = vmatprep.subr.bf16.mxu0 %v17253_v47  ;;  %v17257_v5 = vld [vmem:[#allocation7 + $0xc88] ss:$28 sps:$4 sm:$0xff]  }
 0x6bb   : > { %v7288_v0 = vmax.f32 %v7253_v30, %v7274_v45  ;;  %v7277_v52 = vrot.slane %v7256_v41, 1  ;;  %v7260_v39 = vsel %vm7232_vm6, %v15906_v2, %v7246_v24  ;;  %v15907_v60 = vadd.f32 %v6460_v63, %v2721_v20  ;;  %v17262_v2 = vld [vmem:[#allocation7 + $0xcc4] ss:$28 sps:$4 sm:$0xff]  }
 0x6bc   : > { %v7290_v56 = vmax.f32 %v7255_v4, %v7276_v40  ;;  %v20185_v28 = vmax.f32 %v7254_v48, %v7275_v23  ;;  %v7302_v13 = vrot.slane %v7260_v39, 1  ;;  %vm7234_vm9 = vcmp.ge.f32.partialorder %v15910_v55, 0.0  ;;  %v17260_v24 = vld [vmem:[#allocation7 + $0xcc0] ss:$28 sps:$4 sm:$0xff]  }
 0x6bd   : > { %v7330_v14 = vrot.slane %v7288_v0, 1  ;;  %v20187_v3 = vmax.f32 %v7256_v41, %v7277_v52  ;;  %6865 = vmatpush1.bf16.msra.mxu0 %v17251_v46  ;;  %v7344_v32 = vrot.slane %v7288_v0, 2  ;;  %v7358_v31 = vrot.slane %v7288_v0, 3 }
 0x6be   : > { %v7332_v15 = vrot.slane %v7290_v56, 1  ;;  %v7346_v42 = vrot.slane %v7290_v56, 2  ;;  %v7331_v36 = vrot.slane %v20185_v28, 1  ;;  %6866 = vmatprep.subr.bf16.mxu0 %v17256_v33  ;;  %v7360_v57 = vrot.slane %v7290_v56, 3 }
 0x6bf   : > { %v7421_v37 = vsel %vm1575_vm7, %v7288_v0, %v7330_v14  ;;  %v7333_v20 = vrot.slane %v20187_v3, 1  ;;  %v7345_v34 = vrot.slane %v20185_v28, 2  ;;  %v7359_v54 = vrot.slane %v20185_v28, 3 }
 0x6c0   : > { %v7423_v25 = vsel %vm1575_vm7, %v7290_v56, %v7332_v15  ;;  %v7422_v17 = vsel %vm1575_vm7, %v20185_v28, %v7331_v36  ;;  %v7347_v59 = vrot.slane %v20187_v3, 2  ;;  %v7316_v49 = vmax.f32 %v7260_v39, %v7302_v13  ;;  %v17263_v15 = vld [vmem:[#allocation7 + $0xcf8] ss:$28 sps:$4 sm:$0xff]  }
 0x6c1   : > { %v7248_v61 = vmul.f32 0.01, %v15910_v55  ;;  %vm7233_vm10 = vcmp.ge.f32.partialorder %v15907_v60, 0.0  ;;  %6867 = vmatpush1.bf16.msra.mxu0 %v17254_v16  ;;  %v7247_v27 = vmul.f32 0.01, %v15907_v60  ;;  %v15911_v47 = vadd.f32 %v6718_v21, %v20181_v43 }
 0x6c2   : > { %6868 = vmatprep.subr.bf16.mxu0 %v17259_v18  ;;  %v7428_v38 = vsel %vm1583_vm15, %v7421_v37, %v7344_v32  ;;  %v7430_v62 = vsel %vm1583_vm15, %v7423_v25, %v7346_v42  ;;  %v7424_v44 = vsel %vm1575_vm7, %v20187_v3, %v7333_v20  ;;  %v7379_v63 = vrot.slane %v7316_v49, 4 }
 0x6c3   : > { %v7393_v50 = vrot.slane %v7316_v49, 5  ;;  %v7262_v51 = vsel %vm7234_vm9, %v15910_v55, %v7248_v61  ;;  %v7261_v1 = vsel %vm7233_vm10, %v15907_v60, %v7247_v27  ;;  %vm7235_vm12 = vcmp.ge.f32.partialorder %v15911_v47, 0.0  ;;  %v17265_v55 = vld [vmem:[#allocation7 + $0xcfc] ss:$28 sps:$4 sm:$0xff]  }
 0x6c4   : > { %v7304_v30 = vrot.slane %v7262_v51, 1  ;;  %v7249_v45 = vmul.f32 0.01, %v15911_v47  ;;  %v7303_v4 = vrot.slane %v7261_v1, 1  ;;  %v7407_v43 = vrot.slane %v7316_v49, 6 }
 0x6c5   : > { %6869 = vmatpush1.bf16.msra.mxu0 %v17257_v5  ;;  %v7435_v21 = vsel %vm1591_vm4, %v7428_v38, %v7358_v31  ;;  %v7437_v48 = vsel %vm1591_vm4, %v7430_v62, %v7360_v57  ;;  %v7429_v41 = vsel %vm1583_vm15, %v7422_v17, %v7345_v34  ;;  %v7431_v39 = vsel %vm1583_vm15, %v7424_v44, %v7347_v59  ;;  %v17268_v31 = vld [vmem:[#allocation7 + $0xd34] ss:$28 sps:$4 sm:$0xff]   ;;  %v17271_v38 = vld [vmem:[#allocation7 + $0xd6c] ss:$28 sps:$4 sm:$0xff]  }
 0x6c6   : > { %v7318_v46 = vmax.f32 %v7262_v51, %v7304_v30  ;;  %v7263_v40 = vsel %vm7235_vm12, %v15911_v47, %v7249_v45  ;;  %v7442_v23 = vsel %vm1599_vm5, %v7435_v21, %v7379_v63  ;;  %6870 = vmatprep.subr.bf16.mxu0 %v17262_v2  ;;  %v7317_v33 = vmax.f32 %v7261_v1, %v7303_v4  ;;  %v17266_v5 = vld [vmem:[#allocation7 + $0xd30] ss:$28 sps:$4 sm:$0xff]   ;;  %v17269_v44 = vld [vmem:[#allocation7 + $0xd68] ss:$28 sps:$4 sm:$0xff]   ;;  %v17272_v30 = vld [vmem:[#allocation7 + $0xda0] ss:$28 sps:$4 sm:$0xff]  }
 0x6c7   : > { %v7305_v0 = vrot.slane %v7263_v40, 1  ;;  %v7449_v52 = vsel %vm953_vm2, %v7442_v23, %v7393_v50  ;;  %v7361_v56 = vrot.slane %v20187_v3, 3  ;;  %v7436_v32 = vsel %vm1591_vm4, %v7429_v41, %v7359_v54  ;;  %v17274_v63 = vld [vmem:[#allocation7 + $0xda4] ss:$28 sps:$4 sm:$0xff]   ;;  %v17277_v4 = vld [vmem:[#allocation7 + $0xddc] ss:$28 sps:$4 sm:$0xff]  }
 0x6c8   : > { %v7381_v28 = vrot.slane %v7318_v46, 4  ;;  %v20212_v60 = vsel %vm1614_vm8, %v7449_v52, %v7407_v43  ;;  %v7395_v14 = vrot.slane %v7318_v46, 5  ;;  %v7380_v13 = vrot.slane %v7317_v33, 4  ;;  %v17281_v23 = vld [vmem:[#allocation7 + $0xe48] ss:$28 sps:$4 sm:$0xff]  }
 0x6c9   : > { %v7319_v16 = vmax.f32 %v7263_v40, %v7305_v0  ;;  %6871 = vmatpush1.bf16.msra.mxu0 %v17260_v24  ;;  %v7409_v42 = vrot.slane %v7318_v46, 6  ;;  %v7438_v18 = vsel %vm1591_vm4, %v7431_v39, %v7361_v56  ;;  %v7394_v37 = vrot.slane %v7317_v33, 5  ;;  %v17280_v24 = vld [vmem:[#allocation7 + $0xe14] ss:$28 sps:$4 sm:$0xff]   ;;  %v17283_v40 = vld [vmem:[#allocation7 + $0xe4c] ss:$28 sps:$4 sm:$0xff]  }
 0x6ca   : > { %v7444_v36 = vsel %vm1599_vm5, %v7437_v48, %v7381_v28  ;;  %6872 = vmatprep.subr.bf16.mxu0 %v17265_v55  ;;  %v7408_v34 = vrot.slane %v7317_v33, 6  ;;  %v7443_v54 = vsel %vm1599_vm5, %v7436_v32, %v7380_v13  ;;  %v17275_v48 = vld [vmem:[#allocation7 + $0xdd8] ss:$28 sps:$4 sm:$0xff]   ;;  %v17278_v46 = vld [vmem:[#allocation7 + $0xe10] ss:$28 sps:$4 sm:$0xff]   ;;  %v20648_v28 = vsub.s32 6, %v19509_v7 }
 0x6cb   : > { %v7382_v3 = vrot.slane %v7319_v16, 4  ;;  %v7451_v57 = vsel %vm953_vm2, %v7444_v36, %v7395_v14  ;;  %v7396_v20 = vrot.slane %v7319_v16, 5  ;;  %v7410_v59 = vrot.slane %v7319_v16, 6  ;;  %v17286_v41 = vld [vmem:[#allocation7 + $0xe84] ss:$28 sps:$4 sm:$0xff]  }
 0x6cc   : > { %v20219_v25 = vsel %vm1614_vm8, %v7451_v57, %v7409_v42  ;;  %v7450_v61 = vsel %vm953_vm2, %v7443_v54, %v7394_v37  ;;  %v17284_v55 = vld [vmem:[#allocation7 + $0xe80] ss:$28 sps:$4 sm:$0xff]   ;;  %v17287_v0 = vld [vmem:[#allocation7 + $0xeb8] ss:$28 sps:$4 sm:$0xff]   ;;  %v17290_v39 = vld [vmem:[#allocation7 + $0xef0] ss:$28 sps:$4 sm:$0xff]  }
 0x6cd   : > { %v16337_v17 = vpack.i.bf16 %v20219_v25, %v20212_v60  ;;  %v7445_v49 = vsel %vm1599_vm5, %v7438_v18, %v7382_v3  ;;  %6873 = vmatpush1.bf16.msra.mxu0 %v17263_v15  ;;  %v20228_v47 = vsel %vm1614_vm8, %v7450_v61, %v7408_v34  ;;  %v17289_v33 = vld [vmem:[#allocation7 + $0xebc] ss:$28 sps:$4 sm:$0xff]   ;;  %v17292_v52 = vld [vmem:[#allocation7 + $0xef4] ss:$28 sps:$4 sm:$0xff]   ;;  %v17295_v56 = vld [vmem:[#allocation7 + $0xf2c] ss:$28 sps:$4 sm:$0xff]  }
 0x6ce   : > { %v7452_v27 = vsel %vm953_vm2, %v7445_v49, %v7396_v20  ;;  %6874 = vmatprep.subr.bf16.mxu0 %v17268_v31  ;;  %v17298_v14 = vld [vmem:[#allocation7 + $0xf64] ss:$28 sps:$4 sm:$0xff]   ;;  %v17301_v18 = vld [vmem:[#allocation7 + $0xf9c] ss:$28 sps:$4 sm:$0xff]   ;;  %v17304_v34 = vld [vmem:[#allocation7 + $0xfd4] ss:$28 sps:$4 sm:$0xff]  }
 0x6cf   : > { %16338 = vrot.lane.b32.xlu0 %v16337_v17, %s19036_s27  ;;  %v20232_v62 = vsel %vm1614_vm8, %v7452_v27, %v7410_v59  ;;  %v17296_v32 = vld [vmem:[#allocation7 + $0xf60] ss:$28 sps:$4 sm:$0xff]   ;;  %v17299_v20 = vld [vmem:[#allocation7 + $0xf98] ss:$28 sps:$4 sm:$0xff]   ;;  %v17302_v54 = vld [vmem:[#allocation7 + $0xfd0] ss:$28 sps:$4 sm:$0xff]  }
 0x6d0   : > { %v16332_v2 = vpack.i.bf16 %v20232_v62, %v20228_v47  ;;  %v17307_v17 = vld [vmem:[#allocation7 + $0x100c] ss:$28 sps:$4 sm:$0xff]   ;;  %v17310_v49 = vld [vmem:[#allocation7 + $0x1044] ss:$28 sps:$4 sm:$0xff]   ;;  %v17311_v27 = vld [vmem:[#allocation7 + $0x1078] ss:$28 sps:$4 sm:$0xff]  }
 0x6d1   : > { %6875 = vmatpush1.bf16.msra.mxu0 %v17266_v5  ;;  %v17305_v59 = vld [vmem:[#allocation7 + $0x1008] ss:$28 sps:$4 sm:$0xff]   ;;  %v17308_v61 = vld [vmem:[#allocation7 + $0x1040] ss:$28 sps:$4 sm:$0xff]   ;;  %vm19039_vm10 = vmmov 0  }
 0x6d2   : > { %16333 = vrot.lane.b32.xlu1 %v16332_v2, %s19036_s27  ;;  %6876 = vmatprep.subr.bf16.mxu0 %v17271_v38  ;;  %v17313_v5 = vld [vmem:[#allocation7 + $0x107c] ss:$28 sps:$4 sm:$0xff]   ;;  %v17316_v38 = vld [vmem:[#allocation7 + $0x10b4] ss:$28 sps:$4 sm:$0xff]  }
 0x6d3   : > { %v17314_v2 = vld [vmem:[#allocation7 + $0x10b0] ss:$28 sps:$4 sm:$0xff]  }
 0x6d4   : > { %v15721_v50 = vpop.f32.mrb[16].mxu1 }
 0x6d5   : > { %v15722_v51 = vpop.f32.mrb[17].mxu1  ;;  %6877 = vmatpush1.bf16.msra.mxu0 %v17269_v44  ;;  %v17319_v44 = vld [vmem:[#allocation7 + $0x10ec] ss:$28 sps:$4 sm:$0xff]  }
 0x6d6   : > { %v15723_v1 = vadd.f32 %v15722_v51, %v15721_v50  ;;  %v15724_v45 = vpop.f32.mrb[18].mxu1  ;;  %6878 = vmatprep.subr.bf16.mxu0 %v17274_v63  ;;  %v17317_v63 = vld [vmem:[#allocation7 + $0x10e8] ss:$28 sps:$4 sm:$0xff]  }
 0x6d7   : > { %v15725_v43 = vpop.f32.mrb[19].mxu1  ;;  %v17322_v50 = vld [vmem:[#allocation7 + $0x1124] ss:$28 sps:$4 sm:$0xff]  }
 0x6d8   : > { %v15726_v21 = vadd.f32 %v15725_v43, %v15724_v45  ;;  %v17325_v43 = vld [vmem:[#allocation7 + $0x115c] ss:$28 sps:$4 sm:$0xff]  }
 0x6d9   : > { %6879 = vmatpush1.bf16.msra.mxu0 %v17272_v30 }
 0x6da   : > { %6880 = vmatprep.subr.bf16.mxu0 %v17277_v4 }
 0x6dd   : > { %6881 = vmatpush1.bf16.msra.mxu0 %v17275_v48 }
 0x6de   : > { %6893 = vmatprep.subr.bf16.mxu0 %v17280_v24 }
 0x6e0   : > { %6883 = vmatmul.mubr.bf16.vlgmr.msra.gmra.mrb[20].mxu0 %v20128_v6  ;;  %v17293_v6 = vld [vmem:[#allocation7 + $0xf28] ss:$28 sps:$4 sm:$0xff]  }
 0x6e1   : > { %6894 = vmatpush1.bf16.msra.mxu0 %v17278_v46  ;;  %6925 = vmatprep.mubr.bf16.mxu0 %v20132_v53  ;;  %v2741_v53 = vrot.slane %v20171_v58, %v20648_v28  ;;  %v17323_v46 = vld [vmem:[#allocation7 + $0x1158] ss:$28 sps:$4 sm:$0xff]   ;;  %v17338_v28 = vld [vmem:[#allocation7 + $0x1270] ss:$28 sps:$4 sm:$0xff]  }
 0x6e2   : > { %6895 = vmatprep.subr.bf16.mxu0 %v17283_v40 }
 0x6e3   : > { %v7014_v15 = vadd.f32 %v15723_v1, %v2741_v53  ;;  %v7017_v37 = vadd.f32 %v15726_v21, %v2741_v53  ;;  %v17320_v1 = vld [vmem:[#allocation7 + $0x1120] ss:$28 sps:$4 sm:$0xff]   ;;  %v17343_v53 = vld [vmem:[#allocation7 + $0x12ac] ss:$28 sps:$4 sm:$0xff]  }
 0x6e5   : > { %6896 = vmatpush1.bf16.msra.mxu0 %v17281_v23  ;;  %v17328_v23 = vld [vmem:[#allocation7 + $0x1194] ss:$28 sps:$4 sm:$0xff]  }
 0x6e6   : > { %6897 = vmatprep.subr.bf16.mxu0 %v17286_v41  ;;  %v17326_v41 = vld [vmem:[#allocation7 + $0x1190] ss:$28 sps:$4 sm:$0xff]  }
 0x6e9   : > { %6898 = vmatpush1.bf16.msra.mxu0 %v17284_v55  ;;  %v17331_v55 = vld [vmem:[#allocation7 + $0x11cc] ss:$28 sps:$4 sm:$0xff]  }
 0x6ea   : > { %6899 = vmatprep.subr.bf16.mxu0 %v17289_v33  ;;  %v17329_v33 = vld [vmem:[#allocation7 + $0x11c8] ss:$28 sps:$4 sm:$0xff]  }
 0x6ed   : > { %6900 = vmatpush1.bf16.msra.mxu0 %v17287_v0  ;;  %v17334_v0 = vld [vmem:[#allocation7 + $0x1204] ss:$28 sps:$4 sm:$0xff]  }
 0x6ee   : > { %6901 = vmatprep.subr.bf16.mxu0 %v17292_v52  ;;  %v17332_v52 = vld [vmem:[#allocation7 + $0x1200] ss:$28 sps:$4 sm:$0xff]  }
 0x6f1   : > { %6902 = vmatpush1.bf16.msra.mxu0 %v17290_v39  ;;  %v17337_v39 = vld [vmem:[#allocation7 + $0x123c] ss:$28 sps:$4 sm:$0xff]  }
 0x6f2   : > { %6903 = vmatprep.subr.bf16.mxu0 %v17295_v56  ;;  %v17335_v56 = vld [vmem:[#allocation7 + $0x1238] ss:$28 sps:$4 sm:$0xff]  }
 0x6f4   : > { %v15743_v13 = vpop.f32.mrb[20].mxu1 }
 0x6f5   : > { %v15744_v16 = vpop.f32.mrb[21].mxu1  ;;  %6904 = vmatpush1.bf16.msra.mxu0 %v17293_v6  ;;  %v17340_v6 = vld [vmem:[#allocation7 + $0x1274] ss:$28 sps:$4 sm:$0xff]  }
 0x6f6   : > { %v15745_v42 = vadd.f32 %v15744_v16, %v15743_v13  ;;  %v15746_v36 = vpop.f32.mrb[22].mxu1  ;;  %6905 = vmatprep.subr.bf16.mxu0 %v17298_v14  ;;  %v17346_v14 = vld [vmem:[#allocation7 + $0x12e4] ss:$28 sps:$4 sm:$0xff]  }
 0x6f7   : > { %v15747_v31 = vpop.f32.mrb[23].mxu1  ;;  %v17344_v16 = vld [vmem:[#allocation7 + $0x12e0] ss:$28 sps:$4 sm:$0xff]  }
 0x6f8   : > { %v7055_v3 = vadd.f32 %v15745_v42, %v7014_v15  ;;  %v15748_v57 = vadd.f32 %v15747_v31, %v15746_v36  ;;  %v17349_v42 = vld [vmem:[#allocation7 + $0x131c] ss:$28 sps:$4 sm:$0xff]  }
 0x6f9   : > { %6906 = vmatpush1.bf16.msra.mxu0 %v17296_v32 }
 0x6fa   : > { %v7058_v7 = vadd.f32 %v15748_v57, %v7017_v37  ;;  %6907 = vmatprep.subr.bf16.mxu0 %v17301_v18  ;;  %v17347_v37 = vld [vmem:[#allocation7 + $0x1318] ss:$28 sps:$4 sm:$0xff]  }
 0x6fb   : > { %v17352_v57 = vld [vmem:[#allocation7 + $0x1354] ss:$28 sps:$4 sm:$0xff]  }
 0x6fd   : > { %6908 = vmatpush1.bf16.msra.mxu0 %v17299_v20  ;;  %v17350_v20 = vld [vmem:[#allocation7 + $0x1350] ss:$28 sps:$4 sm:$0xff]  }
 0x6fe   : > { %6909 = vmatprep.subr.bf16.mxu0 %v17304_v34  ;;  %v17353_v34 = vld [vmem:[#allocation7 + $0x1388] ss:$28 sps:$4 sm:$0xff]  }
 0x701   : > { %6910 = vmatpush1.bf16.msra.mxu0 %v17302_v54  ;;  %v17358_v54 = vld [vmem:[#allocation7 + $0x13c4] ss:$28 sps:$4 sm:$0xff]  }
 0x702   : > { %6911 = vmatprep.subr.bf16.mxu0 %v17307_v17 }
 0x705   : > { %6912 = vmatpush1.bf16.msra.mxu0 %v17305_v59 }
 0x706   : > { %6913 = vmatprep.subr.bf16.mxu0 %v17310_v49 }
 0x709   : > { %6914 = vmatpush1.bf16.msra.mxu0 %v17308_v61  ;;  %v17356_v61 = vld [vmem:[#allocation7 + $0x13c0] ss:$28 sps:$4 sm:$0xff]  }
 0x70a   : > { %6915 = vmatprep.subr.bf16.mxu0 %v17313_v5  ;;  %v17361_v5 = vld [vmem:[#allocation7 + $0x13fc] ss:$28 sps:$4 sm:$0xff]  }
 0x70d   : > { %6916 = vmatpush1.bf16.msra.mxu0 %v17311_v27 }
 0x70e   : > { %6917 = vmatprep.subr.bf16.mxu0 %v17316_v38 }
 0x711   : > { %6918 = vmatpush1.bf16.msra.mxu0 %v17314_v2 }
 0x712   : > { %6919 = vmatprep.subr.bf16.mxu0 %v17319_v44  ;;  %v17359_v44 = vld [vmem:[#allocation7 + $0x13f8] ss:$28 sps:$4 sm:$0xff]  }
 0x714   : > { %v15765_v51 = vpop.f32.mrb[24].mxu1 }
 0x715   : > { %v15766_v30 = vpop.f32.mrb[25].mxu1  ;;  %6920 = vmatpush1.bf16.msra.mxu0 %v17317_v63  ;;  %v17364_v63 = vld [vmem:[#allocation7 + $0x1434] ss:$28 sps:$4 sm:$0xff]  }
 0x716   : > { %v15767_v45 = vadd.f32 %v15766_v30, %v15765_v51  ;;  %v15768_v4 = vpop.f32.mrb[26].mxu1  ;;  %6921 = vmatprep.subr.bf16.mxu0 %v17322_v50  ;;  %v17362_v50 = vld [vmem:[#allocation7 + $0x1430] ss:$28 sps:$4 sm:$0xff]   ;;  %v17365_v30 = vld [vmem:[#allocation7 + $0x1468] ss:$28 sps:$4 sm:$0xff]  }
 0x717   : > { %v15769_v21 = vpop.f32.mrb[27].mxu1  ;;  %v17367_v51 = vld [vmem:[#allocation7 + $0x146c] ss:$28 sps:$4 sm:$0xff]  }
 0x718   : > { %v7096_v48 = vadd.f32 %v15767_v45, %v7055_v3  ;;  %v15770_v24 = vadd.f32 %v15769_v21, %v15768_v4  ;;  %v17373_v21 = vld [vmem:[#allocation7 + $0x14dc] ss:$28 sps:$4 sm:$0xff]  }
 0x719   : > { %6922 = vmatpush1.bf16.msra.mxu0 %v17320_v1  ;;  %v17370_v1 = vld [vmem:[#allocation7 + $0x14a4] ss:$28 sps:$4 sm:$0xff]  }
 0x71a   : > { %v7099_v40 = vadd.f32 %v15770_v24, %v7058_v7  ;;  %6923 = vmatprep.subr.bf16.mxu0 %v17325_v43  ;;  %v17355_v7 = vld [vmem:[#allocation7 + $0x138c] ss:$28 sps:$4 sm:$0xff]  }
 0x71d   : > { %6924 = vmatpush1.bf16.msra.mxu0 %v17323_v46 }
 0x71e   : > { %6936 = vmatprep.subr.bf16.mxu0 %v17328_v23 }
 0x720   : > { %6926 = vmatmul.mubr.bf16.vlgmr.msra.gmra.mrb[20].mxu0 %v20138_v26  ;;  %v17341_v26 = vld [vmem:[#allocation7 + $0x12a8] ss:$28 sps:$4 sm:$0xff]  }
 0x721   : > { %6937 = vmatpush1.bf16.msra.mxu0 %v17326_v41  ;;  %6968 = vmatprep.mubr.bf16.mxu0 %v20142_v8 }
 0x722   : > { %6938 = vmatprep.subr.bf16.mxu0 %v17331_v55 }
 0x725   : > { %6939 = vmatpush1.bf16.msra.mxu0 %v17329_v33 }
 0x726   : > { %6940 = vmatprep.subr.bf16.mxu0 %v17334_v0 }
 0x729   : > { %6941 = vmatpush1.bf16.msra.mxu0 %v17332_v52 }
 0x72a   : > { %6942 = vmatprep.subr.bf16.mxu0 %v17337_v39 }
 0x72d   : > { %6943 = vmatpush1.bf16.msra.mxu0 %v17335_v56 }
 0x72e   : > { %6944 = vmatprep.subr.bf16.mxu0 %v17340_v6 }
 0x731   : > { %6945 = vmatpush1.bf16.msra.mxu0 %v17338_v28 }
 0x732   : > { %6946 = vmatprep.subr.bf16.mxu0 %v17343_v53 }
 0x734   : > { %v15787_v8 = vpop.f32.mrb[28].mxu1 }
 0x735   : > { %v15788_v13 = vpop.f32.mrb[29].mxu1  ;;  %6947 = vmatpush1.bf16.msra.mxu0 %v17341_v26 }
 0x736   : > { %v15789_v32 = vadd.f32 %v15788_v13, %v15787_v8  ;;  %v15790_v15 = vpop.f32.mrb[30].mxu1  ;;  %6948 = vmatprep.subr.bf16.mxu0 %v17346_v14 }
 0x737   : > { %v15791_v36 = vpop.f32.mrb[31].mxu1 }
 0x738   : > { %v7137_v18 = vadd.f32 %v15789_v32, %v7096_v48  ;;  %v15792_v31 = vadd.f32 %v15791_v36, %v15790_v15 }
 0x739   : > { %6949 = vmatpush1.bf16.msra.mxu0 %v17344_v16 }
 0x73a   : > { %v7140_v3 = vadd.f32 %v15792_v31, %v7099_v40  ;;  %6950 = vmatprep.subr.bf16.mxu0 %v17349_v42  ;;  %v17371_v40 = vld [vmem:[#allocation7 + $0x14d8] ss:$28 sps:$4 sm:$0xff]  }
 0x73d   : > { %6951 = vmatpush1.bf16.msra.mxu0 %v17347_v37 }
 0x73e   : > { %6952 = vmatprep.subr.bf16.mxu0 %v17352_v57 }
 0x741   : > { %6953 = vmatpush1.bf16.msra.mxu0 %v17350_v20 }
 0x742   : > { %6954 = vmatprep.subr.bf16.mxu0 %v17355_v7 }
 0x744   : > { %v16334_v17 = vpop.permute.xlu1 %16333 }
 0x745   : > { %v16336_v59 = vunpack.i.h.bf16 %v16334_v17  ;;  %v16335_v49 = vunpack.i.l.bf16 %v16334_v17  ;;  %6955 = vmatpush1.bf16.msra.mxu0 %v17353_v34 }
 0x746   : > { %6956 = vmatprep.subr.bf16.mxu0 %v17358_v54  ;;  %v20256_v54 = vpop.permute.xlu0 %16338 }
 0x747   : > { %v7482_v27 = vmax.f32 %v20232_v62, %v16336_v59  ;;  %v7472_v38 = vmax.f32 %v20228_v47, %v16335_v49  ;;  %v17368_v62 = vld [vmem:[#allocation7 + $0x14a0] ss:$28 sps:$4 sm:$0xff]   ;;  %v16340_v17 = vunpack.i.l.bf16 %v20256_v54 }
 0x749   : > { %v16342_v2 = vpack.i.bf16 %v7482_v27, %v7472_v38  ;;  %6957 = vmatpush1.bf16.msra.mxu0 %v17356_v61  ;;  %v7467_v49 = vmax.f32 %v20212_v60, %v16340_v17  ;;  %v17374_v38 = vld [vmem:[#allocation10] ss:$28 sps:$4 sm:$0xff]   ;;  %v17443_v17 = vld [vmem:[#allocation10 + $0x270] ss:$28 sps:$4 sm:$0xff]  }
 0x74a   : > { %6958 = vmatprep.subr.bf16.mxu0 %v17361_v5  ;;  %v17383_v60 = vld [vmem:[#allocation10 + $0x40] ss:$28 sps:$4 sm:$0xff]  }
 0x74b   : > { %16343 = vrot.lane.b32.xlu1 %v16342_v2, %s19036_s27  ;;  %v17376_v2 = vld [vmem:[#allocation10 + $0x4] ss:$28 sps:$4 sm:$0xff]  }
 0x74c   : > { %11580 = vmatprep.subr.bf16.mxu1 %v17376_v2  ;;  %v2737_v2 = vrot.slane %v20171_v58, %v19550_v29 }
 0x74d   : > { %6959 = vmatpush1.bf16.msra.mxu0 %v17359_v44  ;;  %v17377_v44 = vld [vmem:[#allocation10 + $0x8] ss:$28 sps:$4 sm:$0xff]   ;;  %11581 = vmatpush1.bf16.msra.mxu1 %v17374_v38  ;;  %v2733_v38 = vrot.slane %v20171_v58, %v19542_v19 }
 0x74e   : > { %6960 = vmatprep.subr.bf16.mxu0 %v17364_v63  ;;  %v17379_v63 = vld [vmem:[#allocation10 + $0xc] ss:$28 sps:$4 sm:$0xff]  }
 0x751   : > { %6961 = vmatpush1.bf16.msra.mxu0 %v17362_v50  ;;  %v17382_v50 = vld [vmem:[#allocation10 + $0x3c] ss:$28 sps:$4 sm:$0xff]  }
 0x752   : > { %6962 = vmatprep.subr.bf16.mxu0 %v17367_v51  ;;  %v17385_v51 = vld [vmem:[#allocation10 + $0x44] ss:$28 sps:$4 sm:$0xff]   ;;  %11582 = vmatprep.subr.bf16.mxu1 %v17382_v50 }
 0x754   : > { %v15809_v45 = vpop.f32.mrb[32].mxu1 }
 0x755   : > { %v15810_v4 = vpop.f32.mrb[33].mxu1  ;;  %6963 = vmatpush1.bf16.msra.mxu0 %v17365_v30  ;;  %v17380_v30 = vld [vmem:[#allocation10 + $0x38] ss:$28 sps:$4 sm:$0xff]  }
 0x756   : > { %v15811_v47 = vadd.f32 %v15810_v4, %v15809_v45  ;;  %v15812_v43 = vpop.f32.mrb[34].mxu1  ;;  %6964 = vmatprep.subr.bf16.mxu0 %v17370_v1  ;;  %v17388_v1 = vld [vmem:[#allocation10 + $0x74] ss:$28 sps:$4 sm:$0xff]   ;;  %v17391_v45 = vld [vmem:[#allocation10 + $0x7c] ss:$28 sps:$4 sm:$0xff]   ;;  %11583 = vmatpush1.bf16.msra.mxu1 %v17380_v30 }
 0x757   : > { %v15813_v48 = vpop.f32.mrb[35].mxu1  ;;  %v17386_v4 = vld [vmem:[#allocation10 + $0x70] ss:$28 sps:$4 sm:$0xff]   ;;  %11584 = vmatprep.subr.bf16.mxu1 %v17388_v1 }
 0x758   : > { %v7178_v24 = vadd.f32 %v15811_v47, %v7137_v18  ;;  %v15814_v46 = vadd.f32 %v15813_v48, %v15812_v43  ;;  %v17394_v47 = vld [vmem:[#allocation10 + $0xac] ss:$28 sps:$4 sm:$0xff]   ;;  %v17397_v43 = vld [vmem:[#allocation10 + $0xb4] ss:$28 sps:$4 sm:$0xff]  }
 0x759   : > { %6965 = vmatpush1.bf16.msra.mxu0 %v17368_v62  ;;  %v17389_v62 = vld [vmem:[#allocation10 + $0x78] ss:$28 sps:$4 sm:$0xff]   ;;  %v17395_v48 = vld [vmem:[#allocation10 + $0xb0] ss:$28 sps:$4 sm:$0xff]  }
 0x75a   : > { %v7181_v23 = vadd.f32 %v15814_v46, %v7140_v3  ;;  %6966 = vmatprep.subr.bf16.mxu0 %v17373_v21  ;;  %11585 = vmatpush1.bf16.msra.mxu1 %v17386_v4  ;;  %v17392_v21 = vld [vmem:[#allocation10 + $0xa8] ss:$28 sps:$4 sm:$0xff]  }
 0x75b   : > { %11586 = vmatprep.subr.bf16.mxu1 %v17394_v47  ;;  %v17403_v46 = vld [vmem:[#allocation10 + $0xec] ss:$28 sps:$4 sm:$0xff]  }
 0x75d   : > { %6967 = vmatpush1.bf16.msra.mxu0 %v17371_v40  ;;  %v17398_v40 = vld [vmem:[#allocation10 + $0xe0] ss:$28 sps:$4 sm:$0xff]  }
 0x75e   : > { %11867 = vmatprep.subr.bf16.mxu0 %v17379_v63  ;;  %11587 = vmatpush1.bf16.msra.mxu1 %v17392_v21 }
 0x760   : > { %6969 = vmatmul.mubr.bf16.vlgmr.msra.gmra.mrb[20].mxu0 %v20148_v35 }
 0x761   : > { %11868 = vmatpush1.bf16.msra.mxu0 %v17377_v44 }
 0x762   : > { %11869 = vmatprep.subr.bf16.mxu0 %v17385_v51 }
 0x765   : > { %11870 = vmatpush1.bf16.msra.mxu0 %v17383_v60 }
 0x766   : > { %11871 = vmatprep.subr.bf16.mxu0 %v17391_v45 }
 0x769   : > { %11872 = vmatpush1.bf16.msra.mxu0 %v17389_v62 }
 0x76a   : > { %11873 = vmatprep.subr.bf16.mxu0 %v17397_v43 }
 0x76d   : > { %11874 = vmatpush1.bf16.msra.mxu0 %v17395_v48 }
 0x76e   : > { %11875 = vmatprep.subr.bf16.mxu0 %v17403_v46 }
 0x774   : > { %v15831_v41 = vpop.f32.mrb[36].mxu1 }
 0x775   : > { %v15832_v55 = vpop.f32.mrb[37].mxu1 }
 0x776   : > { %v15833_v33 = vadd.f32 %v15832_v55, %v15831_v41  ;;  %v15834_v0 = vpop.f32.mrb[38].mxu1  ;;  %v17406_v41 = vld [vmem:[#allocation10 + $0x11c] ss:$28 sps:$4 sm:$0xff]   ;;  %v17409_v55 = vld [vmem:[#allocation10 + $0x124] ss:$28 sps:$4 sm:$0xff]  }
 0x777   : > { %v15835_v52 = vpop.f32.mrb[39].mxu1 }
 0x778   : > { %v7219_v39 = vadd.f32 %v15833_v33, %v7178_v24  ;;  %v15836_v56 = vadd.f32 %v15835_v52, %v15834_v0  ;;  %v17400_v24 = vld [vmem:[#allocation10 + $0xe4] ss:$28 sps:$4 sm:$0xff]   ;;  %v17404_v33 = vld [vmem:[#allocation10 + $0x118] ss:$28 sps:$4 sm:$0xff]  }
 0x779   : > { %11588 = vmatprep.subr.bf16.mxu1 %v17400_v24  ;;  %v17407_v0 = vld [vmem:[#allocation10 + $0x120] ss:$28 sps:$4 sm:$0xff]   ;;  %v17412_v52 = vld [vmem:[#allocation10 + $0x154] ss:$28 sps:$4 sm:$0xff]  }
 0x77a   : > { %vm7231_vm0 = vcmp.ge.f32.partialorder %v7219_v39, 0.0  ;;  %v7245_v6 = vmul.f32 0.01, %v7219_v39  ;;  %v7222_v28 = vadd.f32 %v15836_v56, %v7181_v23  ;;  %v17401_v23 = vld [vmem:[#allocation10 + $0xe8] ss:$28 sps:$4 sm:$0xff]   ;;  %11589 = vmatpush1.bf16.msra.mxu1 %v17398_v40 }
 0x77b   : > { %11876 = vmatpush1.bf16.msra.mxu0 %v17401_v23  ;;  %11590 = vmatprep.subr.bf16.mxu1 %v17406_v41  ;;  %v17410_v56 = vld [vmem:[#allocation10 + $0x150] ss:$28 sps:$4 sm:$0xff]  }
 0x77c   : > { %v7259_v53 = vsel %vm7231_vm0, %v7219_v39, %v7245_v6  ;;  %vm7238_vm13 = vcmp.ge.f32.partialorder %v7222_v28, 0.0  ;;  %v7252_v26 = vmul.f32 0.01, %v7222_v28  ;;  %11877 = vmatprep.subr.bf16.mxu0 %v17409_v55  ;;  %v17415_v39 = vld [vmem:[#allocation10 + $0x15c] ss:$28 sps:$4 sm:$0xff]  }
 0x77d   : > { %v7280_v14 = vrot.slane %v7259_v53, 1  ;;  %v17413_v6 = vld [vmem:[#allocation10 + $0x158] ss:$28 sps:$4 sm:$0xff]  }
 0x77e   : > { %v7266_v8 = vsel %vm7238_vm13, %v7222_v28, %v7252_v26  ;;  %11591 = vmatpush1.bf16.msra.mxu1 %v17404_v33  ;;  %v17418_v28 = vld [vmem:[#allocation10 + $0x18c] ss:$28 sps:$4 sm:$0xff]  }
 0x77f   : > { %v7294_v13 = vmax.f32 %v7259_v53, %v7280_v14  ;;  %v7308_v16 = vrot.slane %v7266_v8, 1  ;;  %11878 = vmatpush1.bf16.msra.mxu0 %v17407_v0  ;;  %11592 = vmatprep.subr.bf16.mxu1 %v17412_v52  ;;  %v17421_v53 = vld [vmem:[#allocation10 + $0x194] ss:$28 sps:$4 sm:$0xff]   ;;  %v17416_v26 = vld [vmem:[#allocation10 + $0x188] ss:$28 sps:$4 sm:$0xff]  }
 0x780   : > { %11879 = vmatprep.subr.bf16.mxu0 %v17415_v39  ;;  %v17419_v14 = vld [vmem:[#allocation10 + $0x190] ss:$28 sps:$4 sm:$0xff]   ;;  %v17452_v39 = vld [vmem:[#allocation10 + $0x2d8] ss:$28 sps:$4 sm:$0xff]  }
 0x781   : > { %v7336_v32 = vrot.slane %v7294_v13, 1  ;;  %v7350_v15 = vrot.slane %v7294_v13, 2  ;;  %v7322_v35 = vmax.f32 %v7266_v8, %v7308_v16  ;;  %v7364_v42 = vrot.slane %v7294_v13, 3  ;;  %v17424_v8 = vld [vmem:[#allocation10 + $0x1c4] ss:$28 sps:$4 sm:$0xff]  }
 0x782   : > { %11593 = vmatpush1.bf16.msra.mxu1 %v17410_v56  ;;  %v17422_v16 = vld [vmem:[#allocation10 + $0x1c0] ss:$28 sps:$4 sm:$0xff]  }
 0x783   : > { %v7427_v36 = vsel %vm1575_vm7, %v7294_v13, %v7336_v32  ;;  %v7385_v18 = vrot.slane %v7322_v35, 4  ;;  %v7399_v37 = vrot.slane %v7322_v35, 5  ;;  %v7413_v57 = vrot.slane %v7322_v35, 6  ;;  %11880 = vmatpush1.bf16.msra.mxu0 %v17413_v6  ;;  %11594 = vmatprep.subr.bf16.mxu1 %v17418_v28  ;;  %v17427_v13 = vld [vmem:[#allocation10 + $0x1cc] ss:$28 sps:$4 sm:$0xff]  }
 0x784   : > { %v7434_v31 = vsel %vm1583_vm15, %v7427_v36, %v7350_v15  ;;  %11881 = vmatprep.subr.bf16.mxu0 %v17421_v53  ;;  %v17425_v32 = vld [vmem:[#allocation10 + $0x1c8] ss:$28 sps:$4 sm:$0xff]   ;;  %v17430_v15 = vld [vmem:[#allocation10 + $0x1fc] ss:$28 sps:$4 sm:$0xff]  }
 0x785   : > { %v7441_v3 = vsel %vm1591_vm4, %v7434_v31, %v7364_v42  ;;  %v17433_v35 = vld [vmem:[#allocation10 + $0x204] ss:$28 sps:$4 sm:$0xff]   ;;  %v17428_v42 = vld [vmem:[#allocation10 + $0x1f8] ss:$28 sps:$4 sm:$0xff]  }
 0x786   : > { %v7448_v20 = vsel %vm1599_vm5, %v7441_v3, %v7385_v18  ;;  %11595 = vmatpush1.bf16.msra.mxu1 %v17416_v26  ;;  %v17431_v36 = vld [vmem:[#allocation10 + $0x200] ss:$28 sps:$4 sm:$0xff]   ;;  %v17436_v18 = vld [vmem:[#allocation10 + $0x234] ss:$28 sps:$4 sm:$0xff]   ;;  %v16341_v26 = vunpack.i.h.bf16 %v20256_v54 }
 0x787   : > { %v7455_v7 = vsel %vm953_vm2, %v7448_v20, %v7399_v37  ;;  %11882 = vmatpush1.bf16.msra.mxu0 %v17419_v14  ;;  %11596 = vmatprep.subr.bf16.mxu1 %v17424_v8  ;;  %v17439_v31 = vld [vmem:[#allocation10 + $0x23c] ss:$28 sps:$4 sm:$0xff]   ;;  %v17434_v37 = vld [vmem:[#allocation10 + $0x230] ss:$28 sps:$4 sm:$0xff]  }
 0x788   : > { %v20254_v34 = vsel %vm1614_vm8, %v7455_v7, %v7413_v57  ;;  %11883 = vmatprep.subr.bf16.mxu0 %v17427_v13  ;;  %v17437_v3 = vld [vmem:[#allocation10 + $0x238] ss:$28 sps:$4 sm:$0xff]   ;;  %v17442_v57 = vld [vmem:[#allocation10 + $0x26c] ss:$28 sps:$4 sm:$0xff]  }
 0x789   : > { %v17445_v20 = vld [vmem:[#allocation10 + $0x274] ss:$28 sps:$4 sm:$0xff]   ;;  %v17440_v7 = vld [vmem:[#allocation10 + $0x268] ss:$28 sps:$4 sm:$0xff]   ;;  %v17454_v53 = vld [vmem:[#allocation10 + $0x2dc] ss:$28 sps:$4 sm:$0xff]  }
 0x78a   : > { %11597 = vmatpush1.bf16.msra.mxu1 %v17422_v16  ;;  %v17455_v16 = vld [vmem:[#allocation10 + $0x2e0] ss:$28 sps:$4 sm:$0xff]  }
 0x78b   : > { %11884 = vmatpush1.bf16.msra.mxu0 %v17425_v32  ;;  %11598 = vmatprep.subr.bf16.mxu1 %v17430_v15 }
 0x78c   : > { %11885 = vmatprep.subr.bf16.mxu0 %v17433_v35 }
 0x78e   : > { %11599 = vmatpush1.bf16.msra.mxu1 %v17428_v42 }
 0x78f   : > { %11886 = vmatpush1.bf16.msra.mxu0 %v17431_v36  ;;  %11600 = vmatprep.subr.bf16.mxu1 %v17436_v18  ;;  %v17457_v36 = vld [vmem:[#allocation10 + $0x2e4] ss:$28 sps:$4 sm:$0xff]  }
 0x790   : > { %11887 = vmatprep.subr.bf16.mxu0 %v17439_v31 }
 0x792   : > { %11601 = vmatpush1.bf16.msra.mxu1 %v17434_v37 }
 0x793   : > { %11888 = vmatpush1.bf16.msra.mxu0 %v17437_v3  ;;  %11602 = vmatprep.subr.bf16.mxu1 %v17442_v57 }
 0x794   : > { %11889 = vmatprep.subr.bf16.mxu0 %v17445_v20 }
 0x796   : > { %11603 = vmatpush1.bf16.msra.mxu1 %v17440_v7 }
 0x797   : > { %11890 = vmatpush1.bf16.msra.mxu0 %v17443_v17 }
 0x7bd   : > { %v20259_v59 = vpop.permute.xlu1 %16343 }
 0x7be   : > { %v16345_v61 = vunpack.i.l.bf16 %v20259_v59  ;;  %v16346_v18 = vunpack.i.h.bf16 %v20259_v59  ;;  %v7477_v59 = vmax.f32 %v20219_v25, %v16341_v26 }
 0x7c0   : > { %v7510_v5 = vsel %vm1812_vm3, %v7467_v49, %v16345_v61  ;;  %v17448_v49 = vld [vmem:[#allocation10 + $0x2a4] ss:$28 sps:$4 sm:$0xff]   ;;  %v17451_v61 = vld [vmem:[#allocation10 + $0x2ac] ss:$28 sps:$4 sm:$0xff]   ;;  %v7511_v25 = vsel %vm1812_vm3, %v7477_v59, %v16346_v18 }
 0x7c1   : > { %v7513_v27 = vpack.c.bf16 %v7510_v5, %v7510_v5  ;;  %v17446_v5 = vld [vmem:[#allocation10 + $0x2a0] ss:$28 sps:$4 sm:$0xff]   ;;  %11604 = vmatprep.subr.bf16.mxu1 %v17448_v49  ;;  %11891 = vmatprep.subr.bf16.mxu0 %v17451_v61  ;;  %v17458_v49 = vld [vmem:[#allocation10 + $0x310] ss:$28 sps:$4 sm:$0xff]  }
 0x7c2   : > { %11605 = vmatpush1.bf16.msra.mxu1 %v17446_v5  ;;  %v17460_v61 = vld [vmem:[#allocation10 + $0x314] ss:$28 sps:$4 sm:$0xff]   ;;  %v17499_v59 = vld [vmem:[#allocation10 + $0x46c] ss:$28 sps:$4 sm:$0xff]  }
 0x7c3   : > { %7521 = vrot.lane.b32.xlu1 %v7513_v27, %s19036_s27  ;;  %v17449_v27 = vld [vmem:[#allocation10 + $0x2a8] ss:$28 sps:$4 sm:$0xff]   ;;  %11606 = vmatprep.subr.bf16.mxu1 %v17454_v53  ;;  %v17461_v5 = vld [vmem:[#allocation10 + $0x318] ss:$28 sps:$4 sm:$0xff]  }
 0x7c4   : > { %11892 = vmatpush1.bf16.msra.mxu0 %v17449_v27 }
 0x7c5   : > { %11893 = vmatprep.subr.bf16.mxu0 %v17457_v36  ;;  %v17479_v36 = vld [vmem:[#allocation10 + $0x3c0] ss:$28 sps:$4 sm:$0xff]  }
 0x7c6   : > { %11607 = vmatpush1.bf16.msra.mxu1 %v17452_v39 }
 0x7c7   : > { %11608 = vmatprep.subr.bf16.mxu1 %v17460_v61  ;;  %v17491_v61 = vld [vmem:[#allocation10 + $0x430] ss:$28 sps:$4 sm:$0xff]  }
 0x7c8   : > { %11894 = vmatpush1.bf16.msra.mxu0 %v17455_v16  ;;  %v17481_v16 = vld [vmem:[#allocation10 + $0x3c4] ss:$28 sps:$4 sm:$0xff]  }
 0x7ca   : > { %11609 = vmatpush1.bf16.msra.mxu1 %v17458_v49  ;;  %v17488_v49 = vld [vmem:[#allocation10 + $0x428] ss:$28 sps:$4 sm:$0xff]  }
 0x833   : > { %v6970_v44 = vpop.f32.mrb[20].mxu0 }
 0x834   : > { %v15912_v63 = vadd.f32 %v6970_v44, %v2733_v38  ;;  %v6972_v50 = vpop.f32.mrb[21].mxu0  ;;  %v17463_v44 = vld [vmem:[#allocation10 + $0x31c] ss:$28 sps:$4 sm:$0xff]  }
 0x835   : > { %v15913_v51 = vadd.f32 %v6972_v50, %v2737_v2  ;;  %v6974_v30 = vpop.f32.mrb[22].mxu0  ;;  %11895 = vmatprep.subr.bf16.mxu0 %v17463_v44  ;;  %v17505_v44 = vld [vmem:[#allocation10 + $0x4a4] ss:$28 sps:$4 sm:$0xff]  }
 0x836   : > { %vm7229_vm14 = vcmp.ge.f32.partialorder %v15912_v63, 0.0  ;;  %v7243_v60 = vmul.f32 0.01, %v15912_v63  ;;  %v15914_v1 = vadd.f32 %v6974_v30, %v2733_v38  ;;  %v6976_v45 = vpop.f32.mrb[23].mxu0  ;;  %v17469_v30 = vld [vmem:[#allocation10 + $0x354] ss:$28 sps:$4 sm:$0xff]   ;;  %11896 = vmatpush1.bf16.msra.mxu0 %v17461_v5 }
 0x837   : > { %vm7230_vm1 = vcmp.ge.f32.partialorder %v15913_v51, 0.0  ;;  %v7244_v4 = vmul.f32 0.01, %v15913_v51  ;;  %v15915_v43 = vadd.f32 %v6976_v45, %v2737_v2  ;;  %v17464_v45 = vld [vmem:[#allocation10 + $0x348] ss:$28 sps:$4 sm:$0xff]   ;;  %11897 = vmatprep.subr.bf16.mxu0 %v17469_v30 }
 0x838   : > { %v7257_v62 = vsel %vm7229_vm14, %v15912_v63, %v7243_v60  ;;  %vm7236_vm6 = vcmp.ge.f32.partialorder %v15914_v1, 0.0  ;;  %v7250_v47 = vmul.f32 0.01, %v15914_v1  ;;  %v17466_v63 = vld [vmem:[#allocation10 + $0x34c] ss:$28 sps:$4 sm:$0xff]  }
 0x839   : > { %v7278_v21 = vrot.slane %v7257_v62, 1  ;;  %v7258_v48 = vsel %vm7230_vm1, %v15913_v51, %v7244_v4  ;;  %vm7237_vm9 = vcmp.ge.f32.partialorder %v15915_v43, 0.0  ;;  %v7251_v58 = vmul.f32 0.01, %v15915_v43  ;;  %v17467_v4 = vld [vmem:[#allocation10 + $0x350] ss:$28 sps:$4 sm:$0xff]   ;;  %11610 = vmatprep.subr.bf16.mxu1 %v17466_v63 }
 0x83a   : > { %v7279_v24 = vrot.slane %v7258_v48, 1  ;;  %v7264_v46 = vsel %vm7236_vm6, %v15914_v1, %v7250_v47  ;;  %11611 = vmatpush1.bf16.msra.mxu1 %v17464_v45  ;;  %11898 = vmatpush1.bf16.msra.mxu0 %v17467_v4  ;;  %v7522_v47 = vpop.permute.xlu1 %7521  ;;  %v17496_v5 = vld [vmem:[#allocation10 + $0x464] ss:$28 sps:$4 sm:$0xff]   ;;  %v17500_v63 = vld [vmem:[#allocation10 + $0x498] ss:$28 sps:$4 sm:$0xff]  }
 0x83b   : > { %v7292_v40 = vmax.f32 %v7257_v62, %v7278_v21  ;;  %v7306_v23 = vrot.slane %v7264_v46, 1  ;;  %v7265_v55 = vsel %vm7237_vm9, %v15915_v43, %v7251_v58  ;;  %v7514_v62 = vpack.c.bf16 %v7511_v25, %v7511_v25  ;;  %v17508_v30 = vld [vmem:[#allocation10 + $0x4d4] ss:$28 sps:$4 sm:$0xff]   ;;  %v17514_v45 = vld [vmem:[#allocation10 + $0x50c] ss:$28 sps:$4 sm:$0xff]  }
 0x83c   : > { %v7293_v41 = vmax.f32 %v7258_v48, %v7279_v24  ;;  %v7307_v28 = vrot.slane %v7265_v55, 1  ;;  %v7534_v43 = vsel %vm1812_vm3, 0, %v7522_v47  ;;  %v17509_v25 = vld [vmem:[#allocation10 + $0x4d8] ss:$28 sps:$4 sm:$0xff]  }
 0x83d   : > { %v7334_v33 = vrot.slane %v7292_v40, 1  ;;  %v7348_v0 = vrot.slane %v7292_v40, 2  ;;  %v7320_v52 = vmax.f32 %v7264_v46, %v7306_v23  ;;  %v7362_v14 = vrot.slane %v7292_v40, 3  ;;  %v17517_v4 = vld [vmem:[#allocation10 + $0x514] ss:$28 sps:$4 sm:$0xff]  }
 0x83e   : > { %v7335_v56 = vrot.slane %v7293_v41, 1  ;;  %v7349_v6 = vrot.slane %v7293_v41, 2  ;;  %v7321_v32 = vmax.f32 %v7265_v55, %v7307_v28  ;;  %v7363_v15 = vrot.slane %v7293_v41, 3 }
 0x83f   : > { %v7425_v8 = vsel %vm1575_vm7, %v7292_v40, %v7334_v33  ;;  %v7383_v13 = vrot.slane %v7320_v52, 4  ;;  %v7397_v31 = vrot.slane %v7320_v52, 5  ;;  %v7411_v7 = vrot.slane %v7320_v52, 6  ;;  %v17472_v52 = vld [vmem:[#allocation10 + $0x384] ss:$28 sps:$4 sm:$0xff]  }
 0x840   : > { %v7426_v35 = vsel %vm1575_vm7, %v7293_v41, %v7335_v56  ;;  %v7432_v42 = vsel %vm1583_vm15, %v7425_v8, %v7348_v0  ;;  %v7384_v3 = vrot.slane %v7321_v32, 4  ;;  %v7398_v57 = vrot.slane %v7321_v32, 5  ;;  %v17475_v56 = vld [vmem:[#allocation10 + $0x38c] ss:$28 sps:$4 sm:$0xff]   ;;  %11621 = vmatprep.subr.bf16.mxu1 %v17472_v52 }
 0x841   : > { %v7433_v37 = vsel %vm1583_vm15, %v7426_v35, %v7349_v6  ;;  %v7439_v54 = vsel %vm1591_vm4, %v7432_v42, %v7362_v14  ;;  %v7412_v27 = vrot.slane %v7321_v32, 6  ;;  %v7535_v48 = vshrl.u32 %v7534_v43, 16  ;;  %11908 = vmatprep.subr.bf16.mxu0 %v17475_v56  ;;  %v17473_v14 = vld [vmem:[#allocation10 + $0x388] ss:$28 sps:$4 sm:$0xff]   ;;  %v17476_v42 = vld [vmem:[#allocation10 + $0x3b8] ss:$28 sps:$4 sm:$0xff]  }
 0x842   : > { %v7440_v20 = vsel %vm1591_vm4, %v7433_v37, %v7363_v15  ;;  %v7446_v17 = vsel %vm1599_vm5, %v7439_v54, %v7383_v13  ;;  %v7538_v39 = vshll.u32 %v7534_v43, 16  ;;  %v17478_v13 = vld [vmem:[#allocation10 + $0x3bc] ss:$28 sps:$4 sm:$0xff]   ;;  %v17484_v37 = vld [vmem:[#allocation10 + $0x3f4] ss:$28 sps:$4 sm:$0xff]  }
 0x843   : > { %v7447_v38 = vsel %vm1599_vm5, %v7440_v20, %v7384_v3  ;;  %v7453_v2 = vsel %vm953_vm2, %v7446_v17, %v7397_v31  ;;  %v7537_v41 = vrot.slane %v7535_v48, 7  ;;  %v17487_v54 = vld [vmem:[#allocation10 + $0x3fc] ss:$28 sps:$4 sm:$0xff]   ;;  %v17493_v17 = vld [vmem:[#allocation10 + $0x434] ss:$28 sps:$4 sm:$0xff]  }
 0x844   : > { %v7454_v50 = vsel %vm953_vm2, %v7447_v38, %v7398_v57  ;;  %v20283_v51 = vsel %vm1614_vm8, %v7453_v2, %v7411_v7  ;;  %v17482_v57 = vld [vmem:[#allocation10 + $0x3f0] ss:$28 sps:$4 sm:$0xff]   ;;  %v17485_v20 = vld [vmem:[#allocation10 + $0x3f8] ss:$28 sps:$4 sm:$0xff]   ;;  %v17497_v38 = vld [vmem:[#allocation10 + $0x468] ss:$28 sps:$4 sm:$0xff]  }
 0x845   : > { %v7461_v60 = vsel %vm1614_vm8, %v7454_v50, %v7412_v27  ;;  %v16347_v1 = vpack.i.bf16 %v20254_v34, %v20283_v51  ;;  %v7540_v53 = vor.u32 %v7538_v39, %v7537_v41  ;;  %v17490_v7 = vld [vmem:[#allocation10 + $0x42c] ss:$28 sps:$4 sm:$0xff]   ;;  %v17494_v27 = vld [vmem:[#allocation10 + $0x460] ss:$28 sps:$4 sm:$0xff]   ;;  %v17524_v41 = vld [vmem:[#allocation10 + $0x578] ss:$28 sps:$4 sm:$0xff]  }
 0x846   : > { %7489 = vrot.lane.b32.xlu0 %v7461_v60, %s19036_s27  ;;  %v17502_v2 = vld [vmem:[#allocation10 + $0x49c] ss:$28 sps:$4 sm:$0xff]   ;;  %v17520_v43 = vld [vmem:[#allocation10 + $0x544] ss:$28 sps:$4 sm:$0xff]   ;;  %v17530_v52 = vld [vmem:[#allocation10 + $0x5b0] ss:$28 sps:$4 sm:$0xff]  }
 0x847   : > { %16348 = vrot.lane.b32.xlu1 %v16347_v1, %s19036_s27  ;;  %v20317_v15 = vsel %vm20060_vm11, 0, %v7540_v53  ;;  %v17503_v50 = vld [vmem:[#allocation10 + $0x4a0] ss:$28 sps:$4 sm:$0xff]   ;;  %v17506_v1 = vld [vmem:[#allocation10 + $0x4d0] ss:$28 sps:$4 sm:$0xff]  }
 0x848   : > { %v17518_v48 = vld [vmem:[#allocation10 + $0x540] ss:$28 sps:$4 sm:$0xff]   ;;  %v17533_v39 = vld [vmem:[#allocation10 + $0x5b8] ss:$28 sps:$4 sm:$0xff]   ;;  %v17538_v56 = vld [vmem:[#allocation10 + $0x5ec] ss:$28 sps:$4 sm:$0xff]  }
 0x849   : > { %v17539_v53 = vld [vmem:[#allocation10 + $0x5f0] ss:$28 sps:$4 sm:$0xff]  }
 0x84a   : > { %7523 = vrot.lane.b32.xlu0 %v7514_v62, %s19036_s27  ;;  %v17512_v62 = vld [vmem:[#allocation10 + $0x508] ss:$28 sps:$4 sm:$0xff]  }
 0x8b8   : > { %v7490_v21 = vpop.permute.xlu0 %7489 }
 0x8b9   : > { %v7492_v24 = vmax.f32 %v7461_v60, %v7490_v21  ;;  %v20293_v46 = vpop.permute.xlu1 %16348  ;;  %v17511_v60 = vld [vmem:[#allocation10 + $0x4dc] ss:$28 sps:$4 sm:$0xff]   ;;  %v17523_v21 = vld [vmem:[#allocation10 + $0x54c] ss:$28 sps:$4 sm:$0xff]  }
 0x8ba   : > { %v16351_v58 = vunpack.i.h.bf16 %v20293_v46 }
 0x8bb   : > { %7507 = vrot.lane.b32.xlu0 %v7492_v24, %s19036_s27  ;;  %v17521_v24 = vld [vmem:[#allocation10 + $0x548] ss:$28 sps:$4 sm:$0xff]  }
 0x8bc   : > { %v7497_v40 = vmax.f32 %v20254_v34, %v16351_v58  ;;  %v20298_v23 = vpop.permute.xlu0 %7523  ;;  %v17470_v34 = vld [vmem:[#allocation10 + $0x380] ss:$28 sps:$4 sm:$0xff]  }
 0x8bd   : > { %v7530_v55 = vsel %vm1812_vm3, %v7522_v47, %v20298_v23  ;;  %v17515_v47 = vld [vmem:[#allocation10 + $0x510] ss:$28 sps:$4 sm:$0xff]   ;;  %v17526_v58 = vld [vmem:[#allocation10 + $0x57c] ss:$28 sps:$4 sm:$0xff]  }
 0x8be   : > { %v7542_v33 = vshrl.u32 %v7530_v55, 16  ;;  %v7516_v0 = vpack.c.bf16 %v7497_v40, %v7497_v40  ;;  %v7545_v28 = vshll.u32 %v7530_v55, 16  ;;  %v17529_v40 = vld [vmem:[#allocation10 + $0x584] ss:$28 sps:$4 sm:$0xff]  }
 0x8bf   : > { %v17527_v55 = vld [vmem:[#allocation10 + $0x580] ss:$28 sps:$4 sm:$0xff]  }
 0x8c0   : > { %v7544_v6 = vrot.slane %v7542_v33, 7  ;;  %7527 = vrot.lane.b32.xlu0 %v7516_v0, %s19036_s27  ;;  %v17532_v33 = vld [vmem:[#allocation10 + $0x5b4] ss:$28 sps:$4 sm:$0xff]   ;;  %v17535_v0 = vld [vmem:[#allocation10 + $0x5bc] ss:$28 sps:$4 sm:$0xff]  }
 0x8c2   : > { %v7547_v26 = vor.u32 %v7545_v28, %v7544_v6  ;;  %v17541_v6 = vld [vmem:[#allocation10 + $0x5f4] ss:$28 sps:$4 sm:$0xff]   ;;  %v17536_v28 = vld [vmem:[#allocation10 + $0x5e8] ss:$28 sps:$4 sm:$0xff]  }
 0x8c4   : > { %v20305_v8 = vsel %vm20060_vm11, 0, %v7547_v26  ;;  %v17544_v26 = vld [vmem:[#allocation10 + $0x624] ss:$28 sps:$4 sm:$0xff]  }
 0x8c5   : > { %v20309_v32 = vsel %vm1599_vm5, %v20305_v8, 0  ;;  %15510 = vmatprep.mubr.msk.bf16.mxu1 %vm1599_vm5, %v20305_v8  ;;  %15515 = vmatprep.mubr.msk.bf16.mxu0 %vm1599_vm5, %v20305_v8 }
 0x8c6   : > { %15511 = vmatmul.mubr.msk.bf16.vlgmr.msra.gmra.mrb[40].mxu1 %vm1599_vm5, %v20317_v15  ;;  %15516 = vmatmul.mubr.msk.bf16.vlgmr.msra.gmra.mrb[24].mxu0 %vm1599_vm5, %v20317_v15  ;;  %v7600_v35 = vshll.u32 %v20309_v32, 16  ;;  %v7598_v18 = vshrl.u32 %v20309_v32, 16 }
 0x8c7   : > { %11622 = vmatpush1.bf16.msra.mxu1 %v17470_v34  ;;  %11909 = vmatpush1.bf16.msra.mxu0 %v17473_v14  ;;  %v17547_v34 = vld [vmem:[#allocation10 + $0x62c] ss:$28 sps:$4 sm:$0xff]   ;;  %v17542_v14 = vld [vmem:[#allocation10 + $0x620] ss:$28 sps:$4 sm:$0xff]  }
 0x8c8   : > { %v7602_v31 = vrot.slane %v7600_v35, 1  ;;  %11623 = vmatprep.subr.bf16.mxu1 %v17478_v13  ;;  %11910 = vmatprep.subr.bf16.mxu0 %v17481_v16  ;;  %v17545_v13 = vld [vmem:[#allocation10 + $0x628] ss:$28 sps:$4 sm:$0xff]   ;;  %v17550_v16 = vld [vmem:[#allocation10 + $0x65c] ss:$28 sps:$4 sm:$0xff]  }
 0x8c9   : > { %v17553_v35 = vld [vmem:[#allocation10 + $0x664] ss:$28 sps:$4 sm:$0xff]  }
 0x8ca   : > { %v7603_v3 = vor.u32 %v7602_v31, %v7598_v18  ;;  %v16350_v18 = vunpack.i.l.bf16 %v20293_v46  ;;  %v20329_v31 = vsel %vm1599_vm5, %v20317_v15, 0  ;;  %v17563_v46 = vld [vmem:[#allocation10 + $0x6d0] ss:$28 sps:$4 sm:$0xff]  }
 0x8cb   : > { %11624 = vmatpush1.bf16.msra.mxu1 %v17476_v42  ;;  %11911 = vmatpush1.bf16.msra.mxu0 %v17479_v36  ;;  %v17548_v42 = vld [vmem:[#allocation10 + $0x658] ss:$28 sps:$4 sm:$0xff]   ;;  %v17551_v36 = vld [vmem:[#allocation10 + $0x660] ss:$28 sps:$4 sm:$0xff]  }
 0x8cc   : > { %7624 = vrot.lane.b32.xlu0 %v7603_v3, %s19036_s27  ;;  %11625 = vmatprep.subr.bf16.mxu1 %v17484_v37  ;;  %v17554_v37 = vld [vmem:[#allocation10 + $0x690] ss:$28 sps:$4 sm:$0xff]   ;;  %v17557_v3 = vld [vmem:[#allocation10 + $0x698] ss:$28 sps:$4 sm:$0xff]  }
 0x8cd   : > { %11912 = vmatprep.subr.bf16.mxu0 %v17487_v54  ;;  %v17556_v54 = vld [vmem:[#allocation10 + $0x694] ss:$28 sps:$4 sm:$0xff]  }
 0x8cf   : > { %11626 = vmatpush1.bf16.msra.mxu1 %v17482_v57  ;;  %11913 = vmatpush1.bf16.msra.mxu0 %v17485_v20  ;;  %v17559_v57 = vld [vmem:[#allocation10 + $0x69c] ss:$28 sps:$4 sm:$0xff]   ;;  %v7594_v20 = vshll.u32 %v20329_v31, 16 }
 0x8d0   : > { %11627 = vmatprep.subr.bf16.mxu1 %v17490_v7  ;;  %11914 = vmatprep.subr.bf16.mxu0 %v17493_v17  ;;  %v17562_v7 = vld [vmem:[#allocation10 + $0x6cc] ss:$28 sps:$4 sm:$0xff]   ;;  %v17565_v17 = vld [vmem:[#allocation10 + $0x6d4] ss:$28 sps:$4 sm:$0xff]  }
 0x8d3   : > { %11628 = vmatpush1.bf16.msra.mxu1 %v17488_v49  ;;  %11915 = vmatpush1.bf16.msra.mxu0 %v17491_v61  ;;  %v7487_v49 = vmax.f32 %v20283_v51, %v16350_v18  ;;  %v17560_v61 = vld [vmem:[#allocation10 + $0x6c8] ss:$28 sps:$4 sm:$0xff]  }
 0x8d4   : > { %11629 = vmatprep.subr.bf16.mxu1 %v17496_v5  ;;  %11916 = vmatprep.subr.bf16.mxu0 %v17499_v59 }
 0x8d7   : > { %11630 = vmatpush1.bf16.msra.mxu1 %v17494_v27  ;;  %11917 = vmatpush1.bf16.msra.mxu0 %v17497_v38  ;;  %v17568_v27 = vld [vmem:[#allocation10 + $0x704] ss:$28 sps:$4 sm:$0xff]   ;;  %v17571_v38 = vld [vmem:[#allocation10 + $0x70c] ss:$28 sps:$4 sm:$0xff]  }
 0x8d8   : > { %11631 = vmatprep.subr.bf16.mxu1 %v17502_v2  ;;  %11918 = vmatprep.subr.bf16.mxu0 %v17505_v44  ;;  %v7596_v44 = vrot.slane %v7594_v20, 1 }
 0x8db   : > { %11632 = vmatpush1.bf16.msra.mxu1 %v17500_v63  ;;  %11919 = vmatpush1.bf16.msra.mxu0 %v17503_v50  ;;  %v7592_v63 = vshrl.u32 %v20329_v31, 16  ;;  %v20649_v50 = vmov 0  }
 0x8dc   : > { %11633 = vmatprep.subr.bf16.mxu1 %v17508_v30  ;;  %11920 = vmatprep.subr.bf16.mxu0 %v17511_v60  ;;  %v7564_v30 = vrot.slane %v20649_v50, 7 }
 0x8dd   : > { %v7597_v51 = vor.u32 %v7596_v44, %v7592_v63  ;;  %v17590_v44 = vld [vmem:[#allocation10 + $0x7e0] ss:$28 sps:$4 sm:$0xff]   ;;  %v17593_v63 = vld [vmem:[#allocation10 + $0x7e8] ss:$28 sps:$4 sm:$0xff]  }
 0x8df   : > { %11634 = vmatpush1.bf16.msra.mxu1 %v17506_v1  ;;  %11921 = vmatpush1.bf16.msra.mxu0 %v17509_v25 }
 0x8e0   : > { %11635 = vmatprep.subr.bf16.mxu1 %v17514_v45  ;;  %11922 = vmatprep.subr.bf16.mxu0 %v17517_v4 }
 0x8e3   : > { %11636 = vmatpush1.bf16.msra.mxu1 %v17512_v62  ;;  %11923 = vmatpush1.bf16.msra.mxu0 %v17515_v47  ;;  %v7577_v47 = vsel %vm20060_vm11, 0, %v7564_v30  ;;  %v17601_v30 = vld [vmem:[#allocation10 + $0x824] ss:$28 sps:$4 sm:$0xff]  }
 0x8e4   : > { %11637 = vmatprep.subr.bf16.mxu1 %v17520_v43  ;;  %11924 = vmatprep.subr.bf16.mxu0 %v17523_v21 }
 0x8e7   : > { %11638 = vmatpush1.bf16.msra.mxu1 %v17518_v48  ;;  %11925 = vmatpush1.bf16.msra.mxu0 %v17521_v24 }
 0x8e8   : > { %11639 = vmatprep.subr.bf16.mxu1 %v17526_v58  ;;  %11926 = vmatprep.subr.bf16.mxu0 %v17529_v40 }
 0x8eb   : > { %11640 = vmatpush1.bf16.msra.mxu1 %v17524_v41  ;;  %11927 = vmatpush1.bf16.msra.mxu0 %v17527_v55  ;;  %v20344_v41 = vsel %vm1599_vm5, %v7577_v47, 0  ;;  %v17566_v55 = vld [vmem:[#allocation10 + $0x700] ss:$28 sps:$4 sm:$0xff]   ;;  %v17610_v47 = vld [vmem:[#allocation10 + $0x88c] ss:$28 sps:$4 sm:$0xff]  }
 0x8ec   : > { %11641 = vmatprep.subr.bf16.mxu1 %v17532_v33  ;;  %11928 = vmatprep.subr.bf16.mxu0 %v17535_v0  ;;  %v17569_v33 = vld [vmem:[#allocation10 + $0x708] ss:$28 sps:$4 sm:$0xff]  }
 0x8ef   : > { %11642 = vmatpush1.bf16.msra.mxu1 %v17530_v52  ;;  %11929 = vmatpush1.bf16.msra.mxu0 %v17533_v39 }
 0x8f0   : > { %11643 = vmatprep.subr.bf16.mxu1 %v17538_v56  ;;  %11930 = vmatprep.subr.bf16.mxu0 %v17541_v6  ;;  %v17574_v6 = vld [vmem:[#allocation10 + $0x73c] ss:$28 sps:$4 sm:$0xff]  }
 0x8f3   : > { %11644 = vmatpush1.bf16.msra.mxu1 %v17536_v28  ;;  %11931 = vmatpush1.bf16.msra.mxu0 %v17539_v53  ;;  %v17577_v28 = vld [vmem:[#allocation10 + $0x744] ss:$28 sps:$4 sm:$0xff]  }
 0x8f4   : > { %11645 = vmatprep.subr.bf16.mxu1 %v17544_v26  ;;  %11932 = vmatprep.subr.bf16.mxu0 %v17547_v34 }
 0x8f7   : > { %11646 = vmatpush1.bf16.msra.mxu1 %v17542_v14  ;;  %11933 = vmatpush1.bf16.msra.mxu0 %v17545_v13  ;;  %v17572_v13 = vld [vmem:[#allocation10 + $0x738] ss:$28 sps:$4 sm:$0xff]  }
 0x8f8   : > { %11647 = vmatprep.subr.bf16.mxu1 %v17550_v16  ;;  %11934 = vmatprep.subr.bf16.mxu0 %v17553_v35  ;;  %v17575_v16 = vld [vmem:[#allocation10 + $0x740] ss:$28 sps:$4 sm:$0xff]   ;;  %v7616_v35 = vshrl.u32 %v20344_v41, 16 }
 0x8fb   : > { %11648 = vmatpush1.bf16.msra.mxu1 %v17548_v42  ;;  %11935 = vmatpush1.bf16.msra.mxu0 %v17551_v36 }
 0x8fc   : > { %11649 = vmatprep.subr.bf16.mxu1 %v17556_v54  ;;  %11936 = vmatprep.subr.bf16.mxu0 %v17559_v57  ;;  %v17583_v57 = vld [vmem:[#allocation10 + $0x77c] ss:$28 sps:$4 sm:$0xff]  }
 0x8ff   : > { %11650 = vmatpush1.bf16.msra.mxu1 %v17554_v37  ;;  %11937 = vmatpush1.bf16.msra.mxu0 %v17557_v3  ;;  %v17580_v3 = vld [vmem:[#allocation10 + $0x774] ss:$28 sps:$4 sm:$0xff]  }
 0x900   : > { %11651 = vmatprep.subr.bf16.mxu1 %v17562_v7  ;;  %11938 = vmatprep.subr.bf16.mxu0 %v17565_v17  ;;  %v17578_v17 = vld [vmem:[#allocation10 + $0x770] ss:$28 sps:$4 sm:$0xff]  }
 0x903   : > { %11652 = vmatpush1.bf16.msra.mxu1 %v17560_v61  ;;  %11939 = vmatpush1.bf16.msra.mxu0 %v17563_v46  ;;  %v17589_v46 = vld [vmem:[#allocation10 + $0x7b4] ss:$28 sps:$4 sm:$0xff]  }
 0x904   : > { %11662 = vmatprep.subr.bf16.mxu1 %v17568_v27  ;;  %11949 = vmatprep.subr.bf16.mxu0 %v17571_v38  ;;  %v17587_v27 = vld [vmem:[#allocation10 + $0x7b0] ss:$28 sps:$4 sm:$0xff]   ;;  %v17592_v38 = vld [vmem:[#allocation10 + $0x7e4] ss:$28 sps:$4 sm:$0xff]  }
 0x92d   : > { %v7508_v5 = vpop.permute.xlu0 %7507 }
 0x92e   : > { %v7512_v59 = vsel %vm1812_vm3, %v7487_v49, %v7508_v5  ;;  %v17581_v49 = vld [vmem:[#allocation10 + $0x778] ss:$28 sps:$4 sm:$0xff]   ;;  %v17586_v5 = vld [vmem:[#allocation10 + $0x7ac] ss:$28 sps:$4 sm:$0xff]  }
 0x92f   : > { %v7515_v2 = vpack.c.bf16 %v7512_v59, %v7512_v59  ;;  %v17584_v59 = vld [vmem:[#allocation10 + $0x7a8] ss:$28 sps:$4 sm:$0xff]  }
 0x931   : > { %7525 = vrot.lane.b32.xlu1 %v7515_v2, %s19036_s27  ;;  %v17595_v2 = vld [vmem:[#allocation10 + $0x7ec] ss:$28 sps:$4 sm:$0xff]  }
 0x932   : > { %v7528_v60 = vpop.permute.xlu0 %7527 }
 0x935   : > { %7622 = vrot.lane.b32.xlu1 %v7597_v51, %s19036_s27  ;;  %v17598_v51 = vld [vmem:[#allocation10 + $0x81c] ss:$28 sps:$4 sm:$0xff]  }
 0x93e   : > { %v20369_v26 = vpop.permute.xlu0 %7624 }
 0x9a3   : > { %v7526_v1 = vpop.permute.xlu1 %7525 }
 0x9a4   : > { %v7531_v25 = vsel %vm1812_vm3, %v20298_v23, %v7526_v1  ;;  %v7532_v45 = vsel %vm1812_vm3, %v7526_v1, %v7528_v60  ;;  %v7618_v23 = vshll.u32 %v20344_v41, 16  ;;  %v17596_v60 = vld [vmem:[#allocation10 + $0x818] ss:$28 sps:$4 sm:$0xff]   ;;  %v17599_v1 = vld [vmem:[#allocation10 + $0x820] ss:$28 sps:$4 sm:$0xff]  }
 0x9a5   : > { %v7549_v4 = vshrl.u32 %v7531_v25, 16  ;;  %v7556_v62 = vshrl.u32 %v7532_v45, 16  ;;  %v7552_v21 = vshll.u32 %v7531_v25, 16  ;;  %v7559_v24 = vshll.u32 %v7532_v45, 16  ;;  %v17604_v25 = vld [vmem:[#allocation10 + $0x854] ss:$28 sps:$4 sm:$0xff]  }
 0x9a6   : > { %v7620_v42 = vrot.slane %v7618_v23, 1  ;;  %v17607_v45 = vld [vmem:[#allocation10 + $0x85c] ss:$28 sps:$4 sm:$0xff]   ;;  %v17625_v23 = vld [vmem:[#allocation10 + $0x904] ss:$28 sps:$4 sm:$0xff]  }
 0x9a7   : > { %v7551_v43 = vrot.slane %v7549_v4, 7  ;;  %v7558_v48 = vrot.slane %v7556_v62, 7  ;;  %v20347_v0 = vpop.permute.xlu1 %7622  ;;  %v17602_v4 = vld [vmem:[#allocation10 + $0x850] ss:$28 sps:$4 sm:$0xff]   ;;  %v17605_v62 = vld [vmem:[#allocation10 + $0x858] ss:$28 sps:$4 sm:$0xff]  }
 0x9a8   : > { %v20380_v14 = vsel %vm1812_vm3, %v20347_v0, %v20369_v26  ;;  %v7621_v61 = vor.u32 %v7620_v42, %v7616_v35  ;;  %v17634_v35 = vld [vmem:[#allocation10 + $0x96c] ss:$28 sps:$4 sm:$0xff]   ;;  %v17637_v42 = vld [vmem:[#allocation10 + $0x974] ss:$28 sps:$4 sm:$0xff]  }
 0x9a9   : > { %v7554_v58 = vor.u32 %v7552_v21, %v7551_v43  ;;  %v7561_v40 = vor.u32 %v7559_v24, %v7558_v48  ;;  %v17613_v43 = vld [vmem:[#allocation10 + $0x894] ss:$28 sps:$4 sm:$0xff]   ;;  %v17608_v21 = vld [vmem:[#allocation10 + $0x888] ss:$28 sps:$4 sm:$0xff]  }
 0x9aa   : > { %v17611_v48 = vld [vmem:[#allocation10 + $0x890] ss:$28 sps:$4 sm:$0xff]   ;;  %v17616_v24 = vld [vmem:[#allocation10 + $0x8c4] ss:$28 sps:$4 sm:$0xff]  }
 0x9ab   : > { %v20351_v52 = vsel %vm20060_vm11, 0, %v7561_v40  ;;  %v20355_v39 = vsel %vm20060_vm11, 0, %v7554_v58  ;;  %v17619_v58 = vld [vmem:[#allocation10 + $0x8cc] ss:$28 sps:$4 sm:$0xff]   ;;  %v17614_v40 = vld [vmem:[#allocation10 + $0x8c0] ss:$28 sps:$4 sm:$0xff]  }
 0x9ac   : > { %v20359_v56 = vsel %vm1599_vm5, %v20351_v52, 0  ;;  %15512 = vmatprep.mubr.msk.bf16.mxu1 %vm1599_vm5, %v20351_v52  ;;  %15517 = vmatprep.mubr.msk.bf16.mxu0 %vm1599_vm5, %v20351_v52  ;;  %v20367_v53 = vsel %vm1599_vm5, %v20355_v39, 0 }
 0x9ad   : > { %15513 = vmatmul.mubr.msk.bf16.vlgmr.msra.gmra.mrb[40].mxu1 %vm1599_vm5, %v20355_v39  ;;  %15518 = vmatmul.mubr.msk.bf16.vlgmr.msra.gmra.mrb[24].mxu0 %vm1599_vm5, %v20355_v39  ;;  %v7612_v22 = vshll.u32 %v20359_v56, 16  ;;  %v7606_v34 = vshll.u32 %v20367_v53, 16  ;;  %v7610_v36 = vshrl.u32 %v20359_v56, 16  ;;  %v7604_v37 = vshrl.u32 %v20367_v53, 16 }
 0x9ae   : > { %11663 = vmatpush1.bf16.msra.mxu1 %v17566_v55  ;;  %11950 = vmatpush1.bf16.msra.mxu0 %v17569_v33  ;;  %v17617_v55 = vld [vmem:[#allocation10 + $0x8c8] ss:$28 sps:$4 sm:$0xff]   ;;  %v17622_v33 = vld [vmem:[#allocation10 + $0x8fc] ss:$28 sps:$4 sm:$0xff]  }
 0x9af   : > { %11694 = vmatprep.mubr.bf16.mxu1 %v20380_v14  ;;  %11981 = vmatprep.mubr.bf16.mxu0 %v20380_v14  ;;  %v7614_v18 = vrot.slane %v7612_v22, 1  ;;  %v7608_v54 = vrot.slane %v7606_v34, 1  ;;  %v17628_v22 = vld [vmem:[#allocation10 + $0x934] ss:$28 sps:$4 sm:$0xff]   ;;  %v17631_v34 = vld [vmem:[#allocation10 + $0x93c] ss:$28 sps:$4 sm:$0xff]  }
 0x9b0   : > { %11664 = vmatprep.subr.bf16.mxu1 %v17574_v6  ;;  %11951 = vmatprep.subr.bf16.mxu0 %v17577_v28  ;;  %v17620_v6 = vld [vmem:[#allocation10 + $0x8f8] ss:$28 sps:$4 sm:$0xff]   ;;  %v17623_v28 = vld [vmem:[#allocation10 + $0x900] ss:$28 sps:$4 sm:$0xff]  }
 0x9b1   : > { %v7615_v20 = vor.u32 %v7614_v18, %v7610_v36  ;;  %v7609_v7 = vor.u32 %v7608_v54, %v7604_v37  ;;  %v17632_v36 = vld [vmem:[#allocation10 + $0x968] ss:$28 sps:$4 sm:$0xff]   ;;  %v17635_v18 = vld [vmem:[#allocation10 + $0x970] ss:$28 sps:$4 sm:$0xff]  }
 0x9b2   : > { %11665 = vmatpush1.bf16.msra.mxu1 %v17572_v13  ;;  %11952 = vmatpush1.bf16.msra.mxu0 %v17575_v16  ;;  %v17626_v13 = vld [vmem:[#allocation10 + $0x930] ss:$28 sps:$4 sm:$0xff]   ;;  %v17629_v16 = vld [vmem:[#allocation10 + $0x938] ss:$28 sps:$4 sm:$0xff]   ;;  %v17640_v37 = vld [vmem:[#allocation10 + $0x9a4] ss:$28 sps:$4 sm:$0xff]  }
 0x9b3   : > { %7628 = vrot.lane.b32.xlu0 %v7615_v20, %s19036_s27  ;;  %7626 = vrot.lane.b32.xlu1 %v7609_v7, %s19036_s27  ;;  %v17643_v54 = vld [vmem:[#allocation10 + $0x9ac] ss:$28 sps:$4 sm:$0xff]   ;;  %v17646_v20 = vld [vmem:[#allocation10 + $0x9dc] ss:$28 sps:$4 sm:$0xff]   ;;  %v17649_v7 = vld [vmem:[#allocation10 + $0x9e4] ss:$28 sps:$4 sm:$0xff]  }
 0x9b4   : > { %11666 = vmatprep.subr.bf16.mxu1 %v17580_v3  ;;  %11953 = vmatprep.subr.bf16.mxu0 %v17583_v57  ;;  %v17638_v3 = vld [vmem:[#allocation10 + $0x9a0] ss:$28 sps:$4 sm:$0xff]   ;;  %v17641_v57 = vld [vmem:[#allocation10 + $0x9a8] ss:$28 sps:$4 sm:$0xff]  }
 0x9b6   : > { %11667 = vmatpush1.bf16.msra.mxu1 %v17578_v17  ;;  %11954 = vmatpush1.bf16.msra.mxu0 %v17581_v49  ;;  %v17644_v17 = vld [vmem:[#allocation10 + $0x9d8] ss:$28 sps:$4 sm:$0xff]   ;;  %v17647_v49 = vld [vmem:[#allocation10 + $0x9e0] ss:$28 sps:$4 sm:$0xff]  }
 0x9b7   : > { %7630 = vrot.lane.b32.xlu1 %v7621_v61, %s19036_s27  ;;  %11668 = vmatprep.subr.bf16.mxu1 %v17586_v5  ;;  %v17652_v61 = vld [vmem:[#allocation10 + $0xa14] ss:$28 sps:$4 sm:$0xff]   ;;  %v17655_v5 = vld [vmem:[#allocation10 + $0xa1c] ss:$28 sps:$4 sm:$0xff]  }
 0x9b8   : > { %11955 = vmatprep.subr.bf16.mxu0 %v17589_v46  ;;  %v17650_v46 = vld [vmem:[#allocation10 + $0xa10] ss:$28 sps:$4 sm:$0xff]  }
 0x9ba   : > { %11669 = vmatpush1.bf16.msra.mxu1 %v17584_v59  ;;  %11956 = vmatpush1.bf16.msra.mxu0 %v17587_v27  ;;  %v17653_v59 = vld [vmem:[#allocation10 + $0xa18] ss:$28 sps:$4 sm:$0xff]   ;;  %v17658_v27 = vld [vmem:[#allocation10 + $0xa4c] ss:$28 sps:$4 sm:$0xff]  }
 0x9bb   : > { %11670 = vmatprep.subr.bf16.mxu1 %v17592_v38  ;;  %11957 = vmatprep.subr.bf16.mxu0 %v17595_v2  ;;  %v17661_v38 = vld [vmem:[#allocation10 + $0xa54] ss:$28 sps:$4 sm:$0xff]   ;;  %v17656_v2 = vld [vmem:[#allocation10 + $0xa48] ss:$28 sps:$4 sm:$0xff]  }
 0x9be   : > { %11671 = vmatpush1.bf16.msra.mxu1 %v17590_v44  ;;  %11958 = vmatpush1.bf16.msra.mxu0 %v17593_v63  ;;  %v17659_v44 = vld [vmem:[#allocation10 + $0xa50] ss:$28 sps:$4 sm:$0xff]   ;;  %v17664_v63 = vld [vmem:[#allocation10 + $0xa84] ss:$28 sps:$4 sm:$0xff]  }
 0x9bf   : > { %11672 = vmatprep.subr.bf16.mxu1 %v17598_v51  ;;  %11959 = vmatprep.subr.bf16.mxu0 %v17601_v30  ;;  %v17667_v51 = vld [vmem:[#allocation10 + $0xa8c] ss:$28 sps:$4 sm:$0xff]   ;;  %v17662_v30 = vld [vmem:[#allocation10 + $0xa80] ss:$28 sps:$4 sm:$0xff]  }
 0x9c2   : > { %11673 = vmatpush1.bf16.msra.mxu1 %v17596_v60  ;;  %11960 = vmatpush1.bf16.msra.mxu0 %v17599_v1  ;;  %v17665_v60 = vld [vmem:[#allocation10 + $0xa88] ss:$28 sps:$4 sm:$0xff]   ;;  %v17670_v1 = vld [vmem:[#allocation10 + $0xabc] ss:$28 sps:$4 sm:$0xff]  }
 0x9c3   : > { %11674 = vmatprep.subr.bf16.mxu1 %v17604_v25  ;;  %11961 = vmatprep.subr.bf16.mxu0 %v17607_v45  ;;  %v17673_v25 = vld [vmem:[#allocation10 + $0xac4] ss:$28 sps:$4 sm:$0xff]   ;;  %v20393_v45 = vsel %vm1812_vm3, %v20344_v41, %v20347_v0  ;;  %v17682_v0 = vld [vmem:[#allocation10 + $0xb2c] ss:$28 sps:$4 sm:$0xff]  }
 0x9c6   : > { %11675 = vmatpush1.bf16.msra.mxu1 %v17602_v4  ;;  %11962 = vmatpush1.bf16.msra.mxu0 %v17605_v62  ;;  %v17668_v4 = vld [vmem:[#allocation10 + $0xab8] ss:$28 sps:$4 sm:$0xff]   ;;  %v17671_v62 = vld [vmem:[#allocation10 + $0xac0] ss:$28 sps:$4 sm:$0xff]  }
 0x9c7   : > { %11676 = vmatprep.subr.bf16.mxu1 %v17610_v47  ;;  %11963 = vmatprep.subr.bf16.mxu0 %v17613_v43  ;;  %v17676_v47 = vld [vmem:[#allocation10 + $0xaf4] ss:$28 sps:$4 sm:$0xff]   ;;  %v17679_v43 = vld [vmem:[#allocation10 + $0xafc] ss:$28 sps:$4 sm:$0xff]  }
 0x9ca   : > { %11677 = vmatpush1.bf16.msra.mxu1 %v17608_v21  ;;  %11964 = vmatpush1.bf16.msra.mxu0 %v17611_v48  ;;  %v17674_v21 = vld [vmem:[#allocation10 + $0xaf0] ss:$28 sps:$4 sm:$0xff]   ;;  %v17677_v48 = vld [vmem:[#allocation10 + $0xaf8] ss:$28 sps:$4 sm:$0xff]  }
 0x9cb   : > { %11678 = vmatprep.subr.bf16.mxu1 %v17616_v24  ;;  %11965 = vmatprep.subr.bf16.mxu0 %v17619_v58  ;;  %v17685_v24 = vld [vmem:[#allocation10 + $0xb34] ss:$28 sps:$4 sm:$0xff]   ;;  %v17680_v58 = vld [vmem:[#allocation10 + $0xb28] ss:$28 sps:$4 sm:$0xff]  }
 0x9ce   : > { %11679 = vmatpush1.bf16.msra.mxu1 %v17614_v40  ;;  %11966 = vmatpush1.bf16.msra.mxu0 %v17617_v55  ;;  %v17683_v40 = vld [vmem:[#allocation10 + $0xb30] ss:$28 sps:$4 sm:$0xff]   ;;  %v17688_v55 = vld [vmem:[#allocation10 + $0xb64] ss:$28 sps:$4 sm:$0xff]  }
 0x9cf   : > { %11680 = vmatprep.subr.bf16.mxu1 %v17622_v33  ;;  %11967 = vmatprep.subr.bf16.mxu0 %v17625_v23  ;;  %v17691_v33 = vld [vmem:[#allocation10 + $0xb6c] ss:$28 sps:$4 sm:$0xff]   ;;  %v17686_v23 = vld [vmem:[#allocation10 + $0xb60] ss:$28 sps:$4 sm:$0xff]  }
 0x9d2   : > { %11681 = vmatpush1.bf16.msra.mxu1 %v17620_v6  ;;  %11968 = vmatpush1.bf16.msra.mxu0 %v17623_v28  ;;  %v17689_v6 = vld [vmem:[#allocation10 + $0xb68] ss:$28 sps:$4 sm:$0xff]   ;;  %v17694_v28 = vld [vmem:[#allocation10 + $0xb9c] ss:$28 sps:$4 sm:$0xff]  }
 0x9d3   : > { %11682 = vmatprep.subr.bf16.mxu1 %v17628_v22  ;;  %11969 = vmatprep.subr.bf16.mxu0 %v17631_v34  ;;  %v17697_v22 = vld [vmem:[#allocation10 + $0xba4] ss:$28 sps:$4 sm:$0xff]   ;;  %v17692_v34 = vld [vmem:[#allocation10 + $0xb98] ss:$28 sps:$4 sm:$0xff]  }
 0x9d6   : > { %11683 = vmatpush1.bf16.msra.mxu1 %v17626_v13  ;;  %11970 = vmatpush1.bf16.msra.mxu0 %v17629_v16  ;;  %v17695_v13 = vld [vmem:[#allocation10 + $0xba0] ss:$28 sps:$4 sm:$0xff]   ;;  %v17700_v16 = vld [vmem:[#allocation10 + $0xbd4] ss:$28 sps:$4 sm:$0xff]  }
 0x9d7   : > { %11684 = vmatprep.subr.bf16.mxu1 %v17634_v35  ;;  %11971 = vmatprep.subr.bf16.mxu0 %v17637_v42  ;;  %v17703_v35 = vld [vmem:[#allocation10 + $0xbdc] ss:$28 sps:$4 sm:$0xff]   ;;  %v17698_v42 = vld [vmem:[#allocation10 + $0xbd0] ss:$28 sps:$4 sm:$0xff]  }
 0x9da   : > { %11685 = vmatpush1.bf16.msra.mxu1 %v17632_v36  ;;  %11972 = vmatpush1.bf16.msra.mxu0 %v17635_v18  ;;  %v17701_v36 = vld [vmem:[#allocation10 + $0xbd8] ss:$28 sps:$4 sm:$0xff]   ;;  %v17706_v18 = vld [vmem:[#allocation10 + $0xc0c] ss:$28 sps:$4 sm:$0xff]  }
 0x9db   : > { %11686 = vmatprep.subr.bf16.mxu1 %v17640_v37  ;;  %11973 = vmatprep.subr.bf16.mxu0 %v17643_v54  ;;  %v17709_v37 = vld [vmem:[#allocation10 + $0xc14] ss:$28 sps:$4 sm:$0xff]   ;;  %v17704_v54 = vld [vmem:[#allocation10 + $0xc08] ss:$28 sps:$4 sm:$0xff]  }
 0x9de   : > { %11687 = vmatpush1.bf16.msra.mxu1 %v17638_v3  ;;  %11974 = vmatpush1.bf16.msra.mxu0 %v17641_v57  ;;  %v17707_v3 = vld [vmem:[#allocation10 + $0xc10] ss:$28 sps:$4 sm:$0xff]   ;;  %v17712_v57 = vld [vmem:[#allocation10 + $0xc44] ss:$28 sps:$4 sm:$0xff]  }
 0x9df   : > { %11688 = vmatprep.subr.bf16.mxu1 %v17646_v20  ;;  %11975 = vmatprep.subr.bf16.mxu0 %v17649_v7  ;;  %v17715_v20 = vld [vmem:[#allocation10 + $0xc4c] ss:$28 sps:$4 sm:$0xff]   ;;  %v17710_v7 = vld [vmem:[#allocation10 + $0xc40] ss:$28 sps:$4 sm:$0xff]  }
 0x9e2   : > { %11689 = vmatpush1.bf16.msra.mxu1 %v17644_v17  ;;  %11976 = vmatpush1.bf16.msra.mxu0 %v17647_v49  ;;  %v17713_v17 = vld [vmem:[#allocation10 + $0xc48] ss:$28 sps:$4 sm:$0xff]   ;;  %v17718_v49 = vld [vmem:[#allocation10 + $0xc7c] ss:$28 sps:$4 sm:$0xff]  }
 0x9e3   : > { %11690 = vmatprep.subr.bf16.mxu1 %v17652_v61  ;;  %11977 = vmatprep.subr.bf16.mxu0 %v17655_v5  ;;  %v17721_v61 = vld [vmem:[#allocation10 + $0xc84] ss:$28 sps:$4 sm:$0xff]   ;;  %v17716_v5 = vld [vmem:[#allocation10 + $0xc78] ss:$28 sps:$4 sm:$0xff]  }
 0x9e6   : > { %11691 = vmatpush1.bf16.msra.mxu1 %v17650_v46  ;;  %11978 = vmatpush1.bf16.msra.mxu0 %v17653_v59  ;;  %v17719_v46 = vld [vmem:[#allocation10 + $0xc80] ss:$28 sps:$4 sm:$0xff]   ;;  %v17724_v59 = vld [vmem:[#allocation10 + $0xcb4] ss:$28 sps:$4 sm:$0xff]  }
 0x9e7   : > { %11692 = vmatprep.subr.bf16.mxu1 %v17658_v27  ;;  %11979 = vmatprep.subr.bf16.mxu0 %v17661_v38  ;;  %v17727_v27 = vld [vmem:[#allocation10 + $0xcbc] ss:$28 sps:$4 sm:$0xff]   ;;  %v17722_v38 = vld [vmem:[#allocation10 + $0xcb0] ss:$28 sps:$4 sm:$0xff]  }
 0x9ea   : > { %11693 = vmatpush1.bf16.msra.mxu1 %v17656_v2  ;;  %11980 = vmatpush1.bf16.msra.mxu0 %v17659_v44  ;;  %v17725_v2 = vld [vmem:[#allocation10 + $0xcb8] ss:$28 sps:$4 sm:$0xff]   ;;  %v17730_v44 = vld [vmem:[#allocation10 + $0xcec] ss:$28 sps:$4 sm:$0xff]  }
 0x9eb   : > { %11703 = vmatprep.subr.bf16.mxu1 %v17664_v63  ;;  %11990 = vmatprep.subr.bf16.mxu0 %v17667_v51  ;;  %v17733_v63 = vld [vmem:[#allocation10 + $0xcf4] ss:$28 sps:$4 sm:$0xff]   ;;  %v17728_v51 = vld [vmem:[#allocation10 + $0xce8] ss:$28 sps:$4 sm:$0xff]  }
 0x9ed   : > { %11695 = vmatmul.mubr.bf16.vlgmr.msra.gmra.mrb[40].mxu1 %v20393_v45  ;;  %11982 = vmatmul.mubr.bf16.vlgmr.msra.gmra.mrb[24].mxu0 %v20393_v45 }
 0x9ee   : > { %11704 = vmatpush1.bf16.msra.mxu1 %v17662_v30  ;;  %11991 = vmatpush1.bf16.msra.mxu0 %v17665_v60  ;;  %v17731_v30 = vld [vmem:[#allocation10 + $0xcf0] ss:$28 sps:$4 sm:$0xff]   ;;  %v17736_v60 = vld [vmem:[#allocation10 + $0xd24] ss:$28 sps:$4 sm:$0xff]  }
 0x9ef   : > { %11705 = vmatprep.subr.bf16.mxu1 %v17670_v1  ;;  %11992 = vmatprep.subr.bf16.mxu0 %v17673_v25  ;;  %v17739_v1 = vld [vmem:[#allocation10 + $0xd2c] ss:$28 sps:$4 sm:$0xff]   ;;  %v17734_v25 = vld [vmem:[#allocation10 + $0xd20] ss:$28 sps:$4 sm:$0xff]  }
 0x9f2   : > { %11706 = vmatpush1.bf16.msra.mxu1 %v17668_v4  ;;  %11993 = vmatpush1.bf16.msra.mxu0 %v17671_v62  ;;  %v17737_v4 = vld [vmem:[#allocation10 + $0xd28] ss:$28 sps:$4 sm:$0xff]   ;;  %v17742_v62 = vld [vmem:[#allocation10 + $0xd5c] ss:$28 sps:$4 sm:$0xff]  }
 0x9f3   : > { %11707 = vmatprep.subr.bf16.mxu1 %v17676_v47  ;;  %11994 = vmatprep.subr.bf16.mxu0 %v17679_v43  ;;  %v17745_v47 = vld [vmem:[#allocation10 + $0xd64] ss:$28 sps:$4 sm:$0xff]   ;;  %v17740_v43 = vld [vmem:[#allocation10 + $0xd58] ss:$28 sps:$4 sm:$0xff]  }
 0x9f6   : > { %11708 = vmatpush1.bf16.msra.mxu1 %v17674_v21  ;;  %11995 = vmatpush1.bf16.msra.mxu0 %v17677_v48  ;;  %v17743_v21 = vld [vmem:[#allocation10 + $0xd60] ss:$28 sps:$4 sm:$0xff]   ;;  %v17748_v48 = vld [vmem:[#allocation10 + $0xd94] ss:$28 sps:$4 sm:$0xff]  }
 0x9f7   : > { %11709 = vmatprep.subr.bf16.mxu1 %v17682_v0  ;;  %11996 = vmatprep.subr.bf16.mxu0 %v17685_v24  ;;  %v17751_v0 = vld [vmem:[#allocation10 + $0xd9c] ss:$28 sps:$4 sm:$0xff]   ;;  %v17746_v24 = vld [vmem:[#allocation10 + $0xd90] ss:$28 sps:$4 sm:$0xff]  }
 0x9fa   : > { %11710 = vmatpush1.bf16.msra.mxu1 %v17680_v58  ;;  %11997 = vmatpush1.bf16.msra.mxu0 %v17683_v40  ;;  %v17749_v58 = vld [vmem:[#allocation10 + $0xd98] ss:$28 sps:$4 sm:$0xff]   ;;  %v17754_v40 = vld [vmem:[#allocation10 + $0xdcc] ss:$28 sps:$4 sm:$0xff]  }
 0x9fb   : > { %11711 = vmatprep.subr.bf16.mxu1 %v17688_v55  ;;  %11998 = vmatprep.subr.bf16.mxu0 %v17691_v33  ;;  %v17757_v55 = vld [vmem:[#allocation10 + $0xdd4] ss:$28 sps:$4 sm:$0xff]  }
 0x9fe   : > { %11712 = vmatpush1.bf16.msra.mxu1 %v17686_v23  ;;  %11999 = vmatpush1.bf16.msra.mxu0 %v17689_v6 }
 0x9ff   : > { %11713 = vmatprep.subr.bf16.mxu1 %v17694_v28  ;;  %12000 = vmatprep.subr.bf16.mxu0 %v17697_v22  ;;  %v17752_v28 = vld [vmem:[#allocation10 + $0xdc8] ss:$28 sps:$4 sm:$0xff]   ;;  %v17755_v22 = vld [vmem:[#allocation10 + $0xdd0] ss:$28 sps:$4 sm:$0xff]  }
 0xa02   : > { %11714 = vmatpush1.bf16.msra.mxu1 %v17692_v34  ;;  %12001 = vmatpush1.bf16.msra.mxu0 %v17695_v13  ;;  %v17760_v34 = vld [vmem:[#allocation10 + $0xe04] ss:$28 sps:$4 sm:$0xff]   ;;  %v17763_v13 = vld [vmem:[#allocation10 + $0xe0c] ss:$28 sps:$4 sm:$0xff]  }
 0xa03   : > { %11715 = vmatprep.subr.bf16.mxu1 %v17700_v16  ;;  %12002 = vmatprep.subr.bf16.mxu0 %v17703_v35  ;;  %v17758_v16 = vld [vmem:[#allocation10 + $0xe00] ss:$28 sps:$4 sm:$0xff]   ;;  %v17761_v35 = vld [vmem:[#allocation10 + $0xe08] ss:$28 sps:$4 sm:$0xff]  }
 0xa06   : > { %11716 = vmatpush1.bf16.msra.mxu1 %v17698_v42  ;;  %12003 = vmatpush1.bf16.msra.mxu0 %v17701_v36  ;;  %v20410_v36 = vrot.slane %v20329_v31, 1  ;;  %v17770_v31 = vld [vmem:[#allocation10 + $0xe70] ss:$28 sps:$4 sm:$0xff]  }
 0xa07   : > { %11717 = vmatprep.subr.bf16.mxu1 %v17706_v18  ;;  %12004 = vmatprep.subr.bf16.mxu0 %v17709_v37  ;;  %v17766_v18 = vld [vmem:[#allocation10 + $0xe3c] ss:$28 sps:$4 sm:$0xff]   ;;  %v17769_v37 = vld [vmem:[#allocation10 + $0xe44] ss:$28 sps:$4 sm:$0xff]  }
 0xa0a   : > { %11718 = vmatpush1.bf16.msra.mxu1 %v17704_v54  ;;  %12005 = vmatpush1.bf16.msra.mxu0 %v17707_v3  ;;  %v17764_v54 = vld [vmem:[#allocation10 + $0xe38] ss:$28 sps:$4 sm:$0xff]   ;;  %v17767_v3 = vld [vmem:[#allocation10 + $0xe40] ss:$28 sps:$4 sm:$0xff]  }
 0xa0b   : > { %11719 = vmatprep.subr.bf16.mxu1 %v17712_v57  ;;  %12006 = vmatprep.subr.bf16.mxu0 %v17715_v20  ;;  %v17772_v57 = vld [vmem:[#allocation10 + $0xe74] ss:$28 sps:$4 sm:$0xff]  }
 0xa0c   : > { %v17773_v20 = vld [vmem:[#allocation10 + $0xe78] ss:$28 sps:$4 sm:$0xff]  }
 0xa0e   : > { %11720 = vmatpush1.bf16.msra.mxu1 %v17710_v7  ;;  %12007 = vmatpush1.bf16.msra.mxu0 %v17713_v17  ;;  %v17778_v7 = vld [vmem:[#allocation10 + $0xeac] ss:$28 sps:$4 sm:$0xff]   ;;  %v17781_v17 = vld [vmem:[#allocation10 + $0xeb4] ss:$28 sps:$4 sm:$0xff]  }
 0xa0f   : > { %11721 = vmatprep.subr.bf16.mxu1 %v17718_v49  ;;  %12008 = vmatprep.subr.bf16.mxu0 %v17721_v61  ;;  %v17776_v49 = vld [vmem:[#allocation10 + $0xea8] ss:$28 sps:$4 sm:$0xff]   ;;  %v17779_v61 = vld [vmem:[#allocation10 + $0xeb0] ss:$28 sps:$4 sm:$0xff]  }
 0xa12   : > { %11722 = vmatpush1.bf16.msra.mxu1 %v17716_v5  ;;  %12009 = vmatpush1.bf16.msra.mxu0 %v17719_v46  ;;  %v17784_v5 = vld [vmem:[#allocation10 + $0xee4] ss:$28 sps:$4 sm:$0xff]   ;;  %v17787_v46 = vld [vmem:[#allocation10 + $0xeec] ss:$28 sps:$4 sm:$0xff]  }
 0xa13   : > { %11723 = vmatprep.subr.bf16.mxu1 %v17724_v59  ;;  %12010 = vmatprep.subr.bf16.mxu0 %v17727_v27  ;;  %v17782_v59 = vld [vmem:[#allocation10 + $0xee0] ss:$28 sps:$4 sm:$0xff]   ;;  %v17785_v27 = vld [vmem:[#allocation10 + $0xee8] ss:$28 sps:$4 sm:$0xff]  }
 0xa16   : > { %11724 = vmatpush1.bf16.msra.mxu1 %v17722_v38  ;;  %12011 = vmatpush1.bf16.msra.mxu0 %v17725_v2  ;;  %v17790_v38 = vld [vmem:[#allocation10 + $0xf1c] ss:$28 sps:$4 sm:$0xff]   ;;  %v17793_v2 = vld [vmem:[#allocation10 + $0xf24] ss:$28 sps:$4 sm:$0xff]  }
 0xa17   : > { %11725 = vmatprep.subr.bf16.mxu1 %v17730_v44  ;;  %12012 = vmatprep.subr.bf16.mxu0 %v17733_v63  ;;  %v17788_v44 = vld [vmem:[#allocation10 + $0xf18] ss:$28 sps:$4 sm:$0xff]   ;;  %v17791_v63 = vld [vmem:[#allocation10 + $0xf20] ss:$28 sps:$4 sm:$0xff]  }
 0xa1a   : > { %11726 = vmatpush1.bf16.msra.mxu1 %v17728_v51  ;;  %12013 = vmatpush1.bf16.msra.mxu0 %v17731_v30  ;;  %v17796_v51 = vld [vmem:[#allocation10 + $0xf54] ss:$28 sps:$4 sm:$0xff]   ;;  %v17799_v30 = vld [vmem:[#allocation10 + $0xf5c] ss:$28 sps:$4 sm:$0xff]  }
 0xa1b   : > { %11727 = vmatprep.subr.bf16.mxu1 %v17736_v60  ;;  %12014 = vmatprep.subr.bf16.mxu0 %v17739_v1  ;;  %v17794_v60 = vld [vmem:[#allocation10 + $0xf50] ss:$28 sps:$4 sm:$0xff]   ;;  %v17797_v1 = vld [vmem:[#allocation10 + $0xf58] ss:$28 sps:$4 sm:$0xff]  }
 0xa1e   : > { %11728 = vmatpush1.bf16.msra.mxu1 %v17734_v25  ;;  %12015 = vmatpush1.bf16.msra.mxu0 %v17737_v4  ;;  %v17802_v25 = vld [vmem:[#allocation10 + $0xf8c] ss:$28 sps:$4 sm:$0xff]   ;;  %v17805_v4 = vld [vmem:[#allocation10 + $0xf94] ss:$28 sps:$4 sm:$0xff]  }
 0xa1f   : > { %11729 = vmatprep.subr.bf16.mxu1 %v17742_v62  ;;  %12016 = vmatprep.subr.bf16.mxu0 %v17745_v47  ;;  %v17800_v62 = vld [vmem:[#allocation10 + $0xf88] ss:$28 sps:$4 sm:$0xff]   ;;  %v17803_v47 = vld [vmem:[#allocation10 + $0xf90] ss:$28 sps:$4 sm:$0xff]  }
 0xa22   : > { %11730 = vmatpush1.bf16.msra.mxu1 %v17740_v43  ;;  %12017 = vmatpush1.bf16.msra.mxu0 %v17743_v21  ;;  %v17808_v43 = vld [vmem:[#allocation10 + $0xfc4] ss:$28 sps:$4 sm:$0xff]   ;;  %v17811_v21 = vld [vmem:[#allocation10 + $0xfcc] ss:$28 sps:$4 sm:$0xff]  }
 0xa23   : > { %11731 = vmatprep.subr.bf16.mxu1 %v17748_v48  ;;  %12018 = vmatprep.subr.bf16.mxu0 %v17751_v0  ;;  %v17806_v48 = vld [vmem:[#allocation10 + $0xfc0] ss:$28 sps:$4 sm:$0xff]   ;;  %v17809_v0 = vld [vmem:[#allocation10 + $0xfc8] ss:$28 sps:$4 sm:$0xff]  }
 0xa25   : > { %v20397_v33 = vpop.permute.xlu0 %7628  ;;  %v7627_v23 = vpop.permute.xlu1 %7626 }
 0xa26   : > { %11732 = vmatpush1.bf16.msra.mxu1 %v17746_v24  ;;  %12019 = vmatpush1.bf16.msra.mxu0 %v17749_v58  ;;  %v20401_v6 = vsel %vm1812_vm3, %v7627_v23, %v20397_v33  ;;  %v20407_v42 = vsel %vm1812_vm3, %v20369_v26, %v7627_v23  ;;  %v17775_v26 = vld [vmem:[#allocation10 + $0xe7c] ss:$28 sps:$4 sm:$0xff]   ;;  %v17817_v58 = vld [vmem:[#allocation10 + $0x1004] ss:$28 sps:$4 sm:$0xff]   ;;  %v17820_v23 = vld [vmem:[#allocation10 + $0x1034] ss:$28 sps:$4 sm:$0xff]  }
 0xa27   : > { %11735 = vmatprep.mubr.bf16.mxu1 %v20401_v6  ;;  %12022 = vmatprep.mubr.bf16.mxu0 %v20401_v6  ;;  %v17814_v24 = vld [vmem:[#allocation10 + $0xffc] ss:$28 sps:$4 sm:$0xff]  }
 0xa28   : > { %11733 = vmatprep.subr.bf16.mxu1 %v17754_v40  ;;  %12020 = vmatprep.subr.bf16.mxu0 %v17757_v55  ;;  %v17812_v40 = vld [vmem:[#allocation10 + $0xff8] ss:$28 sps:$4 sm:$0xff]   ;;  %v17815_v55 = vld [vmem:[#allocation10 + $0x1000] ss:$28 sps:$4 sm:$0xff]  }
 0xa2a   : > { %11734 = vmatpush1.bf16.msra.mxu1 %v17752_v28  ;;  %12021 = vmatpush1.bf16.msra.mxu0 %v17755_v22  ;;  %v17823_v28 = vld [vmem:[#allocation10 + $0x103c] ss:$28 sps:$4 sm:$0xff]   ;;  %v17818_v22 = vld [vmem:[#allocation10 + $0x1030] ss:$28 sps:$4 sm:$0xff]  }
 0xa2b   : > { %11744 = vmatprep.subr.bf16.mxu1 %v17760_v34  ;;  %12031 = vmatprep.subr.bf16.mxu0 %v17763_v13  ;;  %v17821_v34 = vld [vmem:[#allocation10 + $0x1038] ss:$28 sps:$4 sm:$0xff]   ;;  %v17826_v13 = vld [vmem:[#allocation10 + $0x106c] ss:$28 sps:$4 sm:$0xff]  }
 0xa2d   : > { %11736 = vmatmul.mubr.bf16.vlgmr.msra.gmra.mrb[40].mxu1 %v20407_v42  ;;  %12023 = vmatmul.mubr.bf16.vlgmr.msra.gmra.mrb[24].mxu0 %v20407_v42 }
 0xa2e   : > { %11745 = vmatpush1.bf16.msra.mxu1 %v17758_v16  ;;  %11776 = vmatprep.mubr.bf16.mxu1 %v20410_v36  ;;  %v17829_v16 = vld [vmem:[#allocation10 + $0x1074] ss:$28 sps:$4 sm:$0xff]  }
 0xa2f   : > { %12032 = vmatpush1.bf16.msra.mxu0 %v17761_v35  ;;  %12063 = vmatprep.mubr.bf16.mxu0 %v20410_v36  ;;  %v17824_v35 = vld [vmem:[#allocation10 + $0x1068] ss:$28 sps:$4 sm:$0xff]  }
 0xa30   : > { %11746 = vmatprep.subr.bf16.mxu1 %v17766_v18  ;;  %12033 = vmatprep.subr.bf16.mxu0 %v17769_v37  ;;  %v17827_v18 = vld [vmem:[#allocation10 + $0x1070] ss:$28 sps:$4 sm:$0xff]   ;;  %v17832_v37 = vld [vmem:[#allocation10 + $0x10a4] ss:$28 sps:$4 sm:$0xff]  }
 0xa32   : > { %11747 = vmatpush1.bf16.msra.mxu1 %v17764_v54  ;;  %v17835_v54 = vld [vmem:[#allocation10 + $0x10ac] ss:$28 sps:$4 sm:$0xff]  }
 0xa33   : > { %12034 = vmatpush1.bf16.msra.mxu0 %v17767_v3  ;;  %11748 = vmatprep.subr.bf16.mxu1 %v17772_v57  ;;  %v17830_v3 = vld [vmem:[#allocation10 + $0x10a0] ss:$28 sps:$4 sm:$0xff]   ;;  %v17833_v57 = vld [vmem:[#allocation10 + $0x10a8] ss:$28 sps:$4 sm:$0xff]  }
 0xa34   : > { %12035 = vmatprep.subr.bf16.mxu0 %v17775_v26  ;;  %v17838_v26 = vld [vmem:[#allocation10 + $0x10dc] ss:$28 sps:$4 sm:$0xff]  }
 0xa36   : > { %11749 = vmatpush1.bf16.msra.mxu1 %v17770_v31  ;;  %v17841_v31 = vld [vmem:[#allocation10 + $0x10e4] ss:$28 sps:$4 sm:$0xff]  }
 0xa37   : > { %12036 = vmatpush1.bf16.msra.mxu0 %v17773_v20  ;;  %11750 = vmatprep.subr.bf16.mxu1 %v17778_v7  ;;  %v17836_v20 = vld [vmem:[#allocation10 + $0x10d8] ss:$28 sps:$4 sm:$0xff]   ;;  %v17839_v7 = vld [vmem:[#allocation10 + $0x10e0] ss:$28 sps:$4 sm:$0xff]  }
 0xa38   : > { %12037 = vmatprep.subr.bf16.mxu0 %v17781_v17  ;;  %v17844_v17 = vld [vmem:[#allocation10 + $0x1114] ss:$28 sps:$4 sm:$0xff]  }
 0xa3a   : > { %11751 = vmatpush1.bf16.msra.mxu1 %v17776_v49  ;;  %v17847_v49 = vld [vmem:[#allocation10 + $0x111c] ss:$28 sps:$4 sm:$0xff]  }
 0xa3b   : > { %12038 = vmatpush1.bf16.msra.mxu0 %v17779_v61  ;;  %11752 = vmatprep.subr.bf16.mxu1 %v17784_v5  ;;  %v17842_v61 = vld [vmem:[#allocation10 + $0x1110] ss:$28 sps:$4 sm:$0xff]   ;;  %v17845_v5 = vld [vmem:[#allocation10 + $0x1118] ss:$28 sps:$4 sm:$0xff]  }
 0xa3c   : > { %12039 = vmatprep.subr.bf16.mxu0 %v17787_v46  ;;  %v17850_v46 = vld [vmem:[#allocation10 + $0x114c] ss:$28 sps:$4 sm:$0xff]  }
 0xa3e   : > { %11753 = vmatpush1.bf16.msra.mxu1 %v17782_v59  ;;  %v17853_v59 = vld [vmem:[#allocation10 + $0x1154] ss:$28 sps:$4 sm:$0xff]  }
 0xa3f   : > { %12040 = vmatpush1.bf16.msra.mxu0 %v17785_v27  ;;  %11754 = vmatprep.subr.bf16.mxu1 %v17790_v38  ;;  %v17848_v27 = vld [vmem:[#allocation10 + $0x1148] ss:$28 sps:$4 sm:$0xff]   ;;  %v17851_v38 = vld [vmem:[#allocation10 + $0x1150] ss:$28 sps:$4 sm:$0xff]  }
 0xa40   : > { %12041 = vmatprep.subr.bf16.mxu0 %v17793_v2  ;;  %v17856_v2 = vld [vmem:[#allocation10 + $0x1184] ss:$28 sps:$4 sm:$0xff]  }
 0xa42   : > { %11755 = vmatpush1.bf16.msra.mxu1 %v17788_v44  ;;  %v17859_v44 = vld [vmem:[#allocation10 + $0x118c] ss:$28 sps:$4 sm:$0xff]  }
 0xa43   : > { %12042 = vmatpush1.bf16.msra.mxu0 %v17791_v63  ;;  %11756 = vmatprep.subr.bf16.mxu1 %v17796_v51  ;;  %v7631_v63 = vpop.permute.xlu1 %7630  ;;  %v17854_v51 = vld [vmem:[#allocation10 + $0x1180] ss:$28 sps:$4 sm:$0xff]  }
 0xa44   : > { %12043 = vmatprep.subr.bf16.mxu0 %v17799_v30  ;;  %v17857_v30 = vld [vmem:[#allocation10 + $0x1188] ss:$28 sps:$4 sm:$0xff]  }
 0xa46   : > { %11757 = vmatpush1.bf16.msra.mxu1 %v17794_v60  ;;  %v20418_v60 = vsel %vm1812_vm3, %v20397_v33, %v7631_v63  ;;  %v17871_v33 = vld [vmem:[#allocation10 + $0x11fc] ss:$28 sps:$4 sm:$0xff]   ;;  %v17922_v63 = vld [vmem:[#allocation10 + $0x13ec] ss:$28 sps:$4 sm:$0xff]  }
 0xa47   : > { %12044 = vmatpush1.bf16.msra.mxu0 %v17797_v1  ;;  %11758 = vmatprep.subr.bf16.mxu1 %v17802_v25  ;;  %v17862_v1 = vld [vmem:[#allocation10 + $0x11bc] ss:$28 sps:$4 sm:$0xff]   ;;  %v20422_v25 = vrot.slane %v20367_v53, 1 }
 0xa48   : > { %12045 = vmatprep.subr.bf16.mxu0 %v17805_v4  ;;  %v17865_v4 = vld [vmem:[#allocation10 + $0x11c4] ss:$28 sps:$4 sm:$0xff]   ;;  %v17869_v53 = vld [vmem:[#allocation10 + $0x11f8] ss:$28 sps:$4 sm:$0xff]  }
 0xa4a   : > { %11759 = vmatpush1.bf16.msra.mxu1 %v17800_v62  ;;  %v17860_v62 = vld [vmem:[#allocation10 + $0x11b8] ss:$28 sps:$4 sm:$0xff]  }
 0xa4b   : > { %12046 = vmatpush1.bf16.msra.mxu0 %v17803_v47  ;;  %11760 = vmatprep.subr.bf16.mxu1 %v17808_v43  ;;  %v17863_v47 = vld [vmem:[#allocation10 + $0x11c0] ss:$28 sps:$4 sm:$0xff]   ;;  %v17868_v43 = vld [vmem:[#allocation10 + $0x11f4] ss:$28 sps:$4 sm:$0xff]  }
 0xa4c   : > { %12047 = vmatprep.subr.bf16.mxu0 %v17811_v21  ;;  %v17866_v21 = vld [vmem:[#allocation10 + $0x11f0] ss:$28 sps:$4 sm:$0xff]  }
 0xa4e   : > { %11761 = vmatpush1.bf16.msra.mxu1 %v17806_v48  ;;  %v17874_v48 = vld [vmem:[#allocation10 + $0x122c] ss:$28 sps:$4 sm:$0xff]  }
 0xa4f   : > { %12048 = vmatpush1.bf16.msra.mxu0 %v17809_v0  ;;  %11762 = vmatprep.subr.bf16.mxu1 %v17814_v24  ;;  %v17877_v0 = vld [vmem:[#allocation10 + $0x1234] ss:$28 sps:$4 sm:$0xff]   ;;  %v17872_v24 = vld [vmem:[#allocation10 + $0x1228] ss:$28 sps:$4 sm:$0xff]  }
 0xa50   : > { %12049 = vmatprep.subr.bf16.mxu0 %v17817_v58  ;;  %v17875_v58 = vld [vmem:[#allocation10 + $0x1230] ss:$28 sps:$4 sm:$0xff]  }
 0xa52   : > { %11763 = vmatpush1.bf16.msra.mxu1 %v17812_v40  ;;  %v17880_v40 = vld [vmem:[#allocation10 + $0x1264] ss:$28 sps:$4 sm:$0xff]  }
 0xa53   : > { %12050 = vmatpush1.bf16.msra.mxu0 %v17815_v55  ;;  %11764 = vmatprep.subr.bf16.mxu1 %v17820_v23  ;;  %v17883_v55 = vld [vmem:[#allocation10 + $0x126c] ss:$28 sps:$4 sm:$0xff]   ;;  %v17878_v23 = vld [vmem:[#allocation10 + $0x1260] ss:$28 sps:$4 sm:$0xff]  }
 0xa54   : > { %12051 = vmatprep.subr.bf16.mxu0 %v17823_v28  ;;  %v17881_v28 = vld [vmem:[#allocation10 + $0x1268] ss:$28 sps:$4 sm:$0xff]  }
 0xa56   : > { %11765 = vmatpush1.bf16.msra.mxu1 %v17818_v22  ;;  %v17886_v22 = vld [vmem:[#allocation10 + $0x129c] ss:$28 sps:$4 sm:$0xff]  }
 0xa57   : > { %12052 = vmatpush1.bf16.msra.mxu0 %v17821_v34  ;;  %11766 = vmatprep.subr.bf16.mxu1 %v17826_v13  ;;  %v17889_v34 = vld [vmem:[#allocation10 + $0x12a4] ss:$28 sps:$4 sm:$0xff]   ;;  %v17884_v13 = vld [vmem:[#allocation10 + $0x1298] ss:$28 sps:$4 sm:$0xff]  }
 0xa58   : > { %12053 = vmatprep.subr.bf16.mxu0 %v17829_v16  ;;  %v17887_v16 = vld [vmem:[#allocation10 + $0x12a0] ss:$28 sps:$4 sm:$0xff]  }
 0xa5a   : > { %11767 = vmatpush1.bf16.msra.mxu1 %v17824_v35  ;;  %v17892_v35 = vld [vmem:[#allocation10 + $0x12d4] ss:$28 sps:$4 sm:$0xff]  }
 0xa5b   : > { %12054 = vmatpush1.bf16.msra.mxu0 %v17827_v18  ;;  %11768 = vmatprep.subr.bf16.mxu1 %v17832_v37  ;;  %v17895_v18 = vld [vmem:[#allocation10 + $0x12dc] ss:$28 sps:$4 sm:$0xff]   ;;  %v17890_v37 = vld [vmem:[#allocation10 + $0x12d0] ss:$28 sps:$4 sm:$0xff]  }
 0xa5c   : > { %12055 = vmatprep.subr.bf16.mxu0 %v17835_v54  ;;  %v17893_v54 = vld [vmem:[#allocation10 + $0x12d8] ss:$28 sps:$4 sm:$0xff]  }
 0xa5e   : > { %11769 = vmatpush1.bf16.msra.mxu1 %v17830_v3  ;;  %v17898_v3 = vld [vmem:[#allocation10 + $0x130c] ss:$28 sps:$4 sm:$0xff]  }
 0xa5f   : > { %12056 = vmatpush1.bf16.msra.mxu0 %v17833_v57  ;;  %11770 = vmatprep.subr.bf16.mxu1 %v17838_v26  ;;  %v17901_v57 = vld [vmem:[#allocation10 + $0x1314] ss:$28 sps:$4 sm:$0xff]   ;;  %v17896_v26 = vld [vmem:[#allocation10 + $0x1308] ss:$28 sps:$4 sm:$0xff]  }
 0xa60   : > { %12057 = vmatprep.subr.bf16.mxu0 %v17841_v31  ;;  %v17899_v31 = vld [vmem:[#allocation10 + $0x1310] ss:$28 sps:$4 sm:$0xff]  }
 0xa62   : > { %11771 = vmatpush1.bf16.msra.mxu1 %v17836_v20  ;;  %v17904_v20 = vld [vmem:[#allocation10 + $0x1344] ss:$28 sps:$4 sm:$0xff]  }
 0xa63   : > { %12058 = vmatpush1.bf16.msra.mxu0 %v17839_v7  ;;  %11772 = vmatprep.subr.bf16.mxu1 %v17844_v17  ;;  %v17907_v7 = vld [vmem:[#allocation10 + $0x134c] ss:$28 sps:$4 sm:$0xff]   ;;  %v17902_v17 = vld [vmem:[#allocation10 + $0x1340] ss:$28 sps:$4 sm:$0xff]  }
 0xa64   : > { %12059 = vmatprep.subr.bf16.mxu0 %v17847_v49  ;;  %v17905_v49 = vld [vmem:[#allocation10 + $0x1348] ss:$28 sps:$4 sm:$0xff]  }
 0xa66   : > { %11773 = vmatpush1.bf16.msra.mxu1 %v17842_v61  ;;  %v17910_v61 = vld [vmem:[#allocation10 + $0x137c] ss:$28 sps:$4 sm:$0xff]  }
 0xa67   : > { %12060 = vmatpush1.bf16.msra.mxu0 %v17845_v5  ;;  %11774 = vmatprep.subr.bf16.mxu1 %v17850_v46  ;;  %v17913_v5 = vld [vmem:[#allocation10 + $0x1384] ss:$28 sps:$4 sm:$0xff]   ;;  %v17908_v46 = vld [vmem:[#allocation10 + $0x1378] ss:$28 sps:$4 sm:$0xff]  }
 0xa68   : > { %12061 = vmatprep.subr.bf16.mxu0 %v17853_v59  ;;  %v17911_v59 = vld [vmem:[#allocation10 + $0x1380] ss:$28 sps:$4 sm:$0xff]  }
 0xa6a   : > { %11775 = vmatpush1.bf16.msra.mxu1 %v17848_v27  ;;  %v17916_v27 = vld [vmem:[#allocation10 + $0x13b4] ss:$28 sps:$4 sm:$0xff]  }
 0xa6b   : > { %12062 = vmatpush1.bf16.msra.mxu0 %v17851_v38  ;;  %11785 = vmatprep.subr.bf16.mxu1 %v17856_v2  ;;  %v17919_v38 = vld [vmem:[#allocation10 + $0x13bc] ss:$28 sps:$4 sm:$0xff]   ;;  %v17914_v2 = vld [vmem:[#allocation10 + $0x13b0] ss:$28 sps:$4 sm:$0xff]  }
 0xa6c   : > { %12072 = vmatprep.subr.bf16.mxu0 %v17859_v44  ;;  %v17917_v44 = vld [vmem:[#allocation10 + $0x13b8] ss:$28 sps:$4 sm:$0xff]  }
 0xa6d   : > { %11777 = vmatmul.mubr.bf16.vlgmr.msra.gmra.mrb[40].mxu1 %v20418_v60 }
 0xa6e   : > { %12064 = vmatmul.mubr.bf16.vlgmr.msra.gmra.mrb[24].mxu0 %v20418_v60  ;;  %11786 = vmatpush1.bf16.msra.mxu1 %v17854_v51  ;;  %v17925_v51 = vld [vmem:[#allocation10 + $0x13f4] ss:$28 sps:$4 sm:$0xff]  }
 0xa6f   : > { %11817 = vmatprep.mubr.bf16.mxu1 %v20422_v25  ;;  %12073 = vmatpush1.bf16.msra.mxu0 %v17857_v30  ;;  %v17920_v30 = vld [vmem:[#allocation10 + $0x13e8] ss:$28 sps:$4 sm:$0xff]  }
 0xa70   : > { %12104 = vmatprep.mubr.bf16.mxu0 %v20422_v25  ;;  %11787 = vmatprep.subr.bf16.mxu1 %v17862_v1  ;;  %v17923_v1 = vld [vmem:[#allocation10 + $0x13f0] ss:$28 sps:$4 sm:$0xff]  }
 0xa71   : > { %12074 = vmatprep.subr.bf16.mxu0 %v17865_v4  ;;  %v17928_v4 = vld [vmem:[#allocation10 + $0x1424] ss:$28 sps:$4 sm:$0xff]  }
 0xa72   : > { %11788 = vmatpush1.bf16.msra.mxu1 %v17860_v62  ;;  %v17931_v62 = vld [vmem:[#allocation10 + $0x142c] ss:$28 sps:$4 sm:$0xff]  }
 0xa73   : > { %12075 = vmatpush1.bf16.msra.mxu0 %v17863_v47  ;;  %11789 = vmatprep.subr.bf16.mxu1 %v17868_v43  ;;  %v17926_v47 = vld [vmem:[#allocation10 + $0x1420] ss:$28 sps:$4 sm:$0xff]   ;;  %v17929_v43 = vld [vmem:[#allocation10 + $0x1428] ss:$28 sps:$4 sm:$0xff]  }
 0xa74   : > { %12076 = vmatprep.subr.bf16.mxu0 %v17871_v33  ;;  %v17934_v33 = vld [vmem:[#allocation10 + $0x145c] ss:$28 sps:$4 sm:$0xff]  }
 0xa76   : > { %11790 = vmatpush1.bf16.msra.mxu1 %v17866_v21  ;;  %v17937_v21 = vld [vmem:[#allocation10 + $0x1464] ss:$28 sps:$4 sm:$0xff]  }
 0xa77   : > { %12077 = vmatpush1.bf16.msra.mxu0 %v17869_v53  ;;  %11791 = vmatprep.subr.bf16.mxu1 %v17874_v48  ;;  %v17932_v53 = vld [vmem:[#allocation10 + $0x1458] ss:$28 sps:$4 sm:$0xff]   ;;  %v17935_v48 = vld [vmem:[#allocation10 + $0x1460] ss:$28 sps:$4 sm:$0xff]  }
 0xa78   : > { %12078 = vmatprep.subr.bf16.mxu0 %v17877_v0  ;;  %v17940_v0 = vld [vmem:[#allocation10 + $0x1494] ss:$28 sps:$4 sm:$0xff]  }
 0xa7a   : > { %11792 = vmatpush1.bf16.msra.mxu1 %v17872_v24  ;;  %v17943_v24 = vld [vmem:[#allocation10 + $0x149c] ss:$28 sps:$4 sm:$0xff]  }
 0xa7b   : > { %12079 = vmatpush1.bf16.msra.mxu0 %v17875_v58  ;;  %11793 = vmatprep.subr.bf16.mxu1 %v17880_v40  ;;  %v17938_v58 = vld [vmem:[#allocation10 + $0x1490] ss:$28 sps:$4 sm:$0xff]   ;;  %v17941_v40 = vld [vmem:[#allocation10 + $0x1498] ss:$28 sps:$4 sm:$0xff]  }
 0xa7c   : > { %12080 = vmatprep.subr.bf16.mxu0 %v17883_v55  ;;  %v17946_v55 = vld [vmem:[#allocation10 + $0x14cc] ss:$28 sps:$4 sm:$0xff]  }
 0xa7e   : > { %11794 = vmatpush1.bf16.msra.mxu1 %v17878_v23  ;;  %v17949_v23 = vld [vmem:[#allocation10 + $0x14d4] ss:$28 sps:$4 sm:$0xff]  }
 0xa7f   : > { %12081 = vmatpush1.bf16.msra.mxu0 %v17881_v28  ;;  %11795 = vmatprep.subr.bf16.mxu1 %v17886_v22  ;;  %v17944_v28 = vld [vmem:[#allocation10 + $0x14c8] ss:$28 sps:$4 sm:$0xff]   ;;  %v17947_v22 = vld [vmem:[#allocation10 + $0x14d0] ss:$28 sps:$4 sm:$0xff]  }
 0xa80   : > { %12082 = vmatprep.subr.bf16.mxu0 %v17889_v34  ;;  %v17952_v34 = vld [vmem:[#allocation10 + $0x1504] ss:$28 sps:$4 sm:$0xff]  }
 0xa82   : > { %11796 = vmatpush1.bf16.msra.mxu1 %v17884_v13  ;;  %v17955_v13 = vld [vmem:[#allocation10 + $0x150c] ss:$28 sps:$4 sm:$0xff]  }
 0xa83   : > { %12083 = vmatpush1.bf16.msra.mxu0 %v17887_v16  ;;  %11797 = vmatprep.subr.bf16.mxu1 %v17892_v35  ;;  %v17950_v16 = vld [vmem:[#allocation10 + $0x1500] ss:$28 sps:$4 sm:$0xff]   ;;  %v20428_v35 = vrot.slane %v20309_v32, 1 }
 0xa84   : > { %12084 = vmatprep.subr.bf16.mxu0 %v17895_v18  ;;  %v17953_v18 = vld [vmem:[#allocation10 + $0x1508] ss:$28 sps:$4 sm:$0xff]   ;;  %v17967_v32 = vld [vmem:[#allocation10 + $0x157c] ss:$28 sps:$4 sm:$0xff]  }
 0xa86   : > { %11798 = vmatpush1.bf16.msra.mxu1 %v17890_v37  ;;  %v17958_v37 = vld [vmem:[#allocation10 + $0x153c] ss:$28 sps:$4 sm:$0xff]  }
 0xa87   : > { %12085 = vmatpush1.bf16.msra.mxu0 %v17893_v54  ;;  %11799 = vmatprep.subr.bf16.mxu1 %v17898_v3  ;;  %v17961_v54 = vld [vmem:[#allocation10 + $0x1544] ss:$28 sps:$4 sm:$0xff]   ;;  %v20431_v3 = vrot.slane %v20344_v41, 1  ;;  %v17962_v41 = vld [vmem:[#allocation10 + $0x1570] ss:$28 sps:$4 sm:$0xff]  }
 0xa88   : > { %12086 = vmatprep.subr.bf16.mxu0 %v17901_v57  ;;  %v17956_v57 = vld [vmem:[#allocation10 + $0x1538] ss:$28 sps:$4 sm:$0xff]  }
 0xa8a   : > { %11800 = vmatpush1.bf16.msra.mxu1 %v17896_v26  ;;  %v17959_v26 = vld [vmem:[#allocation10 + $0x1540] ss:$28 sps:$4 sm:$0xff]  }
 0xa8b   : > { %12087 = vmatpush1.bf16.msra.mxu0 %v17899_v31  ;;  %11801 = vmatprep.subr.bf16.mxu1 %v17904_v20  ;;  %v17964_v31 = vld [vmem:[#allocation10 + $0x1574] ss:$28 sps:$4 sm:$0xff]  }
 0xa8c   : > { %12088 = vmatprep.subr.bf16.mxu0 %v17907_v7  ;;  %v17965_v20 = vld [vmem:[#allocation10 + $0x1578] ss:$28 sps:$4 sm:$0xff]   ;;  %v17970_v7 = vld [vmem:[#allocation10 + $0x15ac] ss:$28 sps:$4 sm:$0xff]  }
 0xa8e   : > { %11802 = vmatpush1.bf16.msra.mxu1 %v17902_v17  ;;  %v17973_v17 = vld [vmem:[#allocation10 + $0x15b4] ss:$28 sps:$4 sm:$0xff]  }
 0xa8f   : > { %12089 = vmatpush1.bf16.msra.mxu0 %v17905_v49  ;;  %11803 = vmatprep.subr.bf16.mxu1 %v17910_v61  ;;  %v17968_v49 = vld [vmem:[#allocation10 + $0x15a8] ss:$28 sps:$4 sm:$0xff]   ;;  %v17971_v61 = vld [vmem:[#allocation10 + $0x15b0] ss:$28 sps:$4 sm:$0xff]  }
 0xa90   : > { %12090 = vmatprep.subr.bf16.mxu0 %v17913_v5  ;;  %v17976_v5 = vld [vmem:[#allocation10 + $0x15e4] ss:$28 sps:$4 sm:$0xff]  }
 0xa92   : > { %11804 = vmatpush1.bf16.msra.mxu1 %v17908_v46  ;;  %v17979_v46 = vld [vmem:[#allocation10 + $0x15ec] ss:$28 sps:$4 sm:$0xff]  }
 0xa93   : > { %12091 = vmatpush1.bf16.msra.mxu0 %v17911_v59  ;;  %11805 = vmatprep.subr.bf16.mxu1 %v17916_v27  ;;  %v17974_v59 = vld [vmem:[#allocation10 + $0x15e0] ss:$28 sps:$4 sm:$0xff]   ;;  %v17977_v27 = vld [vmem:[#allocation10 + $0x15e8] ss:$28 sps:$4 sm:$0xff]  }
 0xa94   : > { %12092 = vmatprep.subr.bf16.mxu0 %v17919_v38  ;;  %v17982_v38 = vld [vmem:[#allocation10 + $0x161c] ss:$28 sps:$4 sm:$0xff]  }
 0xa96   : > { %11806 = vmatpush1.bf16.msra.mxu1 %v17914_v2  ;;  %v17985_v2 = vld [vmem:[#allocation10 + $0x1624] ss:$28 sps:$4 sm:$0xff]  }
 0xa97   : > { %12093 = vmatpush1.bf16.msra.mxu0 %v17917_v44  ;;  %11807 = vmatprep.subr.bf16.mxu1 %v17922_v63  ;;  %v17980_v44 = vld [vmem:[#allocation10 + $0x1618] ss:$28 sps:$4 sm:$0xff]   ;;  %v17983_v63 = vld [vmem:[#allocation10 + $0x1620] ss:$28 sps:$4 sm:$0xff]  }
 0xa98   : > { %12094 = vmatprep.subr.bf16.mxu0 %v17925_v51  ;;  %v17988_v51 = vld [vmem:[#allocation10 + $0x1654] ss:$28 sps:$4 sm:$0xff]  }
 0xa9a   : > { %11808 = vmatpush1.bf16.msra.mxu1 %v17920_v30  ;;  %v17991_v30 = vld [vmem:[#allocation10 + $0x165c] ss:$28 sps:$4 sm:$0xff]  }
 0xa9b   : > { %12095 = vmatpush1.bf16.msra.mxu0 %v17923_v1  ;;  %11809 = vmatprep.subr.bf16.mxu1 %v17928_v4  ;;  %v17986_v1 = vld [vmem:[#allocation10 + $0x1650] ss:$28 sps:$4 sm:$0xff]   ;;  %v17989_v4 = vld [vmem:[#allocation10 + $0x1658] ss:$28 sps:$4 sm:$0xff]  }
 0xa9c   : > { %12096 = vmatprep.subr.bf16.mxu0 %v17931_v62  ;;  %v17994_v62 = vld [vmem:[#allocation10 + $0x168c] ss:$28 sps:$4 sm:$0xff]  }
 0xa9e   : > { %11810 = vmatpush1.bf16.msra.mxu1 %v17926_v47  ;;  %v17997_v47 = vld [vmem:[#allocation10 + $0x1694] ss:$28 sps:$4 sm:$0xff]  }
 0xa9f   : > { %12097 = vmatpush1.bf16.msra.mxu0 %v17929_v43  ;;  %11811 = vmatprep.subr.bf16.mxu1 %v17934_v33  ;;  %v17992_v43 = vld [vmem:[#allocation10 + $0x1688] ss:$28 sps:$4 sm:$0xff]   ;;  %v17995_v33 = vld [vmem:[#allocation10 + $0x1690] ss:$28 sps:$4 sm:$0xff]  }
 0xaa0   : > { %12098 = vmatprep.subr.bf16.mxu0 %v17937_v21  ;;  %v18000_v21 = vld [vmem:[#allocation10 + $0x16c4] ss:$28 sps:$4 sm:$0xff]  }
 0xaa2   : > { %11812 = vmatpush1.bf16.msra.mxu1 %v17932_v53  ;;  %v18003_v53 = vld [vmem:[#allocation10 + $0x16cc] ss:$28 sps:$4 sm:$0xff]  }
 0xaa3   : > { %12099 = vmatpush1.bf16.msra.mxu0 %v17935_v48  ;;  %11813 = vmatprep.subr.bf16.mxu1 %v17940_v0  ;;  %v17998_v48 = vld [vmem:[#allocation10 + $0x16c0] ss:$28 sps:$4 sm:$0xff]   ;;  %v18001_v0 = vld [vmem:[#allocation10 + $0x16c8] ss:$28 sps:$4 sm:$0xff]  }
 0xaa4   : > { %12100 = vmatprep.subr.bf16.mxu0 %v17943_v24  ;;  %v18006_v24 = vld [vmem:[#allocation10 + $0x16fc] ss:$28 sps:$4 sm:$0xff]  }
 0xaa6   : > { %11814 = vmatpush1.bf16.msra.mxu1 %v17938_v58  ;;  %v18009_v58 = vld [vmem:[#allocation10 + $0x1704] ss:$28 sps:$4 sm:$0xff]  }
 0xaa7   : > { %12101 = vmatpush1.bf16.msra.mxu0 %v17941_v40  ;;  %11815 = vmatprep.subr.bf16.mxu1 %v17946_v55  ;;  %v18004_v40 = vld [vmem:[#allocation10 + $0x16f8] ss:$28 sps:$4 sm:$0xff]   ;;  %v18007_v55 = vld [vmem:[#allocation10 + $0x1700] ss:$28 sps:$4 sm:$0xff]  }
 0xaa8   : > { %12102 = vmatprep.subr.bf16.mxu0 %v17949_v23  ;;  %v18012_v23 = vld [vmem:[#allocation10 + $0x1734] ss:$28 sps:$4 sm:$0xff]  }
 0xaaa   : > { %11816 = vmatpush1.bf16.msra.mxu1 %v17944_v28  ;;  %v18015_v28 = vld [vmem:[#allocation10 + $0x173c] ss:$28 sps:$4 sm:$0xff]  }
 0xaab   : > { %12103 = vmatpush1.bf16.msra.mxu0 %v17947_v22  ;;  %11826 = vmatprep.subr.bf16.mxu1 %v17952_v34  ;;  %v18010_v22 = vld [vmem:[#allocation10 + $0x1730] ss:$28 sps:$4 sm:$0xff]   ;;  %v18013_v34 = vld [vmem:[#allocation10 + $0x1738] ss:$28 sps:$4 sm:$0xff]  }
 0xaac   : > { %12113 = vmatprep.subr.bf16.mxu0 %v17955_v13  ;;  %v18018_v13 = vld [vmem:[#allocation10 + $0x176c] ss:$28 sps:$4 sm:$0xff]  }
 0xaad   : > { %11818 = vmatmul.mubr.bf16.vlgmr.msra.gmra.mrb[40].mxu1 %v20428_v35 }
 0xaae   : > { %12105 = vmatmul.mubr.bf16.vlgmr.msra.gmra.mrb[24].mxu0 %v20428_v35  ;;  %11827 = vmatpush1.bf16.msra.mxu1 %v17950_v16  ;;  %v18021_v16 = vld [vmem:[#allocation10 + $0x1774] ss:$28 sps:$4 sm:$0xff]  }
 0xaaf   : > { %12114 = vmatpush1.bf16.msra.mxu0 %v17953_v18  ;;  %11828 = vmatprep.subr.bf16.mxu1 %v17958_v37  ;;  %v18016_v18 = vld [vmem:[#allocation10 + $0x1768] ss:$28 sps:$4 sm:$0xff]   ;;  %v18019_v37 = vld [vmem:[#allocation10 + $0x1770] ss:$28 sps:$4 sm:$0xff]  }
 0xab0   : > { %12115 = vmatprep.subr.bf16.mxu0 %v17961_v54  ;;  %15514 = vmatprep.mubr.msk.bf16.mxu1 %vm1812_vm3, %v20431_v3  ;;  %v18024_v54 = vld [vmem:[#allocation10 + $0x14] ss:$28 sps:$4 sm:$0xff]  }
 0xab1   : > { %15519 = vmatprep.mubr.msk.bf16.mxu0 %vm1812_vm3, %v20431_v3 }
 0xab2   : > { %11829 = vmatpush1.bf16.msra.mxu1 %v17956_v57  ;;  %v18022_v57 = vld [vmem:[#allocation10 + $0x10] ss:$28 sps:$4 sm:$0xff]  }
 0xab3   : > { %12116 = vmatpush1.bf16.msra.mxu0 %v17959_v26  ;;  %11830 = vmatprep.subr.bf16.mxu1 %v17964_v31  ;;  %v20440_v26 = vrot.slane %v20359_v56, 1  ;;  %v18027_v31 = vld [vmem:[#allocation10 + $0x4c] ss:$28 sps:$4 sm:$0xff]   ;;  %v18031_v56 = vld [vmem:[#allocation10 + $0xb8] ss:$28 sps:$4 sm:$0xff]  }
 0xab4   : > { %12117 = vmatprep.subr.bf16.mxu0 %v17967_v32  ;;  %v18025_v32 = vld [vmem:[#allocation10 + $0x48] ss:$28 sps:$4 sm:$0xff]  }
 0xab6   : > { %11831 = vmatpush1.bf16.msra.mxu1 %v17962_v41  ;;  %v18030_v41 = vld [vmem:[#allocation10 + $0x84] ss:$28 sps:$4 sm:$0xff]  }
 0xab7   : > { %12118 = vmatpush1.bf16.msra.mxu0 %v17965_v20  ;;  %11832 = vmatprep.subr.bf16.mxu1 %v17970_v7  ;;  %v18028_v20 = vld [vmem:[#allocation10 + $0x80] ss:$28 sps:$4 sm:$0xff]  }
 0xab8   : > { %12119 = vmatprep.subr.bf16.mxu0 %v17973_v17  ;;  %v18033_v7 = vld [vmem:[#allocation10 + $0xbc] ss:$28 sps:$4 sm:$0xff]   ;;  %v18036_v17 = vld [vmem:[#allocation10 + $0xf4] ss:$28 sps:$4 sm:$0xff]  }
 0xaba   : > { %11833 = vmatpush1.bf16.msra.mxu1 %v17968_v49  ;;  %v18034_v49 = vld [vmem:[#allocation10 + $0xf0] ss:$28 sps:$4 sm:$0xff]  }
 0xabb   : > { %12120 = vmatpush1.bf16.msra.mxu0 %v17971_v61  ;;  %11834 = vmatprep.subr.bf16.mxu1 %v17976_v5  ;;  %v18039_v61 = vld [vmem:[#allocation10 + $0x12c] ss:$28 sps:$4 sm:$0xff]  }
 0xabc   : > { %12121 = vmatprep.subr.bf16.mxu0 %v17979_v46  ;;  %v18037_v5 = vld [vmem:[#allocation10 + $0x128] ss:$28 sps:$4 sm:$0xff]  }
 0xabd   : > { %v18042_v46 = vld [vmem:[#allocation10 + $0x164] ss:$28 sps:$4 sm:$0xff]  }
 0xabe   : > { %11835 = vmatpush1.bf16.msra.mxu1 %v17974_v59  ;;  %v18045_v59 = vld [vmem:[#allocation10 + $0x19c] ss:$28 sps:$4 sm:$0xff]  }
 0xabf   : > { %12122 = vmatpush1.bf16.msra.mxu0 %v17977_v27  ;;  %11836 = vmatprep.subr.bf16.mxu1 %v17982_v38  ;;  %v18043_v27 = vld [vmem:[#allocation10 + $0x198] ss:$28 sps:$4 sm:$0xff]  }
 0xac0   : > { %12123 = vmatprep.subr.bf16.mxu0 %v17985_v2  ;;  %v18048_v38 = vld [vmem:[#allocation10 + $0x1d4] ss:$28 sps:$4 sm:$0xff]  }
 0xac1   : > { %v18046_v2 = vld [vmem:[#allocation10 + $0x1d0] ss:$28 sps:$4 sm:$0xff]  }
 0xac2   : > { %11837 = vmatpush1.bf16.msra.mxu1 %v17980_v44  ;;  %v18051_v44 = vld [vmem:[#allocation10 + $0x20c] ss:$28 sps:$4 sm:$0xff]  }
 0xac3   : > { %12124 = vmatpush1.bf16.msra.mxu0 %v17983_v63  ;;  %11838 = vmatprep.subr.bf16.mxu1 %v17988_v51  ;;  %v18049_v63 = vld [vmem:[#allocation10 + $0x208] ss:$28 sps:$4 sm:$0xff]  }
 0xac4   : > { %12125 = vmatprep.subr.bf16.mxu0 %v17991_v30  ;;  %v18054_v51 = vld [vmem:[#allocation10 + $0x244] ss:$28 sps:$4 sm:$0xff]  }
 0xac5   : > { %v18052_v30 = vld [vmem:[#allocation10 + $0x240] ss:$28 sps:$4 sm:$0xff]  }
 0xac6   : > { %11839 = vmatpush1.bf16.msra.mxu1 %v17986_v1  ;;  %v18148_v1 = vld [vmem:[#allocation13] ss:$8 sps:$4 sm:$0xff]  }
 0xac7   : > { %12126 = vmatpush1.bf16.msra.mxu0 %v17989_v4  ;;  %11840 = vmatprep.subr.bf16.mxu1 %v17994_v62  ;;  %v18150_v4 = vld [vmem:[#allocation13 + $0x4] ss:$8 sps:$4 sm:$0xff]   ;;  %v18057_v62 = vld [vmem:[#allocation10 + $0x27c] ss:$28 sps:$4 sm:$0xff]  }
 0xac8   : > { %12127 = vmatprep.subr.bf16.mxu0 %v17997_v47  ;;  %v18055_v47 = vld [vmem:[#allocation10 + $0x278] ss:$28 sps:$4 sm:$0xff]  }
 0xaca   : > { %11841 = vmatpush1.bf16.msra.mxu1 %v17992_v43  ;;  %v18154_v43 = vld [vmem:[#allocation13 + $0x10] ss:$8 sps:$4 sm:$0xff]  }
 0xacb   : > { %12128 = vmatpush1.bf16.msra.mxu0 %v17995_v33  ;;  %11842 = vmatprep.subr.bf16.mxu1 %v18000_v21  ;;  %v18156_v33 = vld [vmem:[#allocation13 + $0x14] ss:$8 sps:$4 sm:$0xff]   ;;  %v18060_v21 = vld [vmem:[#allocation10 + $0x2b4] ss:$28 sps:$4 sm:$0xff]  }
 0xacc   : > { %12129 = vmatprep.subr.bf16.mxu0 %v18003_v53  ;;  %v18058_v53 = vld [vmem:[#allocation10 + $0x2b0] ss:$28 sps:$4 sm:$0xff]  }
 0xace   : > { %11843 = vmatpush1.bf16.msra.mxu1 %v17998_v48  ;;  %v18160_v48 = vld [vmem:[#allocation13 + $0x20] ss:$8 sps:$4 sm:$0xff]  }
 0xacf   : > { %12130 = vmatpush1.bf16.msra.mxu0 %v18001_v0  ;;  %11844 = vmatprep.subr.bf16.mxu1 %v18006_v24  ;;  %v18162_v0 = vld [vmem:[#allocation13 + $0x24] ss:$8 sps:$4 sm:$0xff]  }
 0xad0   : > { %12131 = vmatprep.subr.bf16.mxu0 %v18009_v58  ;;  %v18063_v24 = vld [vmem:[#allocation10 + $0x2ec] ss:$28 sps:$4 sm:$0xff]  }
 0xad1   : > { %v18061_v58 = vld [vmem:[#allocation10 + $0x2e8] ss:$28 sps:$4 sm:$0xff]  }
 0xad2   : > { %11845 = vmatpush1.bf16.msra.mxu1 %v18004_v40  ;;  %v18166_v40 = vld [vmem:[#allocation13 + $0x30] ss:$8 sps:$4 sm:$0xff]  }
 0xad3   : > { %12132 = vmatpush1.bf16.msra.mxu0 %v18007_v55  ;;  %11846 = vmatprep.subr.bf16.mxu1 %v18012_v23  ;;  %v18168_v55 = vld [vmem:[#allocation13 + $0x34] ss:$8 sps:$4 sm:$0xff]  }
 0xad4   : > { %12133 = vmatprep.subr.bf16.mxu0 %v18015_v28  ;;  %v18066_v23 = vld [vmem:[#allocation10 + $0x324] ss:$28 sps:$4 sm:$0xff]  }
 0xad5   : > { %v18064_v28 = vld [vmem:[#allocation10 + $0x320] ss:$28 sps:$4 sm:$0xff]  }
 0xad6   : > { %11847 = vmatpush1.bf16.msra.mxu1 %v18010_v22  ;;  %v18172_v22 = vld [vmem:[#allocation13 + $0x40] ss:$8 sps:$4 sm:$0xff]  }
 0xad7   : > { %12134 = vmatpush1.bf16.msra.mxu0 %v18013_v34  ;;  %11848 = vmatprep.subr.bf16.mxu1 %v18018_v13  ;;  %v18174_v34 = vld [vmem:[#allocation13 + $0x44] ss:$8 sps:$4 sm:$0xff]   ;;  %v18069_v13 = vld [vmem:[#allocation10 + $0x35c] ss:$28 sps:$4 sm:$0xff]  }
 0xad8   : > { %12135 = vmatprep.subr.bf16.mxu0 %v18021_v16  ;;  %v18067_v16 = vld [vmem:[#allocation10 + $0x358] ss:$28 sps:$4 sm:$0xff]  }
 0xada   : > { %11849 = vmatpush1.bf16.msra.mxu1 %v18016_v18  ;;  %v18178_v18 = vld [vmem:[#allocation13 + $0x50] ss:$8 sps:$4 sm:$0xff]  }
 0xadb   : > { %12136 = vmatpush1.bf16.msra.mxu0 %v18019_v37  ;;  %12154 = vmatprep.subr.bf16.mxu1 %v18024_v54  ;;  %v18180_v37 = vld [vmem:[#allocation13 + $0x54] ss:$8 sps:$4 sm:$0xff]   ;;  %v18072_v54 = vld [vmem:[#allocation10 + $0x394] ss:$28 sps:$4 sm:$0xff]  }
 0xadc   : > { %13428 = vmatprep.subr.bf16.mxu0 %v18150_v4  ;;  %v18091_v4 = vld [vmem:[#allocation10 + $0x518] ss:$28 sps:$4 sm:$0xff]  }
 0xadd   : > { %11859 = vmatmul.mubr.bf16.vlgmr.msra.gmra.mrb[40].mxu1 %v20440_v26 }
 0xade   : > { %12146 = vmatmul.mubr.bf16.vlgmr.msra.gmra.mrb[24].mxu0 %v20440_v26  ;;  %12155 = vmatpush1.bf16.msra.mxu1 %v18022_v57  ;;  %v18070_v57 = vld [vmem:[#allocation10 + $0x390] ss:$28 sps:$4 sm:$0xff]  }
 0xadf   : > { %15520 = vmatprep.mubr.msk.bf16.mxu1 %vm1599_vm5, %v20305_v8  ;;  %12156 = vmatprep.subr.bf16.mxu1 %v18027_v31  ;;  %v18040_v8 = vld [vmem:[#allocation10 + $0x160] ss:$28 sps:$4 sm:$0xff]   ;;  %v18184_v31 = vld [vmem:[#allocation13 + $0x60] ss:$8 sps:$4 sm:$0xff]  }
 0xae0   : > { %13429 = vmatpush1.bf16.msra.mxu0 %v18148_v1  ;;  %v18093_v1 = vld [vmem:[#allocation10 + $0x51c] ss:$28 sps:$4 sm:$0xff]  }
 0xae1   : > { %13430 = vmatprep.subr.bf16.mxu0 %v18156_v33  ;;  %v18214_v33 = vld [vmem:[#allocation13 + $0xb0] ss:$8 sps:$4 sm:$0xff]  }
 0xae2   : > { %12157 = vmatpush1.bf16.msra.mxu1 %v18025_v32  ;;  %v18186_v32 = vld [vmem:[#allocation13 + $0x64] ss:$8 sps:$4 sm:$0xff]  }
 0xae3   : > { %12158 = vmatprep.subr.bf16.mxu1 %v18030_v41  ;;  %v18075_v41 = vld [vmem:[#allocation10 + $0x3cc] ss:$28 sps:$4 sm:$0xff]  }
 0xae4   : > { %13431 = vmatpush1.bf16.msra.mxu0 %v18154_v43  ;;  %v18099_v43 = vld [vmem:[#allocation10 + $0x58c] ss:$28 sps:$4 sm:$0xff]  }
 0xae5   : > { %13432 = vmatprep.subr.bf16.mxu0 %v18162_v0  ;;  %v18222_v0 = vld [vmem:[#allocation13 + $0xc4] ss:$8 sps:$4 sm:$0xff]  }
 0xae6   : > { %12159 = vmatpush1.bf16.msra.mxu1 %v18028_v20  ;;  %v18073_v20 = vld [vmem:[#allocation10 + $0x3c8] ss:$28 sps:$4 sm:$0xff]  }
 0xae7   : > { %12160 = vmatprep.subr.bf16.mxu1 %v18033_v7  ;;  %v18190_v7 = vld [vmem:[#allocation13 + $0x70] ss:$8 sps:$4 sm:$0xff]  }
 0xae8   : > { %13433 = vmatpush1.bf16.msra.mxu0 %v18160_v48  ;;  %v18102_v48 = vld [vmem:[#allocation10 + $0x5c4] ss:$28 sps:$4 sm:$0xff]  }
 0xae9   : > { %13434 = vmatprep.subr.bf16.mxu0 %v18168_v55  ;;  %v18105_v55 = vld [vmem:[#allocation10 + $0x5fc] ss:$28 sps:$4 sm:$0xff]  }
 0xaea   : > { %12161 = vmatpush1.bf16.msra.mxu1 %v18031_v56  ;;  %v18192_v56 = vld [vmem:[#allocation13 + $0x74] ss:$8 sps:$4 sm:$0xff]  }
 0xaeb   : > { %12162 = vmatprep.subr.bf16.mxu1 %v18036_v17  ;;  %v18078_v17 = vld [vmem:[#allocation10 + $0x404] ss:$28 sps:$4 sm:$0xff]  }
 0xaec   : > { %13435 = vmatpush1.bf16.msra.mxu0 %v18166_v40  ;;  %v18100_v40 = vld [vmem:[#allocation10 + $0x5c0] ss:$28 sps:$4 sm:$0xff]  }
 0xaed   : > { %13436 = vmatprep.subr.bf16.mxu0 %v18174_v34  ;;  %v18108_v34 = vld [vmem:[#allocation10 + $0x634] ss:$28 sps:$4 sm:$0xff]  }
 0xaee   : > { %12163 = vmatpush1.bf16.msra.mxu1 %v18034_v49  ;;  %v18076_v49 = vld [vmem:[#allocation10 + $0x400] ss:$28 sps:$4 sm:$0xff]  }
 0xaef   : > { %12164 = vmatprep.subr.bf16.mxu1 %v18039_v61  ;;  %v18196_v61 = vld [vmem:[#allocation13 + $0x80] ss:$8 sps:$4 sm:$0xff]  }
 0xaf0   : > { %13437 = vmatpush1.bf16.msra.mxu0 %v18172_v22  ;;  %v18103_v22 = vld [vmem:[#allocation10 + $0x5f8] ss:$28 sps:$4 sm:$0xff]  }
 0xaf1   : > { %13438 = vmatprep.subr.bf16.mxu0 %v18180_v37  ;;  %v18111_v37 = vld [vmem:[#allocation10 + $0x66c] ss:$28 sps:$4 sm:$0xff]  }
 0xaf2   : > { %12165 = vmatpush1.bf16.msra.mxu1 %v18037_v5  ;;  %v18198_v5 = vld [vmem:[#allocation13 + $0x84] ss:$8 sps:$4 sm:$0xff]  }
 0xaf3   : > { %12166 = vmatprep.subr.bf16.mxu1 %v18042_v46  ;;  %v18081_v46 = vld [vmem:[#allocation10 + $0x43c] ss:$28 sps:$4 sm:$0xff]  }
 0xaf4   : > { %13439 = vmatpush1.bf16.msra.mxu0 %v18178_v18  ;;  %v18106_v18 = vld [vmem:[#allocation10 + $0x630] ss:$28 sps:$4 sm:$0xff]  }
 0xaf5   : > { %13440 = vmatprep.subr.bf16.mxu0 %v18186_v32  ;;  %v18112_v32 = vld [vmem:[#allocation10 + $0x6a0] ss:$28 sps:$4 sm:$0xff]  }
 0xaf6   : > { %12167 = vmatpush1.bf16.msra.mxu1 %v18040_v8  ;;  %v18202_v8 = vld [vmem:[#allocation13 + $0x90] ss:$8 sps:$4 sm:$0xff]  }
 0xaf7   : > { %12168 = vmatprep.subr.bf16.mxu1 %v18045_v59  ;;  %v18204_v59 = vld [vmem:[#allocation13 + $0x94] ss:$8 sps:$4 sm:$0xff]  }
 0xaf8   : > { %13441 = vmatpush1.bf16.msra.mxu0 %v18184_v31  ;;  %v18114_v31 = vld [vmem:[#allocation10 + $0x6a4] ss:$28 sps:$4 sm:$0xff]  }
 0xaf9   : > { %13442 = vmatprep.subr.bf16.mxu0 %v18192_v56  ;;  %v18118_v56 = vld [vmem:[#allocation10 + $0x710] ss:$28 sps:$4 sm:$0xff]  }
 0xafa   : > { %12169 = vmatpush1.bf16.msra.mxu1 %v18043_v27  ;;  %v18082_v27 = vld [vmem:[#allocation10 + $0x470] ss:$28 sps:$4 sm:$0xff]  }
 0xafb   : > { %12170 = vmatprep.subr.bf16.mxu1 %v18048_v38  ;;  %v18208_v38 = vld [vmem:[#allocation13 + $0xa0] ss:$8 sps:$4 sm:$0xff]  }
 0xafc   : > { %13443 = vmatpush1.bf16.msra.mxu0 %v18190_v7  ;;  %v18120_v7 = vld [vmem:[#allocation10 + $0x714] ss:$28 sps:$4 sm:$0xff]  }
 0xafd   : > { %13444 = vmatprep.subr.bf16.mxu0 %v18198_v5  ;;  %v18124_v5 = vld [vmem:[#allocation10 + $0x780] ss:$28 sps:$4 sm:$0xff]  }
 0xafe   : > { %12171 = vmatpush1.bf16.msra.mxu1 %v18046_v2  ;;  %v18210_v2 = vld [vmem:[#allocation13 + $0xa4] ss:$8 sps:$4 sm:$0xff]  }
 0xaff   : > { %12172 = vmatprep.subr.bf16.mxu1 %v18051_v44  ;;  %v18087_v44 = vld [vmem:[#allocation10 + $0x4ac] ss:$28 sps:$4 sm:$0xff]  }
 0xb00   : > { %13445 = vmatpush1.bf16.msra.mxu0 %v18196_v61  ;;  %v18126_v61 = vld [vmem:[#allocation10 + $0x784] ss:$28 sps:$4 sm:$0xff]  }
 0xb01   : > { %13446 = vmatprep.subr.bf16.mxu0 %v18204_v59  ;;  %v18130_v59 = vld [vmem:[#allocation10 + $0x7f0] ss:$28 sps:$4 sm:$0xff]  }
 0xb02   : > { %12173 = vmatpush1.bf16.msra.mxu1 %v18049_v63  ;;  %v18085_v63 = vld [vmem:[#allocation10 + $0x4a8] ss:$28 sps:$4 sm:$0xff]  }
 0xb03   : > { %12174 = vmatprep.subr.bf16.mxu1 %v18054_v51  ;;  %v18090_v51 = vld [vmem:[#allocation10 + $0x4e4] ss:$28 sps:$4 sm:$0xff]  }
 0xb04   : > { %13447 = vmatpush1.bf16.msra.mxu0 %v18202_v8  ;;  %v18132_v8 = vld [vmem:[#allocation10 + $0x7f4] ss:$28 sps:$4 sm:$0xff]  }
 0xb05   : > { %13448 = vmatprep.subr.bf16.mxu0 %v18210_v2  ;;  %v18139_v2 = vld [vmem:[#allocation10 + $0x898] ss:$28 sps:$4 sm:$0xff]  }
 0xb06   : > { %12175 = vmatpush1.bf16.msra.mxu1 %v18052_v30  ;;  %v18088_v30 = vld [vmem:[#allocation10 + $0x4e0] ss:$28 sps:$4 sm:$0xff]  }
 0xb07   : > { %12176 = vmatprep.subr.bf16.mxu1 %v18057_v62  ;;  %v18096_v62 = vld [vmem:[#allocation10 + $0x554] ss:$28 sps:$4 sm:$0xff]  }
 0xb08   : > { %13449 = vmatpush1.bf16.msra.mxu0 %v18208_v38  ;;  %v18141_v38 = vld [vmem:[#allocation10 + $0x89c] ss:$28 sps:$4 sm:$0xff]  }
 0xb0a   : > { %12177 = vmatpush1.bf16.msra.mxu1 %v18055_v47  ;;  %v18094_v47 = vld [vmem:[#allocation10 + $0x550] ss:$28 sps:$4 sm:$0xff]  }
 0xb0b   : > { %12178 = vmatprep.subr.bf16.mxu1 %v18060_v21  ;;  %v18216_v21 = vld [vmem:[#allocation13 + $0xb4] ss:$8 sps:$4 sm:$0xff]  }
 0xb0c   : > { %13450 = vmatprep.subr.bf16.mxu0 %v18216_v21  ;;  %v18171_v21 = vld [vmem:[#allocation10 + $0x9ec] ss:$28 sps:$4 sm:$0xff]  }
 0xb0d   : > { %13451 = vmatpush1.bf16.msra.mxu0 %v18214_v33  ;;  %v18163_v33 = vld [vmem:[#allocation10 + $0x9b0] ss:$28 sps:$4 sm:$0xff]  }
 0xb0e   : > { %12179 = vmatpush1.bf16.msra.mxu1 %v18058_v53  ;;  %v18097_v53 = vld [vmem:[#allocation10 + $0x588] ss:$28 sps:$4 sm:$0xff]   ;;  %13452 = vmatprep.subr.bf16.mxu0 %v18222_v0  ;;  %v18175_v0 = vld [vmem:[#allocation10 + $0xa20] ss:$28 sps:$4 sm:$0xff]  }
 0xb0f   : > { %12180 = vmatprep.subr.bf16.mxu1 %v18063_v24  ;;  %v18220_v24 = vld [vmem:[#allocation13 + $0xc0] ss:$8 sps:$4 sm:$0xff]  }
 0xb11   : > { %13453 = vmatpush1.bf16.msra.mxu0 %v18220_v24  ;;  %v18183_v24 = vld [vmem:[#allocation10 + $0xa5c] ss:$28 sps:$4 sm:$0xff]  }
 0xb12   : > { %12181 = vmatpush1.bf16.msra.mxu1 %v18061_v58  ;;  %v18228_v58 = vld [vmem:[#allocation13 + $0xd4] ss:$8 sps:$4 sm:$0xff]  }
 0xb13   : > { %12182 = vmatprep.subr.bf16.mxu1 %v18066_v23  ;;  %v18226_v23 = vld [vmem:[#allocation13 + $0xd0] ss:$8 sps:$4 sm:$0xff]   ;;  %13454 = vmatprep.subr.bf16.mxu0 %v18228_v58 }
 0xb14   : > { %v18181_v58 = vld [vmem:[#allocation10 + $0xa58] ss:$28 sps:$4 sm:$0xff]  }
 0xb15   : > { %13455 = vmatpush1.bf16.msra.mxu0 %v18226_v23  ;;  %v18195_v23 = vld [vmem:[#allocation10 + $0xacc] ss:$28 sps:$4 sm:$0xff]  }
 0xb16   : > { %12183 = vmatpush1.bf16.msra.mxu1 %v18064_v28  ;;  %v18234_v28 = vld [vmem:[#allocation13 + $0xe4] ss:$8 sps:$4 sm:$0xff]  }
 0xb17   : > { %12184 = vmatprep.subr.bf16.mxu1 %v18069_v13  ;;  %v18232_v13 = vld [vmem:[#allocation13 + $0xe0] ss:$8 sps:$4 sm:$0xff]   ;;  %13456 = vmatprep.subr.bf16.mxu0 %v18234_v28 }
 0xb18   : > { %v18193_v28 = vld [vmem:[#allocation10 + $0xac8] ss:$28 sps:$4 sm:$0xff]  }
 0xb19   : > { %13457 = vmatpush1.bf16.msra.mxu0 %v18232_v13  ;;  %v18207_v13 = vld [vmem:[#allocation10 + $0xb3c] ss:$28 sps:$4 sm:$0xff]  }
 0xb1a   : > { %12185 = vmatpush1.bf16.msra.mxu1 %v18067_v16  ;;  %v18240_v16 = vld [vmem:[#allocation13 + $0xf4] ss:$8 sps:$4 sm:$0xff]  }
 0xb1b   : > { %12195 = vmatprep.subr.bf16.mxu1 %v18072_v54  ;;  %v18238_v54 = vld [vmem:[#allocation13 + $0xf0] ss:$8 sps:$4 sm:$0xff]   ;;  %13458 = vmatprep.subr.bf16.mxu0 %v18240_v16 }
 0xb1c   : > { %v18205_v16 = vld [vmem:[#allocation10 + $0xb38] ss:$28 sps:$4 sm:$0xff]  }
 0xb1d   : > { %15521 = vmatmul.mubr.msk.bf16.vlgmr.msra.gmra.mrb[44].mxu1 %vm1599_vm5, %v20317_v15  ;;  %v18079_v15 = vld [vmem:[#allocation10 + $0x438] ss:$28 sps:$4 sm:$0xff]   ;;  %13459 = vmatpush1.bf16.msra.mxu0 %v18238_v54  ;;  %v20455_v54 = vld [vmem:[#allocation11] sm:$0xff] }
 0xb1e   : > { %12196 = vmatpush1.bf16.msra.mxu1 %v18070_v57  ;;  %15522 = vmatprep.mubr.msk.bf16.mxu1 %vm1599_vm5, %v20351_v52  ;;  %v18084_v52 = vld [vmem:[#allocation10 + $0x474] ss:$28 sps:$4 sm:$0xff]   ;;  %v18109_v57 = vld [vmem:[#allocation10 + $0x668] ss:$28 sps:$4 sm:$0xff]  }
 0xb1f   : > { %12197 = vmatprep.subr.bf16.mxu1 %v18075_v41  ;;  %v18117_v41 = vld [vmem:[#allocation10 + $0x6dc] ss:$28 sps:$4 sm:$0xff]  }
 0xb22   : > { %12198 = vmatpush1.bf16.msra.mxu1 %v18073_v20  ;;  %v18115_v20 = vld [vmem:[#allocation10 + $0x6d8] ss:$28 sps:$4 sm:$0xff]  }
 0xb23   : > { %12199 = vmatprep.subr.bf16.mxu1 %v18078_v17  ;;  %v18123_v17 = vld [vmem:[#allocation10 + $0x74c] ss:$28 sps:$4 sm:$0xff]  }
 0xb26   : > { %12200 = vmatpush1.bf16.msra.mxu1 %v18076_v49  ;;  %v18121_v49 = vld [vmem:[#allocation10 + $0x748] ss:$28 sps:$4 sm:$0xff]  }
 0xb27   : > { %12201 = vmatprep.subr.bf16.mxu1 %v18081_v46  ;;  %v18129_v46 = vld [vmem:[#allocation10 + $0x7bc] ss:$28 sps:$4 sm:$0xff]  }
 0xb2a   : > { %12202 = vmatpush1.bf16.msra.mxu1 %v18079_v15  ;;  %v18127_v15 = vld [vmem:[#allocation10 + $0x7b8] ss:$28 sps:$4 sm:$0xff]  }
 0xb2b   : > { %12203 = vmatprep.subr.bf16.mxu1 %v18084_v52  ;;  %v18135_v52 = vld [vmem:[#allocation10 + $0x82c] ss:$28 sps:$4 sm:$0xff]  }
 0xb2e   : > { %12204 = vmatpush1.bf16.msra.mxu1 %v18082_v27  ;;  %v18138_v27 = vld [vmem:[#allocation10 + $0x864] ss:$28 sps:$4 sm:$0xff]  }
 0xb2f   : > { %12205 = vmatprep.subr.bf16.mxu1 %v18087_v44  ;;  %v18144_v44 = vld [vmem:[#allocation10 + $0x8d4] ss:$28 sps:$4 sm:$0xff]  }
 0xb32   : > { %12206 = vmatpush1.bf16.msra.mxu1 %v18085_v63  ;;  %v18142_v63 = vld [vmem:[#allocation10 + $0x8d0] ss:$28 sps:$4 sm:$0xff]  }
 0xb33   : > { %12207 = vmatprep.subr.bf16.mxu1 %v18090_v51  ;;  %v18147_v51 = vld [vmem:[#allocation10 + $0x90c] ss:$28 sps:$4 sm:$0xff]  }
 0xb36   : > { %12208 = vmatpush1.bf16.msra.mxu1 %v18088_v30  ;;  %v18145_v30 = vld [vmem:[#allocation10 + $0x908] ss:$28 sps:$4 sm:$0xff]  }
 0xb37   : > { %12209 = vmatprep.subr.bf16.mxu1 %v18093_v1  ;;  %v18153_v1 = vld [vmem:[#allocation10 + $0x944] ss:$28 sps:$4 sm:$0xff]  }
 0xb3a   : > { %12210 = vmatpush1.bf16.msra.mxu1 %v18091_v4  ;;  %v18151_v4 = vld [vmem:[#allocation10 + $0x940] ss:$28 sps:$4 sm:$0xff]  }
 0xb3b   : > { %12211 = vmatprep.subr.bf16.mxu1 %v18096_v62  ;;  %v18159_v62 = vld [vmem:[#allocation10 + $0x97c] ss:$28 sps:$4 sm:$0xff]  }
 0xb3e   : > { %12212 = vmatpush1.bf16.msra.mxu1 %v18094_v47  ;;  %v18157_v47 = vld [vmem:[#allocation10 + $0x978] ss:$28 sps:$4 sm:$0xff]  }
 0xb3f   : > { %12213 = vmatprep.subr.bf16.mxu1 %v18099_v43  ;;  %v18165_v43 = vld [vmem:[#allocation10 + $0x9b4] ss:$28 sps:$4 sm:$0xff]  }
 0xb42   : > { %12214 = vmatpush1.bf16.msra.mxu1 %v18097_v53  ;;  %v18169_v53 = vld [vmem:[#allocation10 + $0x9e8] ss:$28 sps:$4 sm:$0xff]  }
 0xb43   : > { %12215 = vmatprep.subr.bf16.mxu1 %v18102_v48  ;;  %v18177_v48 = vld [vmem:[#allocation10 + $0xa24] ss:$28 sps:$4 sm:$0xff]  }
 0xb46   : > { %12216 = vmatpush1.bf16.msra.mxu1 %v18100_v40  ;;  %v18189_v40 = vld [vmem:[#allocation10 + $0xa94] ss:$28 sps:$4 sm:$0xff]  }
 0xb47   : > { %12217 = vmatprep.subr.bf16.mxu1 %v18105_v55  ;;  %v18187_v55 = vld [vmem:[#allocation10 + $0xa90] ss:$28 sps:$4 sm:$0xff]  }
 0xb4a   : > { %12218 = vmatpush1.bf16.msra.mxu1 %v18103_v22  ;;  %v18201_v22 = vld [vmem:[#allocation10 + $0xb04] ss:$28 sps:$4 sm:$0xff]  }
 0xb4b   : > { %12219 = vmatprep.subr.bf16.mxu1 %v18108_v34  ;;  %v18199_v34 = vld [vmem:[#allocation10 + $0xb00] ss:$28 sps:$4 sm:$0xff]  }
 0xb4e   : > { %12220 = vmatpush1.bf16.msra.mxu1 %v18106_v18  ;;  %v18213_v18 = vld [vmem:[#allocation10 + $0xb74] ss:$28 sps:$4 sm:$0xff]  }
 0xb4f   : > { %12221 = vmatprep.subr.bf16.mxu1 %v18111_v37  ;;  %v18211_v37 = vld [vmem:[#allocation10 + $0xb70] ss:$28 sps:$4 sm:$0xff]  }
 0xb52   : > { %12222 = vmatpush1.bf16.msra.mxu1 %v18109_v57  ;;  %v8318_v57 = vrot.slane %v20455_v54, %v19517_v10  ;;  %v18231_v10 = vld [vmem:[#allocation10 + $0xc1c] ss:$28 sps:$4 sm:$0xff]  }
 0xb53   : > { %12223 = vmatprep.subr.bf16.mxu1 %v18114_v31  ;;  %v8314_v31 = vrot.slane %v20455_v54, %v19520_v11 }
 0xb56   : > { %12224 = vmatpush1.bf16.msra.mxu1 %v18112_v32  ;;  %v18217_v32 = vld [vmem:[#allocation10 + $0xba8] ss:$28 sps:$4 sm:$0xff]  }
 0xb57   : > { %12225 = vmatprep.subr.bf16.mxu1 %v18117_v41  ;;  %v8322_v41 = vrot.slane %v20455_v54, %v19523_v12 }
 0xb5a   : > { %12226 = vmatpush1.bf16.msra.mxu1 %v18115_v20  ;;  %v18225_v20 = vld [vmem:[#allocation10 + $0xbe4] ss:$28 sps:$4 sm:$0xff]  }
 0xb5b   : > { %12236 = vmatprep.subr.bf16.mxu1 %v18120_v7 }
 0xb5d   : > { %15523 = vmatmul.mubr.msk.bf16.vlgmr.msra.gmra.mrb[44].mxu1 %vm1599_vm5, %v20355_v39  ;;  %v18133_v39 = vld [vmem:[#allocation10 + $0x828] ss:$28 sps:$4 sm:$0xff]  }
 0xb5e   : > { %12237 = vmatpush1.bf16.msra.mxu1 %v18118_v56  ;;  %12268 = vmatprep.mubr.bf16.mxu1 %v20380_v14  ;;  %v18136_v14 = vld [vmem:[#allocation10 + $0x860] ss:$28 sps:$4 sm:$0xff]  }
 0xb5f   : > { %12238 = vmatprep.subr.bf16.mxu1 %v18123_v17 }
 0xb62   : > { %12239 = vmatpush1.bf16.msra.mxu1 %v18121_v49 }
 0xb63   : > { %12240 = vmatprep.subr.bf16.mxu1 %v18126_v61 }
 0xb66   : > { %12241 = vmatpush1.bf16.msra.mxu1 %v18124_v5 }
 0xb67   : > { %12242 = vmatprep.subr.bf16.mxu1 %v18129_v46 }
 0xb6a   : > { %12243 = vmatpush1.bf16.msra.mxu1 %v18127_v15 }
 0xb6b   : > { %12244 = vmatprep.subr.bf16.mxu1 %v18132_v8  ;;  %v18223_v8 = vld [vmem:[#allocation10 + $0xbe0] ss:$28 sps:$4 sm:$0xff]  }
 0xb6e   : > { %12245 = vmatpush1.bf16.msra.mxu1 %v18130_v59 }
 0xb6f   : > { %12246 = vmatprep.subr.bf16.mxu1 %v18135_v52 }
 0xb72   : > { %12247 = vmatpush1.bf16.msra.mxu1 %v18133_v39 }
 0xb73   : > { %12248 = vmatprep.subr.bf16.mxu1 %v18138_v27 }
 0xb76   : > { %12249 = vmatpush1.bf16.msra.mxu1 %v18136_v14 }
 0xb77   : > { %12250 = vmatprep.subr.bf16.mxu1 %v18141_v38 }
 0xb7a   : > { %12251 = vmatpush1.bf16.msra.mxu1 %v18139_v2 }
 0xb7b   : > { %12252 = vmatprep.subr.bf16.mxu1 %v18144_v44 }
 0xb7e   : > { %12253 = vmatpush1.bf16.msra.mxu1 %v18142_v63 }
 0xb7f   : > { %12254 = vmatprep.subr.bf16.mxu1 %v18147_v51 }
 0xb82   : > { %12255 = vmatpush1.bf16.msra.mxu1 %v18145_v30 }
 0xb83   : > { %12256 = vmatprep.subr.bf16.mxu1 %v18153_v1  ;;  %v18229_v1 = vld [vmem:[#allocation10 + $0xc18] ss:$28 sps:$4 sm:$0xff]  }
 0xb86   : > { %12257 = vmatpush1.bf16.msra.mxu1 %v18151_v4 }
 0xb87   : > { %12258 = vmatprep.subr.bf16.mxu1 %v18159_v62 }
 0xb8a   : > { %12259 = vmatpush1.bf16.msra.mxu1 %v18157_v47 }
 0xb8b   : > { %12260 = vmatprep.subr.bf16.mxu1 %v18165_v43  ;;  %v18237_v43 = vld [vmem:[#allocation10 + $0xc54] ss:$28 sps:$4 sm:$0xff]  }
 0xb8e   : > { %12261 = vmatpush1.bf16.msra.mxu1 %v18163_v33 }
 0xb8f   : > { %12262 = vmatprep.subr.bf16.mxu1 %v18171_v21 }
 0xb92   : > { %12263 = vmatpush1.bf16.msra.mxu1 %v18169_v53 }
 0xb93   : > { %12264 = vmatprep.subr.bf16.mxu1 %v18177_v48 }
 0xb96   : > { %12265 = vmatpush1.bf16.msra.mxu1 %v18175_v0 }
 0xb97   : > { %12266 = vmatprep.subr.bf16.mxu1 %v18183_v24 }
 0xb9a   : > { %12267 = vmatpush1.bf16.msra.mxu1 %v18181_v58 }
 0xb9b   : > { %12277 = vmatprep.subr.bf16.mxu1 %v18189_v40  ;;  %v18235_v40 = vld [vmem:[#allocation10 + $0xc50] ss:$28 sps:$4 sm:$0xff]  }
 0xb9d   : > { %12269 = vmatmul.mubr.bf16.vlgmr.msra.gmra.mrb[44].mxu1 %v20393_v45  ;;  %v18219_v45 = vld [vmem:[#allocation10 + $0xbac] ss:$28 sps:$4 sm:$0xff]  }
 0xb9e   : > { %12278 = vmatpush1.bf16.msra.mxu1 %v18187_v55  ;;  %12309 = vmatprep.mubr.bf16.mxu1 %v20401_v6  ;;  %v8310_v6 = vrot.slane %v20455_v54, %v19514_v9 }
 0xb9f   : > { %12279 = vmatprep.subr.bf16.mxu1 %v18195_v23 }
 0xba2   : > { %12280 = vmatpush1.bf16.msra.mxu1 %v18193_v28 }
 0xba3   : > { %12281 = vmatprep.subr.bf16.mxu1 %v18201_v22 }
 0xba6   : > { %12282 = vmatpush1.bf16.msra.mxu1 %v18199_v34  ;;  %v18243_v34 = vld [vmem:[#allocation10 + $0xc8c] ss:$28 sps:$4 sm:$0xff]  }
 0xba7   : > { %12283 = vmatprep.subr.bf16.mxu1 %v18207_v13 }
 0xbaa   : > { %12284 = vmatpush1.bf16.msra.mxu1 %v18205_v16 }
 0xbab   : > { %12285 = vmatprep.subr.bf16.mxu1 %v18213_v18 }
 0xbae   : > { %12286 = vmatpush1.bf16.msra.mxu1 %v18211_v37 }
 0xbaf   : > { %12287 = vmatprep.subr.bf16.mxu1 %v18219_v45 }
 0xbb0   : > { %v11860_v7 = vpop.f32.mrb[40].mxu1 }
 0xbb1   : > { %v15916_v56 = vadd.f32 %v11860_v7, %v8310_v6  ;;  %v12147_v17 = vpop.f32.mrb[24].mxu0  ;;  %v11862_v49 = vpop.f32.mrb[41].mxu1 }
 0xbb2   : > { %v15918_v61 = vadd.f32 %v12147_v17, %v8318_v57  ;;  %v15917_v5 = vadd.f32 %v11862_v49, %v8314_v31  ;;  %v12149_v46 = vpop.f32.mrb[25].mxu0  ;;  %v11864_v15 = vpop.f32.mrb[42].mxu1  ;;  %12288 = vmatpush1.bf16.msra.mxu1 %v18217_v32  ;;  %v18241_v32 = vld [vmem:[#allocation10 + $0xc88] ss:$28 sps:$4 sm:$0xff]  }
 0xbb3   : > { %vm12441_vm2 = vcmp.ge.f32.partialorder %v15916_v56, 0.0  ;;  %v12447_v59 = vmul.f32 0.01, %v15916_v56  ;;  %v15919_v52 = vadd.f32 %v12149_v46, %v8322_v41  ;;  %v12151_v39 = vpop.f32.mrb[26].mxu0  ;;  %v11865_v27 = vpop.f32.mrb[43].mxu1  ;;  %12289 = vmatprep.subr.bf16.mxu1 %v18225_v20 }
 0xbb4   : > { %vm12443_vm4 = vcmp.ge.f32.partialorder %v15918_v61, 0.0  ;;  %v12449_v12 = vmul.f32 0.01, %v15918_v61  ;;  %vm12442_vm5 = vcmp.ge.f32.partialorder %v15917_v5, 0.0  ;;  %v12448_v14 = vmul.f32 0.01, %v15917_v5 }
 0xbb5   : > { %v12453_v38 = vsel %vm12441_vm2, %v15916_v56, %v12447_v59  ;;  %vm12444_vm8 = vcmp.ge.f32.partialorder %v15919_v52, 0.0  ;;  %v12450_v2 = vmul.f32 0.01, %v15919_v52  ;;  %v12152_v44 = vpop.f32.mrb[27].mxu0  ;;  %v18246_v56 = vld [vmem:[#allocation10 + $0xcc4] ss:$28 sps:$4 sm:$0xff]  }
 0xbb6   : > { %v12465_v63 = vrot.slane %v12453_v38, 1  ;;  %v12455_v51 = vsel %vm12443_vm4, %v15918_v61, %v12449_v12  ;;  %v12454_v30 = vsel %vm12442_vm5, %v15917_v5, %v12448_v14  ;;  %12290 = vmatpush1.bf16.msra.mxu1 %v18223_v8  ;;  %v18244_v46 = vld [vmem:[#allocation10 + $0xcc0] ss:$28 sps:$4 sm:$0xff]   ;;  %v18252_v59 = vld [vmem:[#allocation10 + $0xd34] ss:$28 sps:$4 sm:$0xff]  }
 0xbb7   : > { %v12467_v4 = vrot.slane %v12455_v51, 1  ;;  %v12466_v62 = vrot.slane %v12454_v30, 1  ;;  %v12456_v47 = vsel %vm12444_vm8, %v15919_v52, %v12450_v2  ;;  %12291 = vmatprep.subr.bf16.mxu1 %v18231_v10  ;;  %v18249_v8 = vld [vmem:[#allocation10 + $0xcfc] ss:$28 sps:$4 sm:$0xff]   ;;  %v18250_v52 = vld [vmem:[#allocation10 + $0xd30] ss:$28 sps:$4 sm:$0xff]  }
 0xbb8   : > { %v12477_v33 = vmax.f32 %v12453_v38, %v12465_v63  ;;  %v12468_v21 = vrot.slane %v12456_v47, 1  ;;  %v18247_v10 = vld [vmem:[#allocation10 + $0xcf8] ss:$28 sps:$4 sm:$0xff]   ;;  %v18255_v39 = vld [vmem:[#allocation10 + $0xd6c] ss:$28 sps:$4 sm:$0xff]  }
 0xbb9   : > { %v12479_v53 = vmax.f32 %v12455_v51, %v12467_v4  ;;  %v12478_v48 = vmax.f32 %v12454_v30, %v12466_v62  ;;  %v18253_v27 = vld [vmem:[#allocation10 + $0xd68] ss:$28 sps:$4 sm:$0xff]   ;;  %v18256_v14 = vld [vmem:[#allocation10 + $0xda0] ss:$28 sps:$4 sm:$0xff]   ;;  %v18259_v2 = vld [vmem:[#allocation10 + $0xdd8] ss:$28 sps:$4 sm:$0xff]  }
 0xbba   : > { %v12489_v0 = vrot.slane %v12477_v33, 1  ;;  %v12501_v24 = vrot.slane %v12477_v33, 2  ;;  %v12480_v58 = vmax.f32 %v12456_v47, %v12468_v21  ;;  %12292 = vmatpush1.bf16.msra.mxu1 %v18229_v1  ;;  %v18258_v12 = vld [vmem:[#allocation10 + $0xda4] ss:$28 sps:$4 sm:$0xff]   ;;  %v18261_v38 = vld [vmem:[#allocation10 + $0xddc] ss:$28 sps:$4 sm:$0xff]  }
 0xbbb   : > { %v12491_v55 = vrot.slane %v12479_v53, 1  ;;  %v12503_v23 = vrot.slane %v12479_v53, 2  ;;  %v12490_v28 = vrot.slane %v12478_v48, 1  ;;  %v12502_v22 = vrot.slane %v12478_v48, 2  ;;  %12293 = vmatprep.subr.bf16.mxu1 %v18237_v43  ;;  %v18264_v44 = vld [vmem:[#allocation10 + $0xe14] ss:$28 sps:$4 sm:$0xff]  }
 0xbbc   : > { %v12513_v13 = vsel %vm1575_vm7, %v12477_v33, %v12489_v0  ;;  %v12492_v16 = vrot.slane %v12480_v58, 1  ;;  %v12504_v18 = vrot.slane %v12480_v58, 2  ;;  %v18262_v63 = vld [vmem:[#allocation10 + $0xe10] ss:$28 sps:$4 sm:$0xff]   ;;  %v18265_v30 = vld [vmem:[#allocation10 + $0xe48] ss:$28 sps:$4 sm:$0xff]  }
 0xbbd   : > { %v12519_v37 = vsel %vm1583_vm15, %v12513_v13, %v12501_v24  ;;  %v12515_v45 = vsel %vm1575_vm7, %v12479_v53, %v12491_v55  ;;  %v12514_v6 = vsel %vm1575_vm7, %v12478_v48, %v12490_v28  ;;  %v18267_v51 = vld [vmem:[#allocation10 + $0xe4c] ss:$28 sps:$4 sm:$0xff]   ;;  %v18270_v1 = vld [vmem:[#allocation10 + $0xe84] ss:$28 sps:$4 sm:$0xff]   ;;  %v18273_v62 = vld [vmem:[#allocation10 + $0xebc] ss:$28 sps:$4 sm:$0xff]  }
 0xbbe   : > { %v12520_v57 = vsel %vm1583_vm15, %v12514_v6, %v12502_v22  ;;  %v12516_v31 = vsel %vm1575_vm7, %v12480_v58, %v12492_v16  ;;  %12294 = vmatpush1.bf16.msra.mxu1 %v18235_v40  ;;  %v12521_v41 = vsel %vm1583_vm15, %v12515_v45, %v12503_v23  ;;  %v18268_v4 = vld [vmem:[#allocation10 + $0xe80] ss:$28 sps:$4 sm:$0xff]   ;;  %v18271_v47 = vld [vmem:[#allocation10 + $0xeb8] ss:$28 sps:$4 sm:$0xff]   ;;  %v18274_v33 = vld [vmem:[#allocation10 + $0xef0] ss:$28 sps:$4 sm:$0xff]  }
 0xbbf   : > { %12295 = vmatprep.subr.bf16.mxu1 %v18243_v34  ;;  %v12522_v20 = vsel %vm1583_vm15, %v12516_v31, %v12504_v18  ;;  %v20473_v7 = vmax.f32 %v12519_v37, %v12520_v57  ;;  %v18276_v43 = vld [vmem:[#allocation10 + $0xef4] ss:$28 sps:$4 sm:$0xff]   ;;  %v18279_v21 = vld [vmem:[#allocation10 + $0xf2c] ss:$28 sps:$4 sm:$0xff]   ;;  %v18282_v53 = vld [vmem:[#allocation10 + $0xf64] ss:$28 sps:$4 sm:$0xff]  }
 0xbc0   : > { %v20475_v17 = vmax.f32 %v12521_v41, %v12522_v20  ;;  %v18285_v48 = vld [vmem:[#allocation10 + $0xf9c] ss:$28 sps:$4 sm:$0xff]   ;;  %v18288_v24 = vld [vmem:[#allocation10 + $0xfd4] ss:$28 sps:$4 sm:$0xff]   ;;  %v18291_v40 = vld [vmem:[#allocation10 + $0x100c] ss:$28 sps:$4 sm:$0xff]  }
 0xbc1   : > { %v12543_v49 = vpack.c.bf16 %v20473_v7, %v20473_v7  ;;  %v12531_v61 = vrot.slane %v20473_v7, 1  ;;  %v18283_v0 = vld [vmem:[#allocation10 + $0xf98] ss:$28 sps:$4 sm:$0xff]   ;;  %v18286_v58 = vld [vmem:[#allocation10 + $0xfd0] ss:$28 sps:$4 sm:$0xff]  }
 0xbc2   : > { %12296 = vmatpush1.bf16.msra.mxu1 %v18241_v32  ;;  %v12544_v5 = vpack.c.bf16 %v20475_v17, %v20475_v17  ;;  %v18289_v55 = vld [vmem:[#allocation10 + $0x1008] ss:$28 sps:$4 sm:$0xff]   ;;  %v18292_v28 = vld [vmem:[#allocation10 + $0x1040] ss:$28 sps:$4 sm:$0xff]   ;;  %v18295_v34 = vld [vmem:[#allocation10 + $0x1078] ss:$28 sps:$4 sm:$0xff]  }
 0xbc3   : > { %12297 = vmatprep.subr.bf16.mxu1 %v18246_v56  ;;  %v12546_v15 = vpack.c.bf16 %v12531_v61, %v12531_v61  ;;  %v18294_v23 = vld [vmem:[#allocation10 + $0x1044] ss:$28 sps:$4 sm:$0xff]   ;;  %v18297_v22 = vld [vmem:[#allocation10 + $0x107c] ss:$28 sps:$4 sm:$0xff]   ;;  %v18300_v13 = vld [vmem:[#allocation10 + $0x10b4] ss:$28 sps:$4 sm:$0xff]  }
 0xbc4   : > { %13460 = vmatprep.mubr.bf16.mxu0 %v12544_v5  ;;  %v18298_v16 = vld [vmem:[#allocation10 + $0x10b0] ss:$28 sps:$4 sm:$0xff]   ;;  %v18301_v6 = vld [vmem:[#allocation10 + $0x10e8] ss:$28 sps:$4 sm:$0xff]   ;;  %v18397_v32 = vld [vmem:[#allocation13 + $0x110] ss:$8 sps:$4 sm:$0xff]  }
 0xbc5   : > { %13461 = vmatmul.mubr.bf16.vlgmr.msra.gmra.mrb[28].mxu0 %v12543_v49  ;;  %v18303_v18 = vld [vmem:[#allocation10 + $0x10ec] ss:$28 sps:$4 sm:$0xff]   ;;  %v18399_v57 = vld [vmem:[#allocation13 + $0x114] ss:$8 sps:$4 sm:$0xff]   ;;  %v18307_v5 = vld [vmem:[#allocation10 + $0x1158] ss:$28 sps:$4 sm:$0xff]  }
 0xbc6   : > { %13501 = vmatprep.mubr.bf16.mxu0 %v12546_v15  ;;  %12298 = vmatpush1.bf16.msra.mxu1 %v18244_v46  ;;  %v18394_v37 = vld [vmem:[#allocation13 + $0x100] ss:$8 sps:$4 sm:$0xff]   ;;  %v18396_v45 = vld [vmem:[#allocation13 + $0x104] ss:$8 sps:$4 sm:$0xff]   ;;  %v18306_v31 = vld [vmem:[#allocation10 + $0x1124] ss:$28 sps:$4 sm:$0xff]  }
 0xbc7   : > { %12299 = vmatprep.subr.bf16.mxu1 %v18249_v8  ;;  %13469 = vmatprep.subr.bf16.mxu0 %v18396_v45  ;;  %v18402_v41 = vld [vmem:[#allocation13 + $0x124] ss:$8 sps:$4 sm:$0xff]   ;;  %v18304_v20 = vld [vmem:[#allocation10 + $0x1120] ss:$28 sps:$4 sm:$0xff]   ;;  %v18400_v49 = vld [vmem:[#allocation13 + $0x120] ss:$8 sps:$4 sm:$0xff]  }
 0xbc8   : > { %13470 = vmatpush1.bf16.msra.mxu0 %v18394_v37  ;;  %v18309_v56 = vld [vmem:[#allocation10 + $0x115c] ss:$28 sps:$4 sm:$0xff]   ;;  %v18312_v46 = vld [vmem:[#allocation10 + $0x1194] ss:$28 sps:$4 sm:$0xff]  }
 0xbc9   : > { %13471 = vmatprep.subr.bf16.mxu0 %v18399_v57  ;;  %v18405_v61 = vld [vmem:[#allocation13 + $0x134] ss:$8 sps:$4 sm:$0xff]   ;;  %v18403_v15 = vld [vmem:[#allocation13 + $0x130] ss:$8 sps:$4 sm:$0xff]   ;;  %v18408_v8 = vld [vmem:[#allocation13 + $0x144] ss:$8 sps:$4 sm:$0xff]  }
 0xbca   : > { %12300 = vmatpush1.bf16.msra.mxu1 %v18247_v10  ;;  %v18310_v10 = vld [vmem:[#allocation10 + $0x1190] ss:$28 sps:$4 sm:$0xff]   ;;  %v18349_v57 = vld [vmem:[#allocation10 + $0x1468] ss:$28 sps:$4 sm:$0xff]  }
 0xbcb   : > { %12301 = vmatprep.subr.bf16.mxu1 %v18252_v59  ;;  %v18315_v59 = vld [vmem:[#allocation10 + $0x11cc] ss:$28 sps:$4 sm:$0xff]   ;;  %v18348_v37 = vld [vmem:[#allocation10 + $0x1434] ss:$28 sps:$4 sm:$0xff]  }
 0xbcc   : > { %13472 = vmatpush1.bf16.msra.mxu0 %v18397_v32  ;;  %v18346_v45 = vld [vmem:[#allocation10 + $0x1430] ss:$28 sps:$4 sm:$0xff]   ;;  %v18352_v32 = vld [vmem:[#allocation10 + $0x14a0] ss:$28 sps:$4 sm:$0xff]  }
 0xbcd   : > { %13473 = vmatprep.subr.bf16.mxu0 %v18402_v41  ;;  %v18357_v41 = vld [vmem:[#allocation10 + $0x14dc] ss:$28 sps:$4 sm:$0xff]  }
 0xbce   : > { %12302 = vmatpush1.bf16.msra.mxu1 %v18250_v52  ;;  %v18406_v52 = vld [vmem:[#allocation13 + $0x140] ss:$8 sps:$4 sm:$0xff]  }
 0xbcf   : > { %12303 = vmatprep.subr.bf16.mxu1 %v18255_v39  ;;  %v18411_v39 = vld [vmem:[#allocation13 + $0x154] ss:$8 sps:$4 sm:$0xff]  }
 0xbd0   : > { %13474 = vmatpush1.bf16.msra.mxu0 %v18400_v49  ;;  %v18358_v49 = vld [vmem:[#allocation10 + $0x1510] ss:$28 sps:$4 sm:$0xff]  }
 0xbd1   : > { %13475 = vmatprep.subr.bf16.mxu0 %v18405_v61  ;;  %v18363_v61 = vld [vmem:[#allocation10 + $0x154c] ss:$28 sps:$4 sm:$0xff]  }
 0xbd2   : > { %12304 = vmatpush1.bf16.msra.mxu1 %v18253_v27  ;;  %v18313_v27 = vld [vmem:[#allocation10 + $0x11c8] ss:$28 sps:$4 sm:$0xff]  }
 0xbd3   : > { %12305 = vmatprep.subr.bf16.mxu1 %v18258_v12  ;;  %v18318_v12 = vld [vmem:[#allocation10 + $0x1204] ss:$28 sps:$4 sm:$0xff]  }
 0xbd4   : > { %13476 = vmatpush1.bf16.msra.mxu0 %v18403_v15  ;;  %v18364_v15 = vld [vmem:[#allocation10 + $0x1580] ss:$28 sps:$4 sm:$0xff]  }
 0xbd5   : > { %13477 = vmatprep.subr.bf16.mxu0 %v18408_v8  ;;  %v18369_v8 = vld [vmem:[#allocation10 + $0x15bc] ss:$28 sps:$4 sm:$0xff]  }
 0xbd6   : > { %12306 = vmatpush1.bf16.msra.mxu1 %v18256_v14  ;;  %v18409_v14 = vld [vmem:[#allocation13 + $0x150] ss:$8 sps:$4 sm:$0xff]  }
 0xbd7   : > { %12307 = vmatprep.subr.bf16.mxu1 %v18261_v38  ;;  %v18414_v38 = vld [vmem:[#allocation13 + $0x164] ss:$8 sps:$4 sm:$0xff]  }
 0xbd8   : > { %13478 = vmatpush1.bf16.msra.mxu0 %v18406_v52  ;;  %v18370_v52 = vld [vmem:[#allocation10 + $0x15f0] ss:$28 sps:$4 sm:$0xff]  }
 0xbd9   : > { %13479 = vmatprep.subr.bf16.mxu0 %v18411_v39  ;;  %v18375_v39 = vld [vmem:[#allocation10 + $0x162c] ss:$28 sps:$4 sm:$0xff]  }
 0xbda   : > { %12308 = vmatpush1.bf16.msra.mxu1 %v18259_v2  ;;  %v18316_v2 = vld [vmem:[#allocation10 + $0x1200] ss:$28 sps:$4 sm:$0xff]  }
 0xbdb   : > { %12318 = vmatprep.subr.bf16.mxu1 %v18264_v44  ;;  %v18321_v44 = vld [vmem:[#allocation10 + $0x123c] ss:$28 sps:$4 sm:$0xff]  }
 0xbdc   : > { %13480 = vmatpush1.bf16.msra.mxu0 %v18409_v14  ;;  %v18379_v14 = vld [vmem:[#allocation10 + $0x1698] ss:$28 sps:$4 sm:$0xff]  }
 0xbdd   : > { %12310 = vmatmul.mubr.bf16.vlgmr.msra.gmra.mrb[44].mxu1 %v20407_v42  ;;  %v18277_v42 = vld [vmem:[#allocation10 + $0xf28] ss:$28 sps:$4 sm:$0xff]   ;;  %13481 = vmatprep.subr.bf16.mxu0 %v18414_v38  ;;  %v18384_v38 = vld [vmem:[#allocation10 + $0x16d4] ss:$28 sps:$4 sm:$0xff]  }
 0xbde   : > { %12319 = vmatpush1.bf16.msra.mxu1 %v18262_v63  ;;  %12350 = vmatprep.mubr.bf16.mxu1 %v20410_v36  ;;  %v18280_v36 = vld [vmem:[#allocation10 + $0xf60] ss:$28 sps:$4 sm:$0xff]   ;;  %v18412_v63 = vld [vmem:[#allocation13 + $0x160] ss:$8 sps:$4 sm:$0xff]  }
 0xbdf   : > { %12320 = vmatprep.subr.bf16.mxu1 %v18267_v51  ;;  %v18319_v51 = vld [vmem:[#allocation10 + $0x1238] ss:$28 sps:$4 sm:$0xff]  }
 0xbe0   : > { %13482 = vmatpush1.bf16.msra.mxu0 %v18412_v63  ;;  %v18385_v63 = vld [vmem:[#allocation10 + $0x1708] ss:$28 sps:$4 sm:$0xff]  }
 0xbe2   : > { %12321 = vmatpush1.bf16.msra.mxu1 %v18265_v30  ;;  %v18324_v30 = vld [vmem:[#allocation10 + $0x1274] ss:$28 sps:$4 sm:$0xff]  }
 0xbe3   : > { %12322 = vmatprep.subr.bf16.mxu1 %v18270_v1  ;;  %v18420_v1 = vld [vmem:[#allocation13 + $0x184] ss:$8 sps:$4 sm:$0xff]  }
 0xbe6   : > { %12323 = vmatpush1.bf16.msra.mxu1 %v18268_v4  ;;  %v18322_v4 = vld [vmem:[#allocation10 + $0x1270] ss:$28 sps:$4 sm:$0xff]  }
 0xbe7   : > { %12324 = vmatprep.subr.bf16.mxu1 %v18273_v62  ;;  %v18327_v62 = vld [vmem:[#allocation10 + $0x12ac] ss:$28 sps:$4 sm:$0xff]  }
 0xbea   : > { %12325 = vmatpush1.bf16.msra.mxu1 %v18271_v47  ;;  %v18418_v47 = vld [vmem:[#allocation13 + $0x180] ss:$8 sps:$4 sm:$0xff]  }
 0xbeb   : > { %12326 = vmatprep.subr.bf16.mxu1 %v18276_v43  ;;  %v18423_v43 = vld [vmem:[#allocation13 + $0x194] ss:$8 sps:$4 sm:$0xff]  }
 0xbee   : > { %12327 = vmatpush1.bf16.msra.mxu1 %v18274_v33  ;;  %v18325_v33 = vld [vmem:[#allocation10 + $0x12a8] ss:$28 sps:$4 sm:$0xff]  }
 0xbef   : > { %12328 = vmatprep.subr.bf16.mxu1 %v18279_v21  ;;  %v18330_v21 = vld [vmem:[#allocation10 + $0x12e4] ss:$28 sps:$4 sm:$0xff]  }
 0xbf2   : > { %12329 = vmatpush1.bf16.msra.mxu1 %v18277_v42  ;;  %v18421_v42 = vld [vmem:[#allocation13 + $0x190] ss:$8 sps:$4 sm:$0xff]  }
 0xbf3   : > { %12330 = vmatprep.subr.bf16.mxu1 %v18282_v53  ;;  %v18426_v53 = vld [vmem:[#allocation13 + $0x1a4] ss:$8 sps:$4 sm:$0xff]  }
 0xbf6   : > { %12331 = vmatpush1.bf16.msra.mxu1 %v18280_v36  ;;  %v18328_v36 = vld [vmem:[#allocation10 + $0x12e0] ss:$28 sps:$4 sm:$0xff]  }
 0xbf7   : > { %12332 = vmatprep.subr.bf16.mxu1 %v18285_v48  ;;  %v18333_v48 = vld [vmem:[#allocation10 + $0x131c] ss:$28 sps:$4 sm:$0xff]  }
 0xbfa   : > { %12333 = vmatpush1.bf16.msra.mxu1 %v18283_v0  ;;  %v18424_v0 = vld [vmem:[#allocation13 + $0x1a0] ss:$8 sps:$4 sm:$0xff]  }
 0xbfb   : > { %12334 = vmatprep.subr.bf16.mxu1 %v18288_v24  ;;  %v18429_v24 = vld [vmem:[#allocation13 + $0x1b4] ss:$8 sps:$4 sm:$0xff]  }
 0xbfe   : > { %12335 = vmatpush1.bf16.msra.mxu1 %v18286_v58  ;;  %v18331_v58 = vld [vmem:[#allocation10 + $0x1318] ss:$28 sps:$4 sm:$0xff]  }
 0xbff   : > { %12336 = vmatprep.subr.bf16.mxu1 %v18291_v40  ;;  %v18336_v40 = vld [vmem:[#allocation10 + $0x1354] ss:$28 sps:$4 sm:$0xff]  }
 0xc02   : > { %12337 = vmatpush1.bf16.msra.mxu1 %v18289_v55  ;;  %v18427_v55 = vld [vmem:[#allocation13 + $0x1b0] ss:$8 sps:$4 sm:$0xff]  }
 0xc03   : > { %12338 = vmatprep.subr.bf16.mxu1 %v18294_v23  ;;  %v18334_v23 = vld [vmem:[#allocation10 + $0x1350] ss:$28 sps:$4 sm:$0xff]  }
 0xc06   : > { %12339 = vmatpush1.bf16.msra.mxu1 %v18292_v28  ;;  %v18339_v28 = vld [vmem:[#allocation10 + $0x138c] ss:$28 sps:$4 sm:$0xff]  }
 0xc07   : > { %12340 = vmatprep.subr.bf16.mxu1 %v18297_v22  ;;  %v18337_v22 = vld [vmem:[#allocation10 + $0x1388] ss:$28 sps:$4 sm:$0xff]  }
 0xc0a   : > { %12341 = vmatpush1.bf16.msra.mxu1 %v18295_v34  ;;  %v18342_v34 = vld [vmem:[#allocation10 + $0x13c4] ss:$28 sps:$4 sm:$0xff]  }
 0xc0b   : > { %12342 = vmatprep.subr.bf16.mxu1 %v18300_v13  ;;  %v18340_v13 = vld [vmem:[#allocation10 + $0x13c0] ss:$28 sps:$4 sm:$0xff]  }
 0xc0e   : > { %12343 = vmatpush1.bf16.msra.mxu1 %v18298_v16  ;;  %v18345_v16 = vld [vmem:[#allocation10 + $0x13fc] ss:$28 sps:$4 sm:$0xff]  }
 0xc0f   : > { %12344 = vmatprep.subr.bf16.mxu1 %v18303_v18  ;;  %v18343_v18 = vld [vmem:[#allocation10 + $0x13f8] ss:$28 sps:$4 sm:$0xff]  }
 0xc12   : > { %12345 = vmatpush1.bf16.msra.mxu1 %v18301_v6  ;;  %v18351_v6 = vld [vmem:[#allocation10 + $0x146c] ss:$28 sps:$4 sm:$0xff]  }
 0xc13   : > { %12346 = vmatprep.subr.bf16.mxu1 %v18306_v31  ;;  %v18354_v31 = vld [vmem:[#allocation10 + $0x14a4] ss:$28 sps:$4 sm:$0xff]  }
 0xc16   : > { %12347 = vmatpush1.bf16.msra.mxu1 %v18304_v20  ;;  %v18355_v20 = vld [vmem:[#allocation10 + $0x14d8] ss:$28 sps:$4 sm:$0xff]  }
 0xc17   : > { %12348 = vmatprep.subr.bf16.mxu1 %v18309_v56  ;;  %v18360_v56 = vld [vmem:[#allocation10 + $0x1514] ss:$28 sps:$4 sm:$0xff]  }
 0xc1a   : > { %12349 = vmatpush1.bf16.msra.mxu1 %v18307_v5  ;;  %v18361_v5 = vld [vmem:[#allocation10 + $0x1548] ss:$28 sps:$4 sm:$0xff]  }
 0xc1b   : > { %12359 = vmatprep.subr.bf16.mxu1 %v18312_v46  ;;  %v18366_v46 = vld [vmem:[#allocation10 + $0x1584] ss:$28 sps:$4 sm:$0xff]  }
 0xc1d   : > { %12351 = vmatmul.mubr.bf16.vlgmr.msra.gmra.mrb[44].mxu1 %v20418_v60  ;;  %v18417_v60 = vld [vmem:[#allocation13 + $0x174] ss:$8 sps:$4 sm:$0xff]  }
 0xc1e   : > { %12360 = vmatpush1.bf16.msra.mxu1 %v18310_v10  ;;  %12391 = vmatprep.mubr.bf16.mxu1 %v20422_v25  ;;  %v18415_v25 = vld [vmem:[#allocation13 + $0x170] ss:$8 sps:$4 sm:$0xff]  }
 0xc1f   : > { %12361 = vmatprep.subr.bf16.mxu1 %v18315_v59  ;;  %13483 = vmatprep.subr.bf16.mxu0 %v18417_v60  ;;  %v18367_v10 = vld [vmem:[#allocation10 + $0x15b8] ss:$28 sps:$4 sm:$0xff]   ;;  %v18390_v60 = vld [vmem:[#allocation10 + $0x1744] ss:$28 sps:$4 sm:$0xff]  }
 0xc20   : > { %13484 = vmatpush1.bf16.msra.mxu0 %v18415_v25  ;;  %v18372_v59 = vld [vmem:[#allocation10 + $0x15f4] ss:$28 sps:$4 sm:$0xff]  }
 0xc21   : > { %13485 = vmatprep.subr.bf16.mxu0 %v18420_v1  ;;  %v18391_v25 = vld [vmem:[#allocation10 + $0x1778] ss:$28 sps:$4 sm:$0xff]   ;;  %v18430_v1 = vld [vmem:[#allocation13 + $0x1c0] ss:$8 sps:$4 sm:$0xff]  }
 0xc22   : > { %12362 = vmatpush1.bf16.msra.mxu1 %v18313_v27  ;;  %v18378_v27 = vld [vmem:[#allocation10 + $0x1664] ss:$28 sps:$4 sm:$0xff]  }
 0xc23   : > { %12363 = vmatprep.subr.bf16.mxu1 %v18318_v12  ;;  %v18381_v12 = vld [vmem:[#allocation10 + $0x169c] ss:$28 sps:$4 sm:$0xff]  }
 0xc24   : > { %13486 = vmatpush1.bf16.msra.mxu0 %v18418_v47  ;;  %v18433_v47 = vld [vmem:[#allocation13 + $0x1d0] ss:$8 sps:$4 sm:$0xff]  }
 0xc25   : > { %13487 = vmatprep.subr.bf16.mxu0 %v18423_v43  ;;  %v18438_v43 = vld [vmem:[#allocation13 + $0x1e4] ss:$8 sps:$4 sm:$0xff]  }
 0xc26   : > { %12364 = vmatpush1.bf16.msra.mxu1 %v18316_v2  ;;  %v18382_v2 = vld [vmem:[#allocation10 + $0x16d0] ss:$28 sps:$4 sm:$0xff]  }
 0xc27   : > { %12365 = vmatprep.subr.bf16.mxu1 %v18321_v44  ;;  %v18387_v44 = vld [vmem:[#allocation10 + $0x170c] ss:$28 sps:$4 sm:$0xff]  }
 0xc28   : > { %13488 = vmatpush1.bf16.msra.mxu0 %v18421_v42  ;;  %v18439_v42 = vld [vmem:[#allocation13 + $0x1f0] ss:$8 sps:$4 sm:$0xff]  }
 0xc29   : > { %13489 = vmatprep.subr.bf16.mxu0 %v18426_v53  ;;  %v18444_v53 = vld [vmem:[#allocation13 + $0x204] ss:$8 sps:$4 sm:$0xff]  }
 0xc2a   : > { %12366 = vmatpush1.bf16.msra.mxu1 %v18319_v51  ;;  %v18388_v51 = vld [vmem:[#allocation10 + $0x1740] ss:$28 sps:$4 sm:$0xff]  }
 0xc2b   : > { %12367 = vmatprep.subr.bf16.mxu1 %v18324_v30  ;;  %v18393_v30 = vld [vmem:[#allocation10 + $0x177c] ss:$28 sps:$4 sm:$0xff]  }
 0xc2c   : > { %13490 = vmatpush1.bf16.msra.mxu0 %v18424_v0 }
 0xc2d   : > { %13491 = vmatprep.subr.bf16.mxu0 %v18429_v24 }
 0xc2e   : > { %12368 = vmatpush1.bf16.msra.mxu1 %v18322_v4  ;;  %v18432_v4 = vld [vmem:[#allocation13 + $0x1c4] ss:$8 sps:$4 sm:$0xff]  }
 0xc2f   : > { %12369 = vmatprep.subr.bf16.mxu1 %v18327_v62  ;;  %v18435_v62 = vld [vmem:[#allocation13 + $0x1d4] ss:$8 sps:$4 sm:$0xff]  }
 0xc30   : > { %13492 = vmatpush1.bf16.msra.mxu0 %v18427_v55 }
 0xc31   : > { %13493 = vmatprep.subr.bf16.mxu0 %v18432_v4  ;;  %v18565_v4 = vld [vmem:[#allocation16 + $0x8] sm:$0xff]  }
 0xc32   : > { %12370 = vmatpush1.bf16.msra.mxu1 %v18325_v33  ;;  %v18436_v33 = vld [vmem:[#allocation13 + $0x1e0] ss:$8 sps:$4 sm:$0xff]  }
 0xc33   : > { %12371 = vmatprep.subr.bf16.mxu1 %v18330_v21  ;;  %v18441_v21 = vld [vmem:[#allocation13 + $0x1f4] ss:$8 sps:$4 sm:$0xff]  }
 0xc34   : > { %13494 = vmatpush1.bf16.msra.mxu0 %v18430_v1  ;;  %v18474_v1 = vld [vmem:[#allocation13 + $0x2a4] ss:$8 sps:$4 sm:$0xff]  }
 0xc35   : > { %13495 = vmatprep.subr.bf16.mxu0 %v18435_v62  ;;  %v18566_v62 = vld [vmem:[#allocation16 + $0x50] sm:$0xff]  }
 0xc36   : > { %12372 = vmatpush1.bf16.msra.mxu1 %v18328_v36  ;;  %v8330_v36 = vrot.slane %v20455_v54, %v19550_v29 }
 0xc37   : > { %12373 = vmatprep.subr.bf16.mxu1 %v18333_v48 }
 0xc38   : > { %13496 = vmatpush1.bf16.msra.mxu0 %v18433_v47  ;;  %v18472_v47 = vld [vmem:[#allocation13 + $0x2a0] ss:$8 sps:$4 sm:$0xff]  }
 0xc39   : > { %13497 = vmatprep.subr.bf16.mxu0 %v18438_v43  ;;  %v18477_v43 = vld [vmem:[#allocation13 + $0x2b4] ss:$8 sps:$4 sm:$0xff]  }
 0xc3a   : > { %12374 = vmatpush1.bf16.msra.mxu1 %v18331_v58 }
 0xc3b   : > { %12375 = vmatprep.subr.bf16.mxu1 %v18336_v40 }
 0xc3c   : > { %13498 = vmatpush1.bf16.msra.mxu0 %v18436_v33  ;;  %v18567_v33 = vld [vmem:[#allocation16 + $0x10] sm:$0xff]  }
 0xc3d   : > { %13499 = vmatprep.subr.bf16.mxu0 %v18441_v21  ;;  %v18568_v21 = vld [vmem:[#allocation16 + $0x58] sm:$0xff]  }
 0xc3e   : > { %12376 = vmatpush1.bf16.msra.mxu1 %v18334_v23 }
 0xc3f   : > { %12377 = vmatprep.subr.bf16.mxu1 %v18339_v28 }
 0xc40   : > { %13500 = vmatpush1.bf16.msra.mxu0 %v18439_v42  ;;  %v18475_v42 = vld [vmem:[#allocation13 + $0x2b0] ss:$8 sps:$4 sm:$0xff]  }
 0xc41   : > { %13510 = vmatprep.subr.bf16.mxu0 %v18444_v53  ;;  %v18480_v53 = vld [vmem:[#allocation13 + $0x2c4] ss:$8 sps:$4 sm:$0xff]  }
 0xc42   : > { %12378 = vmatpush1.bf16.msra.mxu1 %v18337_v22 }
 0xc43   : > { %12379 = vmatprep.subr.bf16.mxu1 %v18342_v34 }
 0xc46   : > { %12380 = vmatpush1.bf16.msra.mxu1 %v18340_v13 }
 0xc47   : > { %12381 = vmatprep.subr.bf16.mxu1 %v18345_v16 }
 0xc4a   : > { %12382 = vmatpush1.bf16.msra.mxu1 %v18343_v18 }
 0xc4b   : > { %12383 = vmatprep.subr.bf16.mxu1 %v18348_v37 }
 0xc4e   : > { %12384 = vmatpush1.bf16.msra.mxu1 %v18346_v45 }
 0xc4f   : > { %12385 = vmatprep.subr.bf16.mxu1 %v18351_v6 }
 0xc52   : > { %12386 = vmatpush1.bf16.msra.mxu1 %v18349_v57 }
 0xc53   : > { %12387 = vmatprep.subr.bf16.mxu1 %v18354_v31 }
 0xc56   : > { %12388 = vmatpush1.bf16.msra.mxu1 %v18352_v32 }
 0xc57   : > { %12389 = vmatprep.subr.bf16.mxu1 %v18357_v41 }
 0xc5a   : > { %12390 = vmatpush1.bf16.msra.mxu1 %v18355_v20  ;;  %v18442_v20 = vld [vmem:[#allocation13 + $0x200] ss:$8 sps:$4 sm:$0xff]  }
 0xc5b   : > { %12400 = vmatprep.subr.bf16.mxu1 %v18360_v56 }
 0xc5d   : > { %12392 = vmatmul.mubr.bf16.vlgmr.msra.gmra.mrb[44].mxu1 %v20428_v35  ;;  %v18373_v35 = vld [vmem:[#allocation10 + $0x1628] ss:$28 sps:$4 sm:$0xff]  }
 0xc5e   : > { %12401 = vmatpush1.bf16.msra.mxu1 %v18358_v49  ;;  %15524 = vmatprep.mubr.msk.bf16.mxu1 %vm1812_vm3, %v20431_v3  ;;  %v18376_v3 = vld [vmem:[#allocation10 + $0x1660] ss:$28 sps:$4 sm:$0xff]  }
 0xc5f   : > { %12402 = vmatprep.subr.bf16.mxu1 %v18363_v61  ;;  %v18447_v61 = vld [vmem:[#allocation13 + $0x214] ss:$8 sps:$4 sm:$0xff]  }
 0xc62   : > { %12403 = vmatpush1.bf16.msra.mxu1 %v18361_v5 }
 0xc63   : > { %12404 = vmatprep.subr.bf16.mxu1 %v18366_v46  ;;  %v18445_v46 = vld [vmem:[#allocation13 + $0x210] ss:$8 sps:$4 sm:$0xff]  }
 0xc66   : > { %12405 = vmatpush1.bf16.msra.mxu1 %v18364_v15  ;;  %v18450_v15 = vld [vmem:[#allocation13 + $0x224] ss:$8 sps:$4 sm:$0xff]  }
 0xc67   : > { %12406 = vmatprep.subr.bf16.mxu1 %v18369_v8  ;;  %v18448_v8 = vld [vmem:[#allocation13 + $0x220] ss:$8 sps:$4 sm:$0xff]  }
 0xc6a   : > { %12407 = vmatpush1.bf16.msra.mxu1 %v18367_v10  ;;  %v18453_v10 = vld [vmem:[#allocation13 + $0x234] ss:$8 sps:$4 sm:$0xff]  }
 0xc6b   : > { %12408 = vmatprep.subr.bf16.mxu1 %v18372_v59  ;;  %v18451_v59 = vld [vmem:[#allocation13 + $0x230] ss:$8 sps:$4 sm:$0xff]  }
 0xc6e   : > { %12409 = vmatpush1.bf16.msra.mxu1 %v18370_v52  ;;  %v18456_v52 = vld [vmem:[#allocation13 + $0x244] ss:$8 sps:$4 sm:$0xff]  }
 0xc6f   : > { %12410 = vmatprep.subr.bf16.mxu1 %v18375_v39  ;;  %v18454_v39 = vld [vmem:[#allocation13 + $0x240] ss:$8 sps:$4 sm:$0xff]  }
 0xc72   : > { %12411 = vmatpush1.bf16.msra.mxu1 %v18373_v35  ;;  %v18459_v35 = vld [vmem:[#allocation13 + $0x254] ss:$8 sps:$4 sm:$0xff]  }
 0xc73   : > { %12412 = vmatprep.subr.bf16.mxu1 %v18378_v27  ;;  %v18457_v27 = vld [vmem:[#allocation13 + $0x250] ss:$8 sps:$4 sm:$0xff]  }
 0xc76   : > { %12413 = vmatpush1.bf16.msra.mxu1 %v18376_v3  ;;  %v18462_v3 = vld [vmem:[#allocation13 + $0x264] ss:$8 sps:$4 sm:$0xff]  }
 0xc77   : > { %12414 = vmatprep.subr.bf16.mxu1 %v18381_v12  ;;  %v18460_v12 = vld [vmem:[#allocation13 + $0x260] ss:$8 sps:$4 sm:$0xff]  }
 0xc7a   : > { %12415 = vmatpush1.bf16.msra.mxu1 %v18379_v14  ;;  %v18465_v14 = vld [vmem:[#allocation13 + $0x274] ss:$8 sps:$4 sm:$0xff]  }
 0xc7b   : > { %12416 = vmatprep.subr.bf16.mxu1 %v18384_v38  ;;  %v18463_v38 = vld [vmem:[#allocation13 + $0x270] ss:$8 sps:$4 sm:$0xff]  }
 0xc7e   : > { %12417 = vmatpush1.bf16.msra.mxu1 %v18382_v2  ;;  %v18468_v2 = vld [vmem:[#allocation13 + $0x284] ss:$8 sps:$4 sm:$0xff]  }
 0xc7f   : > { %12418 = vmatprep.subr.bf16.mxu1 %v18387_v44  ;;  %v18466_v44 = vld [vmem:[#allocation13 + $0x280] ss:$8 sps:$4 sm:$0xff]  }
 0xc82   : > { %12419 = vmatpush1.bf16.msra.mxu1 %v18385_v63  ;;  %v18471_v63 = vld [vmem:[#allocation13 + $0x294] ss:$8 sps:$4 sm:$0xff]  }
 0xc83   : > { %12420 = vmatprep.subr.bf16.mxu1 %v18390_v60  ;;  %v18562_v60 = vld [vmem:[#allocation16 + $0x40] sm:$0xff]  }
 0xc86   : > { %12421 = vmatpush1.bf16.msra.mxu1 %v18388_v51  ;;  %v18563_v51 = vld [vmem:[#allocation16] sm:$0xff]  }
 0xc87   : > { %12422 = vmatprep.subr.bf16.mxu1 %v18393_v30  ;;  %v18564_v30 = vld [vmem:[#allocation16 + $0x48] sm:$0xff]  }
 0xc8a   : > { %12423 = vmatpush1.bf16.msra.mxu1 %v18391_v25  ;;  %v18469_v25 = vld [vmem:[#allocation13 + $0x290] ss:$8 sps:$4 sm:$0xff]  }
 0xc8b   : > { %15837 = vmatprep.subr.bf16.mxu1 %v18562_v60  ;;  %v18537_v60 = vld [vmem:[#allocation13 + $0x3f4] ss:$8 sps:$4 sm:$0xff]  }
 0xc8d   : > { %12433 = vmatmul.mubr.bf16.vlgmr.msra.gmra.mrb[44].mxu1 %v20440_v26  ;;  %v8326_v26 = vrot.slane %v20455_v54, %v19542_v19 }
 0xc8e   : > { %15838 = vmatpush3.bf16.msra.mxu1 %v18563_v51  ;;  %v18535_v51 = vld [vmem:[#allocation13 + $0x3f0] ss:$8 sps:$4 sm:$0xff]  }
 0xc8f   : > { %15839 = vmatprep.subr.bf16.mxu1 %v18564_v30  ;;  %v12537_v30 = vrot.slane %v20473_v7, 2  ;;  %v18552_v7 = vld [vmem:[#allocation13 + $0x444] ss:$8 sps:$4 sm:$0xff]  }
 0xc92   : > { %15840 = vmatpush3.bf16.msra.mxu1 %v18565_v4  ;;  %v12549_v4 = vpack.c.bf16 %v12537_v30, %v12537_v30 }
 0xc93   : > { %15841 = vmatprep.subr.bf16.mxu1 %v18566_v62  ;;  %v18543_v62 = vld [vmem:[#allocation13 + $0x414] ss:$8 sps:$4 sm:$0xff]  }
 0xc96   : > { %15842 = vmatpush3.bf16.msra.mxu1 %v18567_v33  ;;  %v18544_v33 = vld [vmem:[#allocation13 + $0x420] ss:$8 sps:$4 sm:$0xff]  }
 0xc97   : > { %15843 = vmatprep.subr.bf16.mxu1 %v18568_v21  ;;  %v18549_v21 = vld [vmem:[#allocation13 + $0x434] ss:$8 sps:$4 sm:$0xff]  }
 0xd60   : > { %v12434_v48 = vpop.f32.mrb[44].mxu1 }
 0xd61   : > { %v15920_v0 = vadd.f32 %v12434_v48, %v8326_v26  ;;  %v12436_v24 = vpop.f32.mrb[45].mxu1  ;;  %v18569_v26 = vld [vmem:[#allocation16 + $0x18] sm:$0xff]  }
 0xd62   : > { %v15921_v58 = vadd.f32 %v12436_v24, %v8330_v36  ;;  %v12438_v40 = vpop.f32.mrb[46].mxu1  ;;  %v18570_v36 = vld [vmem:[#allocation16 + $0x60] sm:$0xff]   ;;  %15844 = vmatpush3.bf16.msra.mxu1 %v18569_v26  ;;  %v18555_v26 = vld [vmem:[#allocation13 + $0x454] ss:$8 sps:$4 sm:$0xff]  }
 0xd63   : > { %vm12445_vm3 = vcmp.ge.f32.partialorder %v15920_v0, 0.0  ;;  %v12451_v55 = vmul.f32 0.01, %v15920_v0  ;;  %v12439_v23 = vpop.f32.mrb[47].mxu1  ;;  %v18478_v48 = vld [vmem:[#allocation13 + $0x2c0] ss:$8 sps:$4 sm:$0xff]   ;;  %15845 = vmatprep.subr.bf16.mxu1 %v18570_v36 }
 0xd64   : > { %vm12446_vm11 = vcmp.ge.f32.partialorder %v15921_v58, 0.0  ;;  %v12452_v28 = vmul.f32 0.01, %v15921_v58  ;;  %v18571_v24 = vld [vmem:[#allocation16 + $0x20] sm:$0xff]   ;;  %v18481_v40 = vld [vmem:[#allocation13 + $0x2d0] ss:$8 sps:$4 sm:$0xff]  }
 0xd65   : > { %v12457_v22 = vsel %vm12445_vm3, %v15920_v0, %v12451_v55  ;;  %v18483_v0 = vld [vmem:[#allocation13 + $0x2d4] ss:$8 sps:$4 sm:$0xff]   ;;  %v18486_v55 = vld [vmem:[#allocation13 + $0x2e4] ss:$8 sps:$4 sm:$0xff]   ;;  %v18553_v36 = vld [vmem:[#allocation13 + $0x450] ss:$8 sps:$4 sm:$0xff]  }
 0xd66   : > { %v12469_v34 = vrot.slane %v12457_v22, 1  ;;  %v12458_v13 = vsel %vm12446_vm11, %v15921_v58, %v12452_v28  ;;  %v18572_v58 = vld [vmem:[#allocation16 + $0x68] sm:$0xff]   ;;  %15846 = vmatpush3.bf16.msra.mxu1 %v18571_v24 }
 0xd67   : > { %v12470_v16 = vrot.slane %v12458_v13, 1  ;;  %v18573_v23 = vld [vmem:[#allocation16 + $0x28] sm:$0xff]   ;;  %15847 = vmatprep.subr.bf16.mxu1 %v18572_v58 }
 0xd68   : > { %v12481_v18 = vmax.f32 %v12457_v22, %v12469_v34  ;;  %v18484_v28 = vld [vmem:[#allocation13 + $0x2e0] ss:$8 sps:$4 sm:$0xff]   ;;  %v18489_v22 = vld [vmem:[#allocation13 + $0x2f4] ss:$8 sps:$4 sm:$0xff]   ;;  %v18487_v34 = vld [vmem:[#allocation13 + $0x2f0] ss:$8 sps:$4 sm:$0xff]  }
 0xd69   : > { %v12482_v37 = vmax.f32 %v12458_v13, %v12470_v16  ;;  %v12532_v13 = vrot.slane %v20475_v17, 1  ;;  %v18492_v16 = vld [vmem:[#allocation13 + $0x304] ss:$8 sps:$4 sm:$0xff]   ;;  %v18559_v24 = vld [vmem:[#allocation13 + $0x470] ss:$8 sps:$4 sm:$0xff]  }
 0xd6a   : > { %v12493_v19 = vrot.slane %v12481_v18, 1  ;;  %v12505_v45 = vrot.slane %v12481_v18, 2  ;;  %15848 = vmatpush3.bf16.msra.mxu1 %v18573_v23  ;;  %v18575_v23 = vld [vmem:[#allocation16 + $0x30] sm:$0xff]  }
 0xd6b   : > { %v12494_v6 = vrot.slane %v12482_v37, 1  ;;  %v12506_v29 = vrot.slane %v12482_v37, 2 }
 0xd6c   : > { %v12517_v54 = vsel %vm1575_vm7, %v12481_v18, %v12493_v19  ;;  %v12538_v18 = vrot.slane %v20475_v17, 2  ;;  %v12547_v19 = vpack.c.bf16 %v12532_v13, %v12532_v13  ;;  %v18504_v17 = vld [vmem:[#allocation13 + $0x344] ss:$8 sps:$4 sm:$0xff]   ;;  %v12696_v13 = vld [vmem:[#allocation14] sm:$0x3] }
 0xd6d   : > { %v12523_v57 = vsel %vm1583_vm15, %v12517_v54, %v12505_v45  ;;  %v12518_v31 = vsel %vm1575_vm7, %v12482_v37, %v12494_v6  ;;  %v18490_v37 = vld [vmem:[#allocation13 + $0x300] ss:$8 sps:$4 sm:$0xff]   ;;  %v18495_v45 = vld [vmem:[#allocation13 + $0x314] ss:$8 sps:$4 sm:$0xff]   ;;  %v18498_v54 = vld [vmem:[#allocation13 + $0x324] ss:$8 sps:$4 sm:$0xff]  }
 0xd6e   : > { %v12524_v32 = vsel %vm1583_vm15, %v12518_v31, %v12506_v29  ;;  %v12550_v6 = vpack.c.bf16 %v12538_v18, %v12538_v18  ;;  %v18493_v29 = vld [vmem:[#allocation13 + $0x310] ss:$8 sps:$4 sm:$0xff]   ;;  %v18501_v31 = vld [vmem:[#allocation13 + $0x334] ss:$8 sps:$4 sm:$0xff]   ;;  %v13425_v18 = vrot.slane %v12696_v13, %v19520_v11 }
 0xd6f   : > { %v20498_v41 = vmax.f32 %v12523_v57, %v12524_v32  ;;  %v18496_v57 = vld [vmem:[#allocation13 + $0x320] ss:$8 sps:$4 sm:$0xff]   ;;  %v18499_v32 = vld [vmem:[#allocation13 + $0x330] ss:$8 sps:$4 sm:$0xff]  }
 0xd70   : > { %v18580_v11 = vld [vmem:[#allocation19 + $0x10] sm:$0xff]  }
 0xd71   : > { %v12545_v56 = vpack.c.bf16 %v20498_v41, %v20498_v41  ;;  %v12533_v49 = vrot.slane %v20498_v41, 1  ;;  %v12539_v58 = vrot.slane %v20498_v41, 2 }
 0xd73   : > { %13502 = vmatmul.mubr.bf16.vlgmr.msra.gmra.mrb[28].mxu0 %v12545_v56  ;;  %v12548_v5 = vpack.c.bf16 %v12533_v49, %v12533_v49  ;;  %v18507_v56 = vld [vmem:[#allocation13 + $0x354] ss:$8 sps:$4 sm:$0xff]   ;;  %v18505_v49 = vld [vmem:[#allocation13 + $0x350] ss:$8 sps:$4 sm:$0xff]  }
 0xd74   : > { %13511 = vmatpush1.bf16.msra.mxu0 %v18442_v20  ;;  %v18502_v20 = vld [vmem:[#allocation13 + $0x340] ss:$8 sps:$4 sm:$0xff]  }
 0xd75   : > { %13542 = vmatprep.mubr.bf16.mxu0 %v12548_v5  ;;  %13512 = vmatprep.subr.bf16.mxu0 %v18447_v61  ;;  %v18510_v61 = vld [vmem:[#allocation13 + $0x364] ss:$8 sps:$4 sm:$0xff]   ;;  %v18508_v5 = vld [vmem:[#allocation13 + $0x360] ss:$8 sps:$4 sm:$0xff]  }
 0xd78   : > { %13513 = vmatpush1.bf16.msra.mxu0 %v18445_v46  ;;  %v18513_v46 = vld [vmem:[#allocation13 + $0x374] ss:$8 sps:$4 sm:$0xff]  }
 0xd79   : > { %13514 = vmatprep.subr.bf16.mxu0 %v18450_v15  ;;  %v18511_v15 = vld [vmem:[#allocation13 + $0x370] ss:$8 sps:$4 sm:$0xff]  }
 0xd7c   : > { %13515 = vmatpush1.bf16.msra.mxu0 %v18448_v8  ;;  %v18516_v8 = vld [vmem:[#allocation13 + $0x384] ss:$8 sps:$4 sm:$0xff]  }
 0xd7d   : > { %13516 = vmatprep.subr.bf16.mxu0 %v18453_v10  ;;  %v18514_v10 = vld [vmem:[#allocation13 + $0x380] ss:$8 sps:$4 sm:$0xff]  }
 0xd80   : > { %13517 = vmatpush1.bf16.msra.mxu0 %v18451_v59  ;;  %v18519_v59 = vld [vmem:[#allocation13 + $0x394] ss:$8 sps:$4 sm:$0xff]  }
 0xd81   : > { %13518 = vmatprep.subr.bf16.mxu0 %v18456_v52  ;;  %v18517_v52 = vld [vmem:[#allocation13 + $0x390] ss:$8 sps:$4 sm:$0xff]  }
 0xd84   : > { %13519 = vmatpush1.bf16.msra.mxu0 %v18454_v39  ;;  %v18522_v39 = vld [vmem:[#allocation13 + $0x3a4] ss:$8 sps:$4 sm:$0xff]  }
 0xd85   : > { %13520 = vmatprep.subr.bf16.mxu0 %v18459_v35  ;;  %v18520_v35 = vld [vmem:[#allocation13 + $0x3a0] ss:$8 sps:$4 sm:$0xff]  }
 0xd88   : > { %13521 = vmatpush1.bf16.msra.mxu0 %v18457_v27  ;;  %v18525_v27 = vld [vmem:[#allocation13 + $0x3b4] ss:$8 sps:$4 sm:$0xff]  }
 0xd89   : > { %13522 = vmatprep.subr.bf16.mxu0 %v18462_v3  ;;  %v18523_v3 = vld [vmem:[#allocation13 + $0x3b0] ss:$8 sps:$4 sm:$0xff]  }
 0xd8c   : > { %13523 = vmatpush1.bf16.msra.mxu0 %v18460_v12  ;;  %v18528_v12 = vld [vmem:[#allocation13 + $0x3c4] ss:$8 sps:$4 sm:$0xff]  }
 0xd8d   : > { %13524 = vmatprep.subr.bf16.mxu0 %v18465_v14  ;;  %v18526_v14 = vld [vmem:[#allocation13 + $0x3c0] ss:$8 sps:$4 sm:$0xff]  }
 0xd90   : > { %13525 = vmatpush1.bf16.msra.mxu0 %v18463_v38  ;;  %v18531_v38 = vld [vmem:[#allocation13 + $0x3d4] ss:$8 sps:$4 sm:$0xff]  }
 0xd91   : > { %13526 = vmatprep.subr.bf16.mxu0 %v18468_v2  ;;  %v18529_v2 = vld [vmem:[#allocation13 + $0x3d0] ss:$8 sps:$4 sm:$0xff]  }
 0xd94   : > { %13527 = vmatpush1.bf16.msra.mxu0 %v18466_v44  ;;  %v18534_v44 = vld [vmem:[#allocation13 + $0x3e4] ss:$8 sps:$4 sm:$0xff]  }
 0xd95   : > { %13528 = vmatprep.subr.bf16.mxu0 %v18471_v63  ;;  %v18532_v63 = vld [vmem:[#allocation13 + $0x3e0] ss:$8 sps:$4 sm:$0xff]  }
 0xd98   : > { %13529 = vmatpush1.bf16.msra.mxu0 %v18469_v25  ;;  %v18540_v25 = vld [vmem:[#allocation13 + $0x404] ss:$8 sps:$4 sm:$0xff]  }
 0xd99   : > { %13530 = vmatprep.subr.bf16.mxu0 %v18474_v1  ;;  %v18538_v1 = vld [vmem:[#allocation13 + $0x400] ss:$8 sps:$4 sm:$0xff]  }
 0xd9c   : > { %13531 = vmatpush1.bf16.msra.mxu0 %v18472_v47  ;;  %v18541_v47 = vld [vmem:[#allocation13 + $0x410] ss:$8 sps:$4 sm:$0xff]  }
 0xd9d   : > { %13532 = vmatprep.subr.bf16.mxu0 %v18477_v43  ;;  %v18546_v43 = vld [vmem:[#allocation13 + $0x424] ss:$8 sps:$4 sm:$0xff]  }
 0xda0   : > { %13533 = vmatpush1.bf16.msra.mxu0 %v18475_v42  ;;  %v18547_v42 = vld [vmem:[#allocation13 + $0x430] ss:$8 sps:$4 sm:$0xff]  }
 0xda1   : > { %13534 = vmatprep.subr.bf16.mxu0 %v18480_v53  ;;  %v18550_v53 = vld [vmem:[#allocation13 + $0x440] ss:$8 sps:$4 sm:$0xff]  }
 0xda4   : > { %13535 = vmatpush1.bf16.msra.mxu0 %v18478_v48  ;;  %v18558_v48 = vld [vmem:[#allocation13 + $0x464] ss:$8 sps:$4 sm:$0xff]  }
 0xda5   : > { %13536 = vmatprep.subr.bf16.mxu0 %v18483_v0  ;;  %v18561_v0 = vld [vmem:[#allocation13 + $0x474] ss:$8 sps:$4 sm:$0xff]  }
 0xda8   : > { %13537 = vmatpush1.bf16.msra.mxu0 %v18481_v40  ;;  %v12551_v40 = vpack.c.bf16 %v12539_v58, %v12539_v58 }
 0xda9   : > { %13538 = vmatprep.subr.bf16.mxu0 %v18486_v55  ;;  %v18574_v55 = vld [vmem:[#allocation16 + $0x70] sm:$0xff]  }
 0xdaa   : > { %15849 = vmatprep.subr.bf16.mxu1 %v18574_v55 }
 0xdab   : > { %15850 = vmatpush3.bf16.msra.mxu1 %v18575_v23 }
 0xdac   : > { %13539 = vmatpush1.bf16.msra.mxu0 %v18484_v28  ;;  %v18576_v28 = vld [vmem:[#allocation16 + $0x78] sm:$0xff]  }
 0xdad   : > { %13540 = vmatprep.subr.bf16.mxu0 %v18489_v22  ;;  %v18577_v22 = vld [vmem:[#allocation16 + $0x38] sm:$0xff]   ;;  %15851 = vmatprep.subr.bf16.mxu1 %v18576_v28 }
 0xdaf   : > { %15852 = vmatpush3.bf16.msra.mxu1 %v18577_v22 }
 0xdb0   : > { %13541 = vmatpush1.bf16.msra.mxu0 %v18487_v34  ;;  %v19038_v34 = vmov 0.0  }
 0xdb1   : > { %13551 = vmatprep.subr.bf16.mxu0 %v18492_v16  ;;  %15884 = vmatprep.subr.bf16.mxu1 %v19038_v34  ;;  %v13421_v16 = vrot.slane %v12696_v13, %v19514_v9  ;;  %v18579_v9 = vld [vmem:[#allocation19 + $0x8] sm:$0xff]  }
 0xdb3   : > { %13543 = vmatmul.mubr.bf16.vlgmr.msra.gmra.mrb[28].mxu0 %v12547_v19 }
 0xdb4   : > { %13552 = vmatpush1.bf16.msra.mxu0 %v18490_v37  ;;  %13583 = vmatprep.mubr.bf16.mxu0 %v12550_v6 }
 0xdb5   : > { %13553 = vmatprep.subr.bf16.mxu0 %v18495_v45 }
 0xdb8   : > { %13554 = vmatpush1.bf16.msra.mxu0 %v18493_v29 }
 0xdb9   : > { %13555 = vmatprep.subr.bf16.mxu0 %v18498_v54 }
 0xdbc   : > { %13556 = vmatpush1.bf16.msra.mxu0 %v18496_v57 }
 0xdbd   : > { %13557 = vmatprep.subr.bf16.mxu0 %v18501_v31 }
 0xdc0   : > { %13558 = vmatpush1.bf16.msra.mxu0 %v18499_v32 }
 0xdc1   : > { %13559 = vmatprep.subr.bf16.mxu0 %v18504_v17 }
 0xdc4   : > { %13560 = vmatpush1.bf16.msra.mxu0 %v18502_v20  ;;  %v18578_v20 = vld [vmem:[#allocation19] sm:$0xff]  }
 0xdc5   : > { %13561 = vmatprep.subr.bf16.mxu0 %v18507_v56 }
 0xdc8   : > { %13562 = vmatpush1.bf16.msra.mxu0 %v18505_v49  ;;  %v18581_v49 = vld [vmem:[#allocation19 + $0x18] sm:$0xff]  }
 0xdc9   : > { %13563 = vmatprep.subr.bf16.mxu0 %v18510_v61  ;;  %v18582_v61 = vld [vmem:[#allocation19 + $0x20] sm:$0xff]  }
 0xdcc   : > { %13564 = vmatpush1.bf16.msra.mxu0 %v18508_v5  ;;  %v18583_v5 = vld [vmem:[#allocation19 + $0x28] sm:$0xff]  }
 0xdcd   : > { %13565 = vmatprep.subr.bf16.mxu0 %v18513_v46  ;;  %v18584_v46 = vld [vmem:[#allocation19 + $0x30] sm:$0xff]  }
 0xdd0   : > { %13566 = vmatpush1.bf16.msra.mxu0 %v18511_v15  ;;  %v18585_v15 = vld [vmem:[#allocation19 + $0x38] sm:$0xff]  }
 0xdd1   : > { %13567 = vmatprep.subr.bf16.mxu0 %v18516_v8 }
 0xdd4   : > { %13568 = vmatpush1.bf16.msra.mxu0 %v18514_v10  ;;  %v13673_v10 = vld [vmem:[#allocation17] sm:$0x1] }
 0xdd5   : > { %13569 = vmatprep.subr.bf16.mxu0 %v18519_v59 }
 0xdd8   : > { %13570 = vmatpush1.bf16.msra.mxu0 %v18517_v52 }
 0xdd9   : > { %13571 = vmatprep.subr.bf16.mxu0 %v18522_v39 }
 0xddc   : > { %13572 = vmatpush1.bf16.msra.mxu0 %v18520_v35 }
 0xddd   : > { %13573 = vmatprep.subr.bf16.mxu0 %v18525_v27 }
 0xde0   : > { %13574 = vmatpush1.bf16.msra.mxu0 %v18523_v3 }
 0xde1   : > { %13575 = vmatprep.subr.bf16.mxu0 %v18528_v12 }
 0xde4   : > { %13576 = vmatpush1.bf16.msra.mxu0 %v18526_v14 }
 0xde5   : > { %13577 = vmatprep.subr.bf16.mxu0 %v18531_v38  ;;  %v13830_v38 = vld [vmem:[#allocation20] sm:$0x1] }
 0xde8   : > { %13578 = vmatpush1.bf16.msra.mxu0 %v18529_v2 }
 0xde9   : > { %13579 = vmatprep.subr.bf16.mxu0 %v18534_v44 }
 0xdec   : > { %13580 = vmatpush1.bf16.msra.mxu0 %v18532_v63 }
 0xded   : > { %13581 = vmatprep.subr.bf16.mxu0 %v18537_v60 }
 0xdf0   : > { %13582 = vmatpush1.bf16.msra.mxu0 %v18535_v51 }
 0xdf1   : > { %13592 = vmatprep.subr.bf16.mxu0 %v18540_v25 }
 0xdf3   : > { %13584 = vmatmul.mubr.bf16.vlgmr.msra.gmra.mrb[28].mxu0 %v12549_v4 }
 0xdf4   : > { %13593 = vmatpush1.bf16.msra.mxu0 %v18538_v1  ;;  %13624 = vmatprep.mubr.bf16.mxu0 %v20649_v50  ;;  %v18556_v50 = vld [vmem:[#allocation13 + $0x460] ss:$8 sps:$4 sm:$0xff]  }
 0xdf5   : > { %13594 = vmatprep.subr.bf16.mxu0 %v18543_v62 }
 0xdf8   : > { %13595 = vmatpush1.bf16.msra.mxu0 %v18541_v47 }
 0xdf9   : > { %13596 = vmatprep.subr.bf16.mxu0 %v18546_v43 }
 0xdfc   : > { %13597 = vmatpush1.bf16.msra.mxu0 %v18544_v33 }
 0xdfd   : > { %13598 = vmatprep.subr.bf16.mxu0 %v18549_v21 }
 0xe00   : > { %13599 = vmatpush1.bf16.msra.mxu0 %v18547_v42 }
 0xe01   : > { %13600 = vmatprep.subr.bf16.mxu0 %v18552_v7 }
 0xe04   : > { %13601 = vmatpush1.bf16.msra.mxu0 %v18550_v53 }
 0xe05   : > { %13602 = vmatprep.subr.bf16.mxu0 %v18555_v26 }
 0xe08   : > { %13603 = vmatpush1.bf16.msra.mxu0 %v18553_v36 }
 0xe09   : > { %13604 = vmatprep.subr.bf16.mxu0 %v18558_v48 }
 0xe0c   : > { %13605 = vmatpush1.bf16.msra.mxu0 %v18556_v50 }
 0xe0d   : > { %13606 = vmatprep.subr.bf16.mxu0 %v18561_v0 }
 0xe10   : > { %13607 = vmatpush1.bf16.msra.mxu0 %v18559_v24 }
 0xe13   : > { %13625 = vmatmul.mubr.bf16.vlgmr.msra.gmra.mrb[28].mxu0 %v12551_v40 }
 0xee6   : > { %v13626_v37 = vpop.f32.mrb[28].mxu0 }
 0xee7   : > { %v15922_v41 = vadd.f32 %v13626_v37, %v13421_v16  ;;  %v13628_v19 = vpop.f32.mrb[29].mxu0 }
 0xee8   : > { %v15923_v45 = vadd.f32 %v13628_v19, %v13425_v18  ;;  %v13630_v6 = vpop.f32.mrb[30].mxu0 }
 0xee9   : > { %vm13633_vm7 = vcmp.ge.f32.partialorder %v15922_v41, 0.0  ;;  %v13635_v29 = vmul.f32 0.01, %v15922_v41  ;;  %v13631_v54 = vpop.f32.mrb[31].mxu0 }
 0xeea   : > { %vm13634_vm15 = vcmp.ge.f32.partialorder %v15923_v45, 0.0  ;;  %v13636_v57 = vmul.f32 0.01, %v15923_v45 }
 0xeeb   : > { %v13637_v31 = vsel %vm13633_vm7, %v15922_v41, %v13635_v29 }
 0xeec   : > { %v13638_v32 = vsel %vm13634_vm15, %v15923_v45, %v13636_v57  ;;  %v13639_v56 = vpack.c.bf16 %v13637_v31, %v13637_v31 }
 0xeed   : > { %v13640_v17 = vpack.c.bf16 %v13638_v32, %v13638_v32 }
 0xeef   : > { %13802 = vmatprep.mubr.bf16.mxu1 %v13640_v17 }
 0xef0   : > { %13803 = vmatmul.mubr.bf16.vlgmr.msra.gmra.mrb[48].mxu1 %v13639_v56 }
 0xef1   : > { %15885 = vmatpush3.bf16.msra.mxu1 %v18578_v20  ;;  %15900 = vmatprep.mubr.msk.bf16.mxu1 %vm19039_vm10, %v19038_v34 }
 0xef2   : > { %15886 = vmatprep.subr.bf16.mxu1 %v19038_v34 }
 0xef5   : > { %15887 = vmatpush3.bf16.msra.mxu1 %v18579_v9 }
 0xef6   : > { %15888 = vmatprep.subr.bf16.mxu1 %v19038_v34 }
 0xef9   : > { %15889 = vmatpush3.bf16.msra.mxu1 %v18580_v11 }
 0xefa   : > { %15890 = vmatprep.subr.bf16.mxu1 %v19038_v34 }
 0xefd   : > { %15891 = vmatpush3.bf16.msra.mxu1 %v18581_v49 }
 0xefe   : > { %15892 = vmatprep.subr.bf16.mxu1 %v19038_v34 }
 0xf01   : > { %15893 = vmatpush3.bf16.msra.mxu1 %v18582_v61 }
 0xf02   : > { %15894 = vmatprep.subr.bf16.mxu1 %v19038_v34 }
 0xf05   : > { %15895 = vmatpush3.bf16.msra.mxu1 %v18583_v5 }
 0xf06   : > { %15896 = vmatprep.subr.bf16.mxu1 %v19038_v34 }
 0xf09   : > { %15897 = vmatpush3.bf16.msra.mxu1 %v18584_v46 }
 0xf0a   : > { %15898 = vmatprep.subr.bf16.mxu1 %v19038_v34 }
 0xf0d   : > { %15899 = vmatpush3.bf16.msra.mxu1 %v18585_v15 }
 0xfc3   : > { %v15853_v8 = vpop.f32.mrb[48].mxu1 }
 0xfc4   : > { %v15854_v59 = vpop.f32.mrb[49].mxu1 }
 0xfc5   : > { %v15855_v52 = vadd.f32 %v15854_v59, %v15853_v8  ;;  %v15856_v39 = vpop.f32.mrb[50].mxu1 }
 0xfc6   : > { %v15857_v35 = vpop.f32.mrb[51].mxu1 }
 0xfc7   : > { %v13805_v27 = vadd.f32 %v15855_v52, %v13673_v10 }
 0xfc9   : > { %vm13810_vm12 = vcmp.ge.f32.partialorder %v13805_v27, 0.0  ;;  %v13811_v3 = vmul.f32 0.01, %v13805_v27 }
 0xfcb   : > { %v13812_v12 = vsel %vm13810_vm12, %v13805_v27, %v13811_v3 }
 0xfcc   : > { %v13813_v14 = vpack.c.bf16 %v13812_v12, %v13812_v12 }
 0xfce   : > { %15901 = vmatmul.mubr.bf16.vlgmr.msra.gmra.mrb[52].mxu1 %v13813_v14 }
0x10a1   : > { %v13913_v2 = vpop.f32.mrb[52].mxu1 }
0x10a2   : > { %v13914_v44 = vadd.f32 %v13913_v2, %v13830_v38  ;;  %v15902_v63 = vpop.f32.mrb[53].mxu1 }
0x10a3   : > { %v13916_v60 = vpop.f32.mrb[54].mxu1 }
0x10a4   : > { %13919 = vst [vmem:[%s595_s24] sm:$0x1] %v13914_v44  ;;  %v15903_v51 = vpop.f32.mrb[55].mxu1 }
0x10a5   : > { %18935 = shalt.err (!%p18932_p3)
}
0x10a6   : > { %s18936_s28 = scalar_lea.hbm %s20515_s20, 16  ;;  %s18940_s27 = scalar_lea.hbm %s20650_s4, 32 }
0x10a7   : > { %p18937_p4 = scmp.ne.s32.totalorder %s20515_s20, %s18936_s28  ;;  %p18941_p11 = scmp.lt.u32.totalorder %s20515_s20, %s20650_s4 }
0x10a8   : > { %p18942_p13 = scmp.lt.u32.totalorder %s18940_s27, %s18936_s28  ;;  %p18944_p1 = scmp.lt.u32.totalorder %s18936_s28, %s20515_s20 }
0x10a9   : > { %p18938_p7 = pnand %p18937_p4, %p20651_p6 }
0x10aa   : > { %p18943_p0 = por %p18942_p13, %p18941_p11 }
0x10ab   : > { %p18939_p8 = pneg %p18938_p7 }
0x10ac   : > { %p18945_p5 = por %p18944_p1, %p18943_p0 }
0x10ae   : > { %p18946_p9 = pnand %p18945_p5, %p18939_p8 }
0x10b0   : > { %18949 = shalt.err (!%p18946_p9)
}
0x10b1   : > { %16121 = dma.vmem_to_hbm [thread:$0]  (%p20651_p6), %s20517_s16, 16, %s20515_s20, %s13921_s30  }
0x10b2 PF: > { %s20652_s19 = sld [smem:[#allocation33_spill]]  ;;  %s20653_s24 = sld [smem:[#allocation31_spill]] }
0x10b3   : > { %s20654_s22 = sld [smem:[#allocation36_spill]] }
0x10b8   : > { %p16188_p12 = scmp.ge.s32.totalorder %s20652_s19, 2  ;;  %s13945_s13 = sand.u32 1, %s20653_s24  }
0x10b9   : > { %p20655_p10 = scmp.ne.s32.totalorder %s20654_s22, 0  ;;  %s13946_s29 = scalar_lea.sflag [#allocation4], %s13945_s13 }
0x10bb   : > { %p16161_p2 = pnand %p16188_p12, %p20655_p10 }
0x10bd   : > { %18995 = dma.done.wait (!%p16161_p2), %s13946_s29, 16  }
0x10be   : > { %18997 = vsyncadd (!%p16161_p2), %s13946_s29, 4294967280  ;;  %s20656_s28 = sld [smem:[#allocation34_spill]]  ;;  %s20657_s23 = sld [smem:[#allocation32_spill]] }
0x10bf   : > { %s20658_s27 = sld [smem:[#allocation35_spill]]  ;;  %s20659_s25 = smov %s19004_s26 }
0x10c4   : > { %p30_p3 = scmp.ge.s32.totalorder %s20656_s28, 4   ;;  %s20660_s26 = smov %s20657_s23 }
0x10c6   :  { %32 = sbr.rel (!%p30_p3) target bundleno = 14 (0xe), region = 156 }
0x10cd   :  { %13950 = vsyncpa [#allocation3], 1 }
0x10ce   :  { %13952 = vsyncpa [#allocation3 + $0x1], 1 }
0x10cf   :  { %13953 = vsyncpa [#allocation6], 1 }
0x10d0   :  { %13954 = vsyncpa [#allocation9], 1 }
0x10d1   :  { %13955 = vsyncpa [#allocation12], 1 }
0x10d2   :  { %13956 = vsyncpa [#allocation15], 1 }
0x10d3   :  { %13957 = vsyncpa [#allocation18], 1 }
0x10d4   :  { %13958 = vsyncpa [#allocation21], 1 }
0x10d5   :  { %13959 = vsyncpa [#allocation4], 1 }
0x10d6   :  { %13961 = vsyncpa [#allocation4 + $0x1], 1 }

</bundles_post_ra>
